<compile_context>
chip_gen: v5e
topology: v5e:2x2
jax: 0.10.0
libtpu: 0.0.40
codegen_flags: <defaults>
</compile_context>

<pallas_src>
import functools

import jax
import jax.numpy as jnp
from jax import lax
from jax.experimental import pallas as pl
from jax.experimental.pallas import tpu as pltpu


# --------------------------------------------------------------------------- #
# in-kernel helpers
# --------------------------------------------------------------------------- #
def _zero_margins(ref, y0, y1, x0, x1):
    """Zero everything in ref (H, W, C) outside rows [y0,y1) x cols [x0,x1).

    Only the border/margin strips are written (no full-buffer zeroing); all
    bounds are Python ints so the strip stores are static.
    """
    H, W, C = ref.shape
    z = lambda h, w: jnp.zeros((h, w, C), ref.dtype)
    if y0 > 0:
        ref[pl.ds(0, y0), pl.ds(0, W), :] = z(y0, W)
    if y1 < H:
        ref[pl.ds(y1, H - y1), pl.ds(0, W), :] = z(H - y1, W)
    if x0 > 0:
        ref[pl.ds(0, H), pl.ds(0, x0), :] = z(H, x0)
    if x1 < W:
        ref[pl.ds(0, H), pl.ds(x1, W - x1), :] = z(H, W - x1)


def _conv3x3_acc(xpad, w_ref, patch_ref, hh, ww):
    """3x3 'valid' conv via im2col: ONE MXU matmul with K = 9*cin.

    xpad:      (hh+2, ww+2, cin) bf16 value (borders already hold the zero pad).
    w_ref:     ref of (9*cin, cout) bf16 weights, tap-major order (ky, kx, cin).
    patch_ref: shared VMEM scratch, at least (hh, ww, 9*cin); assembled in place
               (every element read is written first, so no zeroing needed).
    Returns the (hh*ww, cout) f32 accumulator (bias/ReLU applied by the caller).
    """
    cin = xpad.shape[-1]
    t = 0
    for ky in range(3):
        for kx in range(3):
            patch_ref[pl.ds(0, hh), pl.ds(0, ww), pl.ds(t * cin, cin)] = (
                xpad[ky:ky + hh, kx:kx + ww, :])
            t += 1
    cols = patch_ref[pl.ds(0, hh), pl.ds(0, ww), pl.ds(0, 9 * cin)]
    return jnp.dot(cols.reshape(hh * ww, 9 * cin), w_ref[...],
                   preferred_element_type=jnp.float32)


# --------------------------------------------------------------------------- #
# kernels
# --------------------------------------------------------------------------- #
def _up_concat_kernel(x1p_ref, x2p_ref, wup_ref, bup_ref, w1a_x2_ref, w1a_x1_ref,
                      b1a_ref, w1b_ref, b1b_ref, o_ref,
                      x1u_pad, mid_pad, patch, *, py0, px0):
    """Skip path: up(x1), F.pad to x2, DoubleConv(2C->OC) via split weights."""
    _, H1p, W1p, C = x1p_ref.shape            # H1p = H1 + 4 (2-padded for up-conv)
    H1u, W1u = H1p - 2, W1p - 2               # ConvTranspose2d output spatial
    _, H2p, W2p, _ = x2p_ref.shape            # H2p = H2 + 2 (1-padded for conv a)
    H2, W2 = H2p - 2, W2p - 2
    OC = o_ref.shape[-1]

    # ---- ConvTranspose2d(C, C, 3, s=1): one im2col matmul on 2-padded x1 ----
    up = _conv3x3_acc(x1p_ref[0], wup_ref, patch, H1u, W1u) + bup_ref[...]

    # ---- F.pad(up) into a 1-conv-padded frame (no channel concat anywhere) ----
    _zero_margins(x1u_pad, 1 + py0, 1 + py0 + H1u, 1 + px0, 1 + px0 + W1u)
    x1u_pad[pl.ds(1 + py0, H1u), pl.ds(1 + px0, W1u), :] = (
        up.reshape(H1u, W1u, C).astype(x1u_pad.dtype))

    # ---- DoubleConv conv a: split-weight accumulation over {x2, padded up} ----
    acc = _conv3x3_acc(x2p_ref[0], w1a_x2_ref, patch, H2, W2)
    acc = acc + _conv3x3_acc(x1u_pad[...], w1a_x1_ref, patch, H2, W2)
    h = jnp.maximum(acc + b1a_ref[...], 0.0)

    _zero_margins(mid_pad, 1, 1 + H2, 1, 1 + W2)
    mid_pad[pl.ds(1, H2), pl.ds(1, W2), :] = h.reshape(H2, W2, OC).astype(mid_pad.dtype)

    # ---- DoubleConv conv b ----
    out = jnp.maximum(
        _conv3x3_acc(mid_pad[...], w1b_ref, patch, H2, W2) + b1b_ref[...], 0.0)
    o_ref[0] = out.reshape(H2, W2, OC).astype(o_ref.dtype)


def _up_noskip_kernel(x1p_ref, wup_ref, bup_ref, w2a_ref, b2a_ref, w2b_ref, b2b_ref,
                      o_ref, a_pad, mid_pad, patch):
    """x2 is None path: up(x1) then DoubleConv(C->OC)."""
    _, H1p, W1p, C = x1p_ref.shape
    H1u, W1u = H1p - 2, W1p - 2
    OC = o_ref.shape[-1]

    up = _conv3x3_acc(x1p_ref[0], wup_ref, patch, H1u, W1u) + bup_ref[...]

    _zero_margins(a_pad, 1, 1 + H1u, 1, 1 + W1u)
    a_pad[pl.ds(1, H1u), pl.ds(1, W1u), :] = up.reshape(H1u, W1u, C).astype(a_pad.dtype)
    h = jnp.maximum(
        _conv3x3_acc(a_pad[...], w2a_ref, patch, H1u, W1u) + b2a_ref[...], 0.0)

    _zero_margins(mid_pad, 1, 1 + H1u, 1, 1 + W1u)
    mid_pad[pl.ds(1, H1u), pl.ds(1, W1u), :] = h.reshape(H1u, W1u, OC).astype(mid_pad.dtype)
    out = jnp.maximum(
        _conv3x3_acc(mid_pad[...], w2b_ref, patch, H1u, W1u) + b2b_ref[...], 0.0)

    o_ref[0] = out.reshape(H1u, W1u, OC).astype(o_ref.dtype)


# --------------------------------------------------------------------------- #
# wrappers
# --------------------------------------------------------------------------- #
def up_forward_nhwc(x1, x2, params, *, act_dtype=jnp.bfloat16):
    """NHWC-native forward of Up.  x1: (B,H1,W1,C), x2: (B,H2,W2,C) or None."""
    B, H1, W1, C = x1.shape
    H1u, W1u = H1 + 2, W1 + 2
    out_dtype = x1.dtype

    def full(a):  # whole-array (weight/bias) block, same block every grid step
        return pl.BlockSpec(a.shape, lambda b, _nd=a.ndim: (0,) * _nd)

    cparams = pltpu.CompilerParams(
        dimension_semantics=("parallel",),          # B=2 -> both v7x cores busy
        vmem_limit_bytes=48 * 1024 * 1024)          # headroom over v5e's 16 MiB default

    # Pre-pad + cast to bf16 in the wrapper: fuses with the producing layout op
    # and removes in-kernel staging copies / full-buffer zeroing.
    x1p = jnp.pad(x1.astype(act_dtype), ((0, 0), (2, 2), (2, 2), (0, 0)))

    if x2 is not None:
        _, H2, W2, C2 = x2.shape
        assert C2 == C
        dy, dx = H2 - H1u, W2 - W1u
        assert dy >= 0 and dx >= 0, "negative pad (crop) not implemented"
        x2p = jnp.pad(x2.astype(act_dtype), ((0, 0), (1, 1), (1, 1), (0, 0)))
        OC = params["b1a"].shape[-1]
        cmax = max(C, OC)
        weights = (params["w_up"], params["b_up"], params["w1a_x2"], params["w1a_x1"],
                   params["b1a"], params["w1b"], params["b1b"])
        kernel = functools.partial(_up_concat_kernel, py0=dy // 2, px0=dx // 2)
        return pl.pallas_call(
            kernel,
            out_shape=jax.ShapeDtypeStruct((B, H2, W2, OC), out_dtype),
            grid_spec=pltpu.PrefetchScalarGridSpec(
                num_scalar_prefetch=0,
                grid=(B,),
                in_specs=[pl.BlockSpec((1, H1 + 4, W1 + 4, C), lambda b: (b, 0, 0, 0)),
                          pl.BlockSpec((1, H2 + 2, W2 + 2, C), lambda b: (b, 0, 0, 0))]
                         + [full(w) for w in weights],
                out_specs=pl.BlockSpec((1, H2, W2, OC), lambda b: (b, 0, 0, 0)),
                scratch_shapes=[
                    pltpu.VMEM((H2 + 2, W2 + 2, C), act_dtype),     # F.pad'ed up(x1)
                    pltpu.VMEM((H2 + 2, W2 + 2, OC), act_dtype),    # mid activation
                    pltpu.VMEM((H2, W2, 9 * cmax), act_dtype),      # im2col patch slab
                ],
            ),
            compiler_params=cparams,
        )(x1p, x2p, *weights)
    else:
        OC = params["b2a"].shape[-1]
        cmax = max(C, OC)
        weights = (params["w_up"], params["b_up"], params["w2a"], params["b2a"],
                   params["w2b"], params["b2b"])
        return pl.pallas_call(
            _up_noskip_kernel,
            out_shape=jax.ShapeDtypeStruct((B, H1u, W1u, OC), out_dtype),
            grid_spec=pltpu.PrefetchScalarGridSpec(
                num_scalar_prefetch=0,
                grid=(B,),
                in_specs=[pl.BlockSpec((1, H1 + 4, W1 + 4, C), lambda b: (b, 0, 0, 0))]
                         + [full(w) for w in weights],
                out_specs=pl.BlockSpec((1, H1u, W1u, OC), lambda b: (b, 0, 0, 0)),
                scratch_shapes=[
                    pltpu.VMEM((H1u + 2, W1u + 2, C), act_dtype),
                    pltpu.VMEM((H1u + 2, W1u + 2, OC), act_dtype),
                    pltpu.VMEM((H1u, W1u, 9 * cmax), act_dtype),
                ],
            ),
            compiler_params=cparams,
        )(x1p, *weights)


def up_forward(x1_nchw, x2_nchw, params):
    """PyTorch-parity NCHW entry point (thin shim around the NHWC-native path)."""
    x1 = jnp.transpose(x1_nchw, (0, 2, 3, 1))
    x2 = None if x2_nchw is None else jnp.transpose(x2_nchw, (0, 2, 3, 1))
    out = up_forward_nhwc(x1, x2, params)
    return jnp.transpose(out, (0, 3, 1, 2))


# --------------------------------------------------------------------------- #
# parameters (PyTorch layouts -> kernel layouts, BN folded, bf16 flat weights)
# --------------------------------------------------------------------------- #
def init_params(key, in_ch, out_ch, *, weight_dtype=jnp.bfloat16, eps=1e-5):
    std = 0.1
    keys = iter(jax.random.split(key, 32))
    nk = lambda: next(keys)

    def folded_conv_bn(cin, cout):
        # Conv2d(cin, cout, 3, padding=1) (OIHW + bias) followed by eval-mode
        # BatchNorm2d, folded into a single HWIO conv (one-time host op).
        w = jax.random.normal(nk(), (cout, cin, 3, 3), jnp.float32) * std
        b = jax.random.normal(nk(), (cout,), jnp.float32) * std
        gamma = 1.0 + 0.1 * jax.random.normal(nk(), (cout,), jnp.float32)
        beta = 0.1 * jax.random.normal(nk(), (cout,), jnp.float32)
        mean = 0.1 * jax.random.normal(nk(), (cout,), jnp.float32)
        var = (1.0 + 0.1 * jax.random.normal(nk(), (cout,), jnp.float32)) ** 2
        scale = gamma * lax.rsqrt(var + eps)
        w_hwio = jnp.transpose(w, (2, 3, 1, 0)) * scale[None, None, None, :]
        bias = (b - mean) * scale + beta
        return w_hwio, bias

    # ConvTranspose2d(in_ch, in_ch, 3, stride=1): weight (in, out, kH, kW).
    # Stride-1 transposed conv == regular conv on a 2-padded input with the
    # spatially flipped kernel and swapped in/out channels.
    w_up = jax.random.normal(nk(), (in_ch, in_ch, 3, 3), jnp.float32) * std
    b_up = jax.random.normal(nk(), (in_ch,), jnp.float32) * std
    w_up_hwio = jnp.transpose(jnp.flip(w_up, axis=(2, 3)), (2, 3, 0, 1))

    w1a_hwio, b1a = folded_conv_bn(2 * in_ch, out_ch)   # DoubleConv(2*in_ch, out_ch)
    w1b_hwio, b1b = folded_conv_bn(out_ch, out_ch)
    w2a_hwio, b2a = folded_conv_bn(in_ch, out_ch)       # DoubleConv(in_ch, out_ch)
    w2b_hwio, b2b = folded_conv_bn(out_ch, out_ch)

    flat = lambda w: w.reshape(-1, w.shape[-1]).astype(weight_dtype)  # (9*cin, cout)
    row = lambda b: b.reshape(1, -1).astype(jnp.float32)

    return {
        "w_up": flat(w_up_hwio), "b_up": row(b_up),
        # first DoubleConv conv split along input channels: x2 half / x1u half
        "w1a_x2": flat(w1a_hwio[:, :, :in_ch, :]),
        "w1a_x1": flat(w1a_hwio[:, :, in_ch:, :]),
        "b1a": row(b1a),
        "w1b": flat(w1b_hwio), "b1b": row(b1b),
        "w2a": flat(w2a_hwio), "b2a": row(b2a),
        "w2b": flat(w2b_hwio), "b2b": row(b2b),
    }


# --------------------------------------------------------------------------- #
# pure-JAX reference (same folded params, same bf16 activation casts)
# --------------------------------------------------------------------------- #
def up_forward_ref(x1_nchw, x2_nchw, params):
    def unflat(wf, cin):  # (9*cin, cout) -> HWIO f32
        return wf.astype(jnp.float32).reshape(3, 3, cin, wf.shape[-1])

    def conv(x, w, b, pad):
        y = lax.conv_general_dilated(
            x, w, window_strides=(1, 1), padding=[(pad, pad), (pad, pad)],
            dimension_numbers=("NHWC", "HWIO", "NHWC"),
            precision=lax.Precision.HIGHEST)
        return y + b.reshape(1, 1, 1, -1)

    bf = lambda a: a.astype(jnp.bfloat16).astype(jnp.float32)  # mimic kernel casts

    C = x1_nchw.shape[1]
    x1 = bf(jnp.transpose(x1_nchw, (0, 2, 3, 1)))
    xu = bf(conv(x1, unflat(params["w_up"], C), params["b_up"], 2))
    if x2_nchw is not None:
        x2 = bf(jnp.transpose(x2_nchw, (0, 2, 3, 1)))
        dy = x2.shape[1] - xu.shape[1]
        dx = x2.shape[2] - xu.shape[2]
        xu = jnp.pad(xu, ((0, 0), (dy // 2, dy - dy // 2),
                          (dx // 2, dx - dx // 2), (0, 0)))
        x = jnp.concatenate([x2, xu], axis=-1)
        wa = jnp.concatenate([unflat(params["w1a_x2"], C),
                              unflat(params["w1a_x1"], C)], axis=2)
        ba, bb = params["b1a"], params["b1b"]
        wb = unflat(params["w1b"], params["b1b"].shape[-1])
    else:
        x = xu
        wa, ba = unflat(params["w2a"], C), params["b2a"]
        wb, bb = unflat(params["w2b"], params["b2b"].shape[-1]), params["b2b"]
    h = bf(jax.nn.relu(conv(x, wa, ba, 1)))
    out = jax.nn.relu(conv(h, wb, bb, 1))
    return jnp.transpose(out, (0, 3, 1, 2))


# --------------------------------------------------------------------------- #
if __name__ == "__main__":
    B, C_in, C_out = 2, 4, 8
    H1 = W1 = 6            # x1 spatial; ConvTranspose2d(k=3, s=1) -> 8x8
    H2 = W2 = 16           # skip-connection (x2) spatial

    key = jax.random.PRNGKey(0)
    k1, k2, kp = jax.random.split(key, 3)
    x1 = jax.random.normal(k1, (B, C_in, H1, W1), jnp.float32)
    x2 = jax.random.normal(k2, (B, C_in, H2, W2), jnp.float32)
    params = init_params(kp, C_in, C_out)

    out_skip = jax.block_until_ready(up_forward(x1, x2, params))
    out_noskip = jax.block_until_ready(up_forward(x1, None, params))
    assert out_skip.shape == (B, C_out, H2, W2)
    assert out_noskip.shape == (B, C_out, H1 + 2, W1 + 2)

    def check(out, ref, tag):
        err = float(jnp.max(jnp.abs(out - ref)))
        scale = float(jnp.max(jnp.abs(ref)))
        assert err <= 2e-2 * max(scale, 1.0), (tag, err, scale)

    check(out_skip, up_forward_ref(x1, x2, params), "skip")
    check(out_noskip, up_forward_ref(x1, None, params), "noskip")

    print("KERNEL_OK")
</pallas_src>

<mosaic_0001>
module attributes {stable_mosaic.version = 11 : i64} {
  func.func @_up_concat_kernel(%arg0: i32, %arg1: memref<1x10x10x4xbf16, #tpu.memory_space<vmem>>, %arg2: memref<1x18x18x4xbf16, #tpu.memory_space<vmem>>, %arg3: memref<36x4xbf16, #tpu.memory_space<vmem>>, %arg4: memref<1x4xf32, #tpu.memory_space<vmem>>, %arg5: memref<36x8xbf16, #tpu.memory_space<vmem>>, %arg6: memref<36x8xbf16, #tpu.memory_space<vmem>>, %arg7: memref<1x8xf32, #tpu.memory_space<vmem>>, %arg8: memref<72x8xbf16, #tpu.memory_space<vmem>>, %arg9: memref<1x8xf32, #tpu.memory_space<vmem>>, %arg10: memref<1x16x16x8xf32, #tpu.memory_space<vmem>>, %arg11: memref<18x18x4xbf16, #tpu.memory_space<vmem>>, %arg12: memref<18x18x8xbf16, #tpu.memory_space<vmem>>, %arg13: memref<16x16x72xbf16, #tpu.memory_space<vmem>>) attributes {dimension_semantics = [#tpu.dimension_semantics<parallel>], iteration_bounds = array<i64: 2>, scalar_prefetch = 0 : i64, scratch_operands = 3 : i64, tpu.core_type = #tpu.core_type<tc>, window_params = [{transform_indices = @transform_0, window_bounds = array<i64: 1, 10, 10, 4>}, {transform_indices = @transform_1, window_bounds = array<i64: 1, 18, 18, 4>}, {pipeline_mode = #tpu.pipeline_mode<synchronous>, transform_indices = @transform_2, window_bounds = array<i64: 36, 4>}, {pipeline_mode = #tpu.pipeline_mode<synchronous>, transform_indices = @transform_3, window_bounds = array<i64: 1, 4>}, {pipeline_mode = #tpu.pipeline_mode<synchronous>, transform_indices = @transform_4, window_bounds = array<i64: 36, 8>}, {pipeline_mode = #tpu.pipeline_mode<synchronous>, transform_indices = @transform_5, window_bounds = array<i64: 36, 8>}, {pipeline_mode = #tpu.pipeline_mode<synchronous>, transform_indices = @transform_6, window_bounds = array<i64: 1, 8>}, {pipeline_mode = #tpu.pipeline_mode<synchronous>, transform_indices = @transform_7, window_bounds = array<i64: 72, 8>}, {pipeline_mode = #tpu.pipeline_mode<synchronous>, transform_indices = @transform_8, window_bounds = array<i64: 1, 8>}, {transform_indices = @transform_9, window_bounds = array<i64: 1, 16, 16, 8>}]} {
    %c0 = arith.constant 0 : index
    %c0_0 = arith.constant 0 : index
    %c0_1 = arith.constant 0 : index
    %c0_2 = arith.constant 0 : index
    %0 = vector.load %arg1[%c0, %c0_0, %c0_1, %c0_2] : memref<1x10x10x4xbf16, #tpu.memory_space<vmem>>, vector<1x10x10x4xbf16>
    %1 = vector.shape_cast %0 : vector<1x10x10x4xbf16> to vector<10x10x4xbf16>
    %2 = vector.extract_strided_slice %1 {offsets = [0, 0, 0], sizes = [8, 8, 4], strides = [1, 1, 1]} : vector<10x10x4xbf16> to vector<8x8x4xbf16>
    %c0_3 = arith.constant 0 : index
    %c0_4 = arith.constant 0 : index
    %c0_5 = arith.constant 0 : index
    %3 = vector.load %arg13[%c0_3, %c0_4, %c0_5] : memref<16x16x72xbf16, #tpu.memory_space<vmem>>, vector<8x8x4xbf16>
    tpu.vector_store %arg13[%c0_3, %c0_4, %c0_5], %2 {strides = array<i32>} : memref<16x16x72xbf16, #tpu.memory_space<vmem>>, vector<8x8x4xbf16>,
    %4 = vector.extract_strided_slice %1 {offsets = [0, 1, 0], sizes = [8, 8, 4], strides = [1, 1, 1]} : vector<10x10x4xbf16> to vector<8x8x4xbf16>
    %c0_6 = arith.constant 0 : index
    %c0_7 = arith.constant 0 : index
    %c4 = arith.constant 4 : index
    %5 = vector.load %arg13[%c0_6, %c0_7, %c4] : memref<16x16x72xbf16, #tpu.memory_space<vmem>>, vector<8x8x4xbf16>
    tpu.vector_store %arg13[%c0_6, %c0_7, %c4], %4 {strides = array<i32>} : memref<16x16x72xbf16, #tpu.memory_space<vmem>>, vector<8x8x4xbf16>,
    %6 = vector.extract_strided_slice %1 {offsets = [0, 2, 0], sizes = [8, 8, 4], strides = [1, 1, 1]} : vector<10x10x4xbf16> to vector<8x8x4xbf16>
    %c0_8 = arith.constant 0 : index
    %c0_9 = arith.constant 0 : index
    %c8 = arith.constant 8 : index
    %7 = vector.load %arg13[%c0_8, %c0_9, %c8] : memref<16x16x72xbf16, #tpu.memory_space<vmem>>, vector<8x8x4xbf16>
    tpu.vector_store %arg13[%c0_8, %c0_9, %c8], %6 {strides = array<i32>} : memref<16x16x72xbf16, #tpu.memory_space<vmem>>, vector<8x8x4xbf16>,
    %8 = vector.extract_strided_slice %1 {offsets = [1, 0, 0], sizes = [8, 8, 4], strides = [1, 1, 1]} : vector<10x10x4xbf16> to vector<8x8x4xbf16>
    %c0_10 = arith.constant 0 : index
    %c0_11 = arith.constant 0 : index
    %c12 = arith.constant 12 : index
    %9 = vector.load %arg13[%c0_10, %c0_11, %c12] : memref<16x16x72xbf16, #tpu.memory_space<vmem>>, vector<8x8x4xbf16>
    tpu.vector_store %arg13[%c0_10, %c0_11, %c12], %8 {strides = array<i32>} : memref<16x16x72xbf16, #tpu.memory_space<vmem>>, vector<8x8x4xbf16>,
    %10 = vector.extract_strided_slice %1 {offsets = [1, 1, 0], sizes = [8, 8, 4], strides = [1, 1, 1]} : vector<10x10x4xbf16> to vector<8x8x4xbf16>
    %c0_12 = arith.constant 0 : index
    %c0_13 = arith.constant 0 : index
    %c16 = arith.constant 16 : index
    %11 = vector.load %arg13[%c0_12, %c0_13, %c16] : memref<16x16x72xbf16, #tpu.memory_space<vmem>>, vector<8x8x4xbf16>
    tpu.vector_store %arg13[%c0_12, %c0_13, %c16], %10 {strides = array<i32>} : memref<16x16x72xbf16, #tpu.memory_space<vmem>>, vector<8x8x4xbf16>,
    %12 = vector.extract_strided_slice %1 {offsets = [1, 2, 0], sizes = [8, 8, 4], strides = [1, 1, 1]} : vector<10x10x4xbf16> to vector<8x8x4xbf16>
    %c0_14 = arith.constant 0 : index
    %c0_15 = arith.constant 0 : index
    %c20 = arith.constant 20 : index
    %13 = vector.load %arg13[%c0_14, %c0_15, %c20] : memref<16x16x72xbf16, #tpu.memory_space<vmem>>, vector<8x8x4xbf16>
    tpu.vector_store %arg13[%c0_14, %c0_15, %c20], %12 {strides = array<i32>} : memref<16x16x72xbf16, #tpu.memory_space<vmem>>, vector<8x8x4xbf16>,
    %14 = vector.extract_strided_slice %1 {offsets = [2, 0, 0], sizes = [8, 8, 4], strides = [1, 1, 1]} : vector<10x10x4xbf16> to vector<8x8x4xbf16>
    %c0_16 = arith.constant 0 : index
    %c0_17 = arith.constant 0 : index
    %c24 = arith.constant 24 : index
    %15 = vector.load %arg13[%c0_16, %c0_17, %c24] : memref<16x16x72xbf16, #tpu.memory_space<vmem>>, vector<8x8x4xbf16>
    tpu.vector_store %arg13[%c0_16, %c0_17, %c24], %14 {strides = array<i32>} : memref<16x16x72xbf16, #tpu.memory_space<vmem>>, vector<8x8x4xbf16>,
    %16 = vector.extract_strided_slice %1 {offsets = [2, 1, 0], sizes = [8, 8, 4], strides = [1, 1, 1]} : vector<10x10x4xbf16> to vector<8x8x4xbf16>
    %c0_18 = arith.constant 0 : index
    %c0_19 = arith.constant 0 : index
    %c28 = arith.constant 28 : index
    %17 = vector.load %arg13[%c0_18, %c0_19, %c28] : memref<16x16x72xbf16, #tpu.memory_space<vmem>>, vector<8x8x4xbf16>
    tpu.vector_store %arg13[%c0_18, %c0_19, %c28], %16 {strides = array<i32>} : memref<16x16x72xbf16, #tpu.memory_space<vmem>>, vector<8x8x4xbf16>,
    %18 = vector.extract_strided_slice %1 {offsets = [2, 2, 0], sizes = [8, 8, 4], strides = [1, 1, 1]} : vector<10x10x4xbf16> to vector<8x8x4xbf16>
    %c0_20 = arith.constant 0 : index
    %c0_21 = arith.constant 0 : index
    %c32 = arith.constant 32 : index
    %19 = vector.load %arg13[%c0_20, %c0_21, %c32] : memref<16x16x72xbf16, #tpu.memory_space<vmem>>, vector<8x8x4xbf16>
    tpu.vector_store %arg13[%c0_20, %c0_21, %c32], %18 {strides = array<i32>} : memref<16x16x72xbf16, #tpu.memory_space<vmem>>, vector<8x8x4xbf16>,
    %c0_22 = arith.constant 0 : index
    %c0_23 = arith.constant 0 : index
    %c0_24 = arith.constant 0 : index
    %20 = vector.load %arg13[%c0_22, %c0_23, %c0_24] : memref<16x16x72xbf16, #tpu.memory_space<vmem>>, vector<8x8x36xbf16>
    %21 = vector.shape_cast %20 : vector<8x8x36xbf16> to vector<64x36xbf16>
    %c0_25 = arith.constant 0 : index
    %c0_26 = arith.constant 0 : index
    %22 = vector.load %arg3[%c0_25, %c0_26] : memref<36x4xbf16, #tpu.memory_space<vmem>>, vector<36x4xbf16>
    %cst = arith.constant dense<0.000000e+00> : vector<64x4xf32>
    %23 = tpu.matmul %21, %22, %cst {dimension_numbers = #tpu.dot_dimension_numbers<[1], [0], [0], [1], [0, 0, 1, 1], [], []>} : vector<64x36xbf16>, vector<36x4xbf16>, vector<64x4xf32> -> vector<64x4xf32>
    %c0_27 = arith.constant 0 : index
    %c0_28 = arith.constant 0 : index
    %24 = vector.load %arg4[%c0_27, %c0_28] : memref<1x4xf32, #tpu.memory_space<vmem>>, vector<1x4xf32>
    %25 = vector.broadcast %24 : vector<1x4xf32> to vector<64x4xf32>
    %26 = arith.addf %23, %25 : vector<64x4xf32>
    %cst_29 = arith.constant 0.000000e+00 : bf16
    %27 = vector.broadcast %cst_29 : bf16 to vector<5x18x4xbf16>
    %c0_30 = arith.constant 0 : index
    %c0_31 = arith.constant 0 : index
    %c0_32 = arith.constant 0 : index
    %28 = vector.load %arg11[%c0_30, %c0_31, %c0_32] : memref<18x18x4xbf16, #tpu.memory_space<vmem>>, vector<5x18x4xbf16>
    tpu.vector_store %arg11[%c0_30, %c0_31, %c0_32], %27 {strides = array<i32>} : memref<18x18x4xbf16, #tpu.memory_space<vmem>>, vector<5x18x4xbf16>,
    %cst_33 = arith.constant 0.000000e+00 : bf16
    %29 = vector.broadcast %cst_33 : bf16 to vector<5x18x4xbf16>
    %c13 = arith.constant 13 : index
    %c0_34 = arith.constant 0 : index
    %c0_35 = arith.constant 0 : index
    %30 = vector.load %arg11[%c13, %c0_34, %c0_35] : memref<18x18x4xbf16, #tpu.memory_space<vmem>>, vector<5x18x4xbf16>
    tpu.vector_store %arg11[%c13, %c0_34, %c0_35], %29 {strides = array<i32>} : memref<18x18x4xbf16, #tpu.memory_space<vmem>>, vector<5x18x4xbf16>,
    %cst_36 = arith.constant 0.000000e+00 : bf16
    %31 = vector.broadcast %cst_36 : bf16 to vector<18x5x4xbf16>
    %c0_37 = arith.constant 0 : index
    %c0_38 = arith.constant 0 : index
    %c0_39 = arith.constant 0 : index
    %32 = vector.load %arg11[%c0_37, %c0_38, %c0_39] : memref<18x18x4xbf16, #tpu.memory_space<vmem>>, vector<18x5x4xbf16>
    tpu.vector_store %arg11[%c0_37, %c0_38, %c0_39], %31 {strides = array<i32>} : memref<18x18x4xbf16, #tpu.memory_space<vmem>>, vector<18x5x4xbf16>,
    %cst_40 = arith.constant 0.000000e+00 : bf16
    %33 = vector.broadcast %cst_40 : bf16 to vector<18x5x4xbf16>
    %c0_41 = arith.constant 0 : index
    %c13_42 = arith.constant 13 : index
    %c0_43 = arith.constant 0 : index
    %34 = vector.load %arg11[%c0_41, %c13_42, %c0_43] : memref<18x18x4xbf16, #tpu.memory_space<vmem>>, vector<18x5x4xbf16>
    tpu.vector_store %arg11[%c0_41, %c13_42, %c0_43], %33 {strides = array<i32>} : memref<18x18x4xbf16, #tpu.memory_space<vmem>>, vector<18x5x4xbf16>,
    %35 = vector.shape_cast %26 : vector<64x4xf32> to vector<8x8x4xf32>
    %36 = arith.truncf %35 : vector<8x8x4xf32> to vector<8x8x4xbf16>
    %c5 = arith.constant 5 : index
    %c5_44 = arith.constant 5 : index
    %c0_45 = arith.constant 0 : index
    %37 = vector.load %arg11[%c5, %c5_44, %c0_45] : memref<18x18x4xbf16, #tpu.memory_space<vmem>>, vector<8x8x4xbf16>
    tpu.vector_store %arg11[%c5, %c5_44, %c0_45], %36 {strides = array<i32>} : memref<18x18x4xbf16, #tpu.memory_space<vmem>>, vector<8x8x4xbf16>,
    %c0_46 = arith.constant 0 : index
    %c0_47 = arith.constant 0 : index
    %c0_48 = arith.constant 0 : index
    %c0_49 = arith.constant 0 : index
    %38 = vector.load %arg2[%c0_46, %c0_47, %c0_48, %c0_49] : memref<1x18x18x4xbf16, #tpu.memory_space<vmem>>, vector<1x18x18x4xbf16>
    %39 = vector.shape_cast %38 : vector<1x18x18x4xbf16> to vector<18x18x4xbf16>
    %40 = vector.extract_strided_slice %39 {offsets = [0, 0, 0], sizes = [16, 16, 4], strides = [1, 1, 1]} : vector<18x18x4xbf16> to vector<16x16x4xbf16>
    %c0_50 = arith.constant 0 : index
    %c0_51 = arith.constant 0 : index
    %c0_52 = arith.constant 0 : index
    %41 = vector.load %arg13[%c0_50, %c0_51, %c0_52] : memref<16x16x72xbf16, #tpu.memory_space<vmem>>, vector<16x16x4xbf16>
    tpu.vector_store %arg13[%c0_50, %c0_51, %c0_52], %40 {strides = array<i32>} : memref<16x16x72xbf16, #tpu.memory_space<vmem>>, vector<16x16x4xbf16>,
    %42 = vector.extract_strided_slice %39 {offsets = [0, 1, 0], sizes = [16, 16, 4], strides = [1, 1, 1]} : vector<18x18x4xbf16> to vector<16x16x4xbf16>
    %c0_53 = arith.constant 0 : index
    %c0_54 = arith.constant 0 : index
    %c4_55 = arith.constant 4 : index
    %43 = vector.load %arg13[%c0_53, %c0_54, %c4_55] : memref<16x16x72xbf16, #tpu.memory_space<vmem>>, vector<16x16x4xbf16>
    tpu.vector_store %arg13[%c0_53, %c0_54, %c4_55], %42 {strides = array<i32>} : memref<16x16x72xbf16, #tpu.memory_space<vmem>>, vector<16x16x4xbf16>,
    %44 = vector.extract_strided_slice %39 {offsets = [0, 2, 0], sizes = [16, 16, 4], strides = [1, 1, 1]} : vector<18x18x4xbf16> to vector<16x16x4xbf16>
    %c0_56 = arith.constant 0 : index
    %c0_57 = arith.constant 0 : index
    %c8_58 = arith.constant 8 : index
    %45 = vector.load %arg13[%c0_56, %c0_57, %c8_58] : memref<16x16x72xbf16, #tpu.memory_space<vmem>>, vector<16x16x4xbf16>
    tpu.vector_store %arg13[%c0_56, %c0_57, %c8_58], %44 {strides = array<i32>} : memref<16x16x72xbf16, #tpu.memory_space<vmem>>, vector<16x16x4xbf16>,
    %46 = vector.extract_strided_slice %39 {offsets = [1, 0, 0], sizes = [16, 16, 4], strides = [1, 1, 1]} : vector<18x18x4xbf16> to vector<16x16x4xbf16>
    %c0_59 = arith.constant 0 : index
    %c0_60 = arith.constant 0 : index
    %c12_61 = arith.constant 12 : index
    %47 = vector.load %arg13[%c0_59, %c0_60, %c12_61] : memref<16x16x72xbf16, #tpu.memory_space<vmem>>, vector<16x16x4xbf16>
    tpu.vector_store %arg13[%c0_59, %c0_60, %c12_61], %46 {strides = array<i32>} : memref<16x16x72xbf16, #tpu.memory_space<vmem>>, vector<16x16x4xbf16>,
    %48 = vector.extract_strided_slice %39 {offsets = [1, 1, 0], sizes = [16, 16, 4], strides = [1, 1, 1]} : vector<18x18x4xbf16> to vector<16x16x4xbf16>
    %c0_62 = arith.constant 0 : index
    %c0_63 = arith.constant 0 : index
    %c16_64 = arith.constant 16 : index
    %49 = vector.load %arg13[%c0_62, %c0_63, %c16_64] : memref<16x16x72xbf16, #tpu.memory_space<vmem>>, vector<16x16x4xbf16>
    tpu.vector_store %arg13[%c0_62, %c0_63, %c16_64], %48 {strides = array<i32>} : memref<16x16x72xbf16, #tpu.memory_space<vmem>>, vector<16x16x4xbf16>,
    %50 = vector.extract_strided_slice %39 {offsets = [1, 2, 0], sizes = [16, 16, 4], strides = [1, 1, 1]} : vector<18x18x4xbf16> to vector<16x16x4xbf16>
    %c0_65 = arith.constant 0 : index
    %c0_66 = arith.constant 0 : index
    %c20_67 = arith.constant 20 : index
    %51 = vector.load %arg13[%c0_65, %c0_66, %c20_67] : memref<16x16x72xbf16, #tpu.memory_space<vmem>>, vector<16x16x4xbf16>
    tpu.vector_store %arg13[%c0_65, %c0_66, %c20_67], %50 {strides = array<i32>} : memref<16x16x72xbf16, #tpu.memory_space<vmem>>, vector<16x16x4xbf16>,
    %52 = vector.extract_strided_slice %39 {offsets = [2, 0, 0], sizes = [16, 16, 4], strides = [1, 1, 1]} : vector<18x18x4xbf16> to vector<16x16x4xbf16>
    %c0_68 = arith.constant 0 : index
    %c0_69 = arith.constant 0 : index
    %c24_70 = arith.constant 24 : index
    %53 = vector.load %arg13[%c0_68, %c0_69, %c24_70] : memref<16x16x72xbf16, #tpu.memory_space<vmem>>, vector<16x16x4xbf16>
    tpu.vector_store %arg13[%c0_68, %c0_69, %c24_70], %52 {strides = array<i32>} : memref<16x16x72xbf16, #tpu.memory_space<vmem>>, vector<16x16x4xbf16>,
    %54 = vector.extract_strided_slice %39 {offsets = [2, 1, 0], sizes = [16, 16, 4], strides = [1, 1, 1]} : vector<18x18x4xbf16> to vector<16x16x4xbf16>
    %c0_71 = arith.constant 0 : index
    %c0_72 = arith.constant 0 : index
    %c28_73 = arith.constant 28 : index
    %55 = vector.load %arg13[%c0_71, %c0_72, %c28_73] : memref<16x16x72xbf16, #tpu.memory_space<vmem>>, vector<16x16x4xbf16>
    tpu.vector_store %arg13[%c0_71, %c0_72, %c28_73], %54 {strides = array<i32>} : memref<16x16x72xbf16, #tpu.memory_space<vmem>>, vector<16x16x4xbf16>,
    %56 = vector.extract_strided_slice %39 {offsets = [2, 2, 0], sizes = [16, 16, 4], strides = [1, 1, 1]} : vector<18x18x4xbf16> to vector<16x16x4xbf16>
    %c0_74 = arith.constant 0 : index
    %c0_75 = arith.constant 0 : index
    %c32_76 = arith.constant 32 : index
    %57 = vector.load %arg13[%c0_74, %c0_75, %c32_76] : memref<16x16x72xbf16, #tpu.memory_space<vmem>>, vector<16x16x4xbf16>
    tpu.vector_store %arg13[%c0_74, %c0_75, %c32_76], %56 {strides = array<i32>} : memref<16x16x72xbf16, #tpu.memory_space<vmem>>, vector<16x16x4xbf16>,
    %c0_77 = arith.constant 0 : index
    %c0_78 = arith.constant 0 : index
    %c0_79 = arith.constant 0 : index
    %58 = vector.load %arg13[%c0_77, %c0_78, %c0_79] : memref<16x16x72xbf16, #tpu.memory_space<vmem>>, vector<16x16x36xbf16>
    %59 = vector.shape_cast %58 : vector<16x16x36xbf16> to vector<256x36xbf16>
    %c0_80 = arith.constant 0 : index
    %c0_81 = arith.constant 0 : index
    %60 = vector.load %arg5[%c0_80, %c0_81] : memref<36x8xbf16, #tpu.memory_space<vmem>>, vector<36x8xbf16>
    %cst_82 = arith.constant dense<0.000000e+00> : vector<256x8xf32>
    %61 = tpu.matmul %59, %60, %cst_82 {dimension_numbers = #tpu.dot_dimension_numbers<[1], [0], [0], [1], [0, 0, 1, 1], [], []>} : vector<256x36xbf16>, vector<36x8xbf16>, vector<256x8xf32> -> vector<256x8xf32>
    %c0_83 = arith.constant 0 : index
    %c0_84 = arith.constant 0 : index
    %c0_85 = arith.constant 0 : index
    %62 = vector.load %arg11[%c0_83, %c0_84, %c0_85] : memref<18x18x4xbf16, #tpu.memory_space<vmem>>, vector<18x18x4xbf16>
    %63 = vector.extract_strided_slice %62 {offsets = [0, 0, 0], sizes = [16, 16, 4], strides = [1, 1, 1]} : vector<18x18x4xbf16> to vector<16x16x4xbf16>
    %c0_86 = arith.constant 0 : index
    %c0_87 = arith.constant 0 : index
    %c0_88 = arith.constant 0 : index
    %64 = vector.load %arg13[%c0_86, %c0_87, %c0_88] : memref<16x16x72xbf16, #tpu.memory_space<vmem>>, vector<16x16x4xbf16>
    tpu.vector_store %arg13[%c0_86, %c0_87, %c0_88], %63 {strides = array<i32>} : memref<16x16x72xbf16, #tpu.memory_space<vmem>>, vector<16x16x4xbf16>,
    %65 = vector.extract_strided_slice %62 {offsets = [0, 1, 0], sizes = [16, 16, 4], strides = [1, 1, 1]} : vector<18x18x4xbf16> to vector<16x16x4xbf16>
    %c0_89 = arith.constant 0 : index
    %c0_90 = arith.constant 0 : index
    %c4_91 = arith.constant 4 : index
    %66 = vector.load %arg13[%c0_89, %c0_90, %c4_91] : memref<16x16x72xbf16, #tpu.memory_space<vmem>>, vector<16x16x4xbf16>
    tpu.vector_store %arg13[%c0_89, %c0_90, %c4_91], %65 {strides = array<i32>} : memref<16x16x72xbf16, #tpu.memory_space<vmem>>, vector<16x16x4xbf16>,
    %67 = vector.extract_strided_slice %62 {offsets = [0, 2, 0], sizes = [16, 16, 4], strides = [1, 1, 1]} : vector<18x18x4xbf16> to vector<16x16x4xbf16>
    %c0_92 = arith.constant 0 : index
    %c0_93 = arith.constant 0 : index
    %c8_94 = arith.constant 8 : index
    %68 = vector.load %arg13[%c0_92, %c0_93, %c8_94] : memref<16x16x72xbf16, #tpu.memory_space<vmem>>, vector<16x16x4xbf16>
    tpu.vector_store %arg13[%c0_92, %c0_93, %c8_94], %67 {strides = array<i32>} : memref<16x16x72xbf16, #tpu.memory_space<vmem>>, vector<16x16x4xbf16>,
    %69 = vector.extract_strided_slice %62 {offsets = [1, 0, 0], sizes = [16, 16, 4], strides = [1, 1, 1]} : vector<18x18x4xbf16> to vector<16x16x4xbf16>
    %c0_95 = arith.constant 0 : index
    %c0_96 = arith.constant 0 : index
    %c12_97 = arith.constant 12 : index
    %70 = vector.load %arg13[%c0_95, %c0_96, %c12_97] : memref<16x16x72xbf16, #tpu.memory_space<vmem>>, vector<16x16x4xbf16>
    tpu.vector_store %arg13[%c0_95, %c0_96, %c12_97], %69 {strides = array<i32>} : memref<16x16x72xbf16, #tpu.memory_space<vmem>>, vector<16x16x4xbf16>,
    %71 = vector.extract_strided_slice %62 {offsets = [1, 1, 0], sizes = [16, 16, 4], strides = [1, 1, 1]} : vector<18x18x4xbf16> to vector<16x16x4xbf16>
    %c0_98 = arith.constant 0 : index
    %c0_99 = arith.constant 0 : index
    %c16_100 = arith.constant 16 : index
    %72 = vector.load %arg13[%c0_98, %c0_99, %c16_100] : memref<16x16x72xbf16, #tpu.memory_space<vmem>>, vector<16x16x4xbf16>
    tpu.vector_store %arg13[%c0_98, %c0_99, %c16_100], %71 {strides = array<i32>} : memref<16x16x72xbf16, #tpu.memory_space<vmem>>, vector<16x16x4xbf16>,
    %73 = vector.extract_strided_slice %62 {offsets = [1, 2, 0], sizes = [16, 16, 4], strides = [1, 1, 1]} : vector<18x18x4xbf16> to vector<16x16x4xbf16>
    %c0_101 = arith.constant 0 : index
    %c0_102 = arith.constant 0 : index
    %c20_103 = arith.constant 20 : index
    %74 = vector.load %arg13[%c0_101, %c0_102, %c20_103] : memref<16x16x72xbf16, #tpu.memory_space<vmem>>, vector<16x16x4xbf16>
    tpu.vector_store %arg13[%c0_101, %c0_102, %c20_103], %73 {strides = array<i32>} : memref<16x16x72xbf16, #tpu.memory_space<vmem>>, vector<16x16x4xbf16>,
    %75 = vector.extract_strided_slice %62 {offsets = [2, 0, 0], sizes = [16, 16, 4], strides = [1, 1, 1]} : vector<18x18x4xbf16> to vector<16x16x4xbf16>
    %c0_104 = arith.constant 0 : index
    %c0_105 = arith.constant 0 : index
    %c24_106 = arith.constant 24 : index
    %76 = vector.load %arg13[%c0_104, %c0_105, %c24_106] : memref<16x16x72xbf16, #tpu.memory_space<vmem>>, vector<16x16x4xbf16>
    tpu.vector_store %arg13[%c0_104, %c0_105, %c24_106], %75 {strides = array<i32>} : memref<16x16x72xbf16, #tpu.memory_space<vmem>>, vector<16x16x4xbf16>,
    %77 = vector.extract_strided_slice %62 {offsets = [2, 1, 0], sizes = [16, 16, 4], strides = [1, 1, 1]} : vector<18x18x4xbf16> to vector<16x16x4xbf16>
    %c0_107 = arith.constant 0 : index
    %c0_108 = arith.constant 0 : index
    %c28_109 = arith.constant 28 : index
    %78 = vector.load %arg13[%c0_107, %c0_108, %c28_109] : memref<16x16x72xbf16, #tpu.memory_space<vmem>>, vector<16x16x4xbf16>
    tpu.vector_store %arg13[%c0_107, %c0_108, %c28_109], %77 {strides = array<i32>} : memref<16x16x72xbf16, #tpu.memory_space<vmem>>, vector<16x16x4xbf16>,
    %79 = vector.extract_strided_slice %62 {offsets = [2, 2, 0], sizes = [16, 16, 4], strides = [1, 1, 1]} : vector<18x18x4xbf16> to vector<16x16x4xbf16>
    %c0_110 = arith.constant 0 : index
    %c0_111 = arith.constant 0 : index
    %c32_112 = arith.constant 32 : index
    %80 = vector.load %arg13[%c0_110, %c0_111, %c32_112] : memref<16x16x72xbf16, #tpu.memory_space<vmem>>, vector<16x16x4xbf16>
    tpu.vector_store %arg13[%c0_110, %c0_111, %c32_112], %79 {strides = array<i32>} : memref<16x16x72xbf16, #tpu.memory_space<vmem>>, vector<16x16x4xbf16>,
    %c0_113 = arith.constant 0 : index
    %c0_114 = arith.constant 0 : index
    %c0_115 = arith.constant 0 : index
    %81 = vector.load %arg13[%c0_113, %c0_114, %c0_115] : memref<16x16x72xbf16, #tpu.memory_space<vmem>>, vector<16x16x36xbf16>
    %82 = vector.shape_cast %81 : vector<16x16x36xbf16> to vector<256x36xbf16>
    %c0_116 = arith.constant 0 : index
    %c0_117 = arith.constant 0 : index
    %83 = vector.load %arg6[%c0_116, %c0_117] : memref<36x8xbf16, #tpu.memory_space<vmem>>, vector<36x8xbf16>
    %cst_118 = arith.constant dense<0.000000e+00> : vector<256x8xf32>
    %84 = tpu.matmul %82, %83, %cst_118 {dimension_numbers = #tpu.dot_dimension_numbers<[1], [0], [0], [1], [0, 0, 1, 1], [], []>} : vector<256x36xbf16>, vector<36x8xbf16>, vector<256x8xf32> -> vector<256x8xf32>
    %85 = arith.addf %61, %84 : vector<256x8xf32>
    %c0_119 = arith.constant 0 : index
    %c0_120 = arith.constant 0 : index
    %86 = vector.load %arg7[%c0_119, %c0_120] : memref<1x8xf32, #tpu.memory_space<vmem>>, vector<1x8xf32>
    %87 = vector.broadcast %86 : vector<1x8xf32> to vector<256x8xf32>
    %88 = arith.addf %85, %87 : vector<256x8xf32>
    %cst_121 = arith.constant 0.000000e+00 : f32
    %89 = vector.broadcast %cst_121 : f32 to vector<256x8xf32>
    %90 = arith.maximumf %88, %89 : vector<256x8xf32>
    %cst_122 = arith.constant 0.000000e+00 : bf16
    %91 = vector.broadcast %cst_122 : bf16 to vector<1x18x8xbf16>
    %c0_123 = arith.constant 0 : index
    %c0_124 = arith.constant 0 : index
    %c0_125 = arith.constant 0 : index
    %92 = vector.load %arg12[%c0_123, %c0_124, %c0_125] : memref<18x18x8xbf16, #tpu.memory_space<vmem>>, vector<1x18x8xbf16>
    tpu.vector_store %arg12[%c0_123, %c0_124, %c0_125], %91 {strides = array<i32>} : memref<18x18x8xbf16, #tpu.memory_space<vmem>>, vector<1x18x8xbf16>,
    %cst_126 = arith.constant 0.000000e+00 : bf16
    %93 = vector.broadcast %cst_126 : bf16 to vector<1x18x8xbf16>
    %c17 = arith.constant 17 : index
    %c0_127 = arith.constant 0 : index
    %c0_128 = arith.constant 0 : index
    %94 = vector.load %arg12[%c17, %c0_127, %c0_128] : memref<18x18x8xbf16, #tpu.memory_space<vmem>>, vector<1x18x8xbf16>
    tpu.vector_store %arg12[%c17, %c0_127, %c0_128], %93 {strides = array<i32>} : memref<18x18x8xbf16, #tpu.memory_space<vmem>>, vector<1x18x8xbf16>,
    %cst_129 = arith.constant 0.000000e+00 : bf16
    %95 = vector.broadcast %cst_129 : bf16 to vector<18x1x8xbf16>
    %c0_130 = arith.constant 0 : index
    %c0_131 = arith.constant 0 : index
    %c0_132 = arith.constant 0 : index
    %96 = vector.load %arg12[%c0_130, %c0_131, %c0_132] : memref<18x18x8xbf16, #tpu.memory_space<vmem>>, vector<18x1x8xbf16>
    tpu.vector_store %arg12[%c0_130, %c0_131, %c0_132], %95 {strides = array<i32>} : memref<18x18x8xbf16, #tpu.memory_space<vmem>>, vector<18x1x8xbf16>,
    %cst_133 = arith.constant 0.000000e+00 : bf16
    %97 = vector.broadcast %cst_133 : bf16 to vector<18x1x8xbf16>
    %c0_134 = arith.constant 0 : index
    %c17_135 = arith.constant 17 : index
    %c0_136 = arith.constant 0 : index
    %98 = vector.load %arg12[%c0_134, %c17_135, %c0_136] : memref<18x18x8xbf16, #tpu.memory_space<vmem>>, vector<18x1x8xbf16>
    tpu.vector_store %arg12[%c0_134, %c17_135, %c0_136], %97 {strides = array<i32>} : memref<18x18x8xbf16, #tpu.memory_space<vmem>>, vector<18x1x8xbf16>,
    %99 = vector.shape_cast %90 : vector<256x8xf32> to vector<16x16x8xf32>
    %100 = arith.truncf %99 : vector<16x16x8xf32> to vector<16x16x8xbf16>
    %c1 = arith.constant 1 : index
    %c1_137 = arith.constant 1 : index
    %c0_138 = arith.constant 0 : index
    %101 = vector.load %arg12[%c1, %c1_137, %c0_138] : memref<18x18x8xbf16, #tpu.memory_space<vmem>>, vector<16x16x8xbf16>
    tpu.vector_store %arg12[%c1, %c1_137, %c0_138], %100 {strides = array<i32>} : memref<18x18x8xbf16, #tpu.memory_space<vmem>>, vector<16x16x8xbf16>,
    %c0_139 = arith.constant 0 : index
    %c0_140 = arith.constant 0 : index
    %c0_141 = arith.constant 0 : index
    %102 = vector.load %arg12[%c0_139, %c0_140, %c0_141] : memref<18x18x8xbf16, #tpu.memory_space<vmem>>, vector<18x18x8xbf16>
    %103 = vector.extract_strided_slice %102 {offsets = [0, 0, 0], sizes = [16, 16, 8], strides = [1, 1, 1]} : vector<18x18x8xbf16> to vector<16x16x8xbf16>
    %c0_142 = arith.constant 0 : index
    %c0_143 = arith.constant 0 : index
    %c0_144 = arith.constant 0 : index
    %104 = vector.load %arg13[%c0_142, %c0_143, %c0_144] : memref<16x16x72xbf16, #tpu.memory_space<vmem>>, vector<16x16x8xbf16>
    tpu.vector_store %arg13[%c0_142, %c0_143, %c0_144], %103 {strides = array<i32>} : memref<16x16x72xbf16, #tpu.memory_space<vmem>>, vector<16x16x8xbf16>,
    %105 = vector.extract_strided_slice %102 {offsets = [0, 1, 0], sizes = [16, 16, 8], strides = [1, 1, 1]} : vector<18x18x8xbf16> to vector<16x16x8xbf16>
    %c0_145 = arith.constant 0 : index
    %c0_146 = arith.constant 0 : index
    %c8_147 = arith.constant 8 : index
    %106 = vector.load %arg13[%c0_145, %c0_146, %c8_147] : memref<16x16x72xbf16, #tpu.memory_space<vmem>>, vector<16x16x8xbf16>
    tpu.vector_store %arg13[%c0_145, %c0_146, %c8_147], %105 {strides = array<i32>} : memref<16x16x72xbf16, #tpu.memory_space<vmem>>, vector<16x16x8xbf16>,
    %107 = vector.extract_strided_slice %102 {offsets = [0, 2, 0], sizes = [16, 16, 8], strides = [1, 1, 1]} : vector<18x18x8xbf16> to vector<16x16x8xbf16>
    %c0_148 = arith.constant 0 : index
    %c0_149 = arith.constant 0 : index
    %c16_150 = arith.constant 16 : index
    %108 = vector.load %arg13[%c0_148, %c0_149, %c16_150] : memref<16x16x72xbf16, #tpu.memory_space<vmem>>, vector<16x16x8xbf16>
    tpu.vector_store %arg13[%c0_148, %c0_149, %c16_150], %107 {strides = array<i32>} : memref<16x16x72xbf16, #tpu.memory_space<vmem>>, vector<16x16x8xbf16>,
    %109 = vector.extract_strided_slice %102 {offsets = [1, 0, 0], sizes = [16, 16, 8], strides = [1, 1, 1]} : vector<18x18x8xbf16> to vector<16x16x8xbf16>
    %c0_151 = arith.constant 0 : index
    %c0_152 = arith.constant 0 : index
    %c24_153 = arith.constant 24 : index
    %110 = vector.load %arg13[%c0_151, %c0_152, %c24_153] : memref<16x16x72xbf16, #tpu.memory_space<vmem>>, vector<16x16x8xbf16>
    tpu.vector_store %arg13[%c0_151, %c0_152, %c24_153], %109 {strides = array<i32>} : memref<16x16x72xbf16, #tpu.memory_space<vmem>>, vector<16x16x8xbf16>,
    %111 = vector.extract_strided_slice %102 {offsets = [1, 1, 0], sizes = [16, 16, 8], strides = [1, 1, 1]} : vector<18x18x8xbf16> to vector<16x16x8xbf16>
    %c0_154 = arith.constant 0 : index
    %c0_155 = arith.constant 0 : index
    %c32_156 = arith.constant 32 : index
    %112 = vector.load %arg13[%c0_154, %c0_155, %c32_156] : memref<16x16x72xbf16, #tpu.memory_space<vmem>>, vector<16x16x8xbf16>
    tpu.vector_store %arg13[%c0_154, %c0_155, %c32_156], %111 {strides = array<i32>} : memref<16x16x72xbf16, #tpu.memory_space<vmem>>, vector<16x16x8xbf16>,
    %113 = vector.extract_strided_slice %102 {offsets = [1, 2, 0], sizes = [16, 16, 8], strides = [1, 1, 1]} : vector<18x18x8xbf16> to vector<16x16x8xbf16>
    %c0_157 = arith.constant 0 : index
    %c0_158 = arith.constant 0 : index
    %c40 = arith.constant 40 : index
    %114 = vector.load %arg13[%c0_157, %c0_158, %c40] : memref<16x16x72xbf16, #tpu.memory_space<vmem>>, vector<16x16x8xbf16>
    tpu.vector_store %arg13[%c0_157, %c0_158, %c40], %113 {strides = array<i32>} : memref<16x16x72xbf16, #tpu.memory_space<vmem>>, vector<16x16x8xbf16>,
    %115 = vector.extract_strided_slice %102 {offsets = [2, 0, 0], sizes = [16, 16, 8], strides = [1, 1, 1]} : vector<18x18x8xbf16> to vector<16x16x8xbf16>
    %c0_159 = arith.constant 0 : index
    %c0_160 = arith.constant 0 : index
    %c48 = arith.constant 48 : index
    %116 = vector.load %arg13[%c0_159, %c0_160, %c48] : memref<16x16x72xbf16, #tpu.memory_space<vmem>>, vector<16x16x8xbf16>
    tpu.vector_store %arg13[%c0_159, %c0_160, %c48], %115 {strides = array<i32>} : memref<16x16x72xbf16, #tpu.memory_space<vmem>>, vector<16x16x8xbf16>,
    %117 = vector.extract_strided_slice %102 {offsets = [2, 1, 0], sizes = [16, 16, 8], strides = [1, 1, 1]} : vector<18x18x8xbf16> to vector<16x16x8xbf16>
    %c0_161 = arith.constant 0 : index
    %c0_162 = arith.constant 0 : index
    %c56 = arith.constant 56 : index
    %118 = vector.load %arg13[%c0_161, %c0_162, %c56] : memref<16x16x72xbf16, #tpu.memory_space<vmem>>, vector<16x16x8xbf16>
    tpu.vector_store %arg13[%c0_161, %c0_162, %c56], %117 {strides = array<i32>} : memref<16x16x72xbf16, #tpu.memory_space<vmem>>, vector<16x16x8xbf16>,
    %119 = vector.extract_strided_slice %102 {offsets = [2, 2, 0], sizes = [16, 16, 8], strides = [1, 1, 1]} : vector<18x18x8xbf16> to vector<16x16x8xbf16>
    %c0_163 = arith.constant 0 : index
    %c0_164 = arith.constant 0 : index
    %c64 = arith.constant 64 : index
    %120 = vector.load %arg13[%c0_163, %c0_164, %c64] : memref<16x16x72xbf16, #tpu.memory_space<vmem>>, vector<16x16x8xbf16>
    tpu.vector_store %arg13[%c0_163, %c0_164, %c64], %119 {strides = array<i32>} : memref<16x16x72xbf16, #tpu.memory_space<vmem>>, vector<16x16x8xbf16>,
    %c0_165 = arith.constant 0 : index
    %c0_166 = arith.constant 0 : index
    %c0_167 = arith.constant 0 : index
    %121 = vector.load %arg13[%c0_165, %c0_166, %c0_167] : memref<16x16x72xbf16, #tpu.memory_space<vmem>>, vector<16x16x72xbf16>
    %122 = vector.shape_cast %121 : vector<16x16x72xbf16> to vector<256x72xbf16>
    %c0_168 = arith.constant 0 : index
    %c0_169 = arith.constant 0 : index
    %123 = vector.load %arg8[%c0_168, %c0_169] : memref<72x8xbf16, #tpu.memory_space<vmem>>, vector<72x8xbf16>
    %cst_170 = arith.constant dense<0.000000e+00> : vector<256x8xf32>
    %124 = tpu.matmul %122, %123, %cst_170 {dimension_numbers = #tpu.dot_dimension_numbers<[1], [0], [0], [1], [0, 0, 1, 1], [], []>} : vector<256x72xbf16>, vector<72x8xbf16>, vector<256x8xf32> -> vector<256x8xf32>
    %c0_171 = arith.constant 0 : index
    %c0_172 = arith.constant 0 : index
    %125 = vector.load %arg9[%c0_171, %c0_172] : memref<1x8xf32, #tpu.memory_space<vmem>>, vector<1x8xf32>
    %126 = vector.broadcast %125 : vector<1x8xf32> to vector<256x8xf32>
    %127 = arith.addf %124, %126 : vector<256x8xf32>
    %cst_173 = arith.constant 0.000000e+00 : f32
    %128 = vector.broadcast %cst_173 : f32 to vector<256x8xf32>
    %129 = arith.maximumf %127, %128 : vector<256x8xf32>
    %130 = vector.shape_cast %129 : vector<256x8xf32> to vector<16x16x8xf32>
    %c0_174 = arith.constant 0 : index
    %c0_175 = arith.constant 0 : index
    %c0_176 = arith.constant 0 : index
    %c0_177 = arith.constant 0 : index
    %131 = vector.load %arg10[%c0_174, %c0_175, %c0_176, %c0_177] : memref<1x16x16x8xf32, #tpu.memory_space<vmem>>, vector<1x16x16x8xf32>
    %132 = vector.shape_cast %131 : vector<1x16x16x8xf32> to vector<16x16x8xf32>
    %133 = vector.shape_cast %130 : vector<16x16x8xf32> to vector<1x16x16x8xf32>
    tpu.vector_store %arg10[%c0_174, %c0_175, %c0_176, %c0_177], %133 {strides = array<i32>} : memref<1x16x16x8xf32, #tpu.memory_space<vmem>>, vector<1x16x16x8xf32>,
    return
  }
  func.func @transform_0(%arg0: i32) -> (i32, i32, i32, i32) {
    %c0_i32 = arith.constant 0 : i32
    %c0_i32_0 = arith.constant 0 : i32
    %c0_i32_1 = arith.constant 0 : i32
    %c0_i32_2 = arith.constant 0 : i32
    return %arg0, %c0_i32, %c0_i32_0, %c0_i32_1 : i32, i32, i32, i32
  }
  func.func @transform_1(%arg0: i32) -> (i32, i32, i32, i32) {
    %c0_i32 = arith.constant 0 : i32
    %c0_i32_0 = arith.constant 0 : i32
    %c0_i32_1 = arith.constant 0 : i32
    %c0_i32_2 = arith.constant 0 : i32
    return %arg0, %c0_i32, %c0_i32_0, %c0_i32_1 : i32, i32, i32, i32
  }
  func.func @transform_2(%arg0: i32) -> (i32, i32) {
    %c0_i32 = arith.constant 0 : i32
    %c0_i32_0 = arith.constant 0 : i32
    %c0_i32_1 = arith.constant 0 : i32
    return %c0_i32, %c0_i32_0 : i32, i32
  }
  func.func @transform_3(%arg0: i32) -> (i32, i32) {
    %c0_i32 = arith.constant 0 : i32
    %c0_i32_0 = arith.constant 0 : i32
    %c0_i32_1 = arith.constant 0 : i32
    return %c0_i32, %c0_i32_0 : i32, i32
  }
  func.func @transform_4(%arg0: i32) -> (i32, i32) {
    %c0_i32 = arith.constant 0 : i32
    %c0_i32_0 = arith.constant 0 : i32
    %c0_i32_1 = arith.constant 0 : i32
    return %c0_i32, %c0_i32_0 : i32, i32
  }
  func.func @transform_5(%arg0: i32) -> (i32, i32) {
    %c0_i32 = arith.constant 0 : i32
    %c0_i32_0 = arith.constant 0 : i32
    %c0_i32_1 = arith.constant 0 : i32
    return %c0_i32, %c0_i32_0 : i32, i32
  }
  func.func @transform_6(%arg0: i32) -> (i32, i32) {
    %c0_i32 = arith.constant 0 : i32
    %c0_i32_0 = arith.constant 0 : i32
    %c0_i32_1 = arith.constant 0 : i32
    return %c0_i32, %c0_i32_0 : i32, i32
  }
  func.func @transform_7(%arg0: i32) -> (i32, i32) {
    %c0_i32 = arith.constant 0 : i32
    %c0_i32_0 = arith.constant 0 : i32
    %c0_i32_1 = arith.constant 0 : i32
    return %c0_i32, %c0_i32_0 : i32, i32
  }
  func.func @transform_8(%arg0: i32) -> (i32, i32) {
    %c0_i32 = arith.constant 0 : i32
    %c0_i32_0 = arith.constant 0 : i32
    %c0_i32_1 = arith.constant 0 : i32
    return %c0_i32, %c0_i32_0 : i32, i32
  }
  func.func @transform_9(%arg0: i32) -> (i32, i32, i32, i32) {
    %c0_i32 = arith.constant 0 : i32
    %c0_i32_0 = arith.constant 0 : i32
    %c0_i32_1 = arith.constant 0 : i32
    %c0_i32_2 = arith.constant 0 : i32
    return %arg0, %c0_i32, %c0_i32_0, %c0_i32_1 : i32, i32, i32, i32
  }
}

</mosaic_0001>

<bundles_post_ra>
// kernel: tpu_custom_call.1
= control target key start
LH: loop header
LB: loop body
LE: loop exit
PB: predicated region body
PF: predicated region fallthrough
CT: control target
= control target key end

     0   :  { %s8621_s30 = smov 0   ;;  %s14158_s0 = inlined_call_operand.vmem [shape: bf16[2,10,10,4], index: 0, kind: input, shape index: {}]   ;;  %s14159_s1 = inlined_call_operand.vmem [shape: bf16[2,18,18,4], index: 1, kind: input, shape index: {}]   ;;  %s14160_s2 = inlined_call_operand.vmem [shape: bf16[36,4], index: 2, kind: input, shape index: {}]   ;;  %s14161_s3 = inlined_call_operand.vmem [shape: f32[1,4], index: 3, kind: input, shape index: {}]   ;;  %s14162_s4 = inlined_call_operand.vmem [shape: bf16[36,8], index: 4, kind: input, shape index: {}]   ;;  %s14163_s5 = inlined_call_operand.vmem [shape: bf16[36,8], index: 5, kind: input, shape index: {}]   ;;  %s14164_s6 = inlined_call_operand.vmem [shape: f32[1,8], index: 6, kind: input, shape index: {}]   ;;  %s14165_s7 = inlined_call_operand.vmem [shape: bf16[72,8], index: 7, kind: input, shape index: {}]   ;;  %s14166_s8 = inlined_call_operand.vmem [shape: f32[1,8], index: 8, kind: input, shape index: {}]   ;;  %s14167_s9 = inlined_call_operand.vmem [shape: f32[2,16,16,8], index: 9, kind: output, shape index: {}]  }
   0x1 LB: > { %s8063_s10 = sadd.s32 4294967295, %s8556_s30   ;;  %p8067_p0 = scmp.ge.s32.totalorder %s8556_s30, 1  ;;  %s8556_s30 = sphi %s8621_s30, %s19_s30  }
   0x2   : > { %p297_p1 = scmp.lt.s32.totalorder %s8556_s30, 3 }
   0x4   : > { %p298_p2 = pnand %p8067_p0, %p297_p1 }
   0x6   : > { %301 = sbr.rel (%p298_p2) target bundleno = 2863 (0xb2f), region = 56 }
   0xb   : > { %p338_p3 = scmp.lt.s32.totalorder %s8063_s10, 1  ;;  %vm547_vm0 = vcmask 1042432   ;;  %vm548_vm1 = vcmask 1046532   ;;  %v14508_v0 = vmov 0  ;;  %vm383_vm3 = vsmask.f32 3328 }
   0xc   : > { %vm8637_vm2 = vmor %vm547_vm0, %vm548_vm1  ;;  %vm384_vm4 = vsmask.f32 7440  ;;  %s8558_s15 = smov 8   ;;  %s8559_s16 = smov 4   ;;  %vm374_vm6 = vcmask 27648   ;;  %vm14262_vm7 = vcmask 60448  }
   0xd   : > { %s15054_s10 = smov (!%p338_p3, %s8063_s10), 1  ;;  %v14509_v0 = vsel %vm8637_vm2, 4294967295, %v14508_v0  ;;  %vm8677_vm5 = vmor %vm383_vm3, %vm384_vm4  ;;  %s8560_s17 = smov 12   ;;  %vm606_vm8 = vcmask 93248   ;;  %vm640_vm9 = vcmask 126048   ;;  %vm687_vm10 = vcmask 158848  }
   0xe   : > { %s8512_s11 = smul.u32 80, %s15054_s10  ;;  %14510 = vst [vmem:[#allocation5_spill] sm:$0xff] %v14509_v0  ;;  %s8561_s18 = smov 16   ;;  %vm725_vm11 = vcmask 191648   ;;  %vm759_vm12 = vcmask 224448   ;;  %vm806_vm13 = vcmask 257248  }
   0xf   : > { %s8562_s19 = smov 20   ;;  %s8563_s20 = smov 24   ;;  %vm14264_vm14 = vcmask 1041408   ;;  %vm844_vm15 = vcmask 290048   ;;  %vm14263_vm0 = vcmask 293888   ;;  %vm983_vm1 = vcmask 26624  }
  0x10   : > { %s8635_s14 = scalar_lea.vmem %s14158_s0, %s8512_s11  ;;  %s8513_s21 = smul.u32 216, %s15054_s10  ;;  %vm1040_vm3 = vcmask 27650   ;;  %vm984_vm4 = vsmask.f32 2304 }
  0x11   : > { %v8642_v1 = vld [vmem:[%s8635_s14] sm:$0xf]  ;;  %v355_v2 = vld [vmem:[%s8635_s14 + $0x4] sm:$0x1]  ;;  %v8646_v3 = vld [vmem:[%s8635_s14 + $0x10] sm:$0xf] }
  0x12   : > { %v8072_v4 = vrot.slane %v8642_v1, 9  ;;  %v552_v5 = vrot.slane %v355_v2, 5  ;;  %v8650_v6 = vld [vmem:[%s8635_s14 + $0x14] sm:$0x1]  ;;  %v415_v7 = vshrl.u32 %v8646_v3, 16  ;;  %v418_v8 = vshll.u32 %v8646_v3, 16  ;;  %s8920_s24 = scalar_lea.vmem %s14159_s1, %s8513_s21 }
  0x13   : > { %v424_v9 = vshll.u32 %v8650_v6, 16  ;;  %v387_v10 = vshrl.u32 %v8642_v1, 16  ;;  %v390_v11 = vshll.u32 %v8642_v1, 16  ;;  %v396_v12 = vshll.u32 %v355_v2, 16  ;;  %v8658_v13 = vld [vmem:[%s8635_s14 + $0x20] sm:$0xf] }
  0x14   : > { %v553_v14 = vsel %vm8637_vm2, %v8072_v4, %v552_v5  ;;  %v417_v15 = vrot.slane %v415_v7, 4  ;;  %v420_v16 = vrot.slane %v418_v8, 5  ;;  %v8663_v17 = vld [vmem:[%s8635_s14 + $0x24] sm:$0x1]  ;;  %v443_v18 = vshrl.u32 %v8658_v13, 16  ;;  %s8564_s25 = smov 28  }
  0x15   : > { %582 = vrot.lane.b32.xlu2 %v553_v14, %s8558_s15  ;;  %v426_v19 = vrot.slane %v424_v9, 5  ;;  %v389_v20 = vrot.slane %v387_v10, 4  ;;  %v392_v21 = vrot.slane %v390_v11, 5  ;;  %v398_v22 = vrot.slane %v396_v12, 5  ;;  %v8668_v23 = vld [vmem:[%s8635_s14 + $0x18] sm:$0xf] }
  0x16   : > { %v421_v24 = vor.u32 %v420_v16, %v417_v15  ;;  %v445_v25 = vrot.slane %v443_v18, 4  ;;  %v446_v26 = vshll.u32 %v8658_v13, 16  ;;  %v452_v27 = vshll.u32 %v8663_v17, 16  ;;  %v8673_v28 = vld [vmem:[%s8635_s14 + $0x1c] sm:$0x1]  ;;  %s8565_s26 = smov 32  }
  0x17   : > { %v393_v30 = vor.u32 %v392_v21, %v389_v20  ;;  %v429_v31 = vshrl.u32 %v8668_v23, 16  ;;  %v432_v32 = vshll.u32 %v8668_v23, 16  ;;  %v438_v33 = vshll.u32 %v8673_v28, 16  ;;  %v8685_v34 = vld [vmem:[%s8635_s14 + $0x8] sm:$0xf]  ;;  %s8570_s29 = smov 64  }
  0x18   : > { %v422_v35 = vrot.slane %v421_v24, 4  ;;  %v448_v36 = vrot.slane %v446_v26, 5  ;;  %v454_v37 = vrot.slane %v452_v27, 5  ;;  %v8688_v38 = vld [vmem:[%s8635_s14 + $0xc] sm:$0x1]  ;;  %v401_v39 = vshrl.u32 %v8685_v34, 16 }
  0x19   : > { %v394_v40 = vrot.slane %v393_v30, 4  ;;  %v431_v41 = vrot.slane %v429_v31, 4  ;;  %v434_v42 = vrot.slane %v432_v32, 5  ;;  %v440_v43 = vrot.slane %v438_v33, 5  ;;  %v8692_v44 = vld [vmem:[%s8635_s14 + $0x28] sm:$0xf] }
  0x1a   : > { %v8696_v45 = vsel %vm8677_vm5, %v422_v35, %v426_v19  ;;  %v449_v46 = vor.u32 %v448_v36, %v445_v25  ;;  %v403_v47 = vrot.slane %v401_v39, 4  ;;  %v404_v48 = vshll.u32 %v8685_v34, 16  ;;  %v8700_v49 = vld [vmem:[%s8635_s14 + $0x2c] sm:$0x1]  ;;  %v8703_v50 = vld [vmem:[%s8635_s14 + $0x38] sm:$0xf] }
  0x1b   : > { %502 = vrot.lane.b32.xlu1 %v8696_v45, %s8559_s16  ;;  %v399_v51 = vsel %vm8677_vm5, %v394_v40, %v398_v22  ;;  %v435_v52 = vor.u32 %v434_v42, %v431_v41  ;;  %v410_v53 = vshll.u32 %v8688_v38, 16  ;;  %v457_v54 = vshrl.u32 %v8692_v44, 16  ;;  %v8715_v59 = vld [vmem:[%s8635_s14 + $0x3c] sm:$0x1]  ;;  %v8719_v2 = vld [vmem:[%s8635_s14 + $0x30] sm:$0xf] }
  0x1c   : > { %498 = vrot.lane.b32.xlu0 %v399_v51, %s8559_s16  ;;  %v450_v55 = vrot.slane %v449_v46, 4  ;;  %v406_v56 = vrot.slane %v404_v48, 5  ;;  %v460_v57 = vshll.u32 %v8692_v44, 16  ;;  %v466_v58 = vshll.u32 %v8700_v49, 16  ;;  %v367_v9 = vld [vmem:[%s8635_s14 + $0x34] sm:$0x1] }
  0x1d   : > { %v436_v60 = vrot.slane %v435_v52, 4  ;;  %v412_v61 = vrot.slane %v410_v53, 5  ;;  %v459_v62 = vrot.slane %v457_v54, 4  ;;  %v485_v63 = vshrl.u32 %v8703_v50, 16  ;;  %379 = vst.msk [vmem:[#allocation4 + $0x20] sm:$0xf] %vm374_vm6, %v8658_v13 }
  0x1e   : > { %v8723_v4 = vsel %vm8677_vm5, %v450_v55, %v454_v37  ;;  %v407_v5 = vor.u32 %v406_v56, %v403_v47  ;;  %v462_v7 = vrot.slane %v460_v57, 5  ;;  %v468_v8 = vrot.slane %v466_v58, 5  ;;  %375 = vst.msk [vmem:[#allocation4] sm:$0xf] %vm374_vm6, %v8642_v1  ;;  %s8438_s27 = sshll.u32 %s15054_s10, 8 }
  0x1f   : > { %506 = vrot.lane.b32.xlu2 %v8723_v4, %s8559_s16  ;;  %v8730_v10 = vsel %vm8677_vm5, %v436_v60, %v440_v43  ;;  %v487_v11 = vrot.slane %v485_v63, 4  ;;  %v488_v12 = vshll.u32 %v8703_v50, 16  ;;  %v494_v14 = vshll.u32 %v8715_v59, 16  ;;  %376 = vst.msk [vmem:[#allocation4 + $0x8] sm:$0xf] %vm374_vm6, %v8685_v34 }
  0x20   : > { %v408_v15 = vrot.slane %v407_v5, 4  ;;  %v463_v16 = vor.u32 %v462_v7, %v459_v62  ;;  %v471_v18 = vshrl.u32 %v8719_v2, 16  ;;  %v474_v19 = vshll.u32 %v8719_v2, 16  ;;  %377 = vst.msk [vmem:[#allocation4 + $0x10] sm:$0xf] %vm374_vm6, %v8646_v3 }
  0x21   : > { %v490_v20 = vrot.slane %v488_v12, 5  ;;  %v480_v21 = vshll.u32 %v367_v9, 16  ;;  %v496_v31 = vrot.slane %v494_v14, 5  ;;  %v8075_v39 = vrot.slane %v8668_v23, 9  ;;  %378 = vst.msk [vmem:[#allocation4 + $0x18] sm:$0xf] %vm374_vm6, %v8668_v23 }
  0x22   : > { %v8738_v22 = vsel %vm8677_vm5, %v408_v15, %v412_v61  ;;  %v464_v24 = vrot.slane %v463_v16, 4  ;;  %v473_v25 = vrot.slane %v471_v18, 4  ;;  %v476_v26 = vrot.slane %v474_v19, 5  ;;  %v371_v7 = vld [vmem:[%s8635_s14 + $0x44] sm:$0x1] }
  0x23   : > { %504 = vrot.lane.b32.xlu1 %v8730_v10, %s8559_s16  ;;  %v491_v27 = vor.u32 %v490_v20, %v487_v11  ;;  %v482_v35 = vrot.slane %v480_v21, 5  ;;  %v564_v40 = vrot.slane %v8673_v28, 5  ;;  %v8074_v43 = vrot.slane %v8646_v3, 9  ;;  %380 = vst.msk [vmem:[#allocation4 + $0x28] sm:$0xf] %vm374_vm6, %v8692_v44 }
  0x24   : > { %500 = vrot.lane.b32.xlu0 %v8738_v22, %s8559_s16  ;;  %v8746_v30 = vsel %vm8677_vm5, %v464_v24, %v468_v8  ;;  %v477_v32 = vor.u32 %v476_v26, %v473_v25  ;;  %v560_v46 = vrot.slane %v8650_v6, 5  ;;  %v8073_v28 = vrot.slane %v8685_v34, 9  ;;  %381 = vst.msk [vmem:[#allocation4 + $0x30] sm:$0xf] %vm374_vm6, %v8719_v2  ;;  %v8930_v24 = vld [vmem:[%s8920_s24 + $0x4] sm:$0xf] }
  0x25   : > { %v492_v33 = vrot.slane %v491_v27, 4  ;;  %v8766_v42 = vsel %vm8637_vm2, %v8075_v39, %v564_v40  ;;  %v556_v47 = vrot.slane %v8688_v38, 5  ;;  %v8078_v51 = vrot.slane %v8719_v2, 9  ;;  %382 = vst.msk [vmem:[#allocation4 + $0x38] sm:$0xf] %vm374_vm6, %v8703_v50 }
  0x26   : > { %v478_v36 = vrot.slane %v477_v32, 4  ;;  %v8776_v48 = vsel %vm8637_vm2, %v8074_v43, %v560_v46  ;;  %v576_v52 = vrot.slane %v367_v9, 5  ;;  %v8077_v38 = vrot.slane %v8692_v44, 9  ;;  %1315 = vst.msk [vmem:[#allocation4 + $0x4] sm:$0xf] %vm374_vm6, %v8930_v24 }
  0x27   : > { %508 = vrot.lane.b32.xlu2 %v8746_v30, %s8559_s16  ;;  %v8752_v37 = vsel %vm8677_vm5, %v492_v33, %v496_v31  ;;  %v557_v53 = vsel %vm8637_vm2, %v8073_v28, %v556_v47  ;;  %v572_v54 = vrot.slane %v8700_v49, 5  ;;  %v8076_v55 = vrot.slane %v8658_v13, 9  ;;  %v8939_v31 = vld [vmem:[%s8635_s14 + $0x4c] sm:$0x1] }
  0x28   : > { %v8758_v41 = vsel %vm8677_vm5, %v478_v36, %v482_v35  ;;  %v8786_v6 = vsel %vm8637_vm2, %v8078_v51, %v576_v52  ;;  %v568_v56 = vrot.slane %v8663_v17, 5  ;;  %v8079_v17 = vrot.slane %v8703_v50, 9  ;;  %v8948_v36 = vld [vmem:[%s8920_s24 + $0x1c] sm:$0xf]  ;;  %v8979_v51 = vld [vmem:[%s8920_s24] sm:$0xf] }
  0x29   : > { %v8796_v57 = vsel %vm8637_vm2, %v8077_v38, %v572_v54  ;;  %v580_v49 = vrot.slane %v8715_v59, 5  ;;  %v8825_v59 = vld [vmem:[%s8635_s14 + $0x40] sm:$0xf]  ;;  %v699_v16 = vrot.slane %v371_v7, 5  ;;  %v778_v33 = vshll.u32 %v8939_v31, 16 }
  0x2a   : > { %v8800_v58 = vsel %vm8637_vm2, %v8076_v55, %v568_v56  ;;  %v650_v61 = vshrl.u32 %v8825_v59, 16  ;;  %v653_v62 = vshll.u32 %v8825_v59, 16  ;;  %v8080_v15 = vrot.slane %v8825_v59, 9  ;;  %1319 = vst.msk [vmem:[#allocation4 + $0x14] sm:$0xf] %vm374_vm6, %v8948_v36 }
  0x2b   : > { %512 = vrot.lane.b32.xlu1 %v8752_v37, %s8559_s16  ;;  %v8812_v60 = vsel %vm8637_vm2, %v8079_v17, %v580_v49  ;;  %v780_v39 = vrot.slane %v778_v33, 5  ;;  %v1356_v28 = vshll.u32 %v8930_v24, 16  ;;  %v1360_v47 = vshrl.u32 %v8930_v24, 16  ;;  %v8996_v49 = vld [vmem:[%s8920_s24 + $0x8] sm:$0x1] }
  0x2c   : > { %510 = vrot.lane.b32.xlu0 %v8758_v41, %s8559_s16  ;;  %v652_v63 = vrot.slane %v650_v61, 4  ;;  %v655_v5 = vrot.slane %v653_v62, 5  ;;  %v8891_v19 = vsel %vm8637_vm2, %v8080_v15, %v699_v16  ;;  %v1347_v55 = vshrl.u32 %v8979_v51, 16  ;;  %v9008_v62 = vld [vmem:[%s8920_s24 + $0x34] sm:$0xf] }
  0x2d   : > { %v8989_v38 = vrot.slane %v1356_v28, 5  ;;  %v1362_v54 = vrot.slane %v1360_v47, 4  ;;  %v1350_v56 = vshll.u32 %v8979_v51, 16  ;;  %1323 = vst.msk [vmem:[#allocation4 + $0x24] sm:$0xf] %vm374_vm6, %v9008_v62 }
  0x2e   : > { %v656_v1 = vor.u32 %v655_v5, %v652_v63  ;;  %v1366_v5 = vshll.u32 %v8996_v49, 16 }
  0x2f   : > { %588 = vrot.lane.b32.xlu2 %v8766_v42, %s8558_s15  ;;  %v1363_v63 = vor.u32 %v1362_v54, %v8989_v38 }
  0x30   : > { %v657_v8 = vrot.slane %v656_v1, 4  ;;  %v1352_v1 = vrot.slane %v1350_v56, 5  ;;  %v1368_v15 = vrot.slane %v1366_v5, 5 }
  0x33   : > { %586 = vrot.lane.b32.xlu1 %v8776_v48, %s8558_s15 }
  0x34   : > { %584 = vrot.lane.b32.xlu0 %v557_v53, %s8558_s15 }
  0x37   : > { %594 = vrot.lane.b32.xlu2 %v8786_v6, %s8558_s15 }
  0x3b   : > { %592 = vrot.lane.b32.xlu1 %v8796_v57, %s8558_s15 }
  0x3c   : > { %590 = vrot.lane.b32.xlu0 %v8800_v58, %s8558_s15 }
  0x3f   : > { %618 = vrot.lane.b32.xlu2 %v8646_v3, %s8560_s17 }
  0x43   : > { %616 = vrot.lane.b32.xlu1 %v8685_v34, %s8560_s17  ;;  %v659_v34 = vshll.u32 %v371_v7, 16  ;;  %v1349_v7 = vrot.slane %v1347_v55, 4 }
  0x44   : > { %596 = vrot.lane.b32.xlu0 %v8812_v60, %s8558_s15 }
  0x45   : > { %v661_v9 = vrot.slane %v659_v34, 5  ;;  %v1353_v16 = vor.u32 %v1352_v1, %v1349_v7  ;;  %v9096_v1 = vld [vmem:[%s8920_s24 + $0x58] sm:$0xf] }
  0x46   : > { %1329 = vst.msk [vmem:[#allocation4 + $0x3c] sm:$0xf] %vm374_vm6, %v9096_v1 }
  0x47   : > { %624 = vrot.lane.b32.xlu2 %v8692_v44, %s8560_s17  ;;  %v8867_v11 = vsel %vm8677_vm5, %v657_v8, %v661_v9 }
  0x4b   : > { %622 = vrot.lane.b32.xlu1 %v8658_v13, %s8560_s17 }
  0x4c   : > { %620 = vrot.lane.b32.xlu0 %v8668_v23, %s8560_s17 }
  0x4f   : > { %630 = vrot.lane.b32.xlu2 %v8825_v59, %s8560_s17 }
  0x53   : > { %628 = vrot.lane.b32.xlu1 %v8703_v50, %s8560_s17 }
  0x54   : > { %626 = vrot.lane.b32.xlu0 %v8719_v2, %s8560_s17 }
  0x57   : > { %667 = vrot.lane.b32.xlu2 %v8730_v10, %s8561_s18 }
  0x5b   : > { %665 = vrot.lane.b32.xlu1 %v8696_v45, %s8561_s18 }
  0x5c   : > { %663 = vrot.lane.b32.xlu0 %v8738_v22, %s8561_s18 }
  0x5f   : > { %673 = vrot.lane.b32.xlu2 %v8758_v41, %s8561_s18 }
  0x63   : > { %671 = vrot.lane.b32.xlu1 %v8746_v30, %s8561_s18 }
  0x64   : > { %669 = vrot.lane.b32.xlu0 %v8723_v4, %s8561_s18 }
  0x67   : > { %701 = vrot.lane.b32.xlu2 %v557_v53, %s8562_s19  ;;  %v8983_v53 = vld [vmem:[%s8920_s24 + $0x18] sm:$0xf] }
  0x68   : > { %v1398_v61 = vshll.u32 %v8983_v53, 16 }
  0x6a   : > { %v1400_v9 = vrot.slane %v1398_v61, 5 }
  0x6b   : > { %677 = vrot.lane.b32.xlu1 %v8867_v11, %s8561_s18 }
  0x6c   : > { %675 = vrot.lane.b32.xlu0 %v8752_v37, %s8561_s18 }
  0x6f   : > { %707 = vrot.lane.b32.xlu2 %v8800_v58, %s8562_s19  ;;  %v583_v12 = vpop.permute.xlu2 %582 }
  0x73   : > { %705 = vrot.lane.b32.xlu1 %v8766_v42, %s8562_s19 }
  0x74   : > { %703 = vrot.lane.b32.xlu0 %v8776_v48, %s8562_s19 }
  0x77   : > { %713 = vrot.lane.b32.xlu2 %v8812_v60, %s8562_s19 }
  0x79   : > { %v507_v14 = vpop.permute.xlu2 %506 }
  0x7a   : > { %527 = vst.msk [vmem:[#allocation4 + $0x20] sm:$0xf] %vm14262_vm7, %v507_v14  ;;  %v1364_v14 = vrot.slane %v1363_v63, 4 }
  0x7b   : > { %711 = vrot.lane.b32.xlu1 %v8786_v6, %s8562_s19 }
  0x7c   : > { %709 = vrot.lane.b32.xlu0 %v8796_v57, %s8562_s19 }
  0x7f   : > { %737 = vrot.lane.b32.xlu2 %v8668_v23, %s8563_s20  ;;  %v8905_v23 = vld [vmem:[%s8635_s14 + $0x48] sm:$0xf] }
  0x80   : > { %v769_v22 = vshrl.u32 %v8905_v23, 16 }
  0x81   : > { %v509_v18 = vpop.permute.xlu2 %508 }
  0x82   : > { %528 = vst.msk [vmem:[#allocation4 + $0x28] sm:$0xf] %vm14262_vm7, %v509_v18  ;;  %v771_v26 = vrot.slane %v769_v22, 4  ;;  %v9027_v18 = vld [vmem:[%s8920_s24 + $0x4c] sm:$0xf] }
  0x83   : > { %735 = vrot.lane.b32.xlu1 %v8646_v3, %s8563_s20  ;;  %1327 = vst.msk [vmem:[#allocation4 + $0x34] sm:$0xf] %vm374_vm6, %v9027_v18 }
  0x84   : > { %715 = vrot.lane.b32.xlu0 %v8891_v19, %s8562_s19 }
  0x87   : > { %743 = vrot.lane.b32.xlu2 %v8719_v2, %s8563_s20 }
  0x89   : > { %v589_v20 = vpop.permute.xlu2 %588 }
  0x8b   : > { %741 = vrot.lane.b32.xlu1 %v8692_v44, %s8563_s20 }
  0x8c   : > { %739 = vrot.lane.b32.xlu0 %v8658_v13, %s8563_s20 }
  0x8d   : > { %v503_v21 = vpop.permute.xlu1 %502 }
  0x8e   : > { %525 = vst.msk [vmem:[#allocation4 + $0x10] sm:$0xf] %vm14262_vm7, %v503_v21  ;;  %v499_v3 = vpop.permute.xlu0 %498 }
  0x8f   : > { %749 = vrot.lane.b32.xlu2 %v8905_v23, %s8563_s20  ;;  %523 = vst.msk [vmem:[#allocation4] sm:$0xf] %vm14262_vm7, %v499_v3  ;;  %v1404_v3 = vshll.u32 %v8948_v36, 16 }
  0x90   : > { %607 = vst.msk [vmem:[#allocation4] sm:$0xf] %vm606_vm8, %v583_v12 }
  0x91   : > { %v595_v2 = vpop.permute.xlu2 %594  ;;  %v9051_v33 = vrot.slane %v1404_v3, 5 }
  0x93   : > { %747 = vrot.lane.b32.xlu1 %v8825_v59, %s8563_s20  ;;  %v1395_v59 = vshrl.u32 %v8983_v53, 16 }
  0x94   : > { %745 = vrot.lane.b32.xlu0 %v8703_v50, %s8563_s20  ;;  %v772_v50 = vshll.u32 %v8905_v23, 16 }
  0x95   : > { %v505_v13 = vpop.permute.xlu1 %504  ;;  %v1397_v8 = vrot.slane %v1395_v59, 4  ;;  %v1408_v59 = vshrl.u32 %v8948_v36, 16 }
  0x96   : > { %526 = vst.msk [vmem:[#allocation4 + $0x18] sm:$0xf] %vm14262_vm7, %v505_v13  ;;  %v501_v44 = vpop.permute.xlu0 %500 }
  0x97   : > { %786 = vrot.lane.b32.xlu2 %v8723_v4, %s8564_s25  ;;  %524 = vst.msk [vmem:[#allocation4 + $0x8] sm:$0xf] %vm14262_vm7, %v501_v44  ;;  %v774_v4 = vrot.slane %v772_v50, 5  ;;  %v1401_v21 = vor.u32 %v1400_v9, %v1397_v8  ;;  %v9040_v44 = vld [vmem:[%s8920_s24 + $0x14] sm:$0x1] }
  0x98   : > { %610 = vst.msk [vmem:[#allocation4 + $0x18] sm:$0xf] %vm606_vm8, %v589_v20 }
  0x99   : > { %v619_v25 = vpop.permute.xlu2 %618 }
  0x9b   : > { %784 = vrot.lane.b32.xlu1 %v8730_v10, %s8564_s25  ;;  %v775_v10 = vor.u32 %v774_v4, %v771_v26  ;;  %v1369_v26 = vsel %vm8677_vm5, %v1364_v14, %v1368_v15  ;;  %v1354_v4 = vrot.slane %v1353_v16, 4  ;;  %v9111_v15 = vld [vmem:[%s8920_s24 + $0x20] sm:$0x1]  ;;  %v1410_v16 = vrot.slane %v1408_v59, 4 }
  0x9c   : > { %782 = vrot.lane.b32.xlu0 %v8696_v45, %s8564_s25  ;;  %v8955_v45 = vld [vmem:[%s8920_s24 + $0x10] sm:$0xf] }
  0x9d   : > { %v513_v27 = vpop.permute.xlu1 %512  ;;  %1317 = vst.msk [vmem:[#allocation4 + $0xc] sm:$0xf] %vm374_vm6, %v8955_v45  ;;  %v1384_v12 = vshrl.u32 %v8955_v45, 16  ;;  %v1359_v28 = vsel %vm8677_vm5, %v1354_v4, %v8989_v38  ;;  %v9085_v38 = vld [vmem:[%s8920_s24 + $0x64] sm:$0xf] }
  0x9e   : > { %530 = vst.msk [vmem:[#allocation4 + $0x38] sm:$0xf] %vm14262_vm7, %v513_v27  ;;  %v511_v32 = vpop.permute.xlu0 %510  ;;  %v8081_v27 = vrot.slane %v8905_v23, 9 }
  0x9f   : > { %792 = vrot.lane.b32.xlu2 %v8752_v37, %s8564_s25  ;;  %529 = vst.msk [vmem:[#allocation4 + $0x30] sm:$0xf] %vm14262_vm7, %v511_v32  ;;  %v776_v37 = vrot.slane %v775_v10, 4  ;;  %v1386_v50 = vrot.slane %v1384_v12, 4  ;;  %v818_v32 = vrot.slane %v8939_v31, 5  ;;  %v1402_v10 = vrot.slane %v1401_v21, 4 }
  0xa0   : > { %613 = vst.msk [vmem:[#allocation4 + $0x30] sm:$0xf] %vm606_vm8, %v595_v2 }
  0xa1   : > { %v625_v35 = vpop.permute.xlu2 %624  ;;  %v819_v55 = vsel %vm8637_vm2, %v8081_v27, %v818_v32  ;;  %1331 = vst.msk [vmem:[#allocation4 + $0x44] sm:$0xf] %vm374_vm6, %v9085_v38 }
  0xa3   : > { %790 = vrot.lane.b32.xlu1 %v8758_v41, %s8564_s25  ;;  %v8969_v41 = vld [vmem:[%s8920_s24 + $0x28] sm:$0xf] }
  0xa4   : > { %788 = vrot.lane.b32.xlu0 %v8746_v30, %s8564_s25  ;;  %v781_v30 = vsel %vm8677_vm5, %v776_v37, %v780_v39  ;;  %1321 = vst.msk [vmem:[#allocation4 + $0x1c] sm:$0xf] %vm374_vm6, %v8969_v41  ;;  %v1428_v13 = vshll.u32 %v8969_v41, 16  ;;  %v9054_v39 = vld [vmem:[%s8920_s24 + $0x24] sm:$0xf] }
  0xa5   : > { %v587_v40 = vpop.permute.xlu1 %586  ;;  %v1419_v47 = vshrl.u32 %v9054_v39, 16 }
  0xa6   : > { %609 = vst.msk [vmem:[#allocation4 + $0x10] sm:$0xf] %vm606_vm8, %v587_v40  ;;  %v585_v43 = vpop.permute.xlu0 %584  ;;  %v1390_v40 = vshll.u32 %v9040_v44, 16  ;;  %v9061_v23 = vrot.slane %v1428_v13, 5  ;;  %v1456_v13 = vshrl.u32 %v9008_v62, 16 }
  0xa7   : > { %820 = vrot.lane.b32.xlu2 %v8776_v48, %s8565_s26  ;;  %608 = vst.msk [vmem:[#allocation4 + $0x8] sm:$0xf] %vm606_vm8, %v585_v43  ;;  %v9059_v43 = vld [vmem:[%s8920_s24 + $0x2c] sm:$0x1]  ;;  %v1421_v9 = vrot.slane %v1419_v47, 4 }
  0xa8   : > { %642 = vst.msk [vmem:[#allocation4 + $0x8] sm:$0xf] %vm640_vm9, %v619_v25  ;;  %v1432_v25 = vshrl.u32 %v8969_v41, 16  ;;  %v1392_v5 = vrot.slane %v1390_v40, 5  ;;  %v1438_v7 = vshll.u32 %v9059_v43, 16 }
  0xa9   : > { %v631_v46 = vpop.permute.xlu2 %630 }
  0xaa   : > { %v1440_v27 = vrot.slane %v1438_v7, 5 }
  0xab   : > { %796 = vrot.lane.b32.xlu1 %v781_v30, %s8564_s25  ;;  %v1434_v30 = vrot.slane %v1432_v25, 4 }
  0xac   : > { %794 = vrot.lane.b32.xlu0 %v8867_v11, %s8564_s25  ;;  %v9018_v11 = vld [vmem:[%s8920_s24 + $0xc] sm:$0xf] }
  0xad   : > { %v593_v48 = vpop.permute.xlu1 %592  ;;  %v1374_v2 = vshll.u32 %v9018_v11, 16  ;;  %v1435_v8 = vor.u32 %v1434_v30, %v9061_v23 }
  0xae   : > { %612 = vst.msk [vmem:[#allocation4 + $0x28] sm:$0xf] %vm606_vm8, %v593_v48  ;;  %v591_v52 = vpop.permute.xlu0 %590  ;;  %v1422_v48 = vshll.u32 %v9054_v39, 16 }
  0xaf   : > { %826 = vrot.lane.b32.xlu2 %v8796_v57, %s8565_s26  ;;  %611 = vst.msk [vmem:[#allocation4 + $0x20] sm:$0xf] %vm606_vm8, %v591_v52  ;;  %v9001_v57 = vld [vmem:[%s8920_s24 + $0x40] sm:$0xf]  ;;  %v1376_v37 = vrot.slane %v1374_v2, 5  ;;  %v1452_v2 = vshll.u32 %v9008_v62, 16 }
  0xb0   : > { %645 = vst.msk [vmem:[#allocation4 + $0x20] sm:$0xf] %vm640_vm9, %v625_v35  ;;  %v9077_v52 = vld [vmem:[%s8920_s24 + $0x60] sm:$0xf]  ;;  %v1436_v4 = vrot.slane %v1435_v8, 4  ;;  %v1476_v40 = vshll.u32 %v9001_v57, 16 }
  0xb1   : > { %v8993_v17 = vpop.permute.xlu2 %667  ;;  %1325 = vst.msk [vmem:[#allocation4 + $0x2c] sm:$0xf] %vm374_vm6, %v9001_v57  ;;  %v9145_v30 = vrot.slane %v1452_v2, 5 }
  0xb2   : > { %1330 = vst.msk [vmem:[#allocation4 + $0x40] sm:$0xf] %vm374_vm6, %v9077_v52 }
  0xb3   : > { %824 = vrot.lane.b32.xlu1 %v8800_v58, %s8565_s26 }
  0xb4   : > { %822 = vrot.lane.b32.xlu0 %v8766_v42, %s8565_s26  ;;  %v1380_v42 = vshll.u32 %v8955_v45, 16 }
  0xb5   : > { %v617_v34 = vpop.permute.xlu1 %616 }
  0xb6   : > { %641 = vst.msk [vmem:[#allocation4] sm:$0xf] %vm640_vm9, %v617_v34  ;;  %v597_v58 = vpop.permute.xlu0 %596  ;;  %v9042_v22 = vrot.slane %v1380_v42, 5  ;;  %v9102_v34 = vsel %vm8677_vm5, %v1402_v10, %v9051_v33  ;;  %v9106_v42 = vld [vmem:[%s8920_s24 + $0x30] sm:$0xf] }
  0xb7   : > { %832 = vrot.lane.b32.xlu2 %v8891_v19, %s8565_s26  ;;  %614 = vst.msk [vmem:[#allocation4 + $0x38] sm:$0xf] %vm606_vm8, %v597_v58  ;;  %v1371_v19 = vshrl.u32 %v9018_v11, 16  ;;  %v1424_v58 = vrot.slane %v1422_v48, 5  ;;  %v1446_v25 = vshll.u32 %v9106_v42, 16  ;;  %v1504_v48 = vshrl.u32 %v9027_v18, 16 }
  0xb8   : > { %648 = vst.msk [vmem:[#allocation4 + $0x38] sm:$0xf] %vm640_vm9, %v631_v46  ;;  %v1387_v31 = vor.u32 %v1386_v50, %v9042_v22  ;;  %v9067_v46 = vld [vmem:[%s8920_s24 + $0x3c] sm:$0xf]  ;;  %v1443_v50 = vshrl.u32 %v9106_v42, 16 }
  0xb9   : > { %v9029_v20 = vpop.permute.xlu2 %673  ;;  %v1373_v35 = vrot.slane %v1371_v19, 4  ;;  %v1470_v61 = vshll.u32 %v9067_v46, 16  ;;  %14513 = vst [vmem:[#allocation6_spill] sm:$0xff] %v9102_v34  ;;  %v1425_v32 = vor.u32 %v1424_v58, %v1421_v9  ;;  %v1448_v47 = vrot.slane %v1446_v25, 5 }
  0xba   : > { %v1388_v63 = vrot.slane %v1387_v31, 4  ;;  %v9143_v31 = vld [vmem:[%s8920_s24 + $0x38] sm:$0x1] }
  0xbb   : > { %830 = vrot.lane.b32.xlu1 %v8812_v60, %s8565_s26  ;;  %v1377_v56 = vor.u32 %v1376_v37, %v1373_v35  ;;  %v1472_v19 = vrot.slane %v1470_v61, 5  ;;  %v1411_v37 = vor.u32 %v1410_v16, %v9051_v33  ;;  %v1500_v33 = vshll.u32 %v9027_v18, 16 }
  0xbc   : > { %828 = vrot.lane.b32.xlu0 %v8786_v6, %s8565_s26  ;;  %v1426_v59 = vrot.slane %v1425_v32, 4  ;;  %v1462_v58 = vshll.u32 %v9143_v31, 16  ;;  %v9199_v32 = vld [vmem:[%s8920_s24 + $0x88] sm:$0xf] }
  0xbd   : > { %v623_v60 = vpop.permute.xlu1 %622  ;;  %v1378_v14 = vrot.slane %v1377_v56, 4  ;;  %v9158_v56 = vsel %vm8677_vm5, %v1436_v4, %v1440_v27  ;;  %v1412_v61 = vrot.slane %v1411_v37, 4  ;;  %14522 = vst [vmem:[#allocation15_spill] sm:$0xff] %v9199_v32 }
  0xbe   : > { %644 = vst.msk [vmem:[#allocation4 + $0x18] sm:$0xf] %vm640_vm9, %v623_v60  ;;  %v621_v6 = vpop.permute.xlu0 %620  ;;  %v9128_v60 = vld [vmem:[%s8920_s24 + $0x70] sm:$0xf]  ;;  %v1464_v37 = vrot.slane %v1462_v58, 5 }
  0xbf   : > { %1732 = vrot.lane.b32.xlu2 %v1369_v26, %s8559_s16  ;;  %643 = vst.msk [vmem:[#allocation4 + $0x10] sm:$0xf] %vm640_vm9, %v621_v6  ;;  %v9123_v26 = vsel %vm8677_vm5, %v1388_v63, %v1392_v5  ;;  %v9135_v35 = vsel %vm8677_vm5, %v1378_v14, %v9042_v22  ;;  %v1414_v6 = vshll.u32 %v9111_v15, 16  ;;  %v1445_v22 = vrot.slane %v1443_v50, 4  ;;  %v9163_v5 = vld [vmem:[%s8920_s24 + $0x48] sm:$0xf] }
  0xc0   : > { %690 = vst.msk [vmem:[#allocation4 + $0x10] sm:$0xf] %vm687_vm10, %v8993_v17  ;;  %v1467_v17 = vshrl.u32 %v9067_v46, 16  ;;  %v9174_v14 = vrot.slane %v1476_v40, 5  ;;  %v1491_v2 = vshrl.u32 %v9163_v5, 16  ;;  %v1539_v40 = vshrl.u32 %v9077_v52, 16 }
  0xc1   : > { %v9079_v54 = vpop.permute.xlu2 %701  ;;  %14514 = vst [vmem:[#allocation7_spill] sm:$0xff] %v9123_v26  ;;  %v1416_v63 = vrot.slane %v1414_v6, 5  ;;  %v1449_v16 = vor.u32 %v1448_v47, %v1445_v22  ;;  %v9188_v50 = vld [vmem:[%s8920_s24 + $0x84] sm:$0xf]  ;;  %v9211_v22 = vld [vmem:[%s8920_s24 + $0x7c] sm:$0xf] }
  0xc2   : > { %v1469_v3 = vrot.slane %v1467_v17, 4  ;;  %14515 = vst [vmem:[#allocation8_spill] sm:$0xff] %v9128_v60 }
  0xc3   : > { %1730 = vrot.lane.b32.xlu1 %v1359_v28, %s8559_s16  ;;  %14516 = vst [vmem:[#allocation9_spill] sm:$0xff] %v9135_v35  ;;  %v1458_v28 = vrot.slane %v1456_v13, 4  ;;  %v1494_v13 = vshll.u32 %v9163_v5, 16  ;;  %v9194_v4 = vsel %vm8677_vm5, %v1412_v61, %v1416_v63  ;;  %v1450_v6 = vrot.slane %v1449_v16, 4 }
  0xc4   : > { %834 = vrot.lane.b32.xlu0 %v819_v55, %s8565_s26  ;;  %1333 = vst.msk [vmem:[#allocation4 + $0x4c] sm:$0xf] %vm374_vm6, %v9128_v60  ;;  %v9152_v55 = vld [vmem:[%s8920_s24 + $0x6c] sm:$0xf] }
  0xc5   : > { %v629_v12 = vpop.permute.xlu1 %628  ;;  %14517 = vst [vmem:[#allocation10_spill] sm:$0xff] %v9152_v55  ;;  %v1459_v9 = vor.u32 %v1458_v28, %v9145_v30  ;;  %v1542_v28 = vshll.u32 %v9077_v52, 16 }
  0xc6   : > { %647 = vst.msk [vmem:[#allocation4 + $0x30] sm:$0xf] %vm640_vm9, %v629_v12  ;;  %v627_v21 = vpop.permute.xlu0 %626  ;;  %v9169_v12 = vld [vmem:[%s8920_s24 + $0x50] sm:$0x1] }
  0xc7   : > { %1738 = vrot.lane.b32.xlu2 %v9102_v34, %s8559_s16  ;;  %646 = vst.msk [vmem:[#allocation4 + $0x28] sm:$0xf] %vm640_vm9, %v627_v21  ;;  %v9176_v21 = vrot.slane %v1500_v33, 5  ;;  %v1510_v27 = vshll.u32 %v9169_v12, 16  ;;  %v1493_v33 = vrot.slane %v1491_v2, 4  ;;  %v1544_v2 = vrot.slane %v1542_v28, 5 }
  0xc8   : > { %693 = vst.msk [vmem:[#allocation4 + $0x28] sm:$0xf] %vm687_vm10, %v9029_v20  ;;  %v1473_v20 = vor.u32 %v1472_v19, %v1469_v3  ;;  %v1506_v3 = vrot.slane %v1504_v48, 4  ;;  %v9181_v19 = vsel %vm8677_vm5, %v1426_v59, %v9061_v23  ;;  %v1480_v23 = vshrl.u32 %v9001_v57, 16  ;;  %v9223_v59 = vld [vmem:[%s8920_s24 + $0x78] sm:$0xf] }
  0xc9   : > { %v9130_v10 = vpop.permute.xlu2 %707  ;;  %14518 = vst [vmem:[#allocation11_spill] sm:$0xff] %v9158_v56  ;;  %v1496_v48 = vrot.slane %v1494_v13, 5  ;;  %v1512_v61 = vrot.slane %v1510_v27, 5  ;;  %v9244_v13 = vsel %vm8677_vm5, %v1450_v6, %v9145_v30  ;;  %v1548_v28 = vshll.u32 %v9085_v38, 16 }
  0xca   : > { %1332 = vst.msk [vmem:[#allocation4 + $0x48] sm:$0xf] %vm374_vm6, %v9152_v55  ;;  %v1474_v8 = vrot.slane %v1473_v20, 4  ;;  %v1507_v20 = vor.u32 %v1506_v3, %v9176_v21  ;;  %v1482_v63 = vrot.slane %v1480_v23, 4  ;;  %v1541_v3 = vrot.slane %v1539_v40, 4 }
  0xcb   : > { %1736 = vrot.lane.b32.xlu1 %v9123_v26, %s8559_s16  ;;  %14519 = vst [vmem:[#allocation12_spill] sm:$0xff] %v9181_v19  ;;  %v1497_v27 = vor.u32 %v1496_v48, %v1493_v33  ;;  %v1524_v23 = vshll.u32 %v9096_v1, 16  ;;  %v1576_v40 = vshrl.u32 %v9128_v60, 16  ;;  %v9271_v33 = vld [vmem:[%s8920_s24 + $0x90] sm:$0xf] }
  0xcc   : > { %1734 = vrot.lane.b32.xlu0 %v9135_v35, %s8559_s16  ;;  %14520 = vst [vmem:[#allocation13_spill] sm:$0xff] %v9188_v50  ;;  %v9218_v47 = vsel %vm8677_vm5, %v1474_v8, %v9174_v14  ;;  %v9232_v8 = vld [vmem:[%s8920_s24 + $0x54] sm:$0xf]  ;;  %v1508_v16 = vrot.slane %v1507_v20, 4 }
  0xcd   : > { %v666_v17 = vpop.permute.xlu1 %665  ;;  %14521 = vst [vmem:[#allocation14_spill] sm:$0xff] %v9194_v4  ;;  %v1515_v30 = vshrl.u32 %v9232_v8, 16  ;;  %v1518_v6 = vshll.u32 %v9232_v8, 16  ;;  %v1498_v48 = vrot.slane %v1497_v27, 4 }
  0xce   : > { %689 = vst.msk [vmem:[#allocation4 + $0x8] sm:$0xf] %vm687_vm10, %v666_v17  ;;  %v664_v7 = vpop.permute.xlu0 %663 }
  0xcf   : > { %1744 = vrot.lane.b32.xlu2 %v9158_v56, %s8559_s16  ;;  %688 = vst.msk [vmem:[#allocation4] sm:$0xf] %vm687_vm10, %v664_v7 }
  0xd0   : > { %726 = vst.msk [vmem:[#allocation4] sm:$0xf] %vm725_vm11, %v9079_v54  ;;  %v1460_v54 = vrot.slane %v1459_v9, 4  ;;  %v9229_v9 = vld [vmem:[%s8920_s24 + $0x44] sm:$0x1] }
  0xd1   : > { %v9190_v25 = vpop.permute.xlu2 %713  ;;  %1336 = vst.msk [vmem:[#allocation4 + $0x58] sm:$0xf] %vm374_vm6, %v9188_v50  ;;  %v1486_v20 = vshll.u32 %v9229_v9, 16 }
  0xd2   : > { %1337 = vst.msk [vmem:[#allocation4 + $0x5c] sm:$0xf] %vm374_vm6, %v9199_v32  ;;  %v9239_v58 = vsel %vm8677_vm5, %v1460_v54, %v1464_v37  ;;  %v1483_v37 = vor.u32 %v1482_v63, %v9174_v14  ;;  %v9267_v14 = vsel %vm8677_vm5, %v1508_v16, %v1512_v61  ;;  %v1545_v63 = vor.u32 %v1544_v2, %v1541_v3  ;;  %v9280_v16 = vld [vmem:[%s8920_s24 + $0x5c] sm:$0x1] }
  0xd3   : > { %1742 = vrot.lane.b32.xlu1 %v9181_v19, %s8559_s16  ;;  %14523 = vst [vmem:[#allocation16_spill] sm:$0xff] %v9211_v22  ;;  %v1488_v61 = vrot.slane %v1486_v20, 5  ;;  %v1520_v19 = vrot.slane %v1518_v6, 5  ;;  %v1578_v3 = vrot.slane %v1576_v40, 4  ;;  %v1563_v2 = vshrl.u32 %v9152_v55, 16 }
  0xd4   : > { %1740 = vrot.lane.b32.xlu0 %v9194_v4, %s8559_s16  ;;  %14524 = vst [vmem:[#allocation17_spill] sm:$0xff] %v9218_v47  ;;  %v1484_v34 = vrot.slane %v1483_v37, 4  ;;  %v1517_v4 = vrot.slane %v1515_v30, 4  ;;  %v9293_v37 = vld [vmem:[%s8920_s24 + $0x74] sm:$0x1]  ;;  %v1546_v20 = vrot.slane %v1545_v63, 4 }
  0xd5   : > { %1335 = vst.msk [vmem:[#allocation4 + $0x54] sm:$0xf] %vm374_vm6, %v9211_v22  ;;  %v672_v17 = vpop.permute.xlu1 %671  ;;  %v1534_v6 = vshll.u32 %v9280_v16, 16  ;;  %v1565_v63 = vrot.slane %v1563_v2, 4 }
  0xd6   : > { %14525 = vst [vmem:[#allocation18_spill] sm:$0xff] %v9223_v59  ;;  %v670_v7 = vpop.permute.xlu0 %669  ;;  %v9311_v40 = vsel %vm8677_vm5, %v1484_v34, %v1488_v61  ;;  %v1611_v34 = vshrl.u32 %v9188_v50, 16 }
  0xd7   : > { %1334 = vst.msk [vmem:[#allocation4 + $0x50] sm:$0xf] %vm374_vm6, %v9223_v59  ;;  %1750 = vrot.lane.b32.xlu2 %v9218_v47, %s8559_s16  ;;  %v9275_v47 = vrot.slane %v1524_v23, 5  ;;  %v1566_v23 = vshll.u32 %v9152_v55, 16  ;;  %v1536_v2 = vrot.slane %v1534_v6, 5  ;;  %v1596_v55 = vshll.u32 %v9211_v22, 16 }
  0xd8   : > { %692 = vst.msk [vmem:[#allocation4 + $0x20] sm:$0xf] %vm687_vm10, %v672_v17  ;;  %v1528_v17 = vshrl.u32 %v9096_v1, 16  ;;  %v9346_v6 = vld [vmem:[%s8920_s24 + $0x68] sm:$0x1] }
  0xd9   : > { %691 = vst.msk [vmem:[#allocation4 + $0x18] sm:$0xf] %vm687_vm10, %v670_v7  ;;  %v9251_v7 = vld [vmem:[%s8920_s24 + $0x94] sm:$0xf]  ;;  %v9253_v54 = vpop.permute.xlu2 %737 }
  0xda   : > { %14526 = vst [vmem:[#allocation19_spill] sm:$0xff] %v9239_v58  ;;  %v1530_v56 = vrot.slane %v1528_v17, 4  ;;  %v9290_v17 = vrot.slane %v1548_v28, 5  ;;  %v1521_v28 = vor.u32 %v1520_v19, %v1517_v4  ;;  %v1614_v19 = vshll.u32 %v9188_v50, 16  ;;  %v9328_v4 = vld [vmem:[%s8920_s24 + $0xa0] sm:$0xf] }
  0xdb   : > { %14527 = vst [vmem:[#allocation20_spill] sm:$0xff] %v9244_v13  ;;  %1748 = vrot.lane.b32.xlu1 %v9239_v58, %s8559_s16 }
  0xdc   : > { %729 = vst.msk [vmem:[#allocation4 + $0x18] sm:$0xf] %vm725_vm11, %v9130_v10  ;;  %v1572_v10 = vshll.u32 %v9128_v60, 16  ;;  %1746 = vrot.lane.b32.xlu0 %v9244_v13, %s8559_s16  ;;  %v1531_v30 = vor.u32 %v1530_v56, %v9275_v47  ;;  %v9335_v61 = vsel %vm8677_vm5, %v1546_v20, %v9290_v17  ;;  %v1522_v35 = vrot.slane %v1521_v28, 4 }
  0xdd   : > { %14528 = vst [vmem:[#allocation21_spill] sm:$0xff] %v9251_v7  ;;  %v678_v58 = vpop.permute.xlu1 %677  ;;  %v1613_v28 = vrot.slane %v1611_v34, 4 }
  0xde   : > { %1339 = vst.msk [vmem:[#allocation4 + $0x64] sm:$0xf] %vm374_vm6, %v9251_v7  ;;  %v676_v13 = vpop.permute.xlu0 %675  ;;  %v9283_v27 = vrot.slane %v1572_v10, 5  ;;  %v9305_v10 = vld [vmem:[%s8920_s24 + $0xa8] sm:$0xf] }
  0xdf   : > { %14529 = vst [vmem:[#allocation22_spill] sm:$0xff] %v9267_v14  ;;  %1756 = vrot.lane.b32.xlu2 %v9267_v14, %s8559_s16  ;;  %v1568_v14 = vrot.slane %v1566_v23, 5  ;;  %v9340_v23 = vld [vmem:[%s8920_s24 + $0x9c] sm:$0xf] }
  0xe0   : > { %14530 = vst [vmem:[#allocation23_spill] sm:$0xff] %v9271_v33  ;;  %v1579_v56 = vor.u32 %v1578_v3, %v9283_v27  ;;  %v1532_v3 = vrot.slane %v1531_v30, 4 }
  0xe1   : > { %1338 = vst.msk [vmem:[#allocation4 + $0x60] sm:$0xf] %vm374_vm6, %v9271_v33  ;;  %v1569_v30 = vor.u32 %v1568_v14, %v1565_v63  ;;  %v1587_v14 = vshrl.u32 %v9223_v59, 16  ;;  %v9369_v63 = vsel %vm8677_vm5, %v1522_v35, %v9275_v47  ;;  %v9383_v35 = vld [vmem:[%s8920_s24 + $0x80] sm:$0x1]  ;;  %v1598_v47 = vrot.slane %v1596_v55, 5 }
  0xe2   : > { %695 = vst.msk [vmem:[#allocation4 + $0x38] sm:$0xf] %vm687_vm10, %v678_v58  ;;  %v9298_v58 = vsel %vm8677_vm5, %v1498_v48, %v9176_v21  ;;  %v1552_v21 = vshrl.u32 %v9085_v38, 16  ;;  %v9315_v48 = vld [vmem:[%s8920_s24 + $0xac] sm:$0xf]  ;;  %v1580_v20 = vrot.slane %v1579_v56, 4 }
  0xe3   : > { %694 = vst.msk [vmem:[#allocation4 + $0x30] sm:$0xf] %vm687_vm10, %v676_v13  ;;  %v9307_v13 = vpop.permute.xlu2 %743  ;;  %1754 = vrot.lane.b32.xlu1 %v9298_v58, %s8559_s16  ;;  %v1590_v56 = vshll.u32 %v9223_v59, 16 }
  0xe4   : > { %14531 = vst [vmem:[#allocation24_spill] sm:$0xff] %v9293_v37  ;;  %1752 = vrot.lane.b32.xlu0 %v9311_v40, %s8559_s16  ;;  %v1554_v26 = vrot.slane %v1552_v21, 4  ;;  %v1616_v21 = vrot.slane %v1614_v19, 5  ;;  %v1558_v19 = vshll.u32 %v9346_v6, 16 }
  0xe5   : > { %14532 = vst [vmem:[#allocation25_spill] sm:$0xff] %v9298_v58  ;;  %v706_v58 = vpop.permute.xlu1 %705  ;;  %v1592_v60 = vrot.slane %v1590_v56, 5  ;;  %v1606_v56 = vshll.u32 %v9383_v35, 16 }
  0xe6   : > { %732 = vst.msk [vmem:[#allocation4 + $0x30] sm:$0xf] %vm725_vm11, %v9190_v25  ;;  %v1582_v25 = vshll.u32 %v9293_v37, 16  ;;  %v1600_v37 = vshrl.u32 %v9211_v22, 16  ;;  %v1555_v34 = vor.u32 %v1554_v26, %v9290_v17  ;;  %v9386_v17 = vld [vmem:[%s8920_s24 + $0xb4] sm:$0xf] }
  0xe7   : > { %14533 = vst [vmem:[#allocation26_spill] sm:$0xff] %v9305_v10  ;;  %1762 = vrot.lane.b32.xlu2 %v9335_v61, %s8559_s16  ;;  %v1644_v22 = vshll.u32 %v9251_v7, 16 }
  0xe8   : > { %14534 = vst [vmem:[#allocation27_spill] sm:$0xff] %v9311_v40  ;;  %v704_v40 = vpop.permute.xlu0 %703  ;;  %v1584_v50 = vrot.slane %v1582_v25, 5  ;;  %v1602_v26 = vrot.slane %v1600_v37, 4 }
  0xe9   : > { %14535 = vst [vmem:[#allocation28_spill] sm:$0xff] %v9315_v48 }
  0xea   : > { %1342 = vst.msk [vmem:[#allocation4 + $0x70] sm:$0xf] %vm374_vm6, %v9305_v10 }
  0xeb   : > { %1343 = vst.msk [vmem:[#allocation4 + $0x74] sm:$0xf] %vm374_vm6, %v9315_v48  ;;  %v9364_v25 = vpop.permute.xlu2 %749 }
  0xec   : > { %14536 = vst [vmem:[#allocation29_spill] sm:$0xff] %v9328_v4  ;;  %1758 = vrot.lane.b32.xlu0 %v9369_v63, %s8559_s16 }
  0xed   : > { %14537 = vst [vmem:[#allocation30_spill] sm:$0xff] %v9335_v61  ;;  %v1617_v61 = vor.u32 %v1616_v21, %v1613_v28  ;;  %v1560_v28 = vrot.slane %v1558_v19, 5  ;;  %v1638_v19 = vshll.u32 %v9271_v33, 16 }
  0xee   : > { %1341 = vst.msk [vmem:[#allocation4 + $0x6c] sm:$0xf] %vm374_vm6, %v9328_v4 }
  0xef   : > { %14538 = vst [vmem:[#allocation31_spill] sm:$0xff] %v9340_v23 }
  0xf0   : > { %1340 = vst.msk [vmem:[#allocation4 + $0x68] sm:$0xf] %vm374_vm6, %v9340_v23  ;;  %v710_v55 = vpop.permute.xlu0 %709 }
  0xf1   : > { %728 = vst.msk [vmem:[#allocation4 + $0x10] sm:$0xf] %vm725_vm11, %v706_v58  ;;  %v9355_v58 = vsel %vm8677_vm5, %v1532_v3, %v1536_v2  ;;  %v1620_v3 = vshll.u32 %v9199_v32, 16  ;;  %v9380_v2 = vsel %vm8677_vm5, %v1580_v20, %v1584_v50  ;;  %v712_v50 = vpop.permute.xlu1 %711  ;;  %v1556_v20 = vrot.slane %v1555_v34, 4 }
  0xf2   : > { %727 = vst.msk [vmem:[#allocation4 + $0x8] sm:$0xf] %vm725_vm11, %v704_v40  ;;  %v9362_v40 = vld [vmem:[%s8920_s24 + $0xb8] sm:$0xf]  ;;  %1760 = vrot.lane.b32.xlu1 %v9355_v58, %s8559_s16  ;;  %1768 = vrot.lane.b32.xlu2 %v9380_v2, %s8559_s16  ;;  %v1635_v34 = vshrl.u32 %v9271_v33, 16  ;;  %v1683_v33 = vshrl.u32 %v9305_v10, 16 }
  0xf3   : > { %14539 = vst [vmem:[#allocation32_spill] sm:$0xff] %v9355_v58  ;;  %v1648_v58 = vshrl.u32 %v9251_v7, 16  ;;  %v1622_v21 = vrot.slane %v1620_v3, 5  ;;  %v9410_v3 = vpop.permute.xlu2 %786 }
  0xf4   : > { %761 = vst.msk [vmem:[#allocation4 + $0x8] sm:$0xf] %vm759_vm12, %v9253_v54  ;;  %v1570_v54 = vrot.slane %v1569_v30, 4  ;;  %v1589_v30 = vrot.slane %v1587_v14, 4  ;;  %v1618_v14 = vrot.slane %v1617_v61, 4 }
  0xf5   : > { %14540 = vst [vmem:[#allocation33_spill] sm:$0xff] %v9362_v40  ;;  %v9417_v61 = vld [vmem:[%s8920_s24 + $0x98] sm:$0x1] }
  0xf6   : > { %14541 = vst [vmem:[#allocation34_spill] sm:$0xff] %v9369_v63  ;;  %v9398_v37 = vsel %vm8677_vm5, %v1570_v54, %v9283_v27  ;;  %v1593_v63 = vor.u32 %v1592_v60, %v1589_v30  ;;  %v9408_v27 = vrot.slane %v1644_v22, 5  ;;  %v1650_v54 = vrot.slane %v1648_v58, 4 }
  0xf7   : > { %1345 = vst.msk [vmem:[#allocation4 + $0x7c] sm:$0xf] %vm374_vm6, %v9362_v40  ;;  %v9426_v60 = vsel %vm8677_vm5, %v1618_v14, %v1622_v21  ;;  %v1608_v22 = vrot.slane %v1606_v56, 5  ;;  %v1637_v58 = vrot.slane %v1635_v34, 4  ;;  %v1654_v7 = vshll.u32 %v9417_v61, 16 }
  0xf8   : > { %14542 = vst [vmem:[#allocation35_spill] sm:$0xff] %v9380_v2  ;;  %v1624_v2 = vshrl.u32 %v9199_v32, 16  ;;  %v9434_v32 = vld [vmem:[%s8920_s24 + $0x8c] sm:$0x1]  ;;  %v1685_v14 = vrot.slane %v1683_v33, 4 }
  0xf9   : > { %14543 = vst [vmem:[#allocation36_spill] sm:$0xff] %v9383_v35 }
  0xfa   : > { %14544 = vst [vmem:[#allocation37_spill] sm:$0xff] %v9386_v17  ;;  %1766 = vrot.lane.b32.xlu1 %v9398_v37, %s8559_s16  ;;  %v1626_v35 = vrot.slane %v1624_v2, 4  ;;  %1774 = vrot.lane.b32.xlu2 %v9426_v60, %s8559_s16 }
  0xfb   : > { %1344 = vst.msk [vmem:[#allocation4 + $0x78] sm:$0xf] %vm374_vm6, %v9386_v17 }
  0xfc   : > { %731 = vst.msk [vmem:[#allocation4 + $0x28] sm:$0xf] %vm725_vm11, %v712_v50  ;;  %v1603_v50 = vor.u32 %v1602_v26, %v1598_v47  ;;  %v1640_v26 = vrot.slane %v1638_v19, 5  ;;  %v1672_v19 = vshrl.u32 %v9328_v4, 16 }
  0xfd   : > { %14545 = vst [vmem:[#allocation38_spill] sm:$0xff] %v9398_v37  ;;  %v716_v37 = vpop.permute.xlu0 %715 }
  0xfe   : > { %730 = vst.msk [vmem:[#allocation4 + $0x20] sm:$0xf] %vm725_vm11, %v710_v55  ;;  %v9414_v55 = vsel %vm8677_vm5, %v1556_v20, %v1560_v28  ;;  %v1604_v30 = vrot.slane %v1603_v50, 4  ;;  %v1594_v20 = vrot.slane %v1593_v63, 4  ;;  %v1651_v28 = vor.u32 %v1650_v54, %v9408_v27 }
  0xff   : > { %764 = vst.msk [vmem:[#allocation4 + $0x20] sm:$0xf] %vm759_vm12, %v9307_v13  ;;  %v1686_v13 = vshll.u32 %v9305_v10, 16  ;;  %1764 = vrot.lane.b32.xlu0 %v9414_v55, %s8559_s16  ;;  %v736_v10 = vpop.permute.xlu1 %735  ;;  %v1641_v34 = vor.u32 %v1640_v26, %v1637_v58  ;;  %v1668_v63 = vshll.u32 %v9328_v4, 16  ;;  %v1656_v50 = vrot.slane %v1654_v7, 5 }
 0x100   : > { %14546 = vst [vmem:[#allocation39_spill] sm:$0xff] %v9414_v55  ;;  %v9449_v33 = vsel %vm8677_vm5, %v1594_v20, %v1598_v47  ;;  %v1652_v2 = vrot.slane %v1651_v28, 4  ;;  %v1627_v54 = vor.u32 %v1626_v35, %v1622_v21  ;;  %v1659_v58 = vshrl.u32 %v9340_v23, 16  ;;  %v9466_v35 = vld [vmem:[%s8920_s24 + $0xa4] sm:$0x1] }
 0x101   : > { %14547 = vst [vmem:[#allocation40_spill] sm:$0xff] %v9426_v60  ;;  %v1688_v56 = vrot.slane %v1686_v13, 5  ;;  %v1630_v13 = vshll.u32 %v9434_v32, 16  ;;  %v1642_v47 = vrot.slane %v1641_v34, 4  ;;  %v1674_v20 = vrot.slane %v1672_v19, 4 }
 0x102   : > { %760 = vst.msk [vmem:[#allocation4] sm:$0xf] %vm759_vm12, %v736_v10  ;;  %v9445_v10 = vsel %vm8677_vm5, %v1604_v30, %v1608_v22  ;;  %v1692_v22 = vshll.u32 %v9315_v48, 16  ;;  %v1670_v30 = vrot.slane %v1668_v63, 5  ;;  %v9463_v7 = vsel %vm8677_vm5, %v1652_v2, %v1656_v50 }
 0x103   : > { %733 = vst.msk [vmem:[#allocation4 + $0x38] sm:$0xf] %vm725_vm11, %v716_v37  ;;  %v9451_v37 = vpop.permute.xlu2 %792  ;;  %v1689_v26 = vor.u32 %v1688_v56, %v1685_v14  ;;  %1772 = vrot.lane.b32.xlu1 %v9445_v10, %s8559_s16  ;;  %v1716_v21 = vshll.u32 %v9362_v40, 16  ;;  %v1720_v28 = vshrl.u32 %v9362_v40, 16  ;;  %v1628_v56 = vrot.slane %v1627_v54, 4  ;;  %1780 = vrot.lane.b32.xlu2 %v9463_v7, %s8559_s16 }
 0x104   : > { %767 = vst.msk [vmem:[#allocation4 + $0x38] sm:$0xf] %vm759_vm12, %v9364_v25  ;;  %v1662_v25 = vshll.u32 %v9340_v23, 16  ;;  %v1632_v60 = vrot.slane %v1630_v13, 5  ;;  %v1661_v34 = vrot.slane %v1659_v58, 4  ;;  %v9477_v2 = vsel %vm8677_vm5, %v1642_v47, %v9408_v27 }
 0x105   : > { %14548 = vst [vmem:[#allocation41_spill] sm:$0xff] %v9445_v10  ;;  %v740_v19 = vpop.permute.xlu0 %739  ;;  %v1694_v10 = vrot.slane %v1692_v22, 5  ;;  %v1675_v50 = vor.u32 %v1674_v20, %v1670_v30  ;;  %v1678_v54 = vshll.u32 %v9466_v35, 16  ;;  %v9481_v13 = vld [vmem:[%s8920_s24 + $0xbc] sm:$0x1]  ;;  %v1718_v58 = vrot.slane %v1716_v21, 5 }
 0x106   : > { %14549 = vst [vmem:[#allocation42_spill] sm:$0xff] %v9449_v33  ;;  %v1664_v63 = vrot.slane %v1662_v25, 5  ;;  %v1722_v25 = vrot.slane %v1720_v28, 4  ;;  %v1710_v22 = vshll.u32 %v9386_v17, 16  ;;  %v9489_v27 = vsel %vm8677_vm5, %v1628_v56, %v1632_v60 }
 0x107   : > { %1770 = vrot.lane.b32.xlu0 %v9449_v33, %s8559_s16  ;;  %14550 = vst [vmem:[#allocation43_spill] sm:$0xff] %v9463_v7  ;;  %v742_v14 = vpop.permute.xlu1 %741  ;;  %v1690_v33 = vrot.slane %v1689_v26, 4  ;;  %v1707_v26 = vshrl.u32 %v9386_v17, 16  ;;  %v1696_v20 = vshrl.u32 %v9315_v48, 16  ;;  %v1676_v21 = vrot.slane %v1675_v50, 4 }
 0x108   : > { %763 = vst.msk [vmem:[#allocation4 + $0x18] sm:$0xf] %vm759_vm12, %v742_v14  ;;  %v1665_v47 = vor.u32 %v1664_v63, %v1661_v34  ;;  %v1680_v28 = vrot.slane %v1678_v54, 5  ;;  %v1726_v60 = vshll.u32 %v9481_v13, 16  ;;  %v1723_v56 = vor.u32 %v1722_v25, %v1718_v58 }
 0x109   : > { %762 = vst.msk [vmem:[#allocation4 + $0x10] sm:$0xf] %vm759_vm12, %v740_v19  ;;  %v865_v19 = vld [vmem:[%s14160_s2 + $0x10] sm:$0x3]  ;;  %v1709_v34 = vrot.slane %v1707_v26, 4  ;;  %v1712_v63 = vrot.slane %v1710_v22, 5 }
 0x10a   : > { %14551 = vst [vmem:[#allocation44_spill] sm:$0xff] %v9477_v2  ;;  %v899_v7 = vunpack.c.l.b16 %v865_v19  ;;  %v1666_v17 = vrot.slane %v1665_v47, 4  ;;  %v1698_v40 = vrot.slane %v1696_v20, 4  ;;  %v1724_v54 = vrot.slane %v1723_v56, 4 }
 0x10b   : > { %809 = vst.msk [vmem:[#allocation4 + $0x10] sm:$0xf] %vm806_vm13, %v9410_v3  ;;  %v821_v14 = vpop.permute.xlu2 %820  ;;  %1778 = vrot.lane.b32.xlu1 %v9477_v2, %s8559_s16  ;;  %v9499_v3 = vsel %vm8677_vm5, %v1690_v33, %v1694_v10  ;;  %v9506_v33 = vld [vmem:[%s8920_s24 + $0xb0] sm:$0x1]  ;;  %v1728_v25 = vrot.slane %v1726_v60, 5  ;;  %v1713_v26 = vor.u32 %v1712_v63, %v1709_v34  ;;  %v8111_v56 = vrot.slane %v9018_v11, 9 }
 0x10c   : > { %v902_v55 = vpack.c.b16 %v899_v7, %v899_v7  ;;  %1786 = vrot.lane.b32.xlu2 %v9499_v3, %s8559_s16  ;;  %v9514_v7 = vsel %vm8677_vm5, %v1676_v21, %v1680_v28  ;;  %v1699_v47 = vor.u32 %v1698_v40, %v1694_v10  ;;  %v1702_v20 = vshll.u32 %v9506_v33, 16  ;;  %v8443_v21 = vld [vmem:[%s14160_s2] sm:$0xff] }
 0x10d   : > { %v746_v2 = vpop.permute.xlu0 %745  ;;  %14552 = vst [vmem:[#allocation45_spill] sm:$0xff] %v9514_v7  ;;  %v1915_v34 = vrot.slane %v8955_v45, 5  ;;  %v1908_v63 = vrot.slane %v8930_v24, 5  ;;  %v1922_v24 = vrot.slane %v8948_v36, 5 }
 0x10e   : > { %v920_v50 = vsel %vm14264_vm14, %v902_v55, 0  ;;  %765 = vst.msk [vmem:[#allocation4 + $0x28] sm:$0xf] %vm759_vm12, %v746_v2  ;;  %v9520_v55 = vsel %vm8677_vm5, %v1666_v17, %v1670_v30  ;;  %v8444_v2 = vld [vmem:[%s14160_s2 + $0x8] sm:$0xff]  ;;  %v1714_v17 = vrot.slane %v1713_v26, 4  ;;  %v1700_v40 = vrot.slane %v1699_v47, 4 }
 0x10f   : > { %1776 = vrot.lane.b32.xlu0 %v9489_v27, %s8559_s16  ;;  %v748_v19 = vpop.permute.xlu1 %747  ;;  %927 = vmatpush.bf16.msra.mxu0 %v920_v50  ;;  %812 = vst.msk [vmem:[#allocation4 + $0x28] sm:$0xf] %vm806_vm13, %v9451_v37  ;;  %v9532_v37 = vsel %vm8677_vm5, %v1724_v54, %v1728_v25  ;;  %v1704_v10 = vrot.slane %v1702_v20, 5  ;;  %v1911_v54 = vrot.slane %v8996_v49, 5  ;;  %v8110_v26 = vrot.slane %v8979_v51, 9 }
 0x110   : > { %766 = vst.msk [vmem:[#allocation4 + $0x30] sm:$0xf] %vm759_vm12, %v748_v19  ;;  %v9544_v60 = vsel %vm8677_vm5, %v1714_v17, %v1718_v58  ;;  %v9559_v58 = vsel %vm8637_vm2, %v8111_v56, %v1915_v34  ;;  %v1925_v17 = vrot.slane %v9111_v15, 5  ;;  %v1917_v15 = vrot.slane %v1915_v34, 4 }
 0x111   : > { %14553 = vst [vmem:[#allocation46_spill] sm:$0xff] %v9520_v55  ;;  %v9551_v50 = vsel %vm8677_vm5, %v1700_v40, %v1704_v10  ;;  %v1909_v40 = vsel %vm8637_vm2, %v8110_v26, %v1908_v63  ;;  %v8112_v10 = vrot.slane %v8983_v53, 9  ;;  %v8114_v56 = vrot.slane %v9106_v42, 9 }
 0x112   : > { %v1929_v34 = vrot.slane %v8969_v41, 5  ;;  %v1932_v26 = vrot.slane %v9059_v43, 5 }
 0x113   : > { %v827_v22 = vpop.permute.xlu2 %826  ;;  %1784 = vrot.lane.b32.xlu1 %v9514_v7, %s8559_s16  ;;  %928 = vmatpush.bf16.msra.mxu0 %v8444_v2  ;;  %v1924_v2 = vrot.slane %v1922_v24, 4 }
 0x114   : > { %1792 = vrot.lane.b32.xlu2 %v9532_v37, %s8559_s16 }
 0x115   : > { %v783_v28 = vpop.permute.xlu0 %782 }
 0x116   : > { %807 = vst.msk [vmem:[#allocation4] sm:$0xf] %vm806_vm13, %v783_v28 }
 0x117   : > { %1782 = vrot.lane.b32.xlu0 %v9520_v55, %s8559_s16  ;;  %v785_v30 = vpop.permute.xlu1 %784  ;;  %929 = vmatpush.bf16.msra.mxu0 %v8443_v21  ;;  %845 = vst.msk [vmem:[#allocation4] sm:$0xf] %vm844_vm15, %v821_v14  ;;  %v1910_v14 = vrot.slane %v1908_v63, 4 }
 0x118   : > { %808 = vst.msk [vmem:[#allocation4 + $0x8] sm:$0xf] %vm806_vm13, %v785_v30 }
 0x119   : > { %v1912_v49 = vsel %vm8637_vm2, %v1910_v14, %v1911_v54  ;;  %v9597_v14 = vsel %vm8637_vm2, %v8112_v10, %v1922_v24  ;;  %v1931_v24 = vrot.slane %v1929_v34, 4  ;;  %v1946_v10 = vrot.slane %v9229_v9, 5 }
 0x11b   : > { %v833_v19 = vpop.permute.xlu2 %832  ;;  %1790 = vrot.lane.b32.xlu1 %v9544_v60, %s8559_s16  ;;  %v9628_v43 = vsel %vm8637_vm2, %v1931_v24, %v1932_v26 }
 0x11c   : > { %2022 = vrot.lane.b32.xlu2 %v9559_v58, %s8558_s15 }
 0x11d   : > { %v789_v47 = vpop.permute.xlu0 %788 }
 0x11e   : > { %v9565_v20 = vld [vmem:[#allocation4] sm:$0xf]  ;;  %810 = vst.msk [vmem:[#allocation4 + $0x18] sm:$0xf] %vm806_vm13, %v789_v47  ;;  %v1943_v47 = vrot.slane %v9001_v57, 5 }
 0x11f   : > { %1788 = vrot.lane.b32.xlu0 %v9551_v50, %s8559_s16  ;;  %v791_v25 = vpop.permute.xlu1 %790  ;;  %1314 = vst.msk [vmem:[#allocation4] sm:$0xf] %vm374_vm6, %v8979_v51  ;;  %v9583_v51 = vsel %vm8637_vm2, %v1924_v2, %v1925_v17  ;;  %v8113_v2 = vrot.slane %v9054_v39, 9 }
 0x120   : > { %811 = vst.msk [vmem:[#allocation4 + $0x20] sm:$0xf] %vm806_vm13, %v791_v25 }
 0x121   : > { %848 = vst.msk [vmem:[#allocation4 + $0x18] sm:$0xf] %vm844_vm15, %v827_v22  ;;  %v1918_v22 = vrot.slane %v9040_v44, 5  ;;  %v1936_v44 = vrot.slane %v9008_v62, 5 }
 0x123   : > { %v1733_v30 = vpop.permute.xlu2 %1732  ;;  %2020 = vrot.lane.b32.xlu1 %v1912_v49, %s8558_s15  ;;  %v9605_v25 = vsel %vm8637_vm2, %v1917_v15, %v1918_v22  ;;  %v9633_v15 = vsel %vm8637_vm2, %v8113_v2, %v1929_v34  ;;  %v1938_v24 = vrot.slane %v1936_v44, 4  ;;  %v1939_v34 = vrot.slane %v9143_v31, 5 }
 0x124   : > { %1827 = vst.msk [vmem:[#allocation4 + $0x4] sm:$0xf] %vm14262_vm7, %v1733_v30  ;;  %2028 = vrot.lane.b32.xlu2 %v9583_v51, %s8558_s15  ;;  %v8117_v31 = vrot.slane %v9232_v8, 9 }
 0x125   : > { %v795_v28 = vpop.permute.xlu0 %794 }
 0x126   : > { %813 = vst.msk [vmem:[#allocation4 + $0x30] sm:$0xf] %vm806_vm13, %v795_v28  ;;  %v8115_v28 = vrot.slane %v9067_v46, 9 }
 0x127   : > { %2018 = vrot.lane.b32.xlu0 %v1909_v40, %s8558_s15  ;;  %v797_v21 = vpop.permute.xlu1 %796  ;;  %851 = vst.msk [vmem:[#allocation4 + $0x30] sm:$0xf] %vm844_vm15, %v833_v19  ;;  %v9613_v19 = vsel %vm8637_vm2, %v8114_v56, %v1936_v44  ;;  %v1945_v40 = vrot.slane %v1943_v47, 4 }
 0x128   : > { %814 = vst.msk [vmem:[#allocation4 + $0x38] sm:$0xf] %vm806_vm13, %v797_v21  ;;  %v9592_v63 = vld [vmem:[#allocation4 + $0x14] sm:$0xf0]  ;;  %v9658_v44 = vsel %vm8637_vm2, %v8115_v28, %v1943_v47  ;;  %v1964_v28 = vrot.slane %v9085_v38, 5 }
 0x129   : > { %1320 = vst.msk [vmem:[#allocation4 + $0x18] sm:$0xf] %vm374_vm6, %v9054_v39  ;;  %v9642_v22 = vsel %vm8637_vm2, %v1945_v40, %v1946_v10  ;;  %v1950_v40 = vrot.slane %v9027_v18, 5 }
 0x12a   : > { %14554 = vst [vmem:[#allocation47_spill] sm:$0xff] %v9613_v19 }
 0x12b   : > { %v1739_v54 = vpop.permute.xlu2 %1738  ;;  %2026 = vrot.lane.b32.xlu1 %v9597_v14, %s8558_s15  ;;  %14555 = vst [vmem:[#allocation48_spill] sm:$0xff] %v9642_v22  ;;  %v1952_v10 = vrot.slane %v1950_v40, 4 }
 0x12c   : > { %2034 = vrot.lane.b32.xlu2 %v9613_v19, %s8558_s15 }
 0x12d   : > { %v823_v17 = vpop.permute.xlu0 %822 }
 0x12e   : > { %v9619_v30 = vld [vmem:[#allocation4 + $0x30] sm:$0xf]  ;;  %846 = vst.msk [vmem:[#allocation4 + $0x8] sm:$0xf] %vm844_vm15, %v823_v17  ;;  %v1957_v17 = vrot.slane %v9096_v1, 5 }
 0x12f   : > { %2024 = vrot.lane.b32.xlu0 %v9605_v25, %s8558_s15  ;;  %v825_v49 = vpop.permute.xlu1 %824  ;;  %1326 = vst.msk [vmem:[#allocation4 + $0x30] sm:$0xf] %vm374_vm6, %v9163_v5 }
 0x130   : > { %847 = vst.msk [vmem:[#allocation4 + $0x10] sm:$0xf] %vm844_vm15, %v825_v49  ;;  %v9676_v47 = vsel %vm8637_vm2, %v8117_v31, %v1957_v17 }
 0x131   : > { %14557 = vst [vmem:[#allocation50_spill] sm:$0xff] %v9676_v47 }
 0x133   : > { %v1745_v21 = vpop.permute.xlu2 %1744  ;;  %2032 = vrot.lane.b32.xlu1 %v9628_v43, %s8558_s15 }
 0x134   : > { %1833 = vst.msk [vmem:[#allocation4 + $0x1c] sm:$0xf] %vm14262_vm7, %v1745_v21  ;;  %2040 = vrot.lane.b32.xlu2 %v9642_v22, %s8558_s15  ;;  %v1953_v21 = vrot.slane %v9169_v12, 5  ;;  %v1966_v12 = vrot.slane %v1964_v28, 4 }
 0x135   : > { %v8439_v26 = vld [vmem:[#allocation4 + $0x4] sm:$0xf0]  ;;  %v829_v49 = vpop.permute.xlu0 %828 }
 0x136   : > { %v8085_v2 = vor.u32 %v8439_v26, %v9565_v20  ;;  %1316 = vst.msk [vmem:[#allocation4 + $0x8] sm:$0xf] %vm374_vm6, %v9018_v11  ;;  %v9667_v20 = vsel %vm8637_vm2, %v1938_v24, %v1939_v34  ;;  %v8116_v24 = vrot.slane %v9163_v5, 9 }
 0x137   : > { %2030 = vrot.lane.b32.xlu0 %v9633_v15, %s8558_s15  ;;  %v9645_v9 = vld [vmem:[#allocation4 + $0x10] sm:$0xf]  ;;  %v831_v56 = vpop.permute.xlu1 %830  ;;  %14556 = vst [vmem:[#allocation49_spill] sm:$0xff] %v9667_v20 }
 0x138   : > { %1318 = vst.msk [vmem:[#allocation4 + $0x10] sm:$0xf] %vm374_vm6, %v8983_v53  ;;  %8106 = vmatmul.msk.bf16.vlgmr.msra.gmra.mxu0 %vm14263_vm0, %v8085_v2  ;;  %v1967_v2 = vrot.slane %v9346_v6, 5 }
 0x139   : > { %1830 = vst.msk [vmem:[#allocation4 + $0x10] sm:$0xf] %vm14262_vm7, %v1739_v54 }
 0x13a   : > { %850 = vst.msk [vmem:[#allocation4 + $0x28] sm:$0xf] %vm844_vm15, %v831_v56  ;;  %v9710_v6 = vsel %vm8637_vm2, %v1966_v12, %v1967_v2  ;;  %v8089_v12 = vor.u32 %v9592_v63, %v9645_v9  ;;  %v14562_v2 = vld [vmem:[#allocation16_spill] sm:$0xff] }
 0x13b   : > { %v1751_v54 = vpop.permute.xlu2 %1750  ;;  %849 = vst.msk [vmem:[#allocation4 + $0x20] sm:$0xf] %vm844_vm15, %v829_v49  ;;  %2038 = vrot.lane.b32.xlu1 %v9658_v44, %s8558_s15  ;;  %v9689_v49 = vsel %vm8637_vm2, %v1952_v10, %v1953_v21  ;;  %v1959_v21 = vrot.slane %v1957_v17, 4 }
 0x13c   : > { %2046 = vrot.lane.b32.xlu2 %v9676_v47, %s8558_s15  ;;  %14558 = vst [vmem:[#allocation51_spill] sm:$0xff] %v9689_v49  ;;  %v9698_v47 = vsel %vm8637_vm2, %v8116_v24, %v1950_v40  ;;  %v8118_v40 = vrot.slane %v9077_v52, 9  ;;  %v1960_v24 = vrot.slane %v9280_v16, 5  ;;  %v8120_v16 = vrot.slane %v9223_v59, 9 }
 0x13d   : > { %v835_v34 = vpop.permute.xlu0 %834  ;;  %14559 = vst [vmem:[#allocation52_spill] sm:$0xff] %v9698_v47 }
 0x13e   : > { %852 = vst.msk [vmem:[#allocation4 + $0x38] sm:$0xf] %vm844_vm15, %v835_v34  ;;  %v9726_v17 = vsel %vm8637_vm2, %v8118_v40, %v1964_v28  ;;  %v14566_v28 = vld [vmem:[#allocation24_spill] sm:$0xff] }
 0x13f   : > { %2036 = vrot.lane.b32.xlu0 %v9667_v20, %s8558_s15  ;;  %v1731_v56 = vpop.permute.xlu1 %1730  ;;  %14560 = vst [vmem:[#allocation53_spill] sm:$0xff] %v9710_v6  ;;  %v1974_v40 = vrot.slane %v14566_v28, 5  ;;  %v1988_v28 = vrot.slane %v9434_v32, 5 }
 0x140   : > { %1826 = vst.msk [vmem:[#allocation4] sm:$0xf] %vm14262_vm7, %v1731_v56 }
 0x141   : > { %v9685_v26 = vld [vmem:[#allocation4 + $0x24] sm:$0xf0]  ;;  %14561 = vst [vmem:[#allocation54_spill] sm:$0xff] %v9726_v17 }
 0x142   : > { %1324 = vst.msk [vmem:[#allocation4 + $0x28] sm:$0xf] %vm374_vm6, %v9067_v46  ;;  %v9694_v31 = vld [vmem:[#allocation4 + $0x20] sm:$0xf] }
 0x143   : > { %v1757_v56 = vpop.permute.xlu2 %1756  ;;  %1322 = vst.msk [vmem:[#allocation4 + $0x20] sm:$0xf] %vm374_vm6, %v9106_v42  ;;  %2044 = vrot.lane.b32.xlu1 %v9689_v49, %s8558_s15 }
 0x144   : > { %1836 = vst.msk [vmem:[#allocation4 + $0x28] sm:$0xf] %vm14262_vm7, %v1751_v54  ;;  %2052 = vrot.lane.b32.xlu2 %v9710_v6, %s8558_s15  ;;  %v9734_v6 = vsel %vm8637_vm2, %v1959_v21, %v1960_v24  ;;  %v14568_v21 = vld [vmem:[#allocation10_spill] sm:$0xff] }
 0x145   : > { %1839 = vst.msk [vmem:[#allocation4 + $0x34] sm:$0xf] %vm14262_vm7, %v1757_v56  ;;  %v9714_v34 = vld [vmem:[#allocation4 + $0x34] sm:$0xf0]  ;;  %v1735_v54 = vpop.permute.xlu0 %1734  ;;  %v1978_v56 = vrot.slane %v14562_v2, 5  ;;  %v8119_v24 = vrot.slane %v14568_v21, 9 }
 0x146   : > { %1328 = vst.msk [vmem:[#allocation4 + $0x38] sm:$0xf] %vm374_vm6, %v9232_v8 }
 0x147   : > { %2042 = vrot.lane.b32.xlu0 %v9698_v47, %s8558_s15  ;;  %v1737_v10 = vpop.permute.xlu1 %1736  ;;  %1828 = vst.msk [vmem:[#allocation4 + $0x8] sm:$0xf] %vm14262_vm7, %v1735_v54  ;;  %v9743_v63 = vsel %vm8637_vm2, %v8120_v16, %v1978_v56  ;;  %v14567_v54 = vld [vmem:[#allocation15_spill] sm:$0xff] }
 0x148   : > { %1829 = vst.msk [vmem:[#allocation4 + $0xc] sm:$0xf] %vm14262_vm7, %v1737_v10  ;;  %v14563_v10 = vld [vmem:[#allocation8_spill] sm:$0xff]  ;;  %8107 = vmatmul.msk.bf16.gmra.mxu0 %vm14263_vm0, %v8089_v12  ;;  %v1985_v12 = vrot.slane %v14567_v54, 5 }
 0x149   : > { %v1971_v22 = vrot.slane %v14563_v10, 5  ;;  %14564 = vst [vmem:[#allocation16_spill] sm:$0xff] %v9734_v6 }
 0x14a   : > { %14565 = vst [vmem:[#allocation8_spill] sm:$0xff] %v9743_v63 }
 0x14b   : > { %v1763_v47 = vpop.permute.xlu2 %1762  ;;  %2050 = vrot.lane.b32.xlu1 %v9726_v17, %s8558_s15  ;;  %v1973_v9 = vrot.slane %v1971_v22, 4  ;;  %v9759_v19 = vsel %vm8637_vm2, %v8119_v24, %v1971_v22  ;;  %v8123_v24 = vrot.slane %v9340_v23, 9 }
 0x14c   : > { %1842 = vst.msk [vmem:[#allocation4 + $0x40] sm:$0xf] %vm14262_vm7, %v1763_v47  ;;  %2058 = vrot.lane.b32.xlu2 %v9743_v63, %s8558_s15  ;;  %v14573_v63 = vld [vmem:[#allocation36_spill] sm:$0xff] }
 0x14d   : > { %v1741_v47 = vpop.permute.xlu0 %1740  ;;  %v9754_v16 = vsel %vm8637_vm2, %v1973_v9, %v1974_v40  ;;  %14570 = vst [vmem:[#allocation10_spill] sm:$0xff] %v9759_v19  ;;  %v14572_v9 = vld [vmem:[#allocation13_spill] sm:$0xff]  ;;  %v1981_v20 = vrot.slane %v14573_v63, 5 }
 0x14e   : > { %1831 = vst.msk [vmem:[#allocation4 + $0x14] sm:$0xf] %vm14262_vm7, %v1741_v47  ;;  %v8121_v40 = vrot.slane %v14572_v9, 9  ;;  %v1980_v47 = vrot.slane %v1978_v56, 4  ;;  %v1999_v56 = vrot.slane %v9328_v4, 5  ;;  %v14575_v63 = vld [vmem:[#allocation21_spill] sm:$0xff] }
 0x14f   : > { %2048 = vrot.lane.b32.xlu0 %v9734_v6, %s8558_s15  ;;  %v1743_v49 = vpop.permute.xlu1 %1742  ;;  %14569 = vst [vmem:[#allocation24_spill] sm:$0xff] %v9754_v16  ;;  %v1987_v6 = vrot.slane %v1985_v12, 4 }
 0x150   : > { %1832 = vst.msk [vmem:[#allocation4 + $0x18] sm:$0xf] %vm14262_vm7, %v1743_v49 }
 0x151   : > { %v9768_v49 = vsel %vm8637_vm2, %v1987_v6, %v1988_v28  ;;  %v9780_v6 = vsel %vm8637_vm2, %v8121_v40, %v1985_v12  ;;  %v1992_v28 = vrot.slane %v14575_v63, 5  ;;  %v1995_v12 = vrot.slane %v9417_v61, 5 }
 0x152   : > { %14571 = vst [vmem:[#allocation55_spill] sm:$0xff] %v9768_v49  ;;  %v2006_v40 = vrot.slane %v9315_v48, 5  ;;  %v2009_v61 = vrot.slane %v9506_v33, 5 }
 0x153   : > { %v1769_v17 = vpop.permute.xlu2 %1768  ;;  %2056 = vrot.lane.b32.xlu1 %v9754_v16, %s8558_s15  ;;  %14574 = vst [vmem:[#allocation13_spill] sm:$0xff] %v9780_v6 }
 0x154   : > { %1845 = vst.msk [vmem:[#allocation4 + $0x4c] sm:$0xf] %vm14262_vm7, %v1769_v17  ;;  %2064 = vrot.lane.b32.xlu2 %v9768_v49, %s8558_s15  ;;  %v8093_v17 = vor.u32 %v9685_v26, %v9694_v31  ;;  %v9788_v49 = vsel %vm8637_vm2, %v1980_v47, %v1981_v20  ;;  %v9797_v26 = vsel %vm8637_vm2, %v8123_v24, %v1999_v56  ;;  %v1994_v31 = vrot.slane %v1992_v28, 4  ;;  %v14578_v20 = vld [vmem:[#allocation23_spill] sm:$0xff] }
 0x155   : > { %v1747_v22 = vpop.permute.xlu0 %1746  ;;  %14576 = vst [vmem:[#allocation36_spill] sm:$0xff] %v9788_v49  ;;  %v8122_v47 = vrot.slane %v14578_v20, 9 }
 0x156   : > { %1834 = vst.msk [vmem:[#allocation4 + $0x20] sm:$0xf] %vm14262_vm7, %v1747_v22  ;;  %v9808_v24 = vsel %vm8637_vm2, %v1994_v31, %v1995_v12  ;;  %v14581_v12 = vld [vmem:[#allocation26_spill] sm:$0xff] }
 0x157   : > { %2054 = vrot.lane.b32.xlu0 %v9759_v19, %s8558_s15  ;;  %v1749_v32 = vpop.permute.xlu1 %1748  ;;  %14577 = vst [vmem:[#allocation56_spill] sm:$0xff] %v9797_v26 }
 0x158   : > { %1835 = vst.msk [vmem:[#allocation4 + $0x24] sm:$0xf] %vm14262_vm7, %v1749_v32  ;;  %8108 = vmatmul.msk.bf16.gmra.mxu0 %vm14263_vm0, %v8093_v17 }
 0x159   : > { %14579 = vst [vmem:[#allocation57_spill] sm:$0xff] %v9808_v24 }
 0x15b   : > { %v1775_v32 = vpop.permute.xlu2 %1774  ;;  %2062 = vrot.lane.b32.xlu1 %v9780_v6, %s8558_s15  ;;  %v9813_v6 = vsel %vm8637_vm2, %v8122_v47, %v1992_v28 }
 0x15c   : > { %1848 = vst.msk [vmem:[#allocation4 + $0x58] sm:$0xf] %vm14262_vm7, %v1775_v32  ;;  %2070 = vrot.lane.b32.xlu2 %v9797_v26, %s8558_s15  ;;  %v2008_v32 = vrot.slane %v2006_v40, 4  ;;  %v2002_v26 = vrot.slane %v9466_v35, 5 }
 0x15d   : > { %v1753_v17 = vpop.permute.xlu0 %1752 }
 0x15e   : > { %1837 = vst.msk [vmem:[#allocation4 + $0x2c] sm:$0xf] %vm14262_vm7, %v1753_v17  ;;  %v9822_v31 = vsel %vm8637_vm2, %v2008_v32, %v2009_v61  ;;  %v2001_v17 = vrot.slane %v1999_v56, 4  ;;  %v14583_v32 = vld [vmem:[#allocation33_spill] sm:$0xff] }
 0x15f   : > { %2060 = vrot.lane.b32.xlu0 %v9788_v49, %s8558_s15  ;;  %v1755_v22 = vpop.permute.xlu1 %1754  ;;  %14580 = vst [vmem:[#allocation58_spill] sm:$0xff] %v9822_v31  ;;  %v2013_v61 = vrot.slane %v14583_v32, 5 }
 0x160   : > { %1838 = vst.msk [vmem:[#allocation4 + $0x30] sm:$0xf] %vm14262_vm7, %v1755_v22  ;;  %v8124_v22 = vrot.slane %v14581_v12, 9  ;;  %v9840_v35 = vsel %vm8637_vm2, %v2001_v17, %v2002_v26 }
 0x162   : > { %v9834_v47 = vsel %vm8637_vm2, %v8124_v22, %v2006_v40  ;;  %v14584_v22 = vld [vmem:[#allocation37_spill] sm:$0xff] }
 0x163   : > { %v1781_v49 = vpop.permute.xlu2 %1780  ;;  %2068 = vrot.lane.b32.xlu1 %v9808_v24, %s8558_s15  ;;  %14582 = vst [vmem:[#allocation59_spill] sm:$0xff] %v9834_v47 }
 0x164   : > { %1851 = vst.msk [vmem:[#allocation4 + $0x64] sm:$0xf] %vm14262_vm7, %v1781_v49  ;;  %2076 = vrot.lane.b32.xlu2 %v9822_v31, %s8558_s15  ;;  %v8097_v49 = vor.u32 %v9714_v34, %v9619_v30  ;;  %v2015_v30 = vrot.slane %v2013_v61, 4  ;;  %v2016_v34 = vrot.slane %v9481_v13, 5 }
 0x165   : > { %v1759_v28 = vpop.permute.xlu0 %1758 }
 0x166   : > { %1840 = vst.msk [vmem:[#allocation4 + $0x38] sm:$0xf] %vm14262_vm7, %v1759_v28  ;;  %v9855_v26 = vsel %vm8637_vm2, %v2015_v30, %v2016_v34 }
 0x167   : > { %2066 = vrot.lane.b32.xlu0 %v9813_v6, %s8558_s15  ;;  %v1761_v33 = vpop.permute.xlu1 %1760  ;;  %14585 = vst [vmem:[#allocation60_spill] sm:$0xff] %v9855_v26 }
 0x168   : > { %1841 = vst.msk [vmem:[#allocation4 + $0x3c] sm:$0xf] %vm14262_vm7, %v1761_v33  ;;  %8109 = vmatmul.msk.bf16.gmra.mxu0 %vm14263_vm0, %v8097_v49  ;;  %v8125_v33 = vrot.slane %v14584_v22, 9  ;;  %vm9906_vm0 = vmand %vm983_vm1, %vm984_vm4  ;;  %vm14678_vm1 = vcmask 1041408  }
 0x16a   : > { %v9859_v49 = vsel %vm8637_vm2, %v8125_v33, %v2013_v61 }
 0x16b   : > { %v1787_v56 = vpop.permute.xlu2 %1786  ;;  %2074 = vrot.lane.b32.xlu1 %v9834_v47, %s8558_s15 }
 0x16c   : > { %1854 = vst.msk [vmem:[#allocation4 + $0x70] sm:$0xf] %vm14262_vm7, %v1787_v56  ;;  %2148 = vrot.lane.b32.xlu2 %v9018_v11, %s8560_s17 }
 0x16f   : > { %2072 = vrot.lane.b32.xlu0 %v9840_v35, %s8558_s15  ;;  %v1767_v40 = vpop.permute.xlu1 %1766 }
 0x170   : > { %1844 = vst.msk [vmem:[#allocation4 + $0x48] sm:$0xf] %vm14262_vm7, %v1767_v40 }
 0x171   : > { %v1765_v28 = vpop.permute.xlu0 %1764 }
 0x172   : > { %1843 = vst.msk [vmem:[#allocation4 + $0x44] sm:$0xf] %vm14262_vm7, %v1765_v28 }
 0x173   : > { %v1793_v17 = vpop.permute.xlu2 %1792  ;;  %2080 = vrot.lane.b32.xlu1 %v9855_v26, %s8558_s15 }
 0x174   : > { %1857 = vst.msk [vmem:[#allocation4 + $0x7c] sm:$0xf] %vm14262_vm7, %v1793_v17  ;;  %2154 = vrot.lane.b32.xlu2 %v8948_v36, %s8560_s17 }
 0x177   : > { %2078 = vrot.lane.b32.xlu0 %v9859_v49, %s8558_s15  ;;  %v1773_v11 = vpop.permute.xlu1 %1772 }
 0x178   : > { %1847 = vst.msk [vmem:[#allocation4 + $0x54] sm:$0xf] %vm14262_vm7, %v1773_v11 }
 0x179   : > { %v1771_v13 = vpop.permute.xlu0 %1770 }
 0x17a   : > { %1846 = vst.msk [vmem:[#allocation4 + $0x50] sm:$0xf] %vm14262_vm7, %v1771_v13 }
 0x17b   : > { %v2023_v56 = vpop.permute.xlu2 %2022  ;;  %2152 = vrot.lane.b32.xlu1 %v8983_v53, %s8560_s17 }
 0x17c   : > { %2116 = vst.msk [vmem:[#allocation4 + $0x8] sm:$0xf] %vm606_vm8, %v2023_v56  ;;  %2160 = vrot.lane.b32.xlu2 %v9106_v42, %s8560_s17 }
 0x17f   : > { %2150 = vrot.lane.b32.xlu0 %v8955_v45, %s8560_s17  ;;  %v1779_v61 = vpop.permute.xlu1 %1778 }
 0x180   : > { %1850 = vst.msk [vmem:[#allocation4 + $0x60] sm:$0xf] %vm14262_vm7, %v1779_v61  ;;  %v1001_v61 = vld [vmem:[#allocation2 + $0x3c] sm:$0x7] }
 0x181   : > { %v1777_v30 = vpop.permute.xlu0 %1776 }
 0x182   : > { %1849 = vst.msk [vmem:[#allocation4 + $0x5c] sm:$0xf] %vm14262_vm7, %v1777_v30 }
 0x183   : > { %v2029_v34 = vpop.permute.xlu2 %2028  ;;  %2158 = vrot.lane.b32.xlu1 %v8969_v41, %s8560_s17 }
 0x184   : > { %2119 = vst.msk [vmem:[#allocation4 + $0x14] sm:$0xf] %vm606_vm8, %v2029_v34  ;;  %2166 = vrot.lane.b32.xlu2 %v9001_v57, %s8560_s17  ;;  %v14586_v34 = vmov 0 }
 0x185   : > { %v14587_v34 = vsel %vm9906_vm0, 4294967295, %v14586_v34 }
 0x186   : > { %14588 = vst [vmem:[#allocation61_spill] sm:$0xff] %v14587_v34 }
 0x187   : > { %2156 = vrot.lane.b32.xlu0 %v9054_v39, %s8560_s17  ;;  %v1785_v40 = vpop.permute.xlu1 %1784 }
 0x188   : > { %1853 = vst.msk [vmem:[#allocation4 + $0x6c] sm:$0xf] %vm14262_vm7, %v1785_v40  ;;  %v1063_v40 = vld [vmem:[#allocation2 + $0x40] sm:$0xc] }
 0x189   : > { %v1783_v45 = vpop.permute.xlu0 %1782 }
 0x18a   : > { %1852 = vst.msk [vmem:[#allocation4 + $0x68] sm:$0xf] %vm14262_vm7, %v1783_v45  ;;  %v1002_v45 = vsel %vm9906_vm0, 0, %v1001_v61 }
 0x18b   : > { %v2035_v33 = vpop.permute.xlu2 %2034  ;;  %2164 = vrot.lane.b32.xlu1 %v9067_v46, %s8560_s17  ;;  %1003 = vst [vmem:[#allocation2 + $0x3c] sm:$0x7] %v1002_v45 }
 0x18c   : > { %2122 = vst.msk [vmem:[#allocation4 + $0x20] sm:$0xf] %vm606_vm8, %v2035_v33  ;;  %2172 = vrot.lane.b32.xlu2 %v9232_v8, %s8560_s17  ;;  %v14589_v33 = vmov 0 }
 0x18f   : > { %2162 = vrot.lane.b32.xlu0 %v9008_v62, %s8560_s17  ;;  %v1791_v28 = vpop.permute.xlu1 %1790 }
 0x190   : > { %1856 = vst.msk [vmem:[#allocation4 + $0x78] sm:$0xf] %vm14262_vm7, %v1791_v28 }
 0x191   : > { %v1789_v17 = vpop.permute.xlu0 %1788 }
 0x192   : > { %1855 = vst.msk [vmem:[#allocation4 + $0x74] sm:$0xf] %vm14262_vm7, %v1789_v17  ;;  %vm1041_vm7 = vsmask.f32 7946 }
 0x193   : > { %v2041_v11 = vpop.permute.xlu2 %2040  ;;  %2170 = vrot.lane.b32.xlu1 %v9027_v18, %s8560_s17  ;;  %vm9913_vm14 = vmand %vm1040_vm3, %vm1041_vm7  ;;  %vm953_vm7 = vcmask 24576   ;;  %vm14705_vm3 = vcmask 293888  }
 0x194   : > { %2125 = vst.msk [vmem:[#allocation4 + $0x2c] sm:$0xf] %vm606_vm8, %v2041_v11  ;;  %2178 = vrot.lane.b32.xlu2 %v9085_v38, %s8560_s17  ;;  %v14590_v33 = vsel %vm9913_vm14, 4294967295, %v14589_v33  ;;  %v1064_v28 = vsel %vm9913_vm14, 0, %v1063_v40  ;;  %vm14716_vm4 = vmmov %vm14705_vm3 }
 0x195   : > { %14591 = vst [vmem:[#allocation62_spill] sm:$0xff] %v14590_v33 }
 0x196   : > { %1065 = vst [vmem:[#allocation2 + $0x40] sm:$0xc] %v1064_v28 }
 0x197   : > { %2168 = vrot.lane.b32.xlu0 %v9163_v5, %s8560_s17  ;;  %v2021_v13 = vpop.permute.xlu1 %2020 }
 0x198   : > { %2115 = vst.msk [vmem:[#allocation4 + $0x4] sm:$0xf] %vm606_vm8, %v2021_v13 }
 0x199   : > { %v2019_v56 = vpop.permute.xlu0 %2018 }
 0x19a   : > { %2114 = vst.msk [vmem:[#allocation4] sm:$0xf] %vm606_vm8, %v2019_v56  ;;  %v1004_v56 = vld [vmem:[#allocation2 + $0x48] sm:$0x7] }
 0x19b   : > { %v2047_v30 = vpop.permute.xlu2 %2046  ;;  %2176 = vrot.lane.b32.xlu1 %v9077_v52, %s8560_s17  ;;  %v1005_v61 = vsel %vm9906_vm0, 0, %v1004_v56 }
 0x19c   : > { %2128 = vst.msk [vmem:[#allocation4 + $0x38] sm:$0xf] %vm606_vm8, %v2047_v30  ;;  %2184 = vrot.lane.b32.xlu2 %v9223_v59, %s8560_s17  ;;  %v1067_v30 = vld [vmem:[#allocation2 + $0x4c] sm:$0xc] }
 0x19d   : > { %1006 = vst [vmem:[#allocation2 + $0x48] sm:$0x7] %v1005_v61  ;;  %v1068_v45 = vsel %vm9913_vm14, 0, %v1067_v30  ;;  %v1071_v61 = vld [vmem:[#allocation2 + $0x58] sm:$0xc] }
 0x19e   : > { %1069 = vst [vmem:[#allocation2 + $0x4c] sm:$0xc] %v1068_v45 }
 0x19f   : > { %2174 = vrot.lane.b32.xlu0 %v9096_v1, %s8560_s17  ;;  %v2027_v17 = vpop.permute.xlu1 %2026 }
 0x1a0   : > { %2118 = vst.msk [vmem:[#allocation4 + $0x10] sm:$0xf] %vm606_vm8, %v2027_v17 }
 0x1a1   : > { %v2025_v11 = vpop.permute.xlu0 %2024 }
 0x1a2   : > { %2117 = vst.msk [vmem:[#allocation4 + $0xc] sm:$0xf] %vm606_vm8, %v2025_v11  ;;  %v14268_v11 = vmov 0  }
 0x1a3   : > { %v2053_v13 = vpop.permute.xlu2 %2052  ;;  %2182 = vrot.lane.b32.xlu1 %v14563_v10, %s8560_s17  ;;  %951 = vst.msk [vmem:[#allocation2] sm:$0xf] %vm374_vm6, %v14268_v11 }
 0x1a4   : > { %2131 = vst.msk [vmem:[#allocation4 + $0x44] sm:$0xf] %vm606_vm8, %v2053_v13  ;;  %2190 = vrot.lane.b32.xlu2 %v14567_v54, %s8560_s17  ;;  %v1007_v13 = vld [vmem:[#allocation2 + $0x54] sm:$0x7] }
 0x1a5   : > { %v1008_v56 = vsel %vm9906_vm0, 0, %v1007_v13  ;;  %952 = vst.msk [vmem:[#allocation2 + $0x4] sm:$0xf] %vm374_vm6, %v14268_v11  ;;  %v9967_v13 = vld [vmem:[%s14161_s3] ss:$0 sm:$0xff] }
 0x1a6   : > { %1009 = vst [vmem:[#allocation2 + $0x54] sm:$0x7] %v1008_v56 }
 0x1a7   : > { %2180 = vrot.lane.b32.xlu0 %v14568_v21, %s8560_s17  ;;  %v2033_v40 = vpop.permute.xlu1 %2032  ;;  %955 = vst.msk [vmem:[#allocation2 + $0xc] sm:$0xf] %vm374_vm6, %v14268_v11 }
 0x1a8   : > { %2121 = vst.msk [vmem:[#allocation4 + $0x1c] sm:$0xf] %vm606_vm8, %v2033_v40  ;;  %v1072_v40 = vsel %vm9913_vm14, 0, %v1071_v61  ;;  %v1075_v61 = vld [vmem:[#allocation2 + $0x64] sm:$0xc] }
 0x1a9   : > { %v2031_v28 = vpop.permute.xlu0 %2030  ;;  %1073 = vst [vmem:[#allocation2 + $0x58] sm:$0xc] %v1072_v40  ;;  %v1076_v40 = vsel %vm9913_vm14, 0, %v1075_v61  ;;  %v1013_v61 = vld [vmem:[#allocation2 + $0x6c] sm:$0x7] }
 0x1aa   : > { %2120 = vst.msk [vmem:[#allocation4 + $0x18] sm:$0xf] %vm606_vm8, %v2031_v28 }
 0x1ab   : > { %v2059_v17 = vpop.permute.xlu2 %2058  ;;  %2188 = vrot.lane.b32.xlu1 %v14572_v9, %s8560_s17  ;;  %956 = vst.msk [vmem:[#allocation2 + $0x10] sm:$0xf] %vm374_vm6, %v14268_v11 }
 0x1ac   : > { %2134 = vst.msk [vmem:[#allocation4 + $0x50] sm:$0xf] %vm606_vm8, %v2059_v17  ;;  %2196 = vrot.lane.b32.xlu2 %v9340_v23, %s8560_s17  ;;  %v1010_v17 = vld [vmem:[#allocation2 + $0x60] sm:$0x7] }
 0x1ad   : > { %v1011_v56 = vsel %vm9906_vm0, 0, %v1010_v17  ;;  %958 = vst.msk [vmem:[#allocation2 + $0x18] sm:$0xf] %vm374_vm6, %v14268_v11 }
 0x1ae   : > { %1012 = vst [vmem:[#allocation2 + $0x60] sm:$0x7] %v1011_v56 }
 0x1af   : > { %2186 = vrot.lane.b32.xlu0 %v14562_v2, %s8560_s17  ;;  %v2039_v30 = vpop.permute.xlu1 %2038  ;;  %959 = vst.msk [vmem:[#allocation2 + $0x1c] sm:$0xf] %vm374_vm6, %v14268_v11 }
 0x1b0   : > { %2124 = vst.msk [vmem:[#allocation4 + $0x28] sm:$0xf] %vm606_vm8, %v2039_v30 }
 0x1b1   : > { %v2037_v45 = vpop.permute.xlu0 %2036  ;;  %1077 = vst [vmem:[#allocation2 + $0x64] sm:$0xc] %v1076_v40  ;;  %v9994_v40 = vld [vmem:[%s8920_s24 + $0xc0] sm:$0xf] }
 0x1b2   : > { %2123 = vst.msk [vmem:[#allocation4 + $0x24] sm:$0xf] %vm606_vm8, %v2037_v45  ;;  %v2277_v33 = vshrl.u32 %v9994_v40, 16  ;;  %v2280_v34 = vshll.u32 %v9994_v40, 16 }
 0x1b3   : > { %v2065_v28 = vpop.permute.xlu2 %2064  ;;  %2194 = vrot.lane.b32.xlu1 %v14575_v63, %s8560_s17  ;;  %961 = vst.msk [vmem:[#allocation2 + $0x24] sm:$0xf] %vm374_vm6, %v14268_v11 }
 0x1b4   : > { %2137 = vst.msk [vmem:[#allocation4 + $0x5c] sm:$0xf] %vm606_vm8, %v2065_v28  ;;  %2202 = vrot.lane.b32.xlu2 %v9315_v48, %s8560_s17  ;;  %v1014_v48 = vsel %vm9906_vm0, 0, %v1013_v61 }
 0x1b5   : > { %v931_v28 = vpop.f32.mrf.mxu0  ;;  %1015 = vst [vmem:[#allocation2 + $0x6c] sm:$0x7] %v1014_v48 }
 0x1b6   : > { %v932_v17 = vadd.f32 %v9967_v13, %v931_v28 }
 0x1b7   : > { %2192 = vrot.lane.b32.xlu0 %v14578_v20, %s8560_s17  ;;  %v2045_v30 = vpop.permute.xlu1 %2044 }
 0x1b8   : > { %2127 = vst.msk [vmem:[#allocation4 + $0x34] sm:$0xf] %vm606_vm8, %v2045_v30  ;;  %v1115_v56 = vpack.c.bf16 %v932_v17, %v932_v17 }
 0x1b9   : > { %v2043_v45 = vpop.permute.xlu0 %2042 }
 0x1ba   : > { %2126 = vst.msk [vmem:[#allocation4 + $0x30] sm:$0xf] %vm606_vm8, %v2043_v45  ;;  %v1124_v30 = vshrl.u32 %v1115_v56, 16  ;;  %v1127_v54 = vshll.u32 %v1115_v56, 16  ;;  %v1079_v45 = vld [vmem:[#allocation2 + $0x70] sm:$0xc] }
 0x1bb   : > { %v2071_v23 = vpop.permute.xlu2 %2070  ;;  %2200 = vrot.lane.b32.xlu1 %v14581_v12, %s8560_s17  ;;  %v14592_v56 = vmov 0   ;;  %v1212_v12 = vld [vmem:[#allocation2 + $0x3c] sm:$0xc] }
 0x1bc   : > { %2140 = vst.msk [vmem:[#allocation4 + $0x68] sm:$0xf] %vm606_vm8, %v2071_v23  ;;  %v1126_v28 = vrot.slane %v1124_v30, 5  ;;  %v1129_v17 = vrot.slane %v1127_v54, 6  ;;  %v1080_v23 = vsel %vm9913_vm14, 0, %v1079_v45  ;;  %2208 = vrot.lane.b32.xlu2 %v9994_v40, %s8560_s17 }
 0x1bd   : > { %962 = vst.msk [vmem:[#allocation2 + $0x28] sm:$0xf] %vm374_vm6, %v14592_v56  ;;  %v933_v20 = vpop.f32.mrf.mxu0  ;;  %v1215_v54 = vld [vmem:[#allocation2 + $0x40] sm:$0x7] }
 0x1be   : > { %v1130_v63 = vor.u32 %v1129_v17, %v1126_v28  ;;  %v934_v48 = vadd.f32 %v9967_v13, %v933_v20  ;;  %1081 = vst [vmem:[#allocation2 + $0x70] sm:$0xc] %v1080_v23  ;;  %v1083_v20 = vld [vmem:[#allocation2 + $0x7c] sm:$0xc] }
 0x1bf   : > { %2198 = vrot.lane.b32.xlu0 %v9328_v4, %s8560_s17  ;;  %v2051_v11 = vpop.permute.xlu1 %2050  ;;  %964 = vst.msk [vmem:[#allocation2 + $0x30] sm:$0xf] %vm374_vm6, %v14592_v56 }
 0x1c0   : > { %2130 = vst.msk [vmem:[#allocation4 + $0x40] sm:$0xf] %vm606_vm8, %v2051_v11  ;;  %v1131_v30 = vrot.slane %v1130_v63, 4  ;;  %v1213_v45 = vsel %vm9913_vm14, %v1130_v63, %v1212_v12  ;;  %v1116_v4 = vpack.c.bf16 %v934_v48, %v934_v48  ;;  %v1016_v11 = vld [vmem:[#allocation2 + $0x78] sm:$0x7] }
 0x1c1   : > { %v2049_v61 = vpop.permute.xlu0 %2048  ;;  %1214 = vst [vmem:[#allocation2 + $0x3c] sm:$0xc] %v1213_v45  ;;  %v1017_v63 = vsel %vm9906_vm0, 0, %v1016_v11 }
 0x1c2   : > { %2129 = vst.msk [vmem:[#allocation4 + $0x3c] sm:$0xf] %vm606_vm8, %v2049_v61  ;;  %v1216_v28 = vsel %vm9906_vm0, %v1131_v30, %v1215_v54  ;;  %v1133_v17 = vshrl.u32 %v1116_v4, 16  ;;  %v1136_v61 = vshll.u32 %v1116_v4, 16  ;;  %v1084_v4 = vsel %vm9913_vm14, 0, %v1083_v20 }
 0x1c3   : > { %v2077_v59 = vpop.permute.xlu2 %2076  ;;  %2206 = vrot.lane.b32.xlu1 %v14583_v32, %s8560_s17  ;;  %1217 = vst [vmem:[#allocation2 + $0x40] sm:$0x7] %v1216_v28  ;;  %v14593_v28 = vld [vmem:[#allocation7_spill] sm:$0xff] }
 0x1c4   : > { %2143 = vst.msk [vmem:[#allocation4 + $0x74] sm:$0xf] %vm606_vm8, %v2077_v59  ;;  %v1135_v12 = vrot.slane %v1133_v17, 5  ;;  %v1138_v23 = vrot.slane %v1136_v61, 6  ;;  %v1218_v59 = vld [vmem:[#allocation2 + $0x48] sm:$0xc]  ;;  %2302 = vrot.lane.b32.xlu2 %v14593_v28, %s8561_s18 }
 0x1c5   : > { %1018 = vst [vmem:[#allocation2 + $0x78] sm:$0x7] %v1017_v63  ;;  %v936_v30 = vpop.f32.mrf.mxu0  ;;  %v1221_v17 = vld [vmem:[#allocation2 + $0x4c] sm:$0x7]  ;;  %v10028_v32 = vld [vmem:[%s8920_s24 + $0xc4] sm:$0xf] }
 0x1c6   : > { %v1139_v45 = vor.u32 %v1138_v23, %v1135_v12  ;;  %v937_v11 = vadd.f32 %v9967_v13, %v936_v30  ;;  %1085 = vst [vmem:[#allocation2 + $0x7c] sm:$0xc] %v1084_v4  ;;  %v1019_v12 = vld [vmem:[#allocation2 + $0x84] sm:$0x7]  ;;  %v14594_v4 = vld [vmem:[#allocation9_spill] sm:$0xff] }
 0x1c7   : > { %2204 = vrot.lane.b32.xlu0 %v14584_v22, %s8560_s17  ;;  %v2057_v48 = vpop.permute.xlu1 %2056  ;;  %965 = vst.msk [vmem:[#allocation2 + $0x34] sm:$0xf] %vm374_vm6, %v14592_v56  ;;  %v1087_v30 = vld [vmem:[#allocation2 + $0x88] sm:$0xc] }
 0x1c8   : > { %2133 = vst.msk [vmem:[#allocation4 + $0x4c] sm:$0xf] %vm606_vm8, %v2057_v48  ;;  %v1140_v61 = vrot.slane %v1139_v45, 4  ;;  %v1219_v63 = vsel %vm9913_vm14, %v1139_v45, %v1218_v59  ;;  %v1117_v20 = vpack.c.bf16 %v937_v11, %v937_v11  ;;  %v1020_v59 = vsel %vm9906_vm0, 0, %v1019_v12  ;;  %v14595_v12 = vld [vmem:[#allocation12_spill] sm:$0xff] }
 0x1c9   : > { %v2055_v54 = vpop.permute.xlu0 %2054  ;;  %1220 = vst [vmem:[#allocation2 + $0x48] sm:$0xc] %v1219_v63 }
 0x1ca   : > { %2132 = vst.msk [vmem:[#allocation4 + $0x48] sm:$0xf] %vm606_vm8, %v2055_v54  ;;  %v1222_v23 = vsel %vm9906_vm0, %v1140_v61, %v1221_v17  ;;  %v1142_v48 = vshrl.u32 %v1117_v20, 16  ;;  %v1145_v54 = vshll.u32 %v1117_v20, 16  ;;  %v1088_v17 = vsel %vm9913_vm14, 0, %v1087_v30 }
 0x1cb   : > { %v2149_v22 = vpop.permute.xlu2 %2148  ;;  %2300 = vrot.lane.b32.xlu1 %v14594_v4, %s8561_s18  ;;  %1223 = vst [vmem:[#allocation2 + $0x4c] sm:$0x7] %v1222_v23  ;;  %v1224_v61 = vld [vmem:[#allocation2 + $0x54] sm:$0xc] }
 0x1cc   : > { %2244 = vst.msk [vmem:[#allocation4] sm:$0xf] %vm640_vm9, %v2149_v22  ;;  %v1144_v45 = vrot.slane %v1142_v48, 5  ;;  %v1147_v28 = vrot.slane %v1145_v54, 6  ;;  %2308 = vrot.lane.b32.xlu2 %v14595_v12, %s8561_s18  ;;  %v1227_v48 = vld [vmem:[#allocation2 + $0x58] sm:$0x7] }
 0x1cd   : > { %1021 = vst [vmem:[#allocation2 + $0x84] sm:$0x7] %v1020_v59  ;;  %v938_v63 = vpop.f32.mrf.mxu0 }
 0x1ce   : > { %v1148_v20 = vor.u32 %v1147_v28, %v1144_v45  ;;  %v939_v23 = vadd.f32 %v9967_v13, %v938_v63  ;;  %1089 = vst [vmem:[#allocation2 + $0x88] sm:$0xc] %v1088_v17  ;;  %v1022_v45 = vld [vmem:[#allocation2 + $0x90] sm:$0x7]  ;;  %v14596_v17 = vld [vmem:[#allocation14_spill] sm:$0xff] }
 0x1cf   : > { %2210 = vrot.lane.b32.xlu0 %v10028_v32, %s8560_s17  ;;  %v2063_v11 = vpop.permute.xlu1 %2062  ;;  %968 = vst.msk [vmem:[#allocation2 + $0x9c] sm:$0xf] %vm374_vm6, %v14592_v56  ;;  %v14597_v63 = vld [vmem:[#allocation6_spill] sm:$0xff] }
 0x1d0   : > { %2136 = vst.msk [vmem:[#allocation4 + $0x58] sm:$0xf] %vm606_vm8, %v2063_v11  ;;  %v1149_v54 = vrot.slane %v1148_v20, 4  ;;  %v1225_v4 = vsel %vm9913_vm14, %v1148_v20, %v1224_v61  ;;  %v1118_v59 = vpack.c.bf16 %v939_v23, %v939_v23  ;;  %v1023_v61 = vsel %vm9906_vm0, 0, %v1022_v45  ;;  %v1091_v20 = vld [vmem:[#allocation2 + $0x94] sm:$0xc] }
 0x1d1   : > { %v2061_v22 = vpop.permute.xlu0 %2060  ;;  %1226 = vst [vmem:[#allocation2 + $0x54] sm:$0xc] %v1225_v4  ;;  %v14598_v45 = vld [vmem:[#allocation19_spill] sm:$0xff] }
 0x1d2   : > { %2135 = vst.msk [vmem:[#allocation4 + $0x54] sm:$0xf] %vm606_vm8, %v2061_v22  ;;  %v1228_v28 = vsel %vm9906_vm0, %v1149_v54, %v1227_v48  ;;  %v1151_v11 = vshrl.u32 %v1118_v59, 16  ;;  %v1154_v22 = vshll.u32 %v1118_v59, 16  ;;  %v1092_v48 = vsel %vm9913_vm14, 0, %v1091_v20 }
 0x1d3   : > { %v2155_v30 = vpop.permute.xlu2 %2154  ;;  %2306 = vrot.lane.b32.xlu1 %v14596_v17, %s8561_s18  ;;  %1229 = vst [vmem:[#allocation2 + $0x58] sm:$0x7] %v1228_v28  ;;  %v1230_v54 = vld [vmem:[#allocation2 + $0x60] sm:$0xc] }
 0x1d4   : > { %2247 = vst.msk [vmem:[#allocation4 + $0xc] sm:$0xf] %vm640_vm9, %v2155_v30  ;;  %v1153_v23 = vrot.slane %v1151_v11, 5  ;;  %v1156_v4 = vrot.slane %v1154_v22, 6  ;;  %2314 = vrot.lane.b32.xlu2 %v14598_v45, %s8561_s18  ;;  %v1233_v11 = vld [vmem:[#allocation2 + $0x64] sm:$0x7] }
 0x1d5   : > { %1024 = vst [vmem:[#allocation2 + $0x90] sm:$0x7] %v1023_v61  ;;  %v941_v30 = vpop.f32.mrf.mxu0 }
 0x1d6   : > { %v1157_v17 = vor.u32 %v1156_v4, %v1153_v23  ;;  %v942_v28 = vadd.f32 %v9967_v13, %v941_v30  ;;  %1093 = vst [vmem:[#allocation2 + $0x94] sm:$0xc] %v1092_v48  ;;  %v14600_v48 = vld [vmem:[#allocation11_spill] sm:$0xff] }
 0x1d7   : > { %2304 = vrot.lane.b32.xlu0 %v14597_v63, %s8561_s18  ;;  %v2069_v12 = vpop.permute.xlu1 %2068  ;;  %969 = vst.msk [vmem:[#allocation2 + $0xa0] sm:$0xf] %vm374_vm6, %v14592_v56 }
 0x1d8   : > { %2139 = vst.msk [vmem:[#allocation4 + $0x64] sm:$0xf] %vm606_vm8, %v2069_v12  ;;  %v1158_v22 = vrot.slane %v1157_v17, 4  ;;  %v1231_v61 = vsel %vm9913_vm14, %v1157_v17, %v1230_v54  ;;  %v1119_v20 = vpack.c.bf16 %v942_v28, %v942_v28  ;;  %v1236_v28 = vld [vmem:[#allocation2 + $0x6c] sm:$0xc] }
 0x1d9   : > { %v2067_v59 = vpop.permute.xlu0 %2066  ;;  %1232 = vst [vmem:[#allocation2 + $0x60] sm:$0xc] %v1231_v61 }
 0x1da   : > { %2138 = vst.msk [vmem:[#allocation4 + $0x60] sm:$0xf] %vm606_vm8, %v2067_v59  ;;  %v1234_v12 = vsel %vm9906_vm0, %v1158_v22, %v1233_v11  ;;  %v1160_v23 = vshrl.u32 %v1119_v20, 16  ;;  %v1163_v4 = vshll.u32 %v1119_v20, 16  ;;  %v14599_v59 = vld [vmem:[#allocation20_spill] sm:$0xff] }
 0x1db   : > { %v2161_v63 = vpop.permute.xlu2 %2160  ;;  %2312 = vrot.lane.b32.xlu1 %v14599_v59, %s8561_s18  ;;  %1235 = vst [vmem:[#allocation2 + $0x64] sm:$0x7] %v1234_v12  ;;  %v1239_v12 = vld [vmem:[#allocation2 + $0x70] sm:$0x7] }
 0x1dc   : > { %2250 = vst.msk [vmem:[#allocation4 + $0x18] sm:$0xf] %vm640_vm9, %v2161_v63  ;;  %v1162_v17 = vrot.slane %v1160_v23, 5  ;;  %v1165_v54 = vrot.slane %v1163_v4, 6  ;;  %v14601_v63 = vld [vmem:[#allocation25_spill] sm:$0xff] }
 0x1dd   : > { %971 = vst.msk [vmem:[#allocation2 + $0xa8] sm:$0xf] %vm374_vm6, %v14592_v56  ;;  %v943_v22 = vpop.f32.mrf.mxu0  ;;  %2320 = vrot.lane.b32.xlu2 %v14601_v63, %s8561_s18  ;;  %v14603_v63 = vld [vmem:[#allocation17_spill] sm:$0xff] }
 0x1de   : > { %v1166_v61 = vor.u32 %v1165_v54, %v1162_v17  ;;  %v944_v20 = vadd.f32 %v9967_v13, %v943_v22  ;;  %972 = vst.msk [vmem:[#allocation2 + $0xac] sm:$0xf] %vm374_vm6, %v14592_v56  ;;  %v14602_v22 = vld [vmem:[#allocation27_spill] sm:$0xff] }
 0x1df   : > { %2310 = vrot.lane.b32.xlu0 %v14600_v48, %s8561_s18  ;;  %v2075_v30 = vpop.permute.xlu1 %2074  ;;  %974 = vst.msk [vmem:[#allocation2 + $0xb4] sm:$0xf] %vm374_vm6, %v14592_v56 }
 0x1e0   : > { %2142 = vst.msk [vmem:[#allocation4 + $0x70] sm:$0xf] %vm606_vm8, %v2075_v30  ;;  %v1167_v23 = vrot.slane %v1166_v61, 4  ;;  %v1237_v4 = vsel %vm9913_vm14, %v1166_v61, %v1236_v28  ;;  %v1120_v45 = vpack.c.bf16 %v944_v20, %v944_v20 }
 0x1e1   : > { %v2073_v11 = vpop.permute.xlu0 %2072  ;;  %1238 = vst [vmem:[#allocation2 + $0x6c] sm:$0xc] %v1237_v4  ;;  %v1242_v4 = vld [vmem:[#allocation2 + $0x78] sm:$0xc] }
 0x1e2   : > { %2141 = vst.msk [vmem:[#allocation4 + $0x6c] sm:$0xf] %vm606_vm8, %v2073_v11  ;;  %v1240_v17 = vsel %vm9906_vm0, %v1167_v23, %v1239_v12  ;;  %v1169_v54 = vshrl.u32 %v1120_v45, 16  ;;  %v1172_v11 = vshll.u32 %v1120_v45, 16 }
 0x1e3   : > { %v2167_v30 = vpop.permute.xlu2 %2166  ;;  %2318 = vrot.lane.b32.xlu1 %v14602_v22, %s8561_s18  ;;  %1241 = vst [vmem:[#allocation2 + $0x70] sm:$0x7] %v1240_v17 }
 0x1e4   : > { %2253 = vst.msk [vmem:[#allocation4 + $0x24] sm:$0xf] %vm640_vm9, %v2167_v30  ;;  %v1171_v28 = vrot.slane %v1169_v54, 5  ;;  %v1174_v61 = vrot.slane %v1172_v11, 6  ;;  %v14604_v30 = vld [vmem:[#allocation32_spill] sm:$0xff] }
 0x1e5   : > { %975 = vst.msk [vmem:[#allocation2 + $0xb8] sm:$0xf] %vm374_vm6, %v14592_v56  ;;  %v946_v45 = vpop.f32.mrf.mxu0  ;;  %2326 = vrot.lane.b32.xlu2 %v14604_v30, %s8561_s18  ;;  %v14606_v30 = vld [vmem:[#allocation22_spill] sm:$0xff] }
 0x1e6   : > { %v1175_v23 = vor.u32 %v1174_v61, %v1171_v28  ;;  %v947_v17 = vadd.f32 %v9967_v13, %v946_v45  ;;  %977 = vst.msk [vmem:[#allocation2 + $0xc0] sm:$0xf] %vm374_vm6, %v14592_v56  ;;  %v14605_v45 = vld [vmem:[#allocation34_spill] sm:$0xff] }
 0x1e7   : > { %2316 = vrot.lane.b32.xlu0 %v14603_v63, %s8561_s18  ;;  %v2081_v20 = vpop.permute.xlu1 %2080  ;;  %v1245_v63 = vld [vmem:[#allocation2 + $0x7c] sm:$0x7]  ;;  %978 = vst.msk [vmem:[#allocation2 + $0xc4] sm:$0xf] %vm374_vm6, %v14592_v56 }
 0x1e8   : > { %2145 = vst.msk [vmem:[#allocation4 + $0x7c] sm:$0xf] %vm606_vm8, %v2081_v20  ;;  %v1176_v54 = vrot.slane %v1175_v23, 4  ;;  %v1243_v11 = vsel %vm9913_vm14, %v1175_v23, %v1242_v4  ;;  %v1121_v22 = vpack.c.bf16 %v947_v17, %v947_v17 }
 0x1e9   : > { %v2079_v12 = vpop.permute.xlu0 %2078  ;;  %1244 = vst [vmem:[#allocation2 + $0x78] sm:$0xc] %v1243_v11  ;;  %v1248_v11 = vld [vmem:[#allocation2 + $0x84] sm:$0xc] }
 0x1ea   : > { %2144 = vst.msk [vmem:[#allocation4 + $0x78] sm:$0xf] %vm606_vm8, %v2079_v12  ;;  %v1246_v28 = vsel %vm9906_vm0, %v1176_v54, %v1245_v63  ;;  %v1178_v61 = vshrl.u32 %v1121_v22, 16  ;;  %v1181_v12 = vshll.u32 %v1121_v22, 16 }
 0x1eb   : > { %v2173_v20 = vpop.permute.xlu2 %2172  ;;  %2324 = vrot.lane.b32.xlu1 %v14605_v45, %s8561_s18  ;;  %1247 = vst [vmem:[#allocation2 + $0x7c] sm:$0x7] %v1246_v28 }
 0x1ec   : > { %2256 = vst.msk [vmem:[#allocation4 + $0x30] sm:$0xf] %vm640_vm9, %v2173_v20  ;;  %v1180_v4 = vrot.slane %v1178_v61, 5  ;;  %v1183_v23 = vrot.slane %v1181_v12, 6  ;;  %v14607_v20 = vld [vmem:[#allocation38_spill] sm:$0xff] }
 0x1ed   : > { %980 = vst.msk [vmem:[#allocation2 + $0xcc] sm:$0xf] %vm374_vm6, %v14592_v56  ;;  %v948_v22 = vpop.f32.mrf.mxu0  ;;  %2332 = vrot.lane.b32.xlu2 %v14607_v20, %s8561_s18 }
 0x1ee   : > { %v1184_v54 = vor.u32 %v1183_v23, %v1180_v4  ;;  %v949_v28 = vadd.f32 %v9967_v13, %v948_v22  ;;  %981 = vst.msk [vmem:[#allocation2 + $0xd0] sm:$0xf] %vm374_vm6, %v14592_v56  ;;  %v14609_v22 = vld [vmem:[#allocation30_spill] sm:$0xff] }
 0x1ef   : > { %2322 = vrot.lane.b32.xlu0 %v14606_v30, %s8561_s18  ;;  %v2153_v17 = vpop.permute.xlu1 %2152  ;;  %v1251_v30 = vld [vmem:[#allocation2 + $0x88] sm:$0x7]  ;;  %957 = vst.msk [vmem:[#allocation2 + $0x14] sm:$0x1] %vm953_vm7, %v14592_v56 }
 0x1f0   : > { %2246 = vst.msk [vmem:[#allocation4 + $0x8] sm:$0xf] %vm640_vm9, %v2153_v17  ;;  %v1185_v61 = vrot.slane %v1184_v54, 4  ;;  %v1249_v12 = vsel %vm9913_vm14, %v1184_v54, %v1248_v11  ;;  %v1122_v17 = vpack.c.bf16 %v949_v28, %v949_v28 }
 0x1f1   : > { %v2151_v63 = vpop.permute.xlu0 %2150  ;;  %1250 = vst [vmem:[#allocation2 + $0x84] sm:$0xc] %v1249_v12  ;;  %v1254_v12 = vld [vmem:[#allocation2 + $0x90] sm:$0xc] }
 0x1f2   : > { %2245 = vst.msk [vmem:[#allocation4 + $0x4] sm:$0xf] %vm640_vm9, %v2151_v63  ;;  %v1252_v4 = vsel %vm9906_vm0, %v1185_v61, %v1251_v30  ;;  %v1187_v23 = vshrl.u32 %v1122_v17, 16  ;;  %v1190_v13 = vshll.u32 %v1122_v17, 16  ;;  %v14608_v63 = vld [vmem:[#allocation39_spill] sm:$0xff] }
 0x1f3   : > { %v2179_v45 = vpop.permute.xlu2 %2178  ;;  %2330 = vrot.lane.b32.xlu1 %v14608_v63, %s8561_s18  ;;  %1253 = vst [vmem:[#allocation2 + $0x88] sm:$0x7] %v1252_v4  ;;  %v1257_v17 = vld [vmem:[#allocation2 + $0x94] sm:$0x7] }
 0x1f4   : > { %2259 = vst.msk [vmem:[#allocation4 + $0x3c] sm:$0xf] %vm640_vm9, %v2179_v45  ;;  %v1189_v11 = vrot.slane %v1187_v23, 5  ;;  %v1192_v54 = vrot.slane %v1190_v13, 6  ;;  %v14610_v45 = vld [vmem:[#allocation41_spill] sm:$0xff] }
 0x1f5   : > { %1050 = vst.msk [vmem:[#allocation2 + $0x14] sm:$0x1] %vm953_vm7, %v14592_v56  ;;  %2338 = vrot.lane.b32.xlu2 %v14610_v45, %s8561_s18  ;;  %v10190_v45 = vld [vmem:[%s8920_s24 + $0xc8] sm:$0x1] }
 0x1f6   : > { %v1193_v61 = vor.u32 %v1192_v54, %v1189_v11  ;;  %954 = vst.msk [vmem:[#allocation2 + $0x8] sm:$0x1] %vm953_vm7, %v14592_v56  ;;  %v14611_v54 = vld [vmem:[#allocation42_spill] sm:$0xff] }
 0x1f7   : > { %2328 = vrot.lane.b32.xlu0 %v14609_v22, %s8561_s18  ;;  %v2159_v28 = vpop.permute.xlu1 %2158  ;;  %960 = vst.msk [vmem:[#allocation2 + $0x20] sm:$0x1] %vm953_vm7, %v14592_v56 }
 0x1f8   : > { %2249 = vst.msk [vmem:[#allocation4 + $0x14] sm:$0xf] %vm640_vm9, %v2159_v28  ;;  %v1194_v4 = vrot.slane %v1193_v61, 4  ;;  %v1255_v23 = vsel %vm9913_vm14, %v1193_v61, %v1254_v12  ;;  %v14612_v28 = vld [vmem:[#allocation35_spill] sm:$0xff]  ;;  %v14613_v61 = vld [vmem:[#allocation44_spill] sm:$0xff] }
 0x1f9   : > { %v2157_v30 = vpop.permute.xlu0 %2156  ;;  %1256 = vst [vmem:[#allocation2 + $0x90] sm:$0xc] %v1255_v23  ;;  %v2286_v23 = vshll.u32 %v10028_v32, 16 }
 0x1fa   : > { %2248 = vst.msk [vmem:[#allocation4 + $0x10] sm:$0xf] %vm640_vm9, %v2157_v30  ;;  %v1258_v11 = vsel %vm9906_vm0, %v1194_v4, %v1257_v17  ;;  %v14614_v4 = vld [vmem:[#allocation40_spill] sm:$0xff] }
 0x1fb   : > { %v2185_v13 = vpop.permute.xlu2 %2184  ;;  %2336 = vrot.lane.b32.xlu1 %v14611_v54, %s8561_s18  ;;  %1259 = vst [vmem:[#allocation2 + $0x94] sm:$0x7] %v1258_v11 }
 0x1fc   : > { %2262 = vst.msk [vmem:[#allocation4 + $0x48] sm:$0xf] %vm640_vm9, %v2185_v13  ;;  %v2290_v13 = vshrl.u32 %v10028_v32, 16 }
 0x1fd   : > { %963 = vst.msk [vmem:[#allocation2 + $0x2c] sm:$0x1] %vm953_vm7, %v14592_v56  ;;  %2344 = vrot.lane.b32.xlu2 %v14613_v61, %s8561_s18 }
 0x1fe   : > { %966 = vst.msk [vmem:[#allocation2 + $0x38] sm:$0x1] %vm953_vm7, %v14592_v56 }
 0x1ff   : > { %2334 = vrot.lane.b32.xlu0 %v14612_v28, %s8561_s18  ;;  %v2165_v30 = vpop.permute.xlu1 %2164  ;;  %970 = vst.msk [vmem:[#allocation2 + $0xa4] sm:$0x1] %vm953_vm7, %v14592_v56 }
 0x200   : > { %2252 = vst.msk [vmem:[#allocation4 + $0x20] sm:$0xf] %vm640_vm9, %v2165_v30 }
 0x201   : > { %v2163_v12 = vpop.permute.xlu0 %2162  ;;  %973 = vst.msk [vmem:[#allocation2 + $0xb0] sm:$0x1] %vm953_vm7, %v14592_v56 }
 0x202   : > { %2251 = vst.msk [vmem:[#allocation4 + $0x1c] sm:$0xf] %vm640_vm9, %v2163_v12  ;;  %v2288_v12 = vrot.slane %v2286_v23, 5  ;;  %v14615_v23 = vld [vmem:[#allocation43_spill] sm:$0xff] }
 0x203   : > { %v2191_v17 = vpop.permute.xlu2 %2190  ;;  %2342 = vrot.lane.b32.xlu1 %v9489_v27, %s8561_s18  ;;  %976 = vst.msk [vmem:[#allocation2 + $0xbc] sm:$0x1] %vm953_vm7, %v14592_v56 }
 0x204   : > { %2265 = vst.msk [vmem:[#allocation4 + $0x54] sm:$0xf] %vm640_vm9, %v2191_v17  ;;  %v2292_v17 = vrot.slane %v2290_v13, 4 }
 0x205   : > { %979 = vst.msk [vmem:[#allocation2 + $0xc8] sm:$0x1] %vm953_vm7, %v14592_v56  ;;  %2350 = vrot.lane.b32.xlu2 %v9514_v7, %s8561_s18  ;;  %v2282_v7 = vrot.slane %v2280_v34, 5 }
 0x206   : > { %982 = vst.msk [vmem:[#allocation2 + $0xd4] sm:$0x1] %vm953_vm7, %v14592_v56  ;;  %v2293_v13 = vor.u32 %v2292_v17, %v2288_v12 }
 0x207   : > { %2340 = vrot.lane.b32.xlu0 %v14614_v4, %s8561_s18  ;;  %v2171_v11 = vpop.permute.xlu1 %2170  ;;  %1066 = vst.msk [vmem:[#allocation2 + $0x44] sm:$0x1] %vm953_vm7, %v14592_v56 }
 0x208   : > { %2255 = vst.msk [vmem:[#allocation4 + $0x2c] sm:$0xf] %vm640_vm9, %v2171_v11  ;;  %v2296_v11 = vshll.u32 %v10190_v45, 16  ;;  %v2294_v17 = vrot.slane %v2293_v13, 4 }
 0x209   : > { %v2169_v30 = vpop.permute.xlu0 %2168  ;;  %1070 = vst.msk [vmem:[#allocation2 + $0x50] sm:$0x1] %vm953_vm7, %v14592_v56 }
 0x20a   : > { %2254 = vst.msk [vmem:[#allocation4 + $0x28] sm:$0xf] %vm640_vm9, %v2169_v30  ;;  %v2279_v30 = vrot.slane %v2277_v33, 4 }
 0x20b   : > { %v2197_v61 = vpop.permute.xlu2 %2196  ;;  %2348 = vrot.lane.b32.xlu1 %v9520_v55, %s8561_s18  ;;  %1074 = vst.msk [vmem:[#allocation2 + $0x5c] sm:$0x1] %vm953_vm7, %v14592_v56 }
 0x20c   : > { %2268 = vst.msk [vmem:[#allocation4 + $0x60] sm:$0xf] %vm640_vm9, %v2197_v61  ;;  %v2283_v55 = vor.u32 %v2282_v7, %v2279_v30 }
 0x20d   : > { %1078 = vst.msk [vmem:[#allocation2 + $0x68] sm:$0x1] %vm953_vm7, %v14592_v56  ;;  %2356 = vrot.lane.b32.xlu2 %v9544_v60, %s8561_s18 }
 0x20e   : > { %1082 = vst.msk [vmem:[#allocation2 + $0x74] sm:$0x1] %vm953_vm7, %v14592_v56  ;;  %v2284_v33 = vrot.slane %v2283_v55, 4 }
 0x20f   : > { %2346 = vrot.lane.b32.xlu0 %v14615_v23, %s8561_s18  ;;  %v2177_v4 = vpop.permute.xlu1 %2176  ;;  %v2298_v23 = vrot.slane %v2296_v11, 5  ;;  %1086 = vst.msk [vmem:[#allocation2 + $0x80] sm:$0x1] %vm953_vm7, %v14592_v56 }
 0x210   : > { %2258 = vst.msk [vmem:[#allocation4 + $0x38] sm:$0xf] %vm640_vm9, %v2177_v4 }
 0x211   : > { %v2175_v61 = vpop.permute.xlu0 %2174  ;;  %1090 = vst.msk [vmem:[#allocation2 + $0x8c] sm:$0x1] %vm953_vm7, %v14592_v56  ;;  %v10223_v7 = vsel %vm8677_vm5, %v2294_v17, %v2298_v23  ;;  %v10235_v23 = vsel %vm8677_vm5, %v2284_v33, %v2288_v12 }
 0x212   : > { %2257 = vst.msk [vmem:[#allocation4 + $0x34] sm:$0xf] %vm640_vm9, %v2175_v61 }
 0x213   : > { %v2203_v34 = vpop.permute.xlu2 %2202  ;;  %2354 = vrot.lane.b32.xlu1 %v9551_v50, %s8561_s18  ;;  %1094 = vst.msk [vmem:[#allocation2 + $0x98] sm:$0x1] %vm953_vm7, %v14592_v56 }
 0x214   : > { %2271 = vst.msk [vmem:[#allocation4 + $0x6c] sm:$0xf] %vm640_vm9, %v2203_v34 }
 0x215   : > { %1046 = vst.msk [vmem:[#allocation2 + $0x8] sm:$0x1] %vm953_vm7, %v14592_v56  ;;  %2362 = vrot.lane.b32.xlu2 %v10223_v7, %s8561_s18 }
 0x216   : > { %1054 = vst.msk [vmem:[#allocation2 + $0x20] sm:$0x1] %vm953_vm7, %v14592_v56 }
 0x217   : > { %2352 = vrot.lane.b32.xlu0 %v9499_v3, %s8561_s18  ;;  %v2183_v4 = vpop.permute.xlu1 %2182  ;;  %1058 = vst.msk [vmem:[#allocation2 + $0x2c] sm:$0x1] %vm953_vm7, %v14592_v56 }
 0x218   : > { %2261 = vst.msk [vmem:[#allocation4 + $0x44] sm:$0xf] %vm640_vm9, %v2183_v4  ;;  %v14616_v4 = vld [vmem:[#allocation49_spill] sm:$0xff] }
 0x219   : > { %v2181_v13 = vpop.permute.xlu0 %2180  ;;  %1062 = vst.msk [vmem:[#allocation2 + $0x38] sm:$0x1] %vm953_vm7, %v14592_v56 }
 0x21a   : > { %2260 = vst.msk [vmem:[#allocation4 + $0x40] sm:$0xf] %vm640_vm9, %v2181_v13  ;;  %v14617_v13 = vld [vmem:[#allocation47_spill] sm:$0xff] }
 0x21b   : > { %v2209_v55 = vpop.permute.xlu2 %2208  ;;  %2360 = vrot.lane.b32.xlu1 %v10235_v23, %s8561_s18  ;;  %1098 = vst.msk [vmem:[#allocation2 + $0xa4] sm:$0x1] %vm953_vm7, %v14592_v56 }
 0x21c   : > { %2274 = vst.msk [vmem:[#allocation4 + $0x78] sm:$0xf] %vm640_vm9, %v2209_v55 }
 0x21d   : > { %1102 = vst.msk [vmem:[#allocation2 + $0xb0] sm:$0x1] %vm953_vm7, %v14592_v56  ;;  %2440 = vrot.lane.b32.xlu2 %v9597_v14, %s8562_s19 }
 0x21e   : > { %1106 = vst.msk [vmem:[#allocation2 + $0xbc] sm:$0x1] %vm953_vm7, %v14592_v56 }
 0x21f   : > { %2358 = vrot.lane.b32.xlu0 %v9532_v37, %s8561_s18  ;;  %v2189_v12 = vpop.permute.xlu1 %2188  ;;  %1110 = vst.msk [vmem:[#allocation2 + $0xc8] sm:$0x1] %vm953_vm7, %v14592_v56 }
 0x220   : > { %2264 = vst.msk [vmem:[#allocation4 + $0x50] sm:$0xf] %vm640_vm9, %v2189_v12 }
 0x221   : > { %v2187_v11 = vpop.permute.xlu0 %2186  ;;  %1114 = vst.msk [vmem:[#allocation2 + $0xd4] sm:$0x1] %vm953_vm7, %v14592_v56  ;;  %vm14721_vm7 = vcmask 60448  }
 0x222   : > { %2263 = vst.msk [vmem:[#allocation4 + $0x4c] sm:$0xf] %vm640_vm9, %v2187_v11  ;;  %v14618_v11 = vld [vmem:[#allocation51_spill] sm:$0xff] }
 0x223   : > { %v2303_v30 = vpop.permute.xlu2 %2302  ;;  %2438 = vrot.lane.b32.xlu1 %v9605_v25, %s8562_s19 }
 0x224   : > { %2397 = vst.msk [vmem:[#allocation4 + $0x4] sm:$0xf] %vm687_vm10, %v2303_v30 }
 0x225   : > { %2446 = vrot.lane.b32.xlu2 %v9628_v43, %s8562_s19 }
 0x227   : > { %2436 = vrot.lane.b32.xlu0 %v9559_v58, %s8562_s19  ;;  %v2195_v61 = vpop.permute.xlu1 %2194 }
 0x228   : > { %2267 = vst.msk [vmem:[#allocation4 + $0x5c] sm:$0xf] %vm640_vm9, %v2195_v61  ;;  %v14619_v61 = vld [vmem:[#allocation52_spill] sm:$0xff] }
 0x229   : > { %v2193_v17 = vpop.permute.xlu0 %2192 }
 0x22a   : > { %2266 = vst.msk [vmem:[#allocation4 + $0x58] sm:$0xf] %vm640_vm9, %v2193_v17  ;;  %v14620_v17 = vld [vmem:[#allocation48_spill] sm:$0xff] }
 0x22b   : > { %v2309_v34 = vpop.permute.xlu2 %2308  ;;  %2444 = vrot.lane.b32.xlu1 %v9633_v15, %s8562_s19 }
 0x22c   : > { %2400 = vst.msk [vmem:[#allocation4 + $0x10] sm:$0xf] %vm687_vm10, %v2309_v34 }
 0x22d   : > { %2452 = vrot.lane.b32.xlu2 %v9658_v44, %s8562_s19 }
 0x22f   : > { %2442 = vrot.lane.b32.xlu0 %v9583_v51, %s8562_s19  ;;  %v2201_v25 = vpop.permute.xlu1 %2200 }
 0x230   : > { %2270 = vst.msk [vmem:[#allocation4 + $0x68] sm:$0xf] %vm640_vm9, %v2201_v25 }
 0x231   : > { %v2199_v58 = vpop.permute.xlu0 %2198 }
 0x232   : > { %2269 = vst.msk [vmem:[#allocation4 + $0x64] sm:$0xf] %vm640_vm9, %v2199_v58  ;;  %v14621_v58 = vld [vmem:[#allocation54_spill] sm:$0xff] }
 0x233   : > { %v2315_v33 = vpop.permute.xlu2 %2314  ;;  %2450 = vrot.lane.b32.xlu1 %v14616_v4, %s8562_s19 }
 0x234   : > { %2403 = vst.msk [vmem:[#allocation4 + $0x1c] sm:$0xf] %vm687_vm10, %v2315_v33 }
 0x235   : > { %2458 = vrot.lane.b32.xlu2 %v14618_v11, %s8562_s19 }
 0x237   : > { %2448 = vrot.lane.b32.xlu0 %v14617_v13, %s8562_s19  ;;  %v2207_v55 = vpop.permute.xlu1 %2206 }
 0x238   : > { %2273 = vst.msk [vmem:[#allocation4 + $0x74] sm:$0xf] %vm640_vm9, %v2207_v55  ;;  %v14622_v55 = vld [vmem:[#allocation16_spill] sm:$0xff] }
 0x239   : > { %v2205_v12 = vpop.permute.xlu0 %2204 }
 0x23a   : > { %2272 = vst.msk [vmem:[#allocation4 + $0x70] sm:$0xf] %vm640_vm9, %v2205_v12  ;;  %v14623_v12 = vld [vmem:[#allocation50_spill] sm:$0xff] }
 0x23b   : > { %v2321_v30 = vpop.permute.xlu2 %2320  ;;  %2456 = vrot.lane.b32.xlu1 %v14619_v61, %s8562_s19 }
 0x23c   : > { %2406 = vst.msk [vmem:[#allocation4 + $0x28] sm:$0xf] %vm687_vm10, %v2321_v30 }
 0x23d   : > { %2464 = vrot.lane.b32.xlu2 %v14621_v58, %s8562_s19 }
 0x23f   : > { %2454 = vrot.lane.b32.xlu0 %v14620_v17, %s8562_s19  ;;  %v2301_v34 = vpop.permute.xlu1 %2300 }
 0x240   : > { %2396 = vst.msk [vmem:[#allocation4] sm:$0xf] %vm687_vm10, %v2301_v34 }
 0x241   : > { %v2211_v25 = vpop.permute.xlu0 %2210 }
 0x242   : > { %2275 = vst.msk [vmem:[#allocation4 + $0x7c] sm:$0xf] %vm640_vm9, %v2211_v25  ;;  %v14624_v25 = vld [vmem:[#allocation53_spill] sm:$0xff] }
 0x243   : > { %v2327_v33 = vpop.permute.xlu2 %2326  ;;  %2462 = vrot.lane.b32.xlu1 %v14622_v55, %s8562_s19 }
 0x244   : > { %2409 = vst.msk [vmem:[#allocation4 + $0x34] sm:$0xf] %vm687_vm10, %v2327_v33 }
 0x245   : > { %2470 = vrot.lane.b32.xlu2 %v9754_v16, %s8562_s19 }
 0x247   : > { %2460 = vrot.lane.b32.xlu0 %v14623_v12, %s8562_s19  ;;  %v2307_v30 = vpop.permute.xlu1 %2306 }
 0x248   : > { %2399 = vst.msk [vmem:[#allocation4 + $0xc] sm:$0xf] %vm687_vm10, %v2307_v30  ;;  %v14625_v30 = vld [vmem:[#allocation13_spill] sm:$0xff] }
 0x249   : > { %v2305_v56 = vpop.permute.xlu0 %2304 }
 0x24a   : > { %2398 = vst.msk [vmem:[#allocation4 + $0x8] sm:$0xf] %vm687_vm10, %v2305_v56  ;;  %v14626_v56 = vld [vmem:[#allocation36_spill] sm:$0xff] }
 0x24b   : > { %v2333_v34 = vpop.permute.xlu2 %2332  ;;  %2468 = vrot.lane.b32.xlu1 %v9759_v19, %s8562_s19 }
 0x24c   : > { %2412 = vst.msk [vmem:[#allocation4 + $0x40] sm:$0xf] %vm687_vm10, %v2333_v34  ;;  %v14627_v34 = vld [vmem:[#allocation8_spill] sm:$0xff] }
 0x24d   : > { %2476 = vrot.lane.b32.xlu2 %v14625_v30, %s8562_s19 }
 0x24f   : > { %2466 = vrot.lane.b32.xlu0 %v14624_v25, %s8562_s19  ;;  %v2313_v33 = vpop.permute.xlu1 %2312 }
 0x250   : > { %2402 = vst.msk [vmem:[#allocation4 + $0x18] sm:$0xf] %vm687_vm10, %v2313_v33 }
 0x251   : > { %v2311_v58 = vpop.permute.xlu0 %2310 }
 0x252   : > { %2401 = vst.msk [vmem:[#allocation4 + $0x14] sm:$0xf] %vm687_vm10, %v2311_v58 }
 0x253   : > { %v2339_v16 = vpop.permute.xlu2 %2338  ;;  %2474 = vrot.lane.b32.xlu1 %v14626_v56, %s8562_s19 }
 0x254   : > { %2415 = vst.msk [vmem:[#allocation4 + $0x4c] sm:$0xf] %vm687_vm10, %v2339_v16  ;;  %v14628_v16 = vld [vmem:[#allocation55_spill] sm:$0xff] }
 0x255   : > { %2482 = vrot.lane.b32.xlu2 %v9808_v24, %s8562_s19 }
 0x257   : > { %2472 = vrot.lane.b32.xlu0 %v14627_v34, %s8562_s19  ;;  %v2319_v19 = vpop.permute.xlu1 %2318 }
 0x258   : > { %2405 = vst.msk [vmem:[#allocation4 + $0x24] sm:$0xf] %vm687_vm10, %v2319_v19 }
 0x259   : > { %v2317_v25 = vpop.permute.xlu0 %2316 }
 0x25a   : > { %2404 = vst.msk [vmem:[#allocation4 + $0x20] sm:$0xf] %vm687_vm10, %v2317_v25  ;;  %v14629_v25 = vld [vmem:[#allocation56_spill] sm:$0xff] }
 0x25b   : > { %v2345_v33 = vpop.permute.xlu2 %2344  ;;  %2480 = vrot.lane.b32.xlu1 %v9813_v6, %s8562_s19 }
 0x25c   : > { %2418 = vst.msk [vmem:[#allocation4 + $0x58] sm:$0xf] %vm687_vm10, %v2345_v33 }
 0x25d   : > { %2488 = vrot.lane.b32.xlu2 %v9834_v47, %s8562_s19 }
 0x25f   : > { %2478 = vrot.lane.b32.xlu0 %v14628_v16, %s8562_s19  ;;  %v2325_v58 = vpop.permute.xlu1 %2324 }
 0x260   : > { %2408 = vst.msk [vmem:[#allocation4 + $0x30] sm:$0xf] %vm687_vm10, %v2325_v58 }
 0x261   : > { %v2323_v30 = vpop.permute.xlu0 %2322 }
 0x262   : > { %2407 = vst.msk [vmem:[#allocation4 + $0x2c] sm:$0xf] %vm687_vm10, %v2323_v30  ;;  %v2431_v30 = vrot.slane %v10028_v32, 5 }
 0x263   : > { %v2351_v19 = vpop.permute.xlu2 %2350  ;;  %2486 = vrot.lane.b32.xlu1 %v9840_v35, %s8562_s19 }
 0x264   : > { %2421 = vst.msk [vmem:[#allocation4 + $0x64] sm:$0xf] %vm687_vm10, %v2351_v19  ;;  %v2433_v19 = vrot.slane %v2431_v30, 4 }
 0x265   : > { %2494 = vrot.lane.b32.xlu2 %v9855_v26, %s8562_s19 }
 0x267   : > { %2484 = vrot.lane.b32.xlu0 %v14629_v25, %s8562_s19  ;;  %v2331_v33 = vpop.permute.xlu1 %2330  ;;  %v8126_v25 = vrot.slane %v9994_v40, 9 }
 0x268   : > { %2411 = vst.msk [vmem:[#allocation4 + $0x3c] sm:$0xf] %vm687_vm10, %v2331_v33  ;;  %v2434_v33 = vrot.slane %v10190_v45, 5 }
 0x269   : > { %v2329_v24 = vpop.permute.xlu0 %2328 }
 0x26a   : > { %2410 = vst.msk [vmem:[#allocation4 + $0x38] sm:$0xf] %vm687_vm10, %v2329_v24 }
 0x26b   : > { %v2357_v58 = vpop.permute.xlu2 %2356  ;;  %2492 = vrot.lane.b32.xlu1 %v9859_v49, %s8562_s19 }
 0x26c   : > { %2424 = vst.msk [vmem:[#allocation4 + $0x70] sm:$0xf] %vm687_vm10, %v2357_v58  ;;  %v10357_v58 = vsel %vm8637_vm2, %v2433_v19, %v2434_v33  ;;  %v14631_v19 = vld [vmem:[#allocation21_spill] sm:$0xff]  ;;  %v14632_v33 = vld [vmem:[#allocation23_spill] sm:$0xff] }
 0x26d   : > { %2566 = vrot.lane.b32.xlu2 %v8983_v53, %s8563_s20 }
 0x26f   : > { %2490 = vrot.lane.b32.xlu0 %v9822_v31, %s8562_s19  ;;  %v2337_v47 = vpop.permute.xlu1 %2336  ;;  %v10361_v31 = vsel %vm8637_vm2, %v8126_v25, %v2431_v30 }
 0x270   : > { %2414 = vst.msk [vmem:[#allocation4 + $0x48] sm:$0xf] %vm687_vm10, %v2337_v47 }
 0x271   : > { %v2335_v24 = vpop.permute.xlu0 %2334 }
 0x272   : > { %2413 = vst.msk [vmem:[#allocation4 + $0x44] sm:$0xf] %vm687_vm10, %v2335_v24 }
 0x273   : > { %v2363_v26 = vpop.permute.xlu2 %2362  ;;  %2498 = vrot.lane.b32.xlu1 %v10357_v58, %s8562_s19 }
 0x274   : > { %2427 = vst.msk [vmem:[#allocation4 + $0x7c] sm:$0xf] %vm687_vm10, %v2363_v26 }
 0x275   : > { %2572 = vrot.lane.b32.xlu2 %v8969_v41, %s8563_s20 }
 0x277   : > { %2496 = vrot.lane.b32.xlu0 %v10361_v31, %s8562_s19  ;;  %v2343_v53 = vpop.permute.xlu1 %2342 }
 0x278   : > { %2417 = vst.msk [vmem:[#allocation4 + $0x54] sm:$0xf] %vm687_vm10, %v2343_v53 }
 0x279   : > { %v2341_v47 = vpop.permute.xlu0 %2340 }
 0x27a   : > { %2416 = vst.msk [vmem:[#allocation4 + $0x50] sm:$0xf] %vm687_vm10, %v2341_v47  ;;  %v14634_v47 = vld [vmem:[#allocation26_spill] sm:$0xff] }
 0x27b   : > { %v2441_v45 = vpop.permute.xlu2 %2440  ;;  %2570 = vrot.lane.b32.xlu1 %v9054_v39, %s8563_s20 }
 0x27c   : > { %2534 = vst.msk [vmem:[#allocation4 + $0x8] sm:$0xf] %vm725_vm11, %v2441_v45 }
 0x27d   : > { %2578 = vrot.lane.b32.xlu2 %v9067_v46, %s8563_s20 }
 0x27f   : > { %2568 = vrot.lane.b32.xlu0 %v8948_v36, %s8563_s20  ;;  %v2349_v26 = vpop.permute.xlu1 %2348 }
 0x280   : > { %2420 = vst.msk [vmem:[#allocation4 + $0x60] sm:$0xf] %vm687_vm10, %v2349_v26  ;;  %v14635_v26 = vld [vmem:[#allocation29_spill] sm:$0xff] }
 0x281   : > { %v2347_v25 = vpop.permute.xlu0 %2346 }
 0x282   : > { %2419 = vst.msk [vmem:[#allocation4 + $0x5c] sm:$0xf] %vm687_vm10, %v2347_v25  ;;  %v14636_v25 = vld [vmem:[#allocation31_spill] sm:$0xff] }
 0x283   : > { %v2447_v41 = vpop.permute.xlu2 %2446  ;;  %2576 = vrot.lane.b32.xlu1 %v9008_v62, %s8563_s20 }
 0x284   : > { %2537 = vst.msk [vmem:[#allocation4 + $0x14] sm:$0xf] %vm725_vm11, %v2447_v41 }
 0x285   : > { %2584 = vrot.lane.b32.xlu2 %v9027_v18, %s8563_s20 }
 0x287   : > { %2574 = vrot.lane.b32.xlu0 %v9106_v42, %s8563_s20  ;;  %v2355_v39 = vpop.permute.xlu1 %2354 }
 0x288   : > { %2423 = vst.msk [vmem:[#allocation4 + $0x6c] sm:$0xf] %vm687_vm10, %v2355_v39 }
 0x289   : > { %v2353_v36 = vpop.permute.xlu0 %2352 }
 0x28a   : > { %2422 = vst.msk [vmem:[#allocation4 + $0x68] sm:$0xf] %vm687_vm10, %v2353_v36  ;;  %v14637_v36 = vld [vmem:[#allocation33_spill] sm:$0xff] }
 0x28b   : > { %v2453_v46 = vpop.permute.xlu2 %2452  ;;  %2582 = vrot.lane.b32.xlu1 %v9163_v5, %s8563_s20 }
 0x28c   : > { %2540 = vst.msk [vmem:[#allocation4 + $0x20] sm:$0xf] %vm725_vm11, %v2453_v46 }
 0x28d   : > { %2590 = vrot.lane.b32.xlu2 %v9077_v52, %s8563_s20 }
 0x28f   : > { %2580 = vrot.lane.b32.xlu0 %v9001_v57, %s8563_s20  ;;  %v2361_v62 = vpop.permute.xlu1 %2360 }
 0x290   : > { %2426 = vst.msk [vmem:[#allocation4 + $0x78] sm:$0xf] %vm687_vm10, %v2361_v62  ;;  %v14638_v62 = vld [vmem:[#allocation37_spill] sm:$0xff] }
 0x291   : > { %v2359_v42 = vpop.permute.xlu0 %2358 }
 0x292   : > { %2425 = vst.msk [vmem:[#allocation4 + $0x74] sm:$0xf] %vm687_vm10, %v2359_v42  ;;  %v14639_v42 = vld [vmem:[#allocation28_spill] sm:$0xff] }
 0x293   : > { %v2459_v18 = vpop.permute.xlu2 %2458  ;;  %2588 = vrot.lane.b32.xlu1 %v9096_v1, %s8563_s20 }
 0x294   : > { %2543 = vst.msk [vmem:[#allocation4 + $0x2c] sm:$0xf] %vm725_vm11, %v2459_v18  ;;  %v10450_v18 = vld [vmem:[%s8920_s24 + $0xcc] sm:$0xf] }
 0x295   : > { %2596 = vrot.lane.b32.xlu2 %v14563_v10, %s8563_s20 }
 0x297   : > { %2586 = vrot.lane.b32.xlu0 %v9232_v8, %s8563_s20  ;;  %v2439_v5 = vpop.permute.xlu1 %2438 }
 0x298   : > { %2533 = vst.msk [vmem:[#allocation4 + $0x4] sm:$0xf] %vm725_vm11, %v2439_v5 }
 0x299   : > { %v2437_v57 = vpop.permute.xlu0 %2436 }
 0x29a   : > { %2532 = vst.msk [vmem:[#allocation4] sm:$0xf] %vm725_vm11, %v2437_v57 }
 0x29b   : > { %v2465_v52 = vpop.permute.xlu2 %2464  ;;  %2594 = vrot.lane.b32.xlu1 %v14568_v21, %s8563_s20  ;;  %v14630_v21 = vld [vmem:[#allocation18_spill] sm:$0xff] }
 0x29c   : > { %2546 = vst.msk [vmem:[#allocation4 + $0x38] sm:$0xf] %vm725_vm11, %v2465_v52 }
 0x29d   : > { %2602 = vrot.lane.b32.xlu2 %v14572_v9, %s8563_s20 }
 0x29f   : > { %2592 = vrot.lane.b32.xlu0 %v9085_v38, %s8563_s20  ;;  %v2445_v1 = vpop.permute.xlu1 %2444 }
 0x2a0   : > { %2536 = vst.msk [vmem:[#allocation4 + $0x10] sm:$0xf] %vm725_vm11, %v2445_v1 }
 0x2a1   : > { %v2443_v8 = vpop.permute.xlu0 %2442 }
 0x2a2   : > { %2535 = vst.msk [vmem:[#allocation4 + $0xc] sm:$0xf] %vm725_vm11, %v2443_v8 }
 0x2a3   : > { %v2471_v10 = vpop.permute.xlu2 %2470  ;;  %2600 = vrot.lane.b32.xlu1 %v14562_v2, %s8563_s20  ;;  %v14633_v2 = vld [vmem:[#allocation15_spill] sm:$0xff] }
 0x2a4   : > { %2549 = vst.msk [vmem:[#allocation4 + $0x44] sm:$0xf] %vm725_vm11, %v2471_v10  ;;  %v14640_v10 = vld [vmem:[#allocation14_spill] sm:$0xff] }
 0x2a5   : > { %2608 = vrot.lane.b32.xlu2 %v14631_v19, %s8563_s20 }
 0x2a7   : > { %2598 = vrot.lane.b32.xlu0 %v14630_v21, %s8563_s20  ;;  %v2451_v30 = vpop.permute.xlu1 %2450 }
 0x2a8   : > { %2539 = vst.msk [vmem:[#allocation4 + $0x1c] sm:$0xf] %vm725_vm11, %v2451_v30  ;;  %v10466_v30 = vld [vmem:[%s8920_s24 + $0xd0] sm:$0xf] }
 0x2a9   : > { %v2449_v38 = vpop.permute.xlu0 %2448 }
 0x2aa   : > { %2538 = vst.msk [vmem:[#allocation4 + $0x18] sm:$0xf] %vm725_vm11, %v2449_v38  ;;  %v14641_v38 = vld [vmem:[#allocation6_spill] sm:$0xff] }
 0x2ab   : > { %v2477_v9 = vpop.permute.xlu2 %2476  ;;  %2606 = vrot.lane.b32.xlu1 %v14632_v33, %s8563_s20 }
 0x2ac   : > { %2552 = vst.msk [vmem:[#allocation4 + $0x50] sm:$0xf] %vm725_vm11, %v2477_v9  ;;  %v14642_v9 = vld [vmem:[#allocation12_spill] sm:$0xff] }
 0x2ad   : > { %2614 = vrot.lane.b32.xlu2 %v14634_v47, %s8563_s20 }
 0x2af   : > { %2604 = vrot.lane.b32.xlu0 %v14633_v2, %s8563_s20  ;;  %v2457_v24 = vpop.permute.xlu1 %2456 }
 0x2b0   : > { %2542 = vst.msk [vmem:[#allocation4 + $0x28] sm:$0xf] %vm725_vm11, %v2457_v24  ;;  %v14643_v24 = vld [vmem:[#allocation27_spill] sm:$0xff] }
 0x2b1   : > { %v2455_v53 = vpop.permute.xlu0 %2454 }
 0x2b2   : > { %2541 = vst.msk [vmem:[#allocation4 + $0x24] sm:$0xf] %vm725_vm11, %v2455_v53  ;;  %v14644_v53 = vld [vmem:[#allocation17_spill] sm:$0xff] }
 0x2b3   : > { %v2483_v45 = vpop.permute.xlu2 %2482  ;;  %2612 = vrot.lane.b32.xlu1 %v14635_v26, %s8563_s20  ;;  %v14646_v26 = vld [vmem:[#allocation34_spill] sm:$0xff] }
 0x2b4   : > { %2555 = vst.msk [vmem:[#allocation4 + $0x5c] sm:$0xf] %vm725_vm11, %v2483_v45 }
 0x2b5   : > { %2620 = vrot.lane.b32.xlu2 %v14637_v36, %s8563_s20 }
 0x2b7   : > { %2610 = vrot.lane.b32.xlu0 %v14636_v25, %s8563_s20  ;;  %v2463_v41 = vpop.permute.xlu1 %2462 }
 0x2b8   : > { %2545 = vst.msk [vmem:[#allocation4 + $0x34] sm:$0xf] %vm725_vm11, %v2463_v41  ;;  %v14647_v41 = vld [vmem:[#allocation22_spill] sm:$0xff] }
 0x2b9   : > { %v2461_v39 = vpop.permute.xlu0 %2460 }
 0x2ba   : > { %2544 = vst.msk [vmem:[#allocation4 + $0x30] sm:$0xf] %vm725_vm11, %v2461_v39  ;;  %v14648_v39 = vld [vmem:[#allocation25_spill] sm:$0xff] }
 0x2bb   : > { %v2489_v46 = vpop.permute.xlu2 %2488  ;;  %2618 = vrot.lane.b32.xlu1 %v14638_v62, %s8563_s20 }
 0x2bc   : > { %2558 = vst.msk [vmem:[#allocation4 + $0x68] sm:$0xf] %vm725_vm11, %v2489_v46 }
 0x2bd   : > { %2626 = vrot.lane.b32.xlu2 %v10450_v18, %s8563_s20 }
 0x2bf   : > { %2616 = vrot.lane.b32.xlu0 %v14639_v42, %s8563_s20  ;;  %v2469_v5 = vpop.permute.xlu1 %2468  ;;  %v14649_v42 = vld [vmem:[#allocation32_spill] sm:$0xff] }
 0x2c0   : > { %2548 = vst.msk [vmem:[#allocation4 + $0x40] sm:$0xf] %vm725_vm11, %v2469_v5 }
 0x2c1   : > { %v2467_v57 = vpop.permute.xlu0 %2466 }
 0x2c2   : > { %2547 = vst.msk [vmem:[#allocation4 + $0x3c] sm:$0xf] %vm725_vm11, %v2467_v57 }
 0x2c3   : > { %v2495_v52 = vpop.permute.xlu2 %2494  ;;  %2624 = vrot.lane.b32.xlu1 %v10028_v32, %s8563_s20 }
 0x2c4   : > { %2561 = vst.msk [vmem:[#allocation4 + $0x74] sm:$0xf] %vm725_vm11, %v2495_v52  ;;  %v2695_v52 = vshrl.u32 %v10450_v18, 16 }
 0x2c5   : > { %2720 = vrot.lane.b32.xlu2 %v14640_v10, %s8564_s25 }
 0x2c7   : > { %2622 = vrot.lane.b32.xlu0 %v9994_v40, %s8563_s20  ;;  %v2475_v1 = vpop.permute.xlu1 %2474 }
 0x2c8   : > { %2551 = vst.msk [vmem:[#allocation4 + $0x4c] sm:$0xf] %vm725_vm11, %v2475_v1  ;;  %v2698_v1 = vshll.u32 %v10450_v18, 16 }
 0x2c9   : > { %v2473_v8 = vpop.permute.xlu0 %2472 }
 0x2ca   : > { %2550 = vst.msk [vmem:[#allocation4 + $0x48] sm:$0xf] %vm725_vm11, %v2473_v8  ;;  %v2697_v8 = vrot.slane %v2695_v52, 4  ;;  %v2700_v10 = vrot.slane %v2698_v1, 5 }
 0x2cb   : > { %v2567_v21 = vpop.permute.xlu2 %2566  ;;  %2718 = vrot.lane.b32.xlu1 %v14641_v38, %s8564_s25 }
 0x2cc   : > { %2662 = vst.msk [vmem:[#allocation4] sm:$0xf] %vm759_vm12, %v2567_v21  ;;  %v2704_v21 = vshll.u32 %v10466_v30, 16 }
 0x2cd   : > { %2726 = vrot.lane.b32.xlu2 %v14599_v59, %s8564_s25 }
 0x2cf   : > { %2628 = vrot.lane.b32.xlu0 %v10466_v30, %s8563_s20  ;;  %v2481_v32 = vpop.permute.xlu1 %2480 }
 0x2d0   : > { %2554 = vst.msk [vmem:[#allocation4 + $0x58] sm:$0xf] %vm725_vm11, %v2481_v32  ;;  %v14650_v32 = vld [vmem:[#allocation40_spill] sm:$0xff] }
 0x2d1   : > { %v2479_v40 = vpop.permute.xlu0 %2478 }
 0x2d2   : > { %2553 = vst.msk [vmem:[#allocation4 + $0x54] sm:$0xf] %vm725_vm11, %v2479_v40  ;;  %v14651_v40 = vld [vmem:[#allocation41_spill] sm:$0xff] }
 0x2d3   : > { %v2573_v19 = vpop.permute.xlu2 %2572  ;;  %2724 = vrot.lane.b32.xlu1 %v14600_v48, %s8564_s25  ;;  %v14645_v48 = vld [vmem:[#allocation19_spill] sm:$0xff] }
 0x2d4   : > { %2665 = vst.msk [vmem:[#allocation4 + $0xc] sm:$0xf] %vm759_vm12, %v2573_v19 }
 0x2d5   : > { %2732 = vrot.lane.b32.xlu2 %v14643_v24, %s8564_s25 }
 0x2d7   : > { %2722 = vrot.lane.b32.xlu0 %v14642_v9, %s8564_s25  ;;  %v2487_v33 = vpop.permute.xlu1 %2486 }
 0x2d8   : > { %2557 = vst.msk [vmem:[#allocation4 + $0x64] sm:$0xf] %vm725_vm11, %v2487_v33 }
 0x2d9   : > { %v2485_v2 = vpop.permute.xlu0 %2484 }
 0x2da   : > { %2556 = vst.msk [vmem:[#allocation4 + $0x60] sm:$0xf] %vm725_vm11, %v2485_v2  ;;  %v14652_v2 = vld [vmem:[#allocation46_spill] sm:$0xff] }
 0x2db   : > { %v2579_v59 = vpop.permute.xlu2 %2578  ;;  %2730 = vrot.lane.b32.xlu1 %v14644_v53, %s8564_s25  ;;  %v2708_v53 = vshrl.u32 %v10466_v30, 16 }
 0x2dc   : > { %2668 = vst.msk [vmem:[#allocation4 + $0x18] sm:$0xf] %vm759_vm12, %v2579_v59  ;;  %v14653_v59 = vld [vmem:[#allocation43_spill] sm:$0xff] }
 0x2dd   : > { %2738 = vrot.lane.b32.xlu2 %v14646_v26, %s8564_s25  ;;  %v2710_v26 = vrot.slane %v2708_v53, 4 }
 0x2df   : > { %2728 = vrot.lane.b32.xlu0 %v14645_v48, %s8564_s25  ;;  %v2493_v47 = vpop.permute.xlu1 %2492  ;;  %v14654_v48 = vld [vmem:[#allocation44_spill] sm:$0xff] }
 0x2e0   : > { %2560 = vst.msk [vmem:[#allocation4 + $0x70] sm:$0xf] %vm725_vm11, %v2493_v47 }
 0x2e1   : > { %v2491_v45 = vpop.permute.xlu0 %2490 }
 0x2e2   : > { %2559 = vst.msk [vmem:[#allocation4 + $0x6c] sm:$0xf] %vm725_vm11, %v2491_v45 }
 0x2e3   : > { %v2585_v25 = vpop.permute.xlu2 %2584  ;;  %2736 = vrot.lane.b32.xlu1 %v14647_v41, %s8564_s25  ;;  %v10547_v41 = vld [vmem:[%s8920_s24 + $0xd4] sm:$0x1] }
 0x2e4   : > { %2671 = vst.msk [vmem:[#allocation4 + $0x24] sm:$0xf] %vm759_vm12, %v2585_v25 }
 0x2e5   : > { %2744 = vrot.lane.b32.xlu2 %v14608_v63, %s8564_s25 }
 0x2e7   : > { %2734 = vrot.lane.b32.xlu0 %v14648_v39, %s8564_s25  ;;  %v2499_v36 = vpop.permute.xlu1 %2498  ;;  %v14655_v39 = vld [vmem:[#allocation45_spill] sm:$0xff] }
 0x2e8   : > { %2563 = vst.msk [vmem:[#allocation4 + $0x7c] sm:$0xf] %vm725_vm11, %v2499_v36 }
 0x2e9   : > { %v2497_v46 = vpop.permute.xlu0 %2496 }
 0x2ea   : > { %2562 = vst.msk [vmem:[#allocation4 + $0x78] sm:$0xf] %vm725_vm11, %v2497_v46  ;;  %v2714_v46 = vshll.u32 %v10547_v41, 16 }
 0x2eb   : > { %v2591_v62 = vpop.permute.xlu2 %2590  ;;  %2742 = vrot.lane.b32.xlu1 %v14609_v22, %s8564_s25 }
 0x2ec   : > { %2674 = vst.msk [vmem:[#allocation4 + $0x30] sm:$0xf] %vm759_vm12, %v2591_v62 }
 0x2ed   : > { %2750 = vrot.lane.b32.xlu2 %v14611_v54, %s8564_s25 }
 0x2ef   : > { %2740 = vrot.lane.b32.xlu0 %v14649_v42, %s8564_s25  ;;  %v2571_v5 = vpop.permute.xlu1 %2570 }
 0x2f0   : > { %2664 = vst.msk [vmem:[#allocation4 + $0x8] sm:$0xf] %vm759_vm12, %v2571_v5  ;;  %v2716_v5 = vrot.slane %v2714_v46, 5 }
 0x2f1   : > { %v2569_v57 = vpop.permute.xlu0 %2568 }
 0x2f2   : > { %2663 = vst.msk [vmem:[#allocation4 + $0x4] sm:$0xf] %vm759_vm12, %v2569_v57 }
 0x2f3   : > { %v2597_v63 = vpop.permute.xlu2 %2596  ;;  %2748 = vrot.lane.b32.xlu1 %v14612_v28, %s8564_s25  ;;  %v2701_v28 = vor.u32 %v2700_v10, %v2697_v8  ;;  %v986_v8 = vld [vmem:[#allocation2] sm:$0x7]  ;;  %v14656_v10 = vld [vmem:[#allocation10_spill] sm:$0xff] }
 0x2f4   : > { %2677 = vst.msk [vmem:[#allocation4 + $0x3c] sm:$0xf] %vm759_vm12, %v2597_v63 }
 0x2f5   : > { %2756 = vrot.lane.b32.xlu2 %v9489_v27, %s8564_s25  ;;  %v2702_v19 = vrot.slane %v2701_v28, 4 }
 0x2f7   : > { %2746 = vrot.lane.b32.xlu0 %v14607_v20, %s8564_s25  ;;  %v2577_v22 = vpop.permute.xlu1 %2576  ;;  %v2706_v20 = vrot.slane %v2704_v21, 5 }
 0x2f8   : > { %2667 = vst.msk [vmem:[#allocation4 + $0x14] sm:$0xf] %vm759_vm12, %v2577_v22 }
 0x2f9   : > { %v2575_v54 = vpop.permute.xlu0 %2574  ;;  %v2707_v33 = vsel %vm8677_vm5, %v2702_v19, %v2706_v20  ;;  %v2711_v36 = vor.u32 %v2710_v26, %v2706_v20  ;;  %v1047_v19 = vld [vmem:[#allocation2 + $0x10] sm:$0xc] }
 0x2fa   : > { %2666 = vst.msk [vmem:[#allocation4 + $0x10] sm:$0xf] %vm759_vm12, %v2575_v54  ;;  %v987_v54 = vsel %vm9906_vm0, 0, %v986_v8  ;;  %v10696_v8 = vld [vmem:[#allocation2 + $0x14] sm:$0x1] }
 0x2fb   : > { %v2603_v38 = vpop.permute.xlu2 %2602  ;;  %2754 = vrot.lane.b32.xlu1 %v14650_v32, %s8564_s25  ;;  %v2712_v42 = vrot.slane %v2711_v36, 4  ;;  %988 = vst [vmem:[#allocation2] sm:$0x7] %v987_v54  ;;  %v14660_v32 = vld [vmem:[#allocation54_spill] sm:$0xff] }
 0x2fc   : > { %2680 = vst.msk [vmem:[#allocation4 + $0x48] sm:$0xf] %vm759_vm12, %v2603_v38 }
 0x2fd   : > { %2762 = vrot.lane.b32.xlu2 %v14652_v2, %s8564_s25 }
 0x2ff   : > { %2752 = vrot.lane.b32.xlu0 %v14651_v40, %s8564_s25  ;;  %v2583_v9 = vpop.permute.xlu1 %2582 }
 0x300   : > { %2670 = vst.msk [vmem:[#allocation4 + $0x20] sm:$0xf] %vm759_vm12, %v2583_v9  ;;  %v1048_v9 = vsel %vm9913_vm14, 0, %v1047_v19 }
 0x301   : > { %v2581_v27 = vpop.permute.xlu0 %2580  ;;  %1049 = vst [vmem:[#allocation2 + $0x10] sm:$0xc] %v1048_v9  ;;  %v992_v9 = vld [vmem:[#allocation2 + $0x18] sm:$0x7] }
 0x302   : > { %2669 = vst.msk [vmem:[#allocation4 + $0x1c] sm:$0xf] %vm759_vm12, %v2581_v27  ;;  %v10656_v26 = vld [vmem:[#allocation2] sm:$0xf] }
 0x303   : > { %v2609_v24 = vpop.permute.xlu2 %2608  ;;  %2760 = vrot.lane.b32.xlu1 %v14653_v59, %s8564_s25  ;;  %v2849_v59 = vrot.slane %v10466_v30, 5  ;;  %v3109_v36 = vshll.u32 %v10656_v26, 16 }
 0x304   : > { %2683 = vst.msk [vmem:[#allocation4 + $0x54] sm:$0xf] %vm759_vm12, %v2609_v24 }
 0x305   : > { %2768 = vrot.lane.b32.xlu2 %v9551_v50, %s8564_s25 }
 0x307   : > { %2758 = vrot.lane.b32.xlu0 %v14654_v48, %s8564_s25  ;;  %v2589_v47 = vpop.permute.xlu1 %2588 }
 0x308   : > { %2673 = vst.msk [vmem:[#allocation4 + $0x2c] sm:$0xf] %vm759_vm12, %v2589_v47  ;;  %v989_v47 = vld [vmem:[#allocation2 + $0xc] sm:$0x7] }
 0x309   : > { %v2587_v45 = vpop.permute.xlu0 %2586 }
 0x30a   : > { %2672 = vst.msk [vmem:[#allocation4 + $0x28] sm:$0xf] %vm759_vm12, %v2587_v45 }
 0x30b   : > { %v2615_v25 = vpop.permute.xlu2 %2614  ;;  %2766 = vrot.lane.b32.xlu1 %v9499_v3, %s8564_s25  ;;  %v2717_v3 = vsel %vm8677_vm5, %v2712_v42, %v2716_v5  ;;  %v3111_v5 = vrot.slane %v3109_v36, 5 }
 0x30c   : > { %2686 = vst.msk [vmem:[#allocation4 + $0x60] sm:$0xf] %vm759_vm12, %v2615_v25  ;;  %v14663_v25 = vld [vmem:[#allocation56_spill] sm:$0xff] }
 0x30d   : > { %2774 = vrot.lane.b32.xlu2 %v10235_v23, %s8564_s25 }
 0x30f   : > { %2764 = vrot.lane.b32.xlu0 %v14655_v39, %s8564_s25  ;;  %v2595_v62 = vpop.permute.xlu1 %2594  ;;  %v14664_v39 = vld [vmem:[#allocation57_spill] sm:$0xff] }
 0x310   : > { %2676 = vst.msk [vmem:[#allocation4 + $0x38] sm:$0xf] %vm759_vm12, %v2595_v62 }
 0x311   : > { %v2593_v50 = vpop.permute.xlu0 %2592 }
 0x312   : > { %2675 = vst.msk [vmem:[#allocation4 + $0x34] sm:$0xf] %vm759_vm12, %v2593_v50  ;;  %v10669_v50 = vld [vmem:[#allocation2 + $0x10] sm:$0xf] }
 0x313   : > { %v2621_v57 = vpop.permute.xlu2 %2620  ;;  %2772 = vrot.lane.b32.xlu1 %v9532_v37, %s8564_s25 }
 0x314   : > { %2689 = vst.msk [vmem:[#allocation4 + $0x6c] sm:$0xf] %vm759_vm12, %v2621_v57 }
 0x315   : > { %2780 = vrot.lane.b32.xlu2 %v2717_v3, %s8564_s25 }
 0x317   : > { %2770 = vrot.lane.b32.xlu0 %v9544_v60, %s8564_s25  ;;  %v2601_v63 = vpop.permute.xlu1 %2600 }
 0x318   : > { %2679 = vst.msk [vmem:[#allocation4 + $0x44] sm:$0xf] %vm759_vm12, %v2601_v63  ;;  %v3139_v63 = vshll.u32 %v10669_v50, 16 }
 0x319   : > { %v2599_v23 = vpop.permute.xlu0 %2598 }
 0x31a   : > { %2678 = vst.msk [vmem:[#allocation4 + $0x40] sm:$0xf] %vm759_vm12, %v2599_v23  ;;  %v3143_v23 = vshrl.u32 %v10669_v50, 16 }
 0x31b   : > { %v2627_v52 = vpop.permute.xlu2 %2626  ;;  %2778 = vrot.lane.b32.xlu1 %v2707_v33, %s8564_s25  ;;  %v14661_v33 = vld [vmem:[#allocation24_spill] sm:$0xff] }
 0x31c   : > { %2692 = vst.msk [vmem:[#allocation4 + $0x78] sm:$0xf] %vm759_vm12, %v2627_v52  ;;  %v14665_v52 = vld [vmem:[#allocation58_spill] sm:$0xff] }
 0x31d   : > { %2858 = vrot.lane.b32.xlu2 %v9633_v15, %s8565_s26 }
 0x31f   : > { %2776 = vrot.lane.b32.xlu0 %v10223_v7, %s8564_s25  ;;  %v2607_v37 = vpop.permute.xlu1 %2606 }
 0x320   : > { %2682 = vst.msk [vmem:[#allocation4 + $0x50] sm:$0xf] %vm759_vm12, %v2607_v37 }
 0x321   : > { %v2605_v60 = vpop.permute.xlu0 %2604 }
 0x322   : > { %2681 = vst.msk [vmem:[#allocation4 + $0x4c] sm:$0xf] %vm759_vm12, %v2605_v60  ;;  %v1055_v60 = vld [vmem:[#allocation2 + $0x28] sm:$0xc] }
 0x323   : > { %v2721_v1 = vpop.permute.xlu2 %2720  ;;  %2856 = vrot.lane.b32.xlu1 %v9583_v51, %s8565_s26 }
 0x324   : > { %2815 = vst.msk [vmem:[#allocation4 + $0x4] sm:$0xf] %vm806_vm13, %v2721_v1  ;;  %v14666_v1 = vld [vmem:[#allocation59_spill] sm:$0xff] }
 0x325   : > { %2864 = vrot.lane.b32.xlu2 %v14616_v4, %s8565_s26 }
 0x327   : > { %2854 = vrot.lane.b32.xlu0 %v9597_v14, %s8565_s26  ;;  %v2613_v22 = vpop.permute.xlu1 %2612 }
 0x328   : > { %2685 = vst.msk [vmem:[#allocation4 + $0x5c] sm:$0xf] %vm759_vm12, %v2613_v22 }
 0x329   : > { %v2611_v7 = vpop.permute.xlu0 %2610 }
 0x32a   : > { %2684 = vst.msk [vmem:[#allocation4 + $0x58] sm:$0xf] %vm759_vm12, %v2611_v7 }
 0x32b   : > { %v2727_v15 = vpop.permute.xlu2 %2726  ;;  %2862 = vrot.lane.b32.xlu1 %v14617_v13, %s8565_s26 }
 0x32c   : > { %2818 = vst.msk [vmem:[#allocation4 + $0x10] sm:$0xf] %vm806_vm13, %v2727_v15 }
 0x32d   : > { %2870 = vrot.lane.b32.xlu2 %v14619_v61, %s8565_s26 }
 0x32f   : > { %2860 = vrot.lane.b32.xlu0 %v9628_v43, %s8565_s26  ;;  %v2619_v51 = vpop.permute.xlu1 %2618 }
 0x330   : > { %2688 = vst.msk [vmem:[#allocation4 + $0x68] sm:$0xf] %vm759_vm12, %v2619_v51  ;;  %v1051_v51 = vld [vmem:[#allocation2 + $0x1c] sm:$0xc] }
 0x331   : > { %v2617_v14 = vpop.permute.xlu0 %2616 }
 0x332   : > { %2687 = vst.msk [vmem:[#allocation4 + $0x64] sm:$0xf] %vm759_vm12, %v2617_v14 }
 0x333   : > { %v2733_v4 = vpop.permute.xlu2 %2732  ;;  %2868 = vrot.lane.b32.xlu1 %v14620_v17, %s8565_s26 }
 0x334   : > { %2821 = vst.msk [vmem:[#allocation4 + $0x1c] sm:$0xf] %vm806_vm13, %v2733_v4  ;;  %v1056_v4 = vsel %vm9913_vm14, 0, %v1055_v60 }
 0x335   : > { %2876 = vrot.lane.b32.xlu2 %v14622_v55, %s8565_s26  ;;  %1057 = vst [vmem:[#allocation2 + $0x28] sm:$0xc] %v1056_v4 }
 0x337   : > { %2866 = vrot.lane.b32.xlu0 %v9658_v44, %s8565_s26  ;;  %v2625_v13 = vpop.permute.xlu1 %2624 }
 0x338   : > { %2691 = vst.msk [vmem:[#allocation4 + $0x74] sm:$0xf] %vm759_vm12, %v2625_v13 }
 0x339   : > { %v2623_v43 = vpop.permute.xlu0 %2622 }
 0x33a   : > { %2690 = vst.msk [vmem:[#allocation4 + $0x70] sm:$0xf] %vm759_vm12, %v2623_v43  ;;  %v10688_v43 = vrot.slane %v3139_v63, 5 }
 0x33b   : > { %v2739_v61 = vpop.permute.xlu2 %2738  ;;  %2874 = vrot.lane.b32.xlu1 %v14623_v12, %s8565_s26  ;;  %v1043_v12 = vld [vmem:[#allocation2 + $0x4] sm:$0xc] }
 0x33c   : > { %2824 = vst.msk [vmem:[#allocation4 + $0x28] sm:$0xf] %vm806_vm13, %v2739_v61  ;;  %v1044_v28 = vsel %vm9913_vm14, 0, %v1043_v12  ;;  %v3145_v61 = vrot.slane %v3143_v23, 4 }
 0x33d   : > { %2882 = vrot.lane.b32.xlu2 %v14656_v10, %s8565_s26  ;;  %1045 = vst [vmem:[#allocation2 + $0x4] sm:$0xc] %v1044_v28  ;;  %v3149_v28 = vshll.u32 %v10696_v8, 16 }
 0x33f   : > { %2872 = vrot.lane.b32.xlu0 %v14618_v11, %s8565_s26  ;;  %v2719_v17 = vpop.permute.xlu1 %2718  ;;  %v14658_v11 = vld [vmem:[#allocation53_spill] sm:$0xff] }
 0x340   : > { %2814 = vst.msk [vmem:[#allocation4] sm:$0xf] %vm806_vm13, %v2719_v17 }
 0x341   : > { %v2629_v44 = vpop.permute.xlu0 %2628 }
 0x342   : > { %2693 = vst.msk [vmem:[#allocation4 + $0x7c] sm:$0xf] %vm759_vm12, %v2629_v44  ;;  %v1052_v44 = vsel %vm9913_vm14, 0, %v1051_v51 }
 0x343   : > { %v2745_v21 = vpop.permute.xlu2 %2744  ;;  %2880 = vrot.lane.b32.xlu1 %v14658_v11, %s8565_s26  ;;  %1053 = vst [vmem:[#allocation2 + $0x1c] sm:$0xc] %v1052_v44 }
 0x344   : > { %2827 = vst.msk [vmem:[#allocation4 + $0x34] sm:$0xf] %vm806_vm13, %v2745_v21  ;;  %v10671_v3 = vld [vmem:[#allocation2 + $0x4] sm:$0xf] }
 0x345   : > { %2888 = vrot.lane.b32.xlu2 %v14626_v56, %s8565_s26  ;;  %v8127_v56 = vrot.slane %v10450_v18, 9  ;;  %v14662_v18 = vld [vmem:[#allocation13_spill] sm:$0xff]  ;;  %v3115_v7 = vshll.u32 %v10671_v3, 16  ;;  %v3119_v54 = vshrl.u32 %v10671_v3, 16 }
 0x347   : > { %2878 = vrot.lane.b32.xlu0 %v14660_v32, %s8565_s26  ;;  %v2725_v20 = vpop.permute.xlu1 %2724  ;;  %v3117_v12 = vrot.slane %v3115_v7, 5  ;;  %v3121_v19 = vrot.slane %v3119_v54, 4  ;;  %v10744_v7 = vld [vmem:[#allocation2 + $0x20] sm:$0x1]  ;;  %v10756_v54 = vld [vmem:[#allocation2 + $0x48] sm:$0xf] }
 0x348   : > { %2817 = vst.msk [vmem:[#allocation4 + $0xc] sm:$0xf] %vm806_vm13, %v2725_v20  ;;  %v10702_v20 = vld [vmem:[#allocation2 + $0x8] sm:$0x1] }
 0x349   : > { %v2723_v40 = vpop.permute.xlu0 %2722 }
 0x34a   : > { %2816 = vst.msk [vmem:[#allocation4 + $0x8] sm:$0xf] %vm806_vm13, %v2723_v40 }
 0x34b   : > { %v2751_v27 = vpop.permute.xlu2 %2750  ;;  %2886 = vrot.lane.b32.xlu1 %v14627_v34, %s8565_s26  ;;  %v10646_v34 = vsel %vm8637_vm2, %v8127_v56, %v2849_v59  ;;  %v2852_v56 = vrot.slane %v10547_v41, 5  ;;  %v998_v41 = vld [vmem:[#allocation2 + $0x30] sm:$0x7] }
 0x34c   : > { %2830 = vst.msk [vmem:[#allocation4 + $0x40] sm:$0xf] %vm806_vm13, %v2751_v27  ;;  %v1059_v27 = vld [vmem:[#allocation2 + $0x34] sm:$0xc]  ;;  %v999_v23 = vsel %vm9906_vm0, 0, %v998_v41 }
 0x34d   : > { %2894 = vrot.lane.b32.xlu2 %v9813_v6, %s8565_s26  ;;  %1000 = vst [vmem:[#allocation2 + $0x30] sm:$0x7] %v999_v23 }
 0x34f   : > { %2884 = vrot.lane.b32.xlu0 %v14661_v33, %s8565_s26  ;;  %v2731_v2 = vpop.permute.xlu1 %2730  ;;  %v14667_v33 = vld [vmem:[#allocation60_spill] sm:$0xff] }
 0x350   : > { %2820 = vst.msk [vmem:[#allocation4 + $0x18] sm:$0xf] %vm806_vm13, %v2731_v2 }
 0x351   : > { %v2729_v24 = vpop.permute.xlu0 %2728 }
 0x352   : > { %2819 = vst.msk [vmem:[#allocation4 + $0x14] sm:$0xf] %vm806_vm13, %v2729_v24  ;;  %v2851_v24 = vrot.slane %v2849_v59, 4  ;;  %v3125_v59 = vshll.u32 %v10702_v20, 16 }
 0x353   : > { %v2757_v53 = vpop.permute.xlu2 %2756  ;;  %2892 = vrot.lane.b32.xlu1 %v14628_v16, %s8565_s26  ;;  %v990_v16 = vsel %vm9906_vm0, 0, %v989_v47  ;;  %v1060_v47 = vsel %vm9913_vm14, 0, %v1059_v27 }
 0x354   : > { %2833 = vst.msk [vmem:[#allocation4 + $0x4c] sm:$0xf] %vm806_vm13, %v2757_v53 }
 0x355   : > { %2900 = vrot.lane.b32.xlu2 %v9840_v35, %s8565_s26  ;;  %991 = vst [vmem:[#allocation2 + $0xc] sm:$0x7] %v990_v16  ;;  %v3106_v35 = vshrl.u32 %v10656_v26, 16 }
 0x356   : > { %1061 = vst [vmem:[#allocation2 + $0x34] sm:$0xc] %v1060_v47 }
 0x357   : > { %2890 = vrot.lane.b32.xlu0 %v14662_v18, %s8565_s26  ;;  %v2737_v6 = vpop.permute.xlu1 %2736  ;;  %v3108_v42 = vrot.slane %v3106_v35, 4  ;;  %v2853_v35 = vsel %vm8637_vm2, %v2851_v24, %v2852_v56 }
 0x358   : > { %2823 = vst.msk [vmem:[#allocation4 + $0x24] sm:$0xf] %vm806_vm13, %v2737_v6 }
 0x359   : > { %v2735_v48 = vpop.permute.xlu0 %2734  ;;  %v3112_v22 = vor.u32 %v3111_v5, %v3108_v42  ;;  %v10730_v5 = vld [vmem:[#allocation2 + $0x28] sm:$0xf] }
 0x35a   : > { %2822 = vst.msk [vmem:[#allocation4 + $0x20] sm:$0xf] %vm806_vm13, %v2735_v48  ;;  %v3187_v51 = vshll.u32 %v10730_v5, 16  ;;  %v3191_v56 = vshrl.u32 %v10730_v5, 16 }
 0x35b   : > { %v2763_v45 = vpop.permute.xlu2 %2762  ;;  %2898 = vrot.lane.b32.xlu1 %v14663_v25, %s8565_s26  ;;  %v3113_v21 = vrot.slane %v3112_v22, 4 }
 0x35c   : > { %2836 = vst.msk [vmem:[#allocation4 + $0x58] sm:$0xf] %vm806_vm13, %v2763_v45  ;;  %v10678_v37 = vld [vmem:[#allocation2 + $0xc] sm:$0xf]  ;;  %v3151_v45 = vrot.slane %v3149_v28, 5 }
 0x35d   : > { %2906 = vrot.lane.b32.xlu2 %v9859_v49, %s8565_s26  ;;  %v995_v49 = vld [vmem:[#allocation2 + $0x24] sm:$0x7]  ;;  %v3130_v17 = vshrl.u32 %v10678_v37, 16  ;;  %v3133_v10 = vshll.u32 %v10678_v37, 16  ;;  %v3118_v2 = vsel %vm8677_vm5, %v3113_v21, %v3117_v12 }
 0x35e   : > { %v996_v15 = vsel %vm9906_vm0, 0, %v995_v49  ;;  %v10737_v49 = vld [vmem:[#allocation2 + $0x3c] sm:$0xf] }
 0x35f   : > { %2896 = vrot.lane.b32.xlu0 %v14664_v39, %s8565_s26  ;;  %v2743_v46 = vpop.permute.xlu1 %2742  ;;  %997 = vst [vmem:[#allocation2 + $0x24] sm:$0x7] %v996_v15  ;;  %v3132_v32 = vrot.slane %v3130_v17, 4  ;;  %v3135_v40 = vrot.slane %v3133_v10, 5  ;;  %v3122_v39 = vor.u32 %v3121_v19, %v3117_v12  ;;  %v3173_v12 = vshll.u32 %v10744_v7, 16 }
 0x360   : > { %2826 = vst.msk [vmem:[#allocation4 + $0x30] sm:$0xf] %vm806_vm13, %v2743_v46 }
 0x361   : > { %v2741_v62 = vpop.permute.xlu0 %2740  ;;  %v3136_v25 = vor.u32 %v3135_v40, %v3132_v32  ;;  %v3123_v22 = vrot.slane %v3122_v39, 4  ;;  %v10770_v40 = vrot.slane %v3187_v51, 5  ;;  %v10798_v39 = vld [vmem:[#allocation2 + $0x40] sm:$0xf] }
 0x362   : > { %2825 = vst.msk [vmem:[#allocation4 + $0x2c] sm:$0xf] %vm806_vm13, %v2741_v62  ;;  %v10728_v62 = vld [vmem:[#allocation2 + $0x1c] sm:$0xf] }
 0x363   : > { %v2769_v57 = vpop.permute.xlu2 %2768  ;;  %2904 = vrot.lane.b32.xlu1 %v14665_v52, %s8565_s26  ;;  %v3167_v63 = vshrl.u32 %v10728_v62, 16  ;;  %v3127_v52 = vrot.slane %v3125_v59, 5  ;;  %14673 = vst [vmem:[#allocation39_spill] sm:$0xff] %v10798_v39 }
 0x364   : > { %2839 = vst.msk [vmem:[#allocation4 + $0x64] sm:$0xf] %vm806_vm13, %v2769_v57  ;;  %v3163_v57 = vshll.u32 %v10728_v62, 16 }
 0x365   : > { %2912 = vrot.lane.b32.xlu2 %v10357_v58, %s8565_s26  ;;  %v3146_v58 = vor.u32 %v3145_v61, %v10688_v43  ;;  %v3169_v4 = vrot.slane %v3167_v63, 4  ;;  %v3128_v32 = vsel %vm8677_vm5, %v3123_v22, %v3127_v52  ;;  %v10801_v63 = vld [vmem:[#allocation2 + $0x4c] sm:$0xf]  ;;  %v3229_v22 = vshll.u32 %v10737_v49, 16 }
 0x366   : > { %v10714_v53 = vld [vmem:[#allocation2 + $0x24] sm:$0xf] }
 0x367   : > { %2902 = vrot.lane.b32.xlu0 %v14666_v1, %s8565_s26  ;;  %v2749_v14 = vpop.permute.xlu1 %2748  ;;  %v3178_v6 = vshrl.u32 %v10714_v53, 16  ;;  %v3181_v48 = vshll.u32 %v10714_v53, 16  ;;  %v3147_v16 = vrot.slane %v3146_v58, 4  ;;  %v3137_v1 = vrot.slane %v3136_v25, 4 }
 0x368   : > { %2829 = vst.msk [vmem:[#allocation4 + $0x3c] sm:$0xf] %vm806_vm13, %v2749_v14  ;;  %v10749_v14 = vrot.slane %v3163_v57, 5  ;;  %v3193_v57 = vrot.slane %v3191_v56, 4 }
 0x369   : > { %v2747_v13 = vpop.permute.xlu0 %2746  ;;  %v3180_v36 = vrot.slane %v3178_v6, 4  ;;  %v3183_v46 = vrot.slane %v3181_v48, 5  ;;  %v10742_v60 = vsel %vm8677_vm5, %v3147_v16, %v3151_v45  ;;  %v10765_v21 = vsel %vm8677_vm5, %v3137_v1, %v10688_v43  ;;  %v10804_v1 = vld [vmem:[#allocation2 + $0x2c] sm:$0x1] }
 0x36a   : > { %2828 = vst.msk [vmem:[#allocation4 + $0x38] sm:$0xf] %vm806_vm13, %v2747_v13  ;;  %v3170_v19 = vor.u32 %v3169_v4, %v10749_v14  ;;  %v3253_v6 = vshll.u32 %v10756_v54, 16  ;;  %v3175_v48 = vrot.slane %v3173_v12, 5  ;;  %v3235_v4 = vshll.u32 %v10798_v39, 16 }
 0x36b   : > { %v2775_v11 = vpop.permute.xlu2 %2774  ;;  %2910 = vrot.lane.b32.xlu1 %v10361_v31, %s8565_s26  ;;  %v993_v31 = vsel %vm9906_vm0, 0, %v992_v9  ;;  %14668 = vst [vmem:[#allocation7_spill] sm:$0xff] %v10742_v60  ;;  %v3184_v15 = vor.u32 %v3183_v46, %v3180_v36  ;;  %v10773_v9 = vld [vmem:[#allocation2 + $0x34] sm:$0xf] }
 0x36c   : > { %2842 = vst.msk [vmem:[#allocation4 + $0x70] sm:$0xf] %vm806_vm13, %v2775_v11  ;;  %v3211_v43 = vshll.u32 %v10773_v9, 16  ;;  %v3215_v24 = vshrl.u32 %v10773_v9, 16  ;;  %v3171_v16 = vrot.slane %v3170_v19, 4  ;;  %v3255_v51 = vrot.slane %v3253_v6, 5 }
 0x36d   : > { %994 = vst [vmem:[#allocation2 + $0x18] sm:$0x7] %v993_v31  ;;  %3489 = vrot.lane.b32.xlu2 %v3118_v2, %s8559_s16  ;;  %v3185_v58 = vrot.slane %v3184_v15, 4  ;;  %v10775_v2 = vld [vmem:[#allocation2 + $0x38] sm:$0x1]  ;;  %v3197_v19 = vshll.u32 %v10804_v1, 16 }
 0x36e   : > { %14669 = vst [vmem:[#allocation9_spill] sm:$0xff] %v10765_v21  ;;  %v10781_v31 = vld [vmem:[#allocation2 + $0x30] sm:$0xf]  ;;  %v10787_v47 = vrot.slane %v3211_v43, 5  ;;  %v3221_v45 = vshll.u32 %v10775_v2, 16 }
 0x36f   : > { %2908 = vrot.lane.b32.xlu0 %v14667_v33, %s8565_s26  ;;  %v2755_v18 = vpop.permute.xlu1 %2754  ;;  %14670 = vst [vmem:[#allocation20_spill] sm:$0xff] %v10775_v2  ;;  %v3202_v59 = vshrl.u32 %v10781_v31, 16  ;;  %v10794_v41 = vsel %vm8677_vm5, %v3185_v58, %v10770_v40  ;;  %v3205_v25 = vshll.u32 %v10781_v31, 16  ;;  %v3194_v58 = vor.u32 %v3193_v57, %v10770_v40  ;;  %v3018_v43 = vld [vmem:[%s14162_s4 + $0x10] sm:$0x3] }
 0x370   : > { %2832 = vst.msk [vmem:[#allocation4 + $0x48] sm:$0xf] %vm806_vm13, %v2755_v18  ;;  %v3250_v18 = vshrl.u32 %v10756_v54, 16  ;;  %v3231_v57 = vrot.slane %v3229_v22, 5 }
 0x371   : > { %v2753_v30 = vpop.permute.xlu0 %2752  ;;  %14671 = vst [vmem:[#allocation11_spill] sm:$0xff] %v10781_v31  ;;  %v3207_v52 = vrot.slane %v3205_v25, 5  ;;  %v3199_v25 = vrot.slane %v3197_v19, 5 }
 0x372   : > { %2831 = vst.msk [vmem:[#allocation4 + $0x44] sm:$0xf] %vm806_vm13, %v2753_v30  ;;  %v3217_v30 = vrot.slane %v3215_v24, 4  ;;  %v3252_v15 = vrot.slane %v3250_v18, 4  ;;  %v5102_v24 = vunpack.c.l.b16 %v3018_v43 }
 0x373   : > { %v2781_v42 = vpop.permute.xlu2 %2780  ;;  %2916 = vrot.lane.b32.xlu1 %v2853_v35, %s8565_s26  ;;  %14672 = vst [vmem:[#allocation38_spill] sm:$0xff] %v10794_v41 }
 0x374   : > { %2845 = vst.msk [vmem:[#allocation4 + $0x7c] sm:$0xf] %vm806_vm13, %v2781_v42  ;;  %v10751_v13 = vld [vmem:[#allocation2 + $0x18] sm:$0xf]  ;;  %v3218_v46 = vor.u32 %v3217_v30, %v10787_v47  ;;  %v3204_v42 = vrot.slane %v3202_v59, 4  ;;  %v3256_v6 = vor.u32 %v3255_v51, %v3252_v15 }
 0x375   : > { %v3154_v17 = vshrl.u32 %v10751_v13, 16  ;;  %v3157_v44 = vshll.u32 %v10751_v13, 16  ;;  %3495 = vrot.lane.b32.xlu2 %v10742_v60, %s8559_s16  ;;  %v10848_v30 = vld [vmem:[#allocation2 + $0x54] sm:$0xf]  ;;  %v10850_v59 = vld [vmem:[#allocation2 + $0x60] sm:$0xf] }
 0x376   : > { %v3208_v12 = vor.u32 %v3207_v52, %v3204_v42  ;;  %v3263_v52 = vshrl.u32 %v10801_v63, 16  ;;  %v3274_v15 = vshrl.u32 %v10848_v30, 16  ;;  %v3277_v51 = vshll.u32 %v10848_v30, 16 }
 0x377   : > { %2914 = vrot.lane.b32.xlu0 %v10646_v34, %s8565_s26  ;;  %v2761_v61 = vpop.permute.xlu1 %2760  ;;  %v3226_v34 = vshrl.u32 %v10737_v49, 16  ;;  %v3156_v11 = vrot.slane %v3154_v17, 4  ;;  %v3159_v28 = vrot.slane %v3157_v44, 5  ;;  %v10814_v17 = vsel %vm8677_vm5, %v3171_v16, %v3175_v48 }
 0x378   : > { %2835 = vst.msk [vmem:[#allocation4 + $0x54] sm:$0xf] %vm806_vm13, %v2761_v61  ;;  %v3239_v61 = vshrl.u32 %v10798_v39, 16  ;;  %v3219_v44 = vrot.slane %v3218_v46, 4  ;;  %v3209_v18 = vrot.slane %v3208_v12, 4  ;;  %v3301_v12 = vshll.u32 %v10850_v59, 16 }
 0x379   : > { %v2759_v10 = vpop.permute.xlu0 %2758  ;;  %v3160_v33 = vor.u32 %v3159_v28, %v3156_v11  ;;  %14674 = vst [vmem:[#allocation30_spill] sm:$0xff] %v10814_v17  ;;  %v10840_v40 = vrot.slane %v3226_v34, 4  ;;  %v3257_v19 = vrot.slane %v3256_v6, 4 }
 0x37a   : > { %2834 = vst.msk [vmem:[#allocation4 + $0x50] sm:$0xf] %vm806_vm13, %v2759_v10  ;;  %v3223_v10 = vrot.slane %v3221_v45, 5  ;;  %v3241_v48 = vrot.slane %v3239_v61, 4  ;;  %v3195_v45 = vrot.slane %v3194_v58, 4  ;;  %v3298_v61 = vshrl.u32 %v10850_v59, 16 }
 0x37b   : > { %v2859_v27 = vpop.permute.xlu2 %2858  ;;  %3493 = vrot.lane.b32.xlu1 %v10765_v21, %s8559_s16  ;;  %v3161_v36 = vrot.slane %v3160_v33, 4  ;;  %v10828_v33 = vld [vmem:[#allocation2 + $0x58] sm:$0xf]  ;;  %v10872_v22 = vsel %vm8677_vm5, %v3209_v18, %v10787_v47  ;;  %v3232_v6 = vor.u32 %v3231_v57, %v10840_v40 }
 0x37c   : > { %2952 = vst.msk [vmem:[#allocation4 + $0x8] sm:$0xf] %vm844_vm15, %v2859_v27  ;;  %v3259_v27 = vshll.u32 %v10801_v63, 16  ;;  %v10846_v56 = vsel %vm8677_vm5, %v3219_v44, %v3223_v10  ;;  %v3283_v34 = vshll.u32 %v10828_v33, 16  ;;  %v10880_v58 = vsel %vm8677_vm5, %v3195_v45, %v3199_v25 }
 0x37d   : > { %3501 = vrot.lane.b32.xlu2 %v10794_v41, %s8559_s16  ;;  %14677 = vst [vmem:[#allocation49_spill] sm:$0xff] %v10846_v56  ;;  %v3279_v45 = vrot.slane %v3277_v51, 5  ;;  %v3265_v25 = vrot.slane %v3263_v52, 4  ;;  %v10905_v41 = vld [vmem:[#allocation2 + $0x5c] sm:$0x1]  ;;  %v8461_v52 = vld [vmem:[%s14162_s4] sm:$0xff] }
 0x37e   : > { %v10856_v42 = vrot.slane %v3259_v27, 5  ;;  %14680 = vst [vmem:[#allocation51_spill] sm:$0xff] %v10872_v22  ;;  %v10882_v27 = vld [vmem:[#allocation2 + $0x44] sm:$0x1]  ;;  %v10885_v47 = vrot.slane %v3283_v34, 5  ;;  %v8462_v34 = vld [vmem:[%s14162_s4 + $0x8] sm:$0xff] }
 0x37f   : > { %3491 = vrot.lane.b32.xlu0 %v3128_v32, %s8559_s16  ;;  %v2767_v35 = vpop.permute.xlu1 %2766  ;;  %v10821_v32 = vsel %vm8677_vm5, %v3161_v36, %v10749_v14  ;;  %v10836_v14 = vrot.slane %v3235_v4, 5  ;;  %v10853_v36 = vld [vmem:[#allocation2 + $0x64] sm:$0xf]  ;;  %14681 = vst [vmem:[#allocation52_spill] sm:$0xff] %v10880_v58 }
 0x380   : > { %2838 = vst.msk [vmem:[#allocation4 + $0x60] sm:$0xf] %vm806_vm13, %v2767_v35  ;;  %v5105_v35 = vpack.c.b16 %v5102_v24, %v5102_v24  ;;  %v3307_v44 = vshll.u32 %v10853_v36, 16  ;;  %v3311_v10 = vshrl.u32 %v10853_v36, 16  ;;  %v10887_v24 = vld [vmem:[#allocation2 + $0x6c] sm:$0xf]  ;;  %v10916_v51 = vsel %vm8677_vm5, %v3257_v19, %v10856_v42 }
 0x381   : > { %v2765_v23 = vpop.permute.xlu0 %2764  ;;  %14676 = vst [vmem:[#allocation35_spill] sm:$0xff] %v10821_v32  ;;  %v3242_v43 = vor.u32 %v3241_v48, %v10836_v14  ;;  %v3276_v48 = vrot.slane %v3274_v15, 4  ;;  %v3322_v40 = vshrl.u32 %v10887_v24, 16  ;;  %v3325_v57 = vshll.u32 %v10887_v24, 16 }
 0x382   : > { %2837 = vst.msk [vmem:[#allocation4 + $0x5c] sm:$0xf] %vm806_vm13, %v2765_v23  ;;  %v3287_v23 = vshrl.u32 %v10828_v33, 16  ;;  %v10866_v4 = vsel %vm14678_vm1, %v5105_v35, 0  ;;  %vm14722_vm1 = vmmov %vm14705_vm3 }
 0x383   : > { %v10816_v11 = vld [vmem:[#allocation4 + $0x8] sm:$0xf]  ;;  %v2865_v28 = vpop.permute.xlu2 %2864  ;;  %3499 = vrot.lane.b32.xlu1 %v10814_v17, %s8559_s16  ;;  %14679 = vst [vmem:[#allocation47_spill] sm:$0xff] %v10866_v4  ;;  %8504 = vmatpush.bf16.msra.mxu2 %v10866_v4  ;;  %v3324_v60 = vrot.slane %v3322_v40, 4 }
 0x384   : > { %14675 = vst [vmem:[#allocation42_spill] sm:$0xff] %v10816_v11  ;;  %v3289_v35 = vrot.slane %v3287_v23, 4  ;;  %v3313_v23 = vrot.slane %v3311_v10, 4  ;;  %v3303_v11 = vrot.slane %v3301_v12, 5  ;;  %v3293_v10 = vshll.u32 %v10905_v41, 16 }
 0x385   : > { %3075 = vst.msk [vmem:[#allocation4 + $0x8] sm:$0xf] %vm374_vm6, %v10678_v37  ;;  %3507 = vrot.lane.b32.xlu2 %v10846_v56, %s8559_s16  ;;  %v3243_v56 = vrot.slane %v3242_v43, 4  ;;  %v10920_v12 = vld [vmem:[#allocation2 + $0x7c] sm:$0xf]  ;;  %v3233_v43 = vrot.slane %v3232_v6, 4 }
 0x386   : > { %2955 = vst.msk [vmem:[#allocation4 + $0x14] sm:$0xf] %vm844_vm15, %v2865_v28  ;;  %v3359_v17 = vshrl.u32 %v10920_v12, 16 }
 0x387   : > { %3497 = vrot.lane.b32.xlu0 %v10821_v32, %s8559_s16  ;;  %v2773_v16 = vpop.permute.xlu1 %2772  ;;  %14682 = vst [vmem:[#allocation48_spill] sm:$0xff] %v10882_v27  ;;  %8505 = vmatpush.bf16.msra.mxu2 %v8462_v34  ;;  %v3266_v34 = vor.u32 %v3265_v25, %v10856_v42  ;;  %v3327_v32 = vrot.slane %v3325_v57, 5 }
 0x388   : > { %2841 = vst.msk [vmem:[#allocation4 + $0x6c] sm:$0xf] %vm806_vm13, %v2773_v16  ;;  %v3245_v16 = vshll.u32 %v10882_v27, 16 }
 0x389   : > { %v2771_v46 = vpop.permute.xlu0 %2770  ;;  %14683 = vst [vmem:[#allocation16_spill] sm:$0xff] %v10905_v41 }
 0x38a   : > { %2840 = vst.msk [vmem:[#allocation4 + $0x68] sm:$0xf] %vm806_vm13, %v2771_v46  ;;  %v10903_v46 = vrot.slane %v3307_v44, 5  ;;  %v3290_v44 = vor.u32 %v3289_v35, %v10885_v47 }
 0x38b   : > { %v2871_v28 = vpop.permute.xlu2 %2870  ;;  %3505 = vrot.lane.b32.xlu1 %v10872_v22, %s8559_s16  ;;  %14684 = vst [vmem:[#allocation50_spill] sm:$0xff] %v10916_v51  ;;  %8506 = vmatpush.bf16.msra.mxu2 %v8461_v52 }
 0x38c   : > { %2958 = vst.msk [vmem:[#allocation4 + $0x20] sm:$0xf] %vm844_vm15, %v2871_v28  ;;  %v3300_v28 = vrot.slane %v3298_v61, 4  ;;  %v3247_v61 = vrot.slane %v3245_v16, 5  ;;  %v3314_v19 = vor.u32 %v3313_v23, %v10903_v46  ;;  %v3291_v6 = vrot.slane %v3290_v44, 4 }
 0x38d   : > { %v10889_v18 = vld [vmem:[#allocation4 + $0x10] sm:$0xf0]  ;;  %3513 = vrot.lane.b32.xlu2 %v10916_v51, %s8559_s16 }
 0x38e   : > { %3078 = vst.msk [vmem:[#allocation4 + $0x14] sm:$0xf] %vm374_vm6, %v10728_v62  ;;  %v3304_v16 = vor.u32 %v3303_v11, %v3300_v28  ;;  %v10937_v42 = vsel %vm8677_vm5, %v3243_v56, %v3247_v61  ;;  %v10939_v11 = vld [vmem:[#allocation2 + $0x50] sm:$0x1]  ;;  %v3267_v28 = vrot.slane %v3266_v34, 4  ;;  %v3328_v61 = vor.u32 %v3327_v32, %v3324_v60 }
 0x38f   : > { %3503 = vrot.lane.b32.xlu0 %v10880_v58, %s8559_s16  ;;  %v2779_v4 = vpop.permute.xlu1 %2778  ;;  %v10926_v58 = vld [vmem:[#allocation2 + $0x70] sm:$0xf]  ;;  %14685 = vst [vmem:[#allocation36_spill] sm:$0xff] %v10937_v42  ;;  %v3269_v25 = vshll.u32 %v10939_v11, 16  ;;  %v10956_v44 = vrot.slane %v3314_v19, 4 }
 0x390   : > { %2844 = vst.msk [vmem:[#allocation4 + $0x78] sm:$0xf] %vm806_vm13, %v2779_v4  ;;  %v3280_v4 = vor.u32 %v3279_v45, %v3276_v48  ;;  %v3295_v48 = vrot.slane %v3293_v10, 5  ;;  %v10947_v45 = vsel %vm8677_vm5, %v3233_v43, %v10836_v14  ;;  %v3331_v23 = vshll.u32 %v10926_v58, 16  ;;  %v10960_v43 = vld [vmem:[#allocation2 + $0x78] sm:$0xf] }
 0x391   : > { %v2777_v15 = vpop.permute.xlu0 %2776  ;;  %14686 = vst [vmem:[#allocation8_spill] sm:$0xff] %v10939_v11  ;;  %v10953_v40 = vrot.slane %v3304_v16, 4  ;;  %v3335_v57 = vshrl.u32 %v10926_v58, 16  ;;  %v3361_v14 = vrot.slane %v3359_v17, 4  ;;  %v10967_v34 = vld [vmem:[#allocation2 + $0x68] sm:$0x1] }
 0x392   : > { %2843 = vst.msk [vmem:[#allocation4 + $0x74] sm:$0xf] %vm806_vm13, %v2777_v15  ;;  %v3355_v15 = vshll.u32 %v10920_v12, 16  ;;  %v3281_v56 = vrot.slane %v3280_v4, 4  ;;  %v10965_v4 = vsel %vm8677_vm5, %v3291_v6, %v3295_v48  ;;  %v10969_v16 = vld [vmem:[#allocation2 + $0x84] sm:$0xf] }
 0x393   : > { %v10929_v22 = vld [vmem:[#allocation4 + $0x20] sm:$0xf]  ;;  %v2877_v35 = vpop.permute.xlu2 %2876  ;;  %3511 = vrot.lane.b32.xlu1 %v10937_v42, %s8559_s16  ;;  %14687 = vst [vmem:[#allocation55_spill] sm:$0xff] %v10947_v45  ;;  %v3271_v60 = vrot.slane %v3269_v25, 5  ;;  %v10974_v17 = vrot.slane %v3331_v23, 5  ;;  %v3317_v19 = vshll.u32 %v10967_v34, 16 }
 0x394   : > { %3081 = vst.msk [vmem:[#allocation4 + $0x20] sm:$0xf] %vm374_vm6, %v10781_v31  ;;  %v10958_v10 = vrot.slane %v3355_v15, 5  ;;  %v10976_v32 = vld [vmem:[#allocation2 + $0x88] sm:$0xf]  ;;  %v3346_v15 = vshrl.u32 %v10960_v43, 16  ;;  %v10994_v42 = vsel %vm8677_vm5, %v3281_v56, %v10885_v47 }
 0x395   : > { %2961 = vst.msk [vmem:[#allocation4 + $0x2c] sm:$0xf] %vm844_vm15, %v2877_v35  ;;  %3519 = vrot.lane.b32.xlu2 %v10965_v4, %s8559_s16  ;;  %v3349_v6 = vshll.u32 %v10960_v43, 16  ;;  %v10981_v48 = vrot.slane %v3335_v57, 4  ;;  %v3370_v25 = vshrl.u32 %v10969_v16, 16  ;;  %v3373_v23 = vshll.u32 %v10969_v16, 16 }
 0x396   : > { %14688 = vst [vmem:[#allocation18_spill] sm:$0xff] %v10965_v4  ;;  %v3379_v57 = vshll.u32 %v10976_v32, 16  ;;  %v3383_v21 = vshrl.u32 %v10976_v32, 16  ;;  %v3319_v56 = vrot.slane %v3317_v19, 5  ;;  %v3348_v41 = vrot.slane %v3346_v15, 4 }
 0x397   : > { %3509 = vrot.lane.b32.xlu0 %v10947_v45, %s8559_s16  ;;  %v2857_v52 = vpop.permute.xlu1 %2856  ;;  %14689 = vst [vmem:[#allocation21_spill] sm:$0xff] %v10967_v34  ;;  %v3362_v45 = vor.u32 %v3361_v14, %v10958_v10  ;;  %v11012_v34 = vld [vmem:[#allocation2 + $0x80] sm:$0x1]  ;;  %v3351_v27 = vrot.slane %v3349_v6, 5  ;;  %v3372_v2 = vrot.slane %v3370_v25, 4 }
 0x398   : > { %2951 = vst.msk [vmem:[#allocation4 + $0x4] sm:$0xf] %vm844_vm15, %v2857_v52  ;;  %v10983_v52 = vld [vmem:[#allocation2 + $0x90] sm:$0xf]  ;;  %v3365_v31 = vshll.u32 %v11012_v34, 16  ;;  %v11027_v6 = vrot.slane %v3379_v57, 5 }
 0x399   : > { %v2855_v35 = vpop.permute.xlu0 %2854  ;;  %14690 = vst [vmem:[#allocation23_spill] sm:$0xff] %v10983_v52  ;;  %v3394_v14 = vshrl.u32 %v10983_v52, 16  ;;  %v3397_v47 = vshll.u32 %v10983_v52, 16  ;;  %v1025_v57 = vld [vmem:[#allocation2 + $0x9c] sm:$0x7] }
 0x39a   : > { %2950 = vst.msk [vmem:[#allocation4] sm:$0xf] %vm844_vm15, %v2855_v35  ;;  %v3329_v35 = vrot.slane %v3328_v61, 4  ;;  %v11004_v61 = vsel %vm8677_vm5, %v3267_v28, %v3271_v60  ;;  %v3363_v60 = vrot.slane %v3362_v45, 4 }
 0x39b   : > { %v2883_v51 = vpop.permute.xlu2 %2882  ;;  %14691 = vst [vmem:[#allocation15_spill] sm:$0xff] %v10994_v42  ;;  %3517 = vrot.lane.b32.xlu1 %v10994_v42, %s8559_s16  ;;  %v3396_v45 = vrot.slane %v3394_v14, 4  ;;  %v3399_v25 = vrot.slane %v3397_v47, 5  ;;  %v11046_v14 = vsel %vm8677_vm5, %v10956_v44, %v3319_v56  ;;  %v3367_v47 = vrot.slane %v3365_v31, 5 }
 0x39c   : > { %v10988_v4 = vld [vmem:[#allocation4 + $0x28] sm:$0xf0]  ;;  %2964 = vst.msk [vmem:[#allocation4 + $0x38] sm:$0xf] %vm844_vm15, %v2883_v51  ;;  %v11006_v51 = vld [vmem:[#allocation2 + $0x74] sm:$0x1]  ;;  %v11025_v15 = vsel %vm8677_vm5, %v3329_v35, %v10974_v17  ;;  %v3338_v35 = vor.u32 %v10981_v48, %v10974_v17  ;;  %v11063_v31 = vsel %vm8677_vm5, %v10953_v40, %v10903_v46 }
 0x39d   : > { %3084 = vst.msk [vmem:[#allocation4 + $0x2c] sm:$0xf] %vm374_vm6, %v10798_v39  ;;  %v3341_v42 = vshll.u32 %v11006_v51, 16  ;;  %v3375_v39 = vrot.slane %v3373_v23, 5  ;;  %3525 = vrot.lane.b32.xlu2 %v11025_v15, %s8559_s16  ;;  %v11033_v23 = vld [vmem:[#allocation2 + $0x8c] sm:$0x1] }
 0x39e   : > { %14692 = vst [vmem:[#allocation26_spill] sm:$0xff] %v11004_v61  ;;  %v3389_v48 = vshll.u32 %v11033_v23, 16  ;;  %v3339_v44 = vrot.slane %v3338_v35, 4 }
 0x39f   : > { %3515 = vrot.lane.b32.xlu0 %v11004_v61, %s8559_s16  ;;  %14693 = vst [vmem:[#allocation29_spill] sm:$0xff] %v11012_v34  ;;  %v11015_v11 = vld [vmem:[#allocation4] sm:$0xf0]  ;;  %v2863_v28 = vpop.permute.xlu1 %2862 }
 0x3a0   : > { %14694 = vst [vmem:[#allocation31_spill] sm:$0xff] %v11015_v11  ;;  %v3385_v11 = vrot.slane %v3383_v21, 4  ;;  %v11038_v61 = vld [vmem:[#allocation2 + $0x94] sm:$0xf] }
 0x3a1   : > { %3074 = vst.msk [vmem:[#allocation4 + $0x4] sm:$0xf] %vm374_vm6, %v10671_v3  ;;  %v11020_v52 = vld [vmem:[#allocation4] sm:$0xf]  ;;  %v2861_v19 = vpop.permute.xlu0 %2860 }
 0x3a2   : > { %14695 = vst [vmem:[#allocation33_spill] sm:$0xff] %v11020_v52  ;;  %v1095_v52 = vld [vmem:[#allocation2 + $0xa0] sm:$0xc]  ;;  %v3386_v17 = vor.u32 %v3385_v11, %v11027_v6 }
 0x3a3   : > { %14696 = vst [vmem:[#allocation37_spill] sm:$0xff] %v11025_v15  ;;  %v11040_v21 = vld [vmem:[#allocation4 + $0x38] sm:$0xf]  ;;  %v2889_v34 = vpop.permute.xlu2 %2888  ;;  %v3352_v15 = vor.u32 %v3351_v27, %v3348_v41  ;;  %3523 = vrot.lane.b32.xlu1 %v11046_v14, %s8559_s16  ;;  %v3400_v41 = vor.u32 %v3399_v25, %v3396_v45  ;;  %v3403_v27 = vshll.u32 %v11038_v61, 16  ;;  %v3407_v45 = vshrl.u32 %v11038_v61, 16 }
 0x3a4   : > { %3073 = vst.msk [vmem:[#allocation4] sm:$0xf] %vm374_vm6, %v10656_v26  ;;  %v3387_v40 = vrot.slane %v3386_v17, 4 }
 0x3a5   : > { %14697 = vst [vmem:[#allocation28_spill] sm:$0xff] %v11033_v23  ;;  %v3353_v11 = vrot.slane %v3352_v15, 4  ;;  %v11079_v15 = vrot.slane %v3403_v27, 5 }
 0x3a6   : > { %2954 = vst.msk [vmem:[#allocation4 + $0x10] sm:$0xf] %vm844_vm15, %v2863_v28  ;;  %v1096_v28 = vsel %vm9913_vm14, 0, %v1095_v52  ;;  %v3391_v52 = vrot.slane %v3389_v48, 5 }
 0x3a7   : > { %14698 = vst [vmem:[#allocation14_spill] sm:$0xff] %v11040_v21  ;;  %v3376_v21 = vor.u32 %v3375_v39, %v3372_v2  ;;  %3521 = vrot.lane.b32.xlu0 %v11063_v31, %s8559_s16  ;;  %v2869_v2 = vpop.permute.xlu1 %2868  ;;  %v11070_v39 = vsel %vm8677_vm5, %v3363_v60, %v3367_v47  ;;  %v3401_v60 = vrot.slane %v3400_v41, 4  ;;  %v1031_v47 = vld [vmem:[#allocation2 + $0xb4] sm:$0x7]  ;;  %v11097_v48 = vsel %vm8677_vm5, %v3353_v11, %v10958_v10 }
 0x3a8   : > { %2953 = vst.msk [vmem:[#allocation4 + $0xc] sm:$0xf] %vm844_vm15, %v2861_v19  ;;  %v1026_v19 = vsel %vm9906_vm0, 0, %v1025_v57  ;;  %3531 = vrot.lane.b32.xlu2 %v11070_v39, %s8559_s16  ;;  %v11086_v57 = vld [vmem:[#allocation2 + $0xa4] sm:$0x1] }
 0x3a9   : > { %14699 = vst [vmem:[#allocation6_spill] sm:$0xff] %v11046_v14  ;;  %v2867_v46 = vpop.permute.xlu0 %2866  ;;  %v11073_v56 = vrot.slane %v3376_v21, 4  ;;  %v3437_v10 = vshll.u32 %v11086_v57, 16 }
 0x3aa   : > { %3087 = vst.msk [vmem:[#allocation4 + $0x38] sm:$0xf] %vm374_vm6, %v10848_v30 }
 0x3ab   : > { %2967 = vst.msk [vmem:[#allocation4 + $0x44] sm:$0xf] %vm844_vm15, %v2889_v34  ;;  %v3343_v34 = vrot.slane %v3341_v42, 5  ;;  %v2895_v21 = vpop.permute.xlu2 %2894  ;;  %3529 = vrot.lane.b32.xlu1 %v11097_v48, %s8559_s16  ;;  %v3439_v14 = vrot.slane %v3437_v10, 5 }
 0x3ac   : > { %14700 = vst [vmem:[#allocation12_spill] sm:$0xff] %v11063_v31 }
 0x3ad   : > { %1097 = vst [vmem:[#allocation2 + $0xa0] sm:$0xc] %v1096_v28  ;;  %v8244_v25 = vld [vmem:[#allocation4 + $0x10] sm:$0xf]  ;;  %v1103_v28 = vld [vmem:[#allocation2 + $0xb8] sm:$0xc]  ;;  %v11109_v41 = vsel %vm8677_vm5, %v3339_v44, %v3343_v34 }
 0x3ae   : > { %14701 = vst [vmem:[#allocation27_spill] sm:$0xff] %v11070_v39  ;;  %v8245_v35 = vor.u32 %v10889_v18, %v8244_v25  ;;  %v1032_v18 = vsel %vm9906_vm0, 0, %v1031_v47 }
 0x3af   : > { %1027 = vst [vmem:[#allocation2 + $0x9c] sm:$0x7] %v1026_v19  ;;  %v11083_v42 = vld [vmem:[#allocation4 + $0x8] sm:$0xf0]  ;;  %v1104_v19 = vsel %vm9913_vm14, 0, %v1103_v28  ;;  %3527 = vrot.lane.b32.xlu0 %v11109_v41, %s8559_s16  ;;  %v2875_v44 = vpop.permute.xlu1 %2874 }
 0x3b0   : > { %2957 = vst.msk [vmem:[#allocation4 + $0x1c] sm:$0xf] %vm844_vm15, %v2869_v2  ;;  %8308 = vmatmul.msk.bf16.vlgmr.msra.gmra.mxu2 %vm14705_vm3, %v8245_v35  ;;  %v3409_v2 = vrot.slane %v3407_v45, 4  ;;  %v1099_v35 = vld [vmem:[#allocation2 + $0xac] sm:$0xc]  ;;  %vm14725_vm3 = vmmov %vm14721_vm7 }
 0x3b1   : > { %2956 = vst.msk [vmem:[#allocation4 + $0x18] sm:$0xf] %vm844_vm15, %v2867_v46  ;;  %v2873_v28 = vpop.permute.xlu0 %2872 }
 0x3b2   : > { %3077 = vst.msk [vmem:[#allocation4 + $0x10] sm:$0xf] %vm374_vm6, %v10751_v13  ;;  %v11090_v17 = vld [vmem:[#allocation4 + $0x40] sm:$0xf0] }
 0x3b3   : > { %14702 = vst [vmem:[#allocation17_spill] sm:$0xff] %v11083_v42  ;;  %v11129_v42 = vsel %vm8677_vm5, %v3401_v60, %v11079_v15  ;;  %v2901_v60 = vpop.permute.xlu2 %2900 }
 0x3b4   : > { %14703 = vst [vmem:[#allocation19_spill] sm:$0xff] %v11086_v57  ;;  %v11111_v27 = vld [vmem:[#allocation2 + $0xa0] sm:$0xf]  ;;  %3537 = vrot.lane.b32.xlu2 %v11129_v42, %s8559_s16  ;;  %v1028_v57 = vld [vmem:[#allocation2 + $0xa8] sm:$0x7] }
 0x3b5   : > { %3076 = vst.msk [vmem:[#allocation4 + $0xc] sm:$0xf] %vm374_vm6, %v10669_v50  ;;  %v3427_v11 = vshll.u32 %v11111_v27, 16  ;;  %v3431_v46 = vshrl.u32 %v11111_v27, 16 }
 0x3b6   : > { %14704 = vst [vmem:[#allocation34_spill] sm:$0xff] %v11090_v17  ;;  %v11118_v25 = vld [vmem:[#allocation2 + $0x9c] sm:$0xf] }
 0x3b7   : > { %2970 = vst.msk [vmem:[#allocation4 + $0x50] sm:$0xf] %vm844_vm15, %v2895_v21  ;;  %v11120_v21 = vld [vmem:[#allocation4 + $0x18] sm:$0xf0]  ;;  %v3418_v34 = vshrl.u32 %v11118_v25, 16  ;;  %v3421_v47 = vshll.u32 %v11118_v25, 16 }
 0x3b8   : > { %14706 = vst [vmem:[#allocation22_spill] sm:$0xff] %v11097_v48  ;;  %v8248_v45 = vld [vmem:[#allocation4 + $0x18] sm:$0xf]  ;;  %v3433_v39 = vrot.slane %v3431_v46, 4  ;;  %v11135_v48 = vld [vmem:[#allocation2 + $0x98] sm:$0x1] }
 0x3b9   : > { %3090 = vst.msk [vmem:[#allocation4 + $0x44] sm:$0xf] %vm374_vm6, %v10853_v36  ;;  %v3413_v10 = vshll.u32 %v11135_v48, 16 }
 0x3ba   : > { %14707 = vst [vmem:[#allocation25_spill] sm:$0xff] %v11109_v41  ;;  %v3420_v41 = vrot.slane %v3418_v34, 4  ;;  %v1100_v34 = vsel %vm9913_vm14, 0, %v1099_v35  ;;  %v2881_v35 = vpop.permute.xlu1 %2880 }
 0x3bb   : > { %1033 = vst [vmem:[#allocation2 + $0xb4] sm:$0x7] %v1032_v18  ;;  %v3429_v18 = vrot.slane %v3427_v11, 5  ;;  %v11143_v11 = vsel %vm8677_vm5, %v3387_v40, %v3391_v52  ;;  %v11160_v40 = vsel %vm8677_vm5, %v11073_v56, %v11027_v6  ;;  %v2879_v56 = vpop.permute.xlu0 %2878 }
 0x3bc   : > { %1105 = vst [vmem:[#allocation2 + $0xb8] sm:$0xc] %v1104_v19  ;;  %v3423_v19 = vrot.slane %v3421_v47, 5  ;;  %v1029_v47 = vsel %vm9906_vm0, 0, %v1028_v57  ;;  %3535 = vrot.lane.b32.xlu1 %v11143_v11, %s8559_s16  ;;  %3533 = vrot.lane.b32.xlu0 %v11160_v40, %s8559_s16 }
 0x3bd   : > { %3080 = vst.msk [vmem:[#allocation4 + $0x1c] sm:$0xf] %vm374_vm6, %v10730_v5  ;;  %v3434_v31 = vor.u32 %v3433_v39, %v3429_v18  ;;  %v3410_v39 = vor.u32 %v3409_v2, %v11079_v15 }
 0x3be   : > { %14708 = vst [vmem:[#allocation32_spill] sm:$0xff] %v11129_v42  ;;  %v11138_v23 = vld [vmem:[#allocation4 + $0x50] sm:$0xf]  ;;  %v3424_v46 = vor.u32 %v3423_v19, %v3420_v41  ;;  %v3415_v19 = vrot.slane %v3413_v10, 5 }
 0x3bf   : > { %3079 = vst.msk [vmem:[#allocation4 + $0x18] sm:$0xf] %vm374_vm6, %v10714_v53 }
 0x3c0   : > { %2960 = vst.msk [vmem:[#allocation4 + $0x28] sm:$0xf] %vm844_vm15, %v2875_v44  ;;  %v3435_v44 = vrot.slane %v3434_v31, 4  ;;  %v3425_v52 = vrot.slane %v3424_v46, 4 }
 0x3c1   : > { %14709 = vst [vmem:[#allocation40_spill] sm:$0xff] %v11138_v23 }
 0x3c2   : > { %2959 = vst.msk [vmem:[#allocation4 + $0x24] sm:$0xf] %vm844_vm15, %v2873_v28  ;;  %v11162_v31 = vld [vmem:[#allocation2 + $0xb4] sm:$0xf]  ;;  %v11168_v15 = vsel %vm8677_vm5, %v3435_v44, %v3439_v14  ;;  %v3411_v28 = vrot.slane %v3410_v39, 4  ;;  %v11190_v39 = vsel %vm8677_vm5, %v3425_v52, %v3429_v18 }
 0x3c3   : > { %14710 = vst [vmem:[#allocation41_spill] sm:$0xff] %v11143_v11  ;;  %v11170_v57 = vld [vmem:[#allocation2 + $0xb8] sm:$0xf]  ;;  %v3466_v41 = vshrl.u32 %v11162_v31, 16  ;;  %v3469_v2 = vshll.u32 %v11162_v31, 16  ;;  %3543 = vrot.lane.b32.xlu2 %v11168_v15, %s8559_s16  ;;  %v2885_v42 = vpop.permute.xlu0 %2884  ;;  %v3670_v11 = vrot.slane %v10702_v20, 5 }
 0x3c4   : > { %3093 = vst.msk [vmem:[#allocation4 + $0x50] sm:$0xf] %vm374_vm6, %v10960_v43  ;;  %v3475_v6 = vshll.u32 %v11170_v57, 16  ;;  %v11181_v44 = vld [vmem:[#allocation2 + $0xb0] sm:$0x1]  ;;  %3541 = vrot.lane.b32.xlu1 %v11190_v39, %s8559_s16  ;;  %v3479_v52 = vshrl.u32 %v11170_v57, 16 }
 0x3c5   : > { %2973 = vst.msk [vmem:[#allocation4 + $0x5c] sm:$0xf] %vm844_vm15, %v2901_v60  ;;  %v3468_v60 = vrot.slane %v3466_v41, 4  ;;  %v3471_v46 = vrot.slane %v3469_v2, 5  ;;  %v2907_v2 = vpop.permute.xlu2 %2906  ;;  %v3461_v18 = vshll.u32 %v11181_v44, 16 }
 0x3c6   : > { %14711 = vst [vmem:[#allocation46_spill] sm:$0xff] %v11160_v40  ;;  %v3477_v41 = vrot.slane %v3475_v6, 5  ;;  %v3481_v55 = vrot.slane %v3479_v52, 4 }
 0x3c7   : > { %14712 = vst [vmem:[#allocation43_spill] sm:$0xff] %v11168_v15  ;;  %v11176_v14 = vld [vmem:[#allocation4 + $0x28] sm:$0xf]  ;;  %v3472_v10 = vor.u32 %v3471_v46, %v3468_v60 }
 0x3c8   : > { %1101 = vst [vmem:[#allocation2 + $0xac] sm:$0xc] %v1100_v34  ;;  %v3482_v52 = vor.u32 %v3481_v55, %v3477_v41 }
 0x3c9   : > { %1030 = vst [vmem:[#allocation2 + $0xa8] sm:$0x7] %v1029_v47  ;;  %v11185_v34 = vld [vmem:[#allocation4 + $0x20] sm:$0xf0]  ;;  %v8249_v47 = vor.u32 %v11120_v21, %v8248_v45  ;;  %v11204_v21 = vsel %vm8677_vm5, %v3411_v28, %v3415_v19  ;;  %v3667_v28 = vrot.slane %v10671_v3, 5 }
 0x3ca   : > { %2963 = vst.msk [vmem:[#allocation4 + $0x34] sm:$0xf] %vm844_vm15, %v2881_v35  ;;  %3539 = vrot.lane.b32.xlu0 %v11204_v21, %s8559_s16 }
 0x3cb   : > { %2962 = vst.msk [vmem:[#allocation4 + $0x30] sm:$0xf] %vm844_vm15, %v2879_v56  ;;  %8309 = vmatmul.msk.bf16.gmra.mxu2 %vm14716_vm4, %v8249_v47  ;;  %v3473_v56 = vrot.slane %v3472_v10, 4  ;;  %v2887_v10 = vpop.permute.xlu1 %2886  ;;  %v3669_v23 = vrot.slane %v3667_v28, 4  ;;  %v2891_v55 = vpop.permute.xlu0 %2890  ;;  %vm14729_vm4 = vmmov %vm14725_vm3 }
 0x3cc   : > { %14713 = vst [vmem:[#allocation44_spill] sm:$0xff] %v11181_v44  ;;  %v11194_v35 = vld [vmem:[#allocation4 + $0x58] sm:$0xf0]  ;;  %v11235_v44 = vld [vmem:[#allocation2 + $0xbc] sm:$0x1] }
 0x3cd   : > { %3083 = vst.msk [vmem:[#allocation4 + $0x28] sm:$0xf] %vm374_vm6, %v10737_v49  ;;  %v11214_v6 = vsel %vm8677_vm5, %v3473_v56, %v3477_v41 }
 0x3ce   : > { %14714 = vst [vmem:[#allocation45_spill] sm:$0xff] %v11190_v39  ;;  %3549 = vrot.lane.b32.xlu2 %v11214_v6, %s8559_s16 }
 0x3cf   : > { %3082 = vst.msk [vmem:[#allocation4 + $0x24] sm:$0xf] %vm374_vm6, %v10773_v9  ;;  %v11206_v45 = vld [vmem:[#allocation2 + $0xac] sm:$0xf] }
 0x3d0   : > { %14715 = vst [vmem:[#allocation10_spill] sm:$0xff] %v11194_v35  ;;  %v3451_v60 = vshll.u32 %v11206_v45, 16  ;;  %v3455_v46 = vshrl.u32 %v11206_v45, 16  ;;  %v11218_v47 = vld [vmem:[#allocation2 + $0xa8] sm:$0xf]  ;;  %v3463_v35 = vrot.slane %v3461_v18, 5 }
 0x3d1   : > { %2976 = vst.msk [vmem:[#allocation4 + $0x68] sm:$0xf] %vm844_vm15, %v2907_v2  ;;  %v11221_v19 = vld [vmem:[#allocation4 + $0x30] sm:$0xf0]  ;;  %v3442_v2 = vshrl.u32 %v11218_v47, 16  ;;  %v3445_v15 = vshll.u32 %v11218_v47, 16 }
 0x3d2   : > { %3096 = vst.msk [vmem:[#allocation4 + $0x5c] sm:$0xf] %vm374_vm6, %v10976_v32  ;;  %v11227_v56 = vld [vmem:[#allocation4 + $0x30] sm:$0xf]  ;;  %v3457_v39 = vrot.slane %v3455_v46, 4  ;;  %v2913_v46 = vpop.permute.xlu2 %2912 }
 0x3d3   : > { %14717 = vst [vmem:[#allocation53_spill] sm:$0xff] %v11204_v21  ;;  %v3453_v21 = vrot.slane %v3451_v60, 5  ;;  %v3444_v3 = vrot.slane %v3442_v2, 4  ;;  %v3447_v40 = vrot.slane %v3445_v15, 5 }
 0x3d4   : > { %14718 = vst [vmem:[#allocation54_spill] sm:$0xff] %v11214_v6 }
 0x3d5   : > { %3086 = vst.msk [vmem:[#allocation4 + $0x34] sm:$0xf] %vm374_vm6, %v10801_v63  ;;  %v3458_v38 = vor.u32 %v3457_v39, %v3453_v21  ;;  %v3448_v17 = vor.u32 %v3447_v40, %v3444_v3  ;;  %v3485_v39 = vshll.u32 %v11235_v44, 16 }
 0x3d6   : > { %3085 = vst.msk [vmem:[#allocation4 + $0x30] sm:$0xf] %vm374_vm6, %v10756_v54 }
 0x3d7   : > { %2966 = vst.msk [vmem:[#allocation4 + $0x40] sm:$0xf] %vm844_vm15, %v2887_v10  ;;  %v3459_v15 = vrot.slane %v3458_v38, 4  ;;  %v3449_v20 = vrot.slane %v3448_v17, 4  ;;  %v3671_v10 = vsel %vm8637_vm2, %v3669_v23, %v3670_v11  ;;  %v2893_v38 = vpop.permute.xlu1 %2892  ;;  %v8128_v17 = vrot.slane %v10656_v26, 9 }
 0x3d8   : > { %v11237_v60 = vld [vmem:[#allocation4 + $0x68] sm:$0xf]  ;;  %2965 = vst.msk [vmem:[#allocation4 + $0x3c] sm:$0xf] %vm844_vm15, %v2885_v42  ;;  %3779 = vrot.lane.b32.xlu2 %v3671_v10, %s8558_s15  ;;  %v3483_v23 = vrot.slane %v3482_v52, 4  ;;  %v3487_v11 = vrot.slane %v3485_v39, 5  ;;  %v2897_v10 = vpop.permute.xlu0 %2896 }
 0x3d9   : > { %3099 = vst.msk [vmem:[#allocation4 + $0x68] sm:$0xf] %vm374_vm6, %v11118_v25  ;;  %v11246_v18 = vsel %vm8677_vm5, %v3459_v15, %v3463_v35  ;;  %v11254_v42 = vsel %vm8677_vm5, %v3449_v20, %v3453_v21  ;;  %v8253_v35 = vor.u32 %v11185_v34, %v10929_v22  ;;  %v8130_v21 = vrot.slane %v10751_v13, 9 }
 0x3da   : > { %2979 = vst.msk [vmem:[#allocation4 + $0x74] sm:$0xf] %vm844_vm15, %v2913_v46  ;;  %3547 = vrot.lane.b32.xlu1 %v11246_v18, %s8559_s16  ;;  %3545 = vrot.lane.b32.xlu0 %v11254_v42, %s8559_s16  ;;  %v3681_v26 = vrot.slane %v10728_v62, 5  ;;  %v3490_v2 = vpop.permute.xlu2 %3489  ;;  %v3668_v46 = vsel %vm8637_vm2, %v8128_v17, %v3667_v28  ;;  %v3674_v15 = vrot.slane %v10669_v50, 5  ;;  %v11285_v22 = vsel %vm8677_vm5, %v3483_v23, %v3487_v11 }
 0x3db   : > { %14719 = vst [vmem:[#allocation24_spill] sm:$0xff] %v11246_v18  ;;  %8310 = vmatmul.msk.bf16.gmra.mxu2 %vm14722_vm1, %v8253_v35  ;;  %v3688_v20 = vrot.slane %v10730_v5, 5  ;;  %v8129_v17 = vrot.slane %v10678_v37, 9  ;;  %v3691_v11 = vrot.slane %v10804_v1, 5 }
 0x3dc   : > { %14720 = vst [vmem:[#allocation13_spill] sm:$0xff] %v11254_v42  ;;  %v11289_v34 = vsel %vm8637_vm2, %v8130_v21, %v3681_v26 }
 0x3dd   : > { %2969 = vst.msk [vmem:[#allocation4 + $0x4c] sm:$0xf] %vm844_vm15, %v2893_v38  ;;  %v3676_v38 = vrot.slane %v3674_v15, 4  ;;  %v3690_v23 = vrot.slane %v3688_v20, 4  ;;  %v11317_v21 = vsel %vm8637_vm2, %v8129_v17, %v3674_v15  ;;  %v3683_v15 = vrot.slane %v3681_v26, 4 }
 0x3de   : > { %v11260_v40 = vld [vmem:[#allocation4 + $0x40] sm:$0xf]  ;;  %2968 = vst.msk [vmem:[#allocation4 + $0x48] sm:$0xf] %vm844_vm15, %v2891_v55  ;;  %v3677_v55 = vrot.slane %v10696_v8, 5  ;;  %v8257_v17 = vor.u32 %v10988_v4, %v11176_v14  ;;  %v8133_v4 = vrot.slane %v10737_v49, 9 }
 0x3df   : > { %3089 = vst.msk [vmem:[#allocation4 + $0x40] sm:$0xf] %vm374_vm6, %v10850_v59  ;;  %v11266_v41 = vld [vmem:[#allocation4 + $0x38] sm:$0xf0]  ;;  %v2899_v28 = vpop.permute.xlu1 %2898 }
 0x3e0   : > { %3088 = vst.msk [vmem:[#allocation4 + $0x3c] sm:$0xf] %vm374_vm6, %v10828_v33  ;;  %3785 = vrot.lane.b32.xlu2 %v11289_v34, %s8558_s15  ;;  %v11313_v8 = vsel %vm8637_vm2, %v3676_v38, %v3677_v55  ;;  %v3684_v38 = vrot.slane %v10744_v7, 5  ;;  %v14732_v7 = vld [vmem:[#allocation39_spill] sm:$0xff] }
 0x3e1   : > { %v11274_v3 = vld [vmem:[#allocation4 + $0x70] sm:$0xf0]  ;;  %3585 = vst.msk [vmem:[#allocation4] sm:$0xf] %vm14721_vm7, %v3490_v2  ;;  %v11321_v2 = vsel %vm8637_vm2, %v3690_v23, %v3691_v11  ;;  %vm14730_vm7 = vmmov %vm14722_vm1  ;;  %v3702_v11 = vrot.slane %v14732_v7, 5 }
 0x3e2   : > { %3102 = vst.msk [vmem:[#allocation4 + $0x74] sm:$0xf] %vm374_vm6, %v11206_v45  ;;  %3777 = vrot.lane.b32.xlu1 %v3668_v46, %s8558_s15  ;;  %3551 = vrot.lane.b32.xlu0 %v11285_v22, %s8559_s16  ;;  %v3496_v35 = vpop.permute.xlu2 %3495  ;;  %v2903_v46 = vpop.permute.xlu0 %2902  ;;  %vm14738_vm1 = vmmov %vm14725_vm3  ;;  %s13913_s16 = scalar_lea.vmem %s14167_s9, %s8438_s27 }
 0x3e3   : > { %14723 = vst [vmem:[#allocation56_spill] sm:$0xff] %v11285_v22 }
 0x3e4   : > { %14724 = vst [vmem:[#allocation57_spill] sm:$0xff] %v11289_v34  ;;  %v11292_v52 = vld [vmem:[#allocation4 + $0x48] sm:$0xf0]  ;;  %v14736_v34 = vld [vmem:[#allocation23_spill] sm:$0xff] }
 0x3e5   : > { %3092 = vst.msk [vmem:[#allocation4 + $0x4c] sm:$0xf] %vm374_vm6, %v10926_v58  ;;  %v11297_v39 = vld [vmem:[#allocation4 + $0x48] sm:$0xf] }
 0x3e6   : > { %3091 = vst.msk [vmem:[#allocation4 + $0x48] sm:$0xf] %vm374_vm6, %v10887_v24 }
 0x3e7   : > { %2972 = vst.msk [vmem:[#allocation4 + $0x58] sm:$0xf] %vm844_vm15, %v2899_v28  ;;  %v2905_v1 = vpop.permute.xlu1 %2904  ;;  %v8131_v28 = vrot.slane %v10714_v53, 9 }
 0x3e8   : > { %2971 = vst.msk [vmem:[#allocation4 + $0x54] sm:$0xf] %vm844_vm15, %v2897_v10  ;;  %3791 = vrot.lane.b32.xlu2 %v11321_v2, %s8558_s15 }
 0x3e9   : > { %3588 = vst.msk [vmem:[#allocation4 + $0xc] sm:$0xf] %vm14725_vm3, %v3496_v35  ;;  %v11347_v26 = vsel %vm8637_vm2, %v8131_v28, %v3688_v20  ;;  %v3695_v35 = vrot.slane %v10773_v9, 5  ;;  %vm14744_vm3 = vmmov %vm14738_vm1 }
 0x3ea   : > { %14726 = vst [vmem:[#allocation58_spill] sm:$0xff] %v11313_v8  ;;  %3783 = vrot.lane.b32.xlu1 %v11313_v8, %s8558_s15  ;;  %3781 = vrot.lane.b32.xlu0 %v11317_v21, %s8558_s15  ;;  %v3502_v23 = vpop.permute.xlu2 %3501  ;;  %v2909_v28 = vpop.permute.xlu0 %2908  ;;  %v14740_v8 = vld [vmem:[#allocation8_spill] sm:$0xff] }
 0x3eb   : > { %14727 = vst [vmem:[#allocation59_spill] sm:$0xff] %v11317_v21  ;;  %8311 = vmatmul.msk.bf16.gmra.mxu2 %vm14730_vm7, %v8257_v17  ;;  %v3709_v17 = vrot.slane %v10801_v63, 5  ;;  %v3712_v6 = vrot.slane %v14740_v8, 5 }
 0x3ec   : > { %14728 = vst [vmem:[#allocation60_spill] sm:$0xff] %v11321_v2 }
 0x3ed   : > { %2975 = vst.msk [vmem:[#allocation4 + $0x64] sm:$0xf] %vm844_vm15, %v2905_v1  ;;  %v11353_v1 = vsel %vm8637_vm2, %v3683_v15, %v3684_v38  ;;  %v11369_v15 = vsel %vm8637_vm2, %v8133_v4, %v3702_v11  ;;  %v3697_v38 = vrot.slane %v3695_v35, 4 }
 0x3ee   : > { %v11329_v10 = vld [vmem:[#allocation4 + $0x58] sm:$0xf]  ;;  %2974 = vst.msk [vmem:[#allocation4 + $0x60] sm:$0xf] %vm844_vm15, %v2903_v46 }
 0x3ef   : > { %3095 = vst.msk [vmem:[#allocation4 + $0x58] sm:$0xf] %vm374_vm6, %v10969_v16  ;;  %v11337_v55 = vld [vmem:[#allocation4 + $0x50] sm:$0xf0]  ;;  %v2911_v46 = vpop.permute.xlu1 %2910 }
 0x3f0   : > { %3094 = vst.msk [vmem:[#allocation4 + $0x54] sm:$0xf] %vm374_vm6, %v10920_v12  ;;  %3797 = vrot.lane.b32.xlu2 %v11369_v15, %s8558_s15 }
 0x3f1   : > { %3591 = vst.msk [vmem:[#allocation4 + $0x18] sm:$0xf] %vm14729_vm4, %v3502_v23  ;;  %v14735_v23 = vld [vmem:[#allocation20_spill] sm:$0xff]  ;;  %vm14745_vm4 = vmmov %vm14730_vm7 }
 0x3f2   : > { %14731 = vst [vmem:[#allocation63_spill] sm:$0xff] %v11347_v26  ;;  %3789 = vrot.lane.b32.xlu1 %v11347_v26, %s8558_s15  ;;  %3787 = vrot.lane.b32.xlu0 %v11353_v1, %s8558_s15  ;;  %v3698_v2 = vrot.slane %v14735_v23, 5  ;;  %v14737_v26 = vld [vmem:[#allocation11_spill] sm:$0xff]  ;;  %v3711_v23 = vrot.slane %v3709_v17, 4  ;;  %vm14749_vm7 = vmmov %vm14738_vm1 }
 0x3f3   : > { %14733 = vst [vmem:[#allocation39_spill] sm:$0xff] %v11353_v1  ;;  %v8132_v21 = vrot.slane %v14737_v26, 9  ;;  %v3508_v1 = vpop.permute.xlu2 %3507 }
 0x3f4   : > { %v11356_v14 = vld [vmem:[#allocation4 + $0x60] sm:$0xf0]  ;;  %14734 = vst [vmem:[#allocation64_spill] sm:$0xff] %v11369_v15  ;;  %v11382_v4 = vsel %vm8637_vm2, %v3697_v38, %v3698_v2  ;;  %v11396_v2 = vsel %vm8637_vm2, %v3711_v23, %v3712_v6  ;;  %v14743_v38 = vld [vmem:[#allocation48_spill] sm:$0xff] }
 0x3f5   : > { %3098 = vst.msk [vmem:[#allocation4 + $0x64] sm:$0xf] %vm374_vm6, %v11038_v61  ;;  %v11363_v20 = vld [vmem:[#allocation4 + $0x60] sm:$0xf]  ;;  %v11387_v22 = vsel %vm8637_vm2, %v8132_v21, %v3695_v35  ;;  %v8261_v21 = vor.u32 %v11221_v19, %v11227_v56  ;;  %v3704_v35 = vrot.slane %v3702_v11, 4  ;;  %v3705_v23 = vrot.slane %v14743_v38, 5 }
 0x3f6   : > { %3097 = vst.msk [vmem:[#allocation4 + $0x60] sm:$0xf] %vm374_vm6, %v14736_v34  ;;  %v8136_v19 = vrot.slane %v10850_v59, 9  ;;  %v3716_v56 = vrot.slane %v10828_v33, 5 }
 0x3f7   : > { %2978 = vst.msk [vmem:[#allocation4 + $0x70] sm:$0xf] %vm844_vm15, %v2911_v46  ;;  %v2917_v46 = vpop.permute.xlu1 %2916  ;;  %v11428_v11 = vsel %vm8637_vm2, %v3704_v35, %v3705_v23  ;;  %v14750_v23 = vld [vmem:[#allocation16_spill] sm:$0xff] }
 0x3f8   : > { %2977 = vst.msk [vmem:[#allocation4 + $0x6c] sm:$0xf] %vm844_vm15, %v2909_v28  ;;  %3803 = vrot.lane.b32.xlu2 %v11396_v2, %s8558_s15  ;;  %v3718_v35 = vrot.slane %v3716_v56, 4 }
 0x3f9   : > { %3594 = vst.msk [vmem:[#allocation4 + $0x24] sm:$0xf] %vm14738_vm1, %v3508_v1  ;;  %v2915_v1 = vpop.permute.xlu0 %2914 }
 0x3fa   : > { %14739 = vst [vmem:[#allocation20_spill] sm:$0xff] %v11382_v4  ;;  %3795 = vrot.lane.b32.xlu1 %v11382_v4, %s8558_s15  ;;  %3793 = vrot.lane.b32.xlu0 %v11387_v22, %s8558_s15  ;;  %v8135_v4 = vrot.slane %v10848_v30, 9 }
 0x3fb   : > { %14741 = vst [vmem:[#allocation23_spill] sm:$0xff] %v11387_v22  ;;  %v3514_v6 = vpop.permute.xlu2 %3513  ;;  %8312 = vmatmul.msk.bf16.gmra.mxu2 %vm14745_vm4, %v8261_v21  ;;  %v3733_v22 = vrot.slane %v11006_v51, 5  ;;  %vm14756_vm4 = vmmov %vm14738_vm1 }
 0x3fc   : > { %2981 = vst.msk [vmem:[#allocation4 + $0x7c] sm:$0xf] %vm844_vm15, %v2917_v46  ;;  %v8134_v46 = vrot.slane %v10756_v54, 9 }
 0x3fd   : > { %14742 = vst [vmem:[#allocation11_spill] sm:$0xff] %v11396_v2 }
 0x3fe   : > { %v11398_v28 = vld [vmem:[#allocation4 + $0x70] sm:$0xf]  ;;  %2980 = vst.msk [vmem:[#allocation4 + $0x78] sm:$0xf] %vm844_vm15, %v2915_v1  ;;  %v3723_v1 = vrot.slane %v10853_v36, 5  ;;  %v11418_v2 = vsel %vm8637_vm2, %v8134_v46, %v3709_v17  ;;  %v3730_v46 = vrot.slane %v10926_v58, 5 }
 0x3ff   : > { %3101 = vst.msk [vmem:[#allocation4 + $0x70] sm:$0xf] %vm374_vm6, %v11218_v47  ;;  %v11405_v8 = vld [vmem:[#allocation4 + $0x68] sm:$0xf0]  ;;  %v3494_v21 = vpop.permute.xlu1 %3493 }
 0x400   : > { %3100 = vst.msk [vmem:[#allocation4 + $0x6c] sm:$0xf] %vm374_vm6, %v11111_v27  ;;  %v11438_v38 = vsel %vm8637_vm2, %v8136_v19, %v3723_v1  ;;  %v3732_v19 = vrot.slane %v3730_v46, 4 }
 0x401   : > { %3597 = vst.msk [vmem:[#allocation4 + $0x30] sm:$0xf] %vm14744_vm3, %v3514_v6  ;;  %v3492_v17 = vpop.permute.xlu0 %3491  ;;  %3809 = vrot.lane.b32.xlu2 %v11438_v38, %s8558_s15  ;;  %vm14751_vm3 = vmmov %vm14738_vm1 }
 0x402   : > { %14746 = vst [vmem:[#allocation8_spill] sm:$0xff] %v11418_v2  ;;  %3801 = vrot.lane.b32.xlu1 %v11418_v2, %s8558_s15  ;;  %3799 = vrot.lane.b32.xlu0 %v11428_v11, %s8558_s15  ;;  %v3719_v2 = vrot.slane %v14750_v23, 5  ;;  %v14758_v23 = vld [vmem:[#allocation21_spill] sm:$0xff] }
 0x403   : > { %v11422_v15 = vld [vmem:[#allocation4 + $0x78] sm:$0xf0]  ;;  %14747 = vst [vmem:[#allocation48_spill] sm:$0xff] %v11428_v11  ;;  %v3520_v11 = vpop.permute.xlu2 %3519 }
 0x404   : > { %3104 = vst.msk [vmem:[#allocation4 + $0x7c] sm:$0xf] %vm374_vm6, %v11170_v57  ;;  %v11453_v42 = vsel %vm8637_vm2, %v3718_v35, %v3719_v2  ;;  %v14757_v2 = vld [vmem:[#allocation14_spill] sm:$0xff]  ;;  %v3725_v35 = vrot.slane %v3723_v1, 4 }
 0x405   : > { %v11432_v6 = vld [vmem:[#allocation4 + $0x78] sm:$0xf]  ;;  %14748 = vst [vmem:[#allocation65_spill] sm:$0xff] %v11438_v38  ;;  %v3726_v38 = vrot.slane %v14758_v23, 5 }
 0x406   : > { %3103 = vst.msk [vmem:[#allocation4 + $0x78] sm:$0xf] %vm374_vm6, %v11162_v31  ;;  %vm14754_vm6 = vmmov %vm14738_vm1 }
 0x407   : > { %3587 = vst.msk [vmem:[#allocation4 + $0x8] sm:$0xf] %vm14749_vm7, %v3494_v21  ;;  %v11459_v21 = vsel %vm8637_vm2, %v8135_v4, %v3716_v56  ;;  %v8265_v4 = vor.u32 %v11266_v41, %v14757_v2  ;;  %vm14759_vm7 = vmmov %vm14738_vm1  ;;  %v3737_v41 = vrot.slane %v10920_v12, 5  ;;  %v11488_v1 = vsel %vm8637_vm2, %v3725_v35, %v3726_v38  ;;  %v14765_v35 = vld [vmem:[#allocation29_spill] sm:$0xff] }
 0x408   : > { %3586 = vst.msk [vmem:[#allocation4 + $0x4] sm:$0xf] %vm14738_vm1, %v3492_v17  ;;  %v3500_v17 = vpop.permute.xlu1 %3499  ;;  %vm14760_vm1 = vcmask 293888   ;;  %v3740_v23 = vrot.slane %v14765_v35, 5 }
 0x409   : > { %3600 = vst.msk [vmem:[#allocation4 + $0x3c] sm:$0xf] %vm14751_vm3, %v3520_v11  ;;  %v3498_v51 = vpop.permute.xlu0 %3497  ;;  %v11466_v11 = vsel %vm8637_vm2, %v3732_v19, %v3733_v22  ;;  %v3744_v22 = vrot.slane %v10976_v32, 5  ;;  %v3739_v38 = vrot.slane %v3737_v41, 4 }
 0x40a   : > { %14752 = vst [vmem:[#allocation16_spill] sm:$0xff] %v11453_v42  ;;  %3807 = vrot.lane.b32.xlu1 %v11453_v42, %s8558_s15  ;;  %3805 = vrot.lane.b32.xlu0 %v11459_v21, %s8558_s15 }
 0x40b   : > { %14753 = vst [vmem:[#allocation66_spill] sm:$0xff] %v11459_v21  ;;  %3815 = vrot.lane.b32.xlu2 %v11466_v11, %s8558_s15  ;;  %v3526_v56 = vpop.permute.xlu2 %3525  ;;  %8313 = vmatmul.msk.bf16.gmra.mxu2 %vm14760_vm1, %v8265_v4  ;;  %vm14771_vm1 = vmmov %vm14751_vm3 }
 0x40c   : > { %3590 = vst.msk [vmem:[#allocation4 + $0x14] sm:$0xf] %vm14754_vm6, %v3500_v17  ;;  %v8137_v17 = vrot.slane %v10887_v24, 9  ;;  %vm14764_vm6 = vmmov %vm14751_vm3 }
 0x40d   : > { %14755 = vst [vmem:[#allocation67_spill] sm:$0xff] %v11466_v11 }
 0x40e   : > { %3589 = vst.msk [vmem:[#allocation4 + $0x10] sm:$0xf] %vm14756_vm4, %v3498_v51  ;;  %v11480_v19 = vsel %vm8637_vm2, %v8137_v17, %v3730_v46  ;;  %v8139_v51 = vrot.slane %v10969_v16, 9  ;;  %vm14766_vm4 = vmmov %vm14751_vm3 }
 0x40f   : > { %3603 = vst.msk [vmem:[#allocation4 + $0x48] sm:$0xf] %vm14759_vm7, %v3526_v56  ;;  %v3751_v56 = vrot.slane %v11038_v61, 5  ;;  %vm14770_vm7 = vmmov %vm14751_vm3 }
 0x410   : > { %14761 = vst [vmem:[#allocation14_spill] sm:$0xff] %v11480_v19  ;;  %v3506_v2 = vpop.permute.xlu1 %3505  ;;  %v11495_v46 = vsel %vm8637_vm2, %v8139_v51, %v3744_v22  ;;  %v11507_v51 = vsel %vm8637_vm2, %v3739_v38, %v3740_v23  ;;  %v14772_v38 = vld [vmem:[#allocation34_spill] sm:$0xff]  ;;  %v3765_v23 = vrot.slane %v11206_v45, 5 }
 0x411   : > { %14762 = vst [vmem:[#allocation21_spill] sm:$0xff] %v11488_v1  ;;  %v3504_v4 = vpop.permute.xlu0 %3503  ;;  %v3753_v11 = vrot.slane %v3751_v56, 4 }
 0x412   : > { %3813 = vrot.lane.b32.xlu1 %v11480_v19, %s8558_s15  ;;  %3811 = vrot.lane.b32.xlu0 %v11488_v1, %s8558_s15  ;;  %3593 = vst.msk [vmem:[#allocation4 + $0x20] sm:$0xf] %vm14751_vm3, %v3506_v2  ;;  %v3754_v2 = vrot.slane %v11135_v48, 5  ;;  %v8138_v1 = vrot.slane %v10960_v43, 9  ;;  %vm14774_vm3 = vmmov %vm14771_vm1 }
 0x413   : > { %14763 = vst [vmem:[#allocation68_spill] sm:$0xff] %v11495_v46  ;;  %3821 = vrot.lane.b32.xlu2 %v11495_v46, %s8558_s15  ;;  %v3532_v17 = vpop.permute.xlu2 %3531 }
 0x414   : > { %3592 = vst.msk [vmem:[#allocation4 + $0x1c] sm:$0xf] %vm14764_vm6, %v3504_v4  ;;  %v11513_v4 = vsel %vm8637_vm2, %v8138_v1, %v3737_v41  ;;  %v11519_v48 = vsel %vm8637_vm2, %v3753_v11, %v3754_v2  ;;  %v8269_v41 = vor.u32 %v14772_v38, %v11260_v40  ;;  %v8142_v1 = vrot.slane %v11218_v47, 9 }
 0x415   : > { %3606 = vst.msk [vmem:[#allocation4 + $0x54] sm:$0xf] %vm14766_vm4, %v3532_v17  ;;  %vm14775_vm6 = vcmask 293888   ;;  %v8140_v2 = vrot.slane %v14736_v34, 9  ;;  %vm14778_vm4 = vmmov %vm14771_vm1 }
 0x416   : > { %14767 = vst [vmem:[#allocation29_spill] sm:$0xff] %v11507_v51  ;;  %v11540_v40 = vsel %vm8637_vm2, %v8142_v1, %v3765_v23 }
 0x417   : > { %14768 = vst [vmem:[#allocation69_spill] sm:$0xff] %v11513_v4 }
 0x418   : > { %v3512_v35 = vpop.permute.xlu1 %3511  ;;  %14769 = vst [vmem:[#allocation70_spill] sm:$0xff] %v11519_v48 }
 0x419   : > { %3596 = vst.msk [vmem:[#allocation4 + $0x2c] sm:$0xf] %vm14770_vm7, %v3512_v35  ;;  %v3510_v17 = vpop.permute.xlu0 %3509  ;;  %v3758_v35 = vrot.slane %v11111_v27, 5  ;;  %vm14780_vm7 = vmmov %vm14771_vm1 }
 0x41a   : > { %3819 = vrot.lane.b32.xlu1 %v11507_v51, %s8558_s15  ;;  %3817 = vrot.lane.b32.xlu0 %v11513_v4, %s8558_s15  ;;  %3595 = vst.msk [vmem:[#allocation4 + $0x28] sm:$0xf] %vm14771_vm1, %v3510_v17  ;;  %v3746_v4 = vrot.slane %v3744_v22, 4  ;;  %v14773_v51 = vld [vmem:[#allocation28_spill] sm:$0xff]  ;;  %v11536_v17 = vsel %vm8637_vm2, %v8140_v2, %v3751_v56  ;;  %v3772_v22 = vrot.slane %v11170_v57, 5  ;;  %v8141_v2 = vrot.slane %v11118_v25, 9 }
 0x41b   : > { %3827 = vrot.lane.b32.xlu2 %v11519_v48, %s8558_s15  ;;  %v3538_v46 = vpop.permute.xlu2 %3537  ;;  %v3747_v11 = vrot.slane %v14773_v51, 5  ;;  %8314 = vmatmul.msk.bf16.gmra.mxu2 %vm14775_vm6, %v8269_v41  ;;  %14776 = vst [vmem:[#allocation34_spill] sm:$0xff] %v11536_v17  ;;  %v3760_v38 = vrot.slane %v3758_v35, 4  ;;  %v14779_v41 = vld [vmem:[#allocation19_spill] sm:$0xff]  ;;  %vm14784_vm6 = vmmov %vm14771_vm1 }
 0x41c   : > { %3609 = vst.msk [vmem:[#allocation4 + $0x60] sm:$0xf] %vm14774_vm3, %v3538_v46  ;;  %v3761_v1 = vrot.slane %v14779_v41, 5  ;;  %v3774_v48 = vrot.slane %v3772_v22, 4  ;;  %v11565_v41 = vsel %vm8637_vm2, %v8141_v2, %v3758_v35  ;;  %vm14783_vm3 = vmmov %vm14771_vm1  ;;  %v3767_v35 = vrot.slane %v3765_v23, 4 }
 0x41d   : > { %14777 = vst [vmem:[#allocation28_spill] sm:$0xff] %v11540_v40  ;;  %v11547_v46 = vsel %vm8637_vm2, %v3746_v4, %v3747_v11  ;;  %v3775_v4 = vrot.slane %v11235_v44, 5  ;;  %v8273_v2 = vor.u32 %v11292_v52, %v11297_v39 }
 0x41e   : > { %14782 = vst [vmem:[#allocation71_spill] sm:$0xff] %v11565_v41 }
 0x420   : > { %v3518_v51 = vpop.permute.xlu1 %3517 }
 0x421   : > { %3599 = vst.msk [vmem:[#allocation4 + $0x38] sm:$0xf] %vm14778_vm4, %v3518_v51  ;;  %v3516_v56 = vpop.permute.xlu0 %3515  ;;  %v11561_v51 = vsel %vm8637_vm2, %v3760_v38, %v3761_v1  ;;  %v8143_v38 = vrot.slane %v11162_v31, 9  ;;  %vm14786_vm4 = vmmov %vm14771_vm1 }
 0x422   : > { %3825 = vrot.lane.b32.xlu1 %v11536_v17, %s8558_s15  ;;  %3823 = vrot.lane.b32.xlu0 %v11547_v46, %s8558_s15  ;;  %3598 = vst.msk [vmem:[#allocation4 + $0x34] sm:$0xf] %vm14780_vm7, %v3516_v56  ;;  %vm14787_vm7 = vcmask 293888  }
 0x423   : > { %3833 = vrot.lane.b32.xlu2 %v11540_v40, %s8558_s15  ;;  %v3544_v11 = vpop.permute.xlu2 %3543  ;;  %14781 = vst [vmem:[#allocation19_spill] sm:$0xff] %v11561_v51  ;;  %v11569_v40 = vsel %vm8637_vm2, %v3774_v48, %v3775_v4  ;;  %v14785_v48 = vld [vmem:[#allocation44_spill] sm:$0xff] }
 0x424   : > { %3612 = vst.msk [vmem:[#allocation4 + $0x6c] sm:$0xf] %vm14771_vm1, %v3544_v11  ;;  %v3768_v1 = vrot.slane %v14785_v48, 5  ;;  %v11587_v11 = vsel %vm8637_vm2, %v8143_v38, %v3772_v22  ;;  %v14792_v38 = vld [vmem:[#allocation40_spill] sm:$0xff] }
 0x425   : > { %14788 = vst [vmem:[#allocation44_spill] sm:$0xff] %v11587_v11 }
 0x428   : > { %v3524_v56 = vpop.permute.xlu1 %3523 }
 0x429   : > { %3602 = vst.msk [vmem:[#allocation4 + $0x44] sm:$0xf] %vm14783_vm3, %v3524_v56  ;;  %v3522_v44 = vpop.permute.xlu0 %3521  ;;  %v11591_v56 = vsel %vm8637_vm2, %v3767_v35, %v3768_v1  ;;  %vm14789_vm3 = vmmov %vm14771_vm1  ;;  %v8277_v35 = vor.u32 %v11337_v55, %v14792_v38 }
 0x42a   : > { %3831 = vrot.lane.b32.xlu1 %v11561_v51, %s8558_s15  ;;  %3829 = vrot.lane.b32.xlu0 %v11565_v41, %s8558_s15  ;;  %3601 = vst.msk [vmem:[#allocation4 + $0x40] sm:$0xf] %vm14784_vm6, %v3522_v44  ;;  %vm14790_vm6 = vmmov %vm14771_vm1 }
 0x42b   : > { %3839 = vrot.lane.b32.xlu2 %v11569_v40, %s8558_s15  ;;  %v3550_v4 = vpop.permute.xlu2 %3549  ;;  %8315 = vmatmul.msk.bf16.gmra.mxu2 %vm14787_vm7, %v8273_v2 }
 0x42c   : > { %3615 = vst.msk [vmem:[#allocation4 + $0x78] sm:$0xf] %vm14786_vm4, %v3550_v4  ;;  %vm14791_vm4 = vmmov %vm14771_vm1  ;;  %v14795_v4 = vld [vmem:[#allocation10_spill] sm:$0xff] }
 0x430   : > { %v3530_v23 = vpop.permute.xlu1 %3529 }
 0x431   : > { %3605 = vst.msk [vmem:[#allocation4 + $0x50] sm:$0xf] %vm14771_vm1, %v3530_v23  ;;  %v3528_v52 = vpop.permute.xlu0 %3527  ;;  %v8281_v23 = vor.u32 %v14795_v4, %v11329_v10 }
 0x432   : > { %3837 = vrot.lane.b32.xlu1 %v11587_v11, %s8558_s15  ;;  %3835 = vrot.lane.b32.xlu0 %v11591_v56, %s8558_s15  ;;  %3604 = vst.msk [vmem:[#allocation4 + $0x4c] sm:$0xf] %vm14789_vm3, %v3528_v52  ;;  %vm14793_vm3 = vmmov %vm14771_vm1 }
 0x433   : > { %3911 = vrot.lane.b32.xlu2 %v10751_v13, %s8560_s17  ;;  %v3780_v39 = vpop.permute.xlu2 %3779 }
 0x434   : > { %3874 = vst.msk [vmem:[#allocation4 + $0x4] sm:$0xf] %vm606_vm8, %v3780_v39 }
 0x438   : > { %v3536_v22 = vpop.permute.xlu1 %3535 }
 0x439   : > { %3608 = vst.msk [vmem:[#allocation4 + $0x5c] sm:$0xf] %vm14790_vm6, %v3536_v22  ;;  %v3534_v44 = vpop.permute.xlu0 %3533  ;;  %vm14794_vm6 = vmmov %vm14771_vm1 }
 0x43a   : > { %3909 = vrot.lane.b32.xlu1 %v10669_v50, %s8560_s17  ;;  %3907 = vrot.lane.b32.xlu0 %v10678_v37, %s8560_s17  ;;  %3607 = vst.msk [vmem:[#allocation4 + $0x58] sm:$0xf] %vm14791_vm4, %v3534_v44  ;;  %vm14796_vm4 = vmmov %vm14771_vm1 }
 0x43b   : > { %3917 = vrot.lane.b32.xlu2 %v10730_v5, %s8560_s17  ;;  %v3786_v48 = vpop.permute.xlu2 %3785  ;;  %8316 = vmatmul.msk.bf16.gmra.mxu2 %vm14787_vm7, %v8277_v35  ;;  %v8285_v35 = vor.u32 %v11356_v14, %v11363_v20 }
 0x43c   : > { %3877 = vst.msk [vmem:[#allocation4 + $0x10] sm:$0xf] %vm606_vm8, %v3786_v48 }
 0x440   : > { %v3542_v50 = vpop.permute.xlu1 %3541 }
 0x441   : > { %3611 = vst.msk [vmem:[#allocation4 + $0x68] sm:$0xf] %vm14771_vm1, %v3542_v50  ;;  %v3540_v37 = vpop.permute.xlu0 %3539 }
 0x442   : > { %3915 = vrot.lane.b32.xlu1 %v10714_v53, %s8560_s17  ;;  %3913 = vrot.lane.b32.xlu0 %v10728_v62, %s8560_s17  ;;  %3610 = vst.msk [vmem:[#allocation4 + $0x64] sm:$0xf] %vm14793_vm3, %v3540_v37  ;;  %vm14797_vm3 = vmmov %vm14787_vm7  ;;  %v1107_v37 = vld [vmem:[#allocation2 + $0xc4] sm:$0xc] }
 0x443   : > { %3923 = vrot.lane.b32.xlu2 %v10737_v49, %s8560_s17  ;;  %v3792_v55 = vpop.permute.xlu2 %3791 }
 0x444   : > { %3880 = vst.msk [vmem:[#allocation4 + $0x1c] sm:$0xf] %vm606_vm8, %v3792_v55  ;;  %v1034_v55 = vld [vmem:[#allocation2 + $0xc0] sm:$0x7] }
 0x44a   : > { %3921 = vrot.lane.b32.xlu1 %v10773_v9, %s8560_s17  ;;  %3919 = vrot.lane.b32.xlu0 %v14737_v26, %s8560_s17 }
 0x44b   : > { %3929 = vrot.lane.b32.xlu2 %v10801_v63, %s8560_s17  ;;  %v3798_v52 = vpop.permute.xlu2 %3797  ;;  %8317 = vmatmul.msk.bf16.gmra.mxu2 %vm14787_vm7, %v8281_v23  ;;  %vm14808_vm7 = vmmov %vm14797_vm3 }
 0x44c   : > { %v3548_v1 = vpop.permute.xlu1 %3547  ;;  %v3546_v2 = vpop.permute.xlu0 %3545  ;;  %3883 = vst.msk [vmem:[#allocation4 + $0x28] sm:$0xf] %vm606_vm8, %v3798_v52  ;;  %v8289_v52 = vor.u32 %v11405_v8, %v11237_v60 }
 0x44d   : > { %3614 = vst.msk [vmem:[#allocation4 + $0x74] sm:$0xf] %vm14794_vm6, %v3548_v1  ;;  %vm14800_vm6 = vmmov %vm14797_vm3 }
 0x44e   : > { %3613 = vst.msk [vmem:[#allocation4 + $0x70] sm:$0xf] %vm14796_vm4, %v3546_v2  ;;  %v1108_v2 = vsel %vm9913_vm14, 0, %v1107_v37  ;;  %vm14803_vm4 = vmmov %vm14797_vm3  ;;  %v14804_v37 = vld [vmem:[#allocation9_spill] sm:$0xff] }
 0x44f   : > { %1109 = vst [vmem:[#allocation2 + $0xc4] sm:$0xc] %v1108_v2 }
 0x452   : > { %3927 = vrot.lane.b32.xlu1 %v10756_v54, %s8560_s17  ;;  %3925 = vrot.lane.b32.xlu0 %v14732_v7, %s8560_s17 }
 0x453   : > { %3935 = vrot.lane.b32.xlu2 %v10850_v59, %s8560_s17  ;;  %v3804_v22 = vpop.permute.xlu2 %3803 }
 0x454   : > { %v3778_v39 = vpop.permute.xlu1 %3777  ;;  %v3552_v10 = vpop.permute.xlu0 %3551  ;;  %3886 = vst.msk [vmem:[#allocation4 + $0x34] sm:$0xf] %vm606_vm8, %v3804_v22 }
 0x455   : > { %3873 = vst.msk [vmem:[#allocation4] sm:$0xf] %vm606_vm8, %v3778_v39 }
 0x456   : > { %3616 = vst.msk [vmem:[#allocation4 + $0x7c] sm:$0xf] %vm14771_vm1, %v3552_v10  ;;  %v1035_v10 = vsel %vm9906_vm0, 0, %v1034_v55 }
 0x457   : > { %1036 = vst [vmem:[#allocation2 + $0xc0] sm:$0x7] %v1035_v10 }
 0x45a   : > { %3933 = vrot.lane.b32.xlu1 %v10828_v33, %s8560_s17  ;;  %3931 = vrot.lane.b32.xlu0 %v10848_v30, %s8560_s17 }
 0x45b   : > { %3941 = vrot.lane.b32.xlu2 %v10926_v58, %s8560_s17  ;;  %v3810_v48 = vpop.permute.xlu2 %3809  ;;  %8318 = vmatmul.msk.bf16.gmra.mxu2 %vm14797_vm3, %v8285_v35 }
 0x45c   : > { %v3784_v44 = vpop.permute.xlu1 %3783  ;;  %v3782_v38 = vpop.permute.xlu0 %3781  ;;  %3889 = vst.msk [vmem:[#allocation4 + $0x40] sm:$0xf] %vm606_vm8, %v3810_v48 }
 0x45d   : > { %3876 = vst.msk [vmem:[#allocation4 + $0xc] sm:$0xf] %vm606_vm8, %v3784_v44  ;;  %v11681_v44 = vpop.f32.mrf.mxu2 }
 0x45e   : > { %3875 = vst.msk [vmem:[#allocation4 + $0x8] sm:$0xf] %vm606_vm8, %v3782_v38 }
 0x45f   : > { %14801 = vst [vmem:[#allocation40_spill] sm:$0xff] %v11681_v44 }
 0x462   : > { %3939 = vrot.lane.b32.xlu1 %v10887_v24, %s8560_s17  ;;  %3937 = vrot.lane.b32.xlu0 %v10853_v36, %s8560_s17 }
 0x463   : > { %3947 = vrot.lane.b32.xlu2 %v10969_v16, %s8560_s17 }
 0x464   : > { %v3790_v50 = vpop.permute.xlu1 %3789  ;;  %v3788_v14 = vpop.permute.xlu0 %3787 }
 0x465   : > { %3879 = vst.msk [vmem:[#allocation4 + $0x18] sm:$0xf] %vm606_vm8, %v3790_v50  ;;  %v3816_v20 = vpop.permute.xlu2 %3815  ;;  %v11694_v35 = vpop.f32.mrf.mxu2 }
 0x466   : > { %3878 = vst.msk [vmem:[#allocation4 + $0x14] sm:$0xf] %vm606_vm8, %v3788_v14  ;;  %v8293_v14 = vor.u32 %v11274_v3, %v11398_v28 }
 0x467   : > { %3892 = vst.msk [vmem:[#allocation4 + $0x4c] sm:$0xf] %vm606_vm8, %v3816_v20 }
 0x468   : > { %14802 = vst [vmem:[#allocation10_spill] sm:$0xff] %v11694_v35  ;;  %v14823_v35 = vld [vmem:[#allocation22_spill] sm:$0xff] }
 0x46a   : > { %3945 = vrot.lane.b32.xlu1 %v10920_v12, %s8560_s17  ;;  %3943 = vrot.lane.b32.xlu0 %v10960_v43, %s8560_s17 }
 0x46b   : > { %3953 = vrot.lane.b32.xlu2 %v11038_v61, %s8560_s17  ;;  %8319 = vmatmul.msk.bf16.gmra.mxu2 %vm14800_vm6, %v8289_v52  ;;  %v14806_v52 = vld [vmem:[#allocation30_spill] sm:$0xff] }
 0x46c   : > { %v3796_v4 = vpop.permute.xlu1 %3795  ;;  %v3794_v23 = vpop.permute.xlu0 %3793 }
 0x46d   : > { %3882 = vst.msk [vmem:[#allocation4 + $0x24] sm:$0xf] %vm606_vm8, %v3796_v4  ;;  %v3822_v22 = vpop.permute.xlu2 %3821  ;;  %v11712_v2 = vpop.f32.mrf.mxu2  ;;  %v11717_v4 = vld [vmem:[#allocation2 + $0xc4] sm:$0xf] }
 0x46e   : > { %3881 = vst.msk [vmem:[#allocation4 + $0x20] sm:$0xf] %vm606_vm8, %v3794_v23  ;;  %v11719_v23 = vld [vmem:[#allocation2 + $0xc0] sm:$0xf] }
 0x46f   : > { %3895 = vst.msk [vmem:[#allocation4 + $0x58] sm:$0xf] %vm606_vm8, %v3822_v22 }
 0x470   : > { %14805 = vst [vmem:[#allocation62_spill] sm:$0xff] %v11712_v2 }
 0x472   : > { %3951 = vrot.lane.b32.xlu1 %v14736_v34, %s8560_s17  ;;  %3949 = vrot.lane.b32.xlu0 %v10976_v32, %s8560_s17 }
 0x473   : > { %3959 = vrot.lane.b32.xlu2 %v11218_v47, %s8560_s17 }
 0x474   : > { %v3802_v60 = vpop.permute.xlu1 %3801  ;;  %v3800_v8 = vpop.permute.xlu0 %3799 }
 0x475   : > { %3885 = vst.msk [vmem:[#allocation4 + $0x30] sm:$0xf] %vm606_vm8, %v3802_v60  ;;  %v3828_v38 = vpop.permute.xlu2 %3827  ;;  %v8297_v60 = vor.u32 %v11422_v15, %v11432_v6 }
 0x476   : > { %3884 = vst.msk [vmem:[#allocation4 + $0x2c] sm:$0xf] %vm606_vm8, %v3800_v8 }
 0x477   : > { %3898 = vst.msk [vmem:[#allocation4 + $0x64] sm:$0xf] %vm606_vm8, %v3828_v38  ;;  %v11731_v38 = vpop.f32.mrf.mxu2 }
 0x478   : > { %14807 = vst [vmem:[#allocation61_spill] sm:$0xff] %v11731_v38 }
 0x47a   : > { %3957 = vrot.lane.b32.xlu1 %v11111_v27, %s8560_s17  ;;  %3955 = vrot.lane.b32.xlu0 %v11118_v25, %s8560_s17 }
 0x47b   : > { %3965 = vrot.lane.b32.xlu2 %v11170_v57, %s8560_s17  ;;  %8320 = vmatmul.msk.bf16.gmra.mxu2 %vm14803_vm4, %v8293_v14  ;;  %v14811_v14 = vld [vmem:[#allocation51_spill] sm:$0xff] }
 0x47c   : > { %v3808_v48 = vpop.permute.xlu1 %3807  ;;  %v3806_v50 = vpop.permute.xlu0 %3805 }
 0x47d   : > { %3888 = vst.msk [vmem:[#allocation4 + $0x3c] sm:$0xf] %vm606_vm8, %v3808_v48  ;;  %v3834_v20 = vpop.permute.xlu2 %3833  ;;  %v14809_v48 = vld [vmem:[#allocation35_spill] sm:$0xff] }
 0x47e   : > { %3887 = vst.msk [vmem:[#allocation4 + $0x38] sm:$0xf] %vm606_vm8, %v3806_v50  ;;  %v14810_v50 = vld [vmem:[#allocation7_spill] sm:$0xff] }
 0x47f   : > { %3901 = vst.msk [vmem:[#allocation4 + $0x70] sm:$0xf] %vm606_vm8, %v3834_v20 }
 0x482   : > { %3963 = vrot.lane.b32.xlu1 %v11162_v31, %s8560_s17  ;;  %3961 = vrot.lane.b32.xlu0 %v11206_v45, %s8560_s17 }
 0x483   : > { %4059 = vrot.lane.b32.xlu2 %v14804_v37, %s8561_s18  ;;  %v14812_v37 = vld [vmem:[#allocation52_spill] sm:$0xff] }
 0x484   : > { %v3814_v55 = vpop.permute.xlu1 %3813  ;;  %v3812_v3 = vpop.permute.xlu0 %3811 }
 0x485   : > { %3891 = vst.msk [vmem:[#allocation4 + $0x48] sm:$0xf] %vm606_vm8, %v3814_v55  ;;  %v3840_v28 = vpop.permute.xlu2 %3839  ;;  %v14813_v55 = vld [vmem:[#allocation38_spill] sm:$0xff] }
 0x486   : > { %3890 = vst.msk [vmem:[#allocation4 + $0x44] sm:$0xf] %vm606_vm8, %v3812_v3  ;;  %v14814_v3 = vld [vmem:[#allocation36_spill] sm:$0xff] }
 0x487   : > { %3904 = vst.msk [vmem:[#allocation4 + $0x7c] sm:$0xf] %vm606_vm8, %v3840_v28 }
 0x48a   : > { %3969 = vrot.lane.b32.xlu1 %v11717_v4, %s8560_s17  ;;  %3967 = vrot.lane.b32.xlu0 %v11719_v23, %s8560_s17 }
 0x48b   : > { %4065 = vrot.lane.b32.xlu2 %v14806_v52, %s8561_s18  ;;  %8321 = vmatmul.msk.bf16.gmra.mxu2 %vm14808_vm7, %v8297_v60  ;;  %v14815_v60 = vld [vmem:[#allocation55_spill] sm:$0xff] }
 0x48c   : > { %v3820_v10 = vpop.permute.xlu1 %3819  ;;  %v3818_v22 = vpop.permute.xlu0 %3817 }
 0x48d   : > { %3894 = vst.msk [vmem:[#allocation4 + $0x54] sm:$0xf] %vm606_vm8, %v3820_v10  ;;  %v3912_v8 = vpop.permute.xlu2 %3911 }
 0x48e   : > { %3893 = vst.msk [vmem:[#allocation4 + $0x50] sm:$0xf] %vm606_vm8, %v3818_v22 }
 0x48f   : > { %4005 = vst.msk [vmem:[#allocation4 + $0x8] sm:$0xf] %vm640_vm9, %v3912_v8  ;;  %v14816_v8 = vld [vmem:[#allocation49_spill] sm:$0xff] }
 0x492   : > { %4063 = vrot.lane.b32.xlu1 %v14809_v48, %s8561_s18  ;;  %4061 = vrot.lane.b32.xlu0 %v14810_v50, %s8561_s18  ;;  %v14817_v50 = vld [vmem:[#allocation15_spill] sm:$0xff] }
 0x493   : > { %4071 = vrot.lane.b32.xlu2 %v14811_v14, %s8561_s18 }
 0x494   : > { %v3826_v20 = vpop.permute.xlu1 %3825  ;;  %v3824_v15 = vpop.permute.xlu0 %3823 }
 0x495   : > { %3897 = vst.msk [vmem:[#allocation4 + $0x60] sm:$0xf] %vm606_vm8, %v3826_v20  ;;  %v3918_v6 = vpop.permute.xlu2 %3917 }
 0x496   : > { %3896 = vst.msk [vmem:[#allocation4 + $0x5c] sm:$0xf] %vm606_vm8, %v3824_v15 }
 0x497   : > { %4008 = vst.msk [vmem:[#allocation4 + $0x14] sm:$0xf] %vm640_vm9, %v3918_v6 }
 0x49a   : > { %4069 = vrot.lane.b32.xlu1 %v14812_v37, %s8561_s18  ;;  %4067 = vrot.lane.b32.xlu0 %v14813_v55, %s8561_s18 }
 0x49b   : > { %4077 = vrot.lane.b32.xlu2 %v14814_v3, %s8561_s18 }
 0x49c   : > { %v3832_v28 = vpop.permute.xlu1 %3831  ;;  %v3830_v10 = vpop.permute.xlu0 %3829 }
 0x49d   : > { %3900 = vst.msk [vmem:[#allocation4 + $0x6c] sm:$0xf] %vm606_vm8, %v3832_v28  ;;  %v3924_v22 = vpop.permute.xlu2 %3923  ;;  %v14818_v28 = vld [vmem:[#allocation26_spill] sm:$0xff] }
 0x49e   : > { %3899 = vst.msk [vmem:[#allocation4 + $0x68] sm:$0xf] %vm606_vm8, %v3830_v10  ;;  %v14819_v10 = vld [vmem:[#allocation50_spill] sm:$0xff] }
 0x49f   : > { %4011 = vst.msk [vmem:[#allocation4 + $0x20] sm:$0xf] %vm640_vm9, %v3924_v22  ;;  %v14820_v22 = vld [vmem:[#allocation6_spill] sm:$0xff] }
 0x4a2   : > { %4075 = vrot.lane.b32.xlu1 %v14815_v60, %s8561_s18  ;;  %4073 = vrot.lane.b32.xlu0 %v14816_v8, %s8561_s18 }
 0x4a3   : > { %4083 = vrot.lane.b32.xlu2 %v14817_v50, %s8561_s18  ;;  %v14826_v50 = vld [vmem:[#allocation41_spill] sm:$0xff] }
 0x4a4   : > { %v3838_v20 = vpop.permute.xlu1 %3837  ;;  %v3836_v15 = vpop.permute.xlu0 %3835 }
 0x4a5   : > { %3903 = vst.msk [vmem:[#allocation4 + $0x78] sm:$0xf] %vm606_vm8, %v3838_v20  ;;  %v3930_v6 = vpop.permute.xlu2 %3929 }
 0x4a6   : > { %3902 = vst.msk [vmem:[#allocation4 + $0x74] sm:$0xf] %vm606_vm8, %v3836_v15  ;;  %v14821_v15 = vld [vmem:[#allocation12_spill] sm:$0xff]  ;;  %vm5316_vm8 = vcmask 60416  }
 0x4a7   : > { %4014 = vst.msk [vmem:[#allocation4 + $0x2c] sm:$0xf] %vm640_vm9, %v3930_v6  ;;  %v14822_v6 = vld [vmem:[#allocation18_spill] sm:$0xff] }
 0x4aa   : > { %4081 = vrot.lane.b32.xlu1 %v14818_v28, %s8561_s18  ;;  %4079 = vrot.lane.b32.xlu0 %v14819_v10, %s8561_s18  ;;  %v14830_v28 = vld [vmem:[#allocation53_spill] sm:$0xff] }
 0x4ab   : > { %4089 = vrot.lane.b32.xlu2 %v14820_v22, %s8561_s18 }
 0x4ac   : > { %v3910_v38 = vpop.permute.xlu1 %3909  ;;  %v3908_v2 = vpop.permute.xlu0 %3907 }
 0x4ad   : > { %4004 = vst.msk [vmem:[#allocation4 + $0x4] sm:$0xf] %vm640_vm9, %v3910_v38  ;;  %v3936_v20 = vpop.permute.xlu2 %3935 }
 0x4ae   : > { %4003 = vst.msk [vmem:[#allocation4] sm:$0xf] %vm640_vm9, %v3908_v2  ;;  %v14824_v2 = vld [vmem:[#allocation25_spill] sm:$0xff] }
 0x4af   : > { %4017 = vst.msk [vmem:[#allocation4 + $0x38] sm:$0xf] %vm640_vm9, %v3936_v20  ;;  %v14825_v20 = vld [vmem:[#allocation37_spill] sm:$0xff] }
 0x4b2   : > { %4087 = vrot.lane.b32.xlu1 %v14821_v15, %s8561_s18  ;;  %4085 = vrot.lane.b32.xlu0 %v14822_v6, %s8561_s18 }
 0x4b3   : > { %4095 = vrot.lane.b32.xlu2 %v14823_v35, %s8561_s18 }
 0x4b4   : > { %v3916_v44 = vpop.permute.xlu1 %3915  ;;  %v3914_v22 = vpop.permute.xlu0 %3913 }
 0x4b5   : > { %4007 = vst.msk [vmem:[#allocation4 + $0x10] sm:$0xf] %vm640_vm9, %v3916_v44  ;;  %v3942_v38 = vpop.permute.xlu2 %3941 }
 0x4b6   : > { %4006 = vst.msk [vmem:[#allocation4 + $0xc] sm:$0xf] %vm640_vm9, %v3914_v22  ;;  %v4036_v22 = vshrl.u32 %v11719_v23, 16 }
 0x4b7   : > { %4020 = vst.msk [vmem:[#allocation4 + $0x44] sm:$0xf] %vm640_vm9, %v3942_v38  ;;  %v4039_v38 = vshll.u32 %v11719_v23, 16 }
 0x4b8   : > { %v4038_v15 = vrot.slane %v4036_v22, 4 }
 0x4b9   : > { %v4041_v3 = vrot.slane %v4039_v38, 5 }
 0x4ba   : > { %4093 = vrot.lane.b32.xlu1 %v14824_v2, %s8561_s18  ;;  %4091 = vrot.lane.b32.xlu0 %v14825_v20, %s8561_s18  ;;  %v14827_v2 = vld [vmem:[#allocation46_spill] sm:$0xff]  ;;  %v14828_v20 = vld [vmem:[#allocation27_spill] sm:$0xff] }
 0x4bb   : > { %4101 = vrot.lane.b32.xlu2 %v14826_v50, %s8561_s18  ;;  %v14829_v50 = vld [vmem:[#allocation45_spill] sm:$0xff]  ;;  %v4042_v10 = vor.u32 %v4041_v3, %v4038_v15  ;;  %v4049_v15 = vshrl.u32 %v11717_v4, 16 }
 0x4bc   : > { %v3922_v6 = vpop.permute.xlu1 %3921  ;;  %v3920_v35 = vpop.permute.xlu0 %3919 }
 0x4bd   : > { %4010 = vst.msk [vmem:[#allocation4 + $0x1c] sm:$0xf] %vm640_vm9, %v3922_v6  ;;  %v3948_v44 = vpop.permute.xlu2 %3947  ;;  %v4043_v38 = vrot.slane %v4042_v10, 4 }
 0x4be   : > { %4009 = vst.msk [vmem:[#allocation4 + $0x18] sm:$0xf] %vm640_vm9, %v3920_v35 }
 0x4bf   : > { %4023 = vst.msk [vmem:[#allocation4 + $0x50] sm:$0xf] %vm640_vm9, %v3948_v44 }
 0x4c2   : > { %4099 = vrot.lane.b32.xlu1 %v14827_v2, %s8561_s18  ;;  %4097 = vrot.lane.b32.xlu0 %v14828_v20, %s8561_s18  ;;  %v4045_v2 = vshll.u32 %v11717_v4, 16  ;;  %v14831_v20 = vld [vmem:[#allocation32_spill] sm:$0xff] }
 0x4c3   : > { %4107 = vrot.lane.b32.xlu2 %v14829_v50, %s8561_s18  ;;  %v14833_v50 = vld [vmem:[#allocation13_spill] sm:$0xff] }
 0x4c4   : > { %v3928_v6 = vpop.permute.xlu1 %3927  ;;  %v3926_v35 = vpop.permute.xlu0 %3925 }
 0x4c5   : > { %4013 = vst.msk [vmem:[#allocation4 + $0x28] sm:$0xf] %vm640_vm9, %v3928_v6  ;;  %v3954_v44 = vpop.permute.xlu2 %3953 }
 0x4c6   : > { %4012 = vst.msk [vmem:[#allocation4 + $0x24] sm:$0xf] %vm640_vm9, %v3926_v35  ;;  %v4047_v35 = vrot.slane %v4045_v2, 5  ;;  %v4051_v2 = vrot.slane %v4049_v15, 4  ;;  %v14837_v15 = vld [vmem:[#allocation58_spill] sm:$0xff] }
 0x4c7   : > { %4026 = vst.msk [vmem:[#allocation4 + $0x5c] sm:$0xf] %vm640_vm9, %v3954_v44 }
 0x4c8   : > { %v11813_v44 = vsel %vm8677_vm5, %v4043_v38, %v4047_v35 }
 0x4c9   : > { %14832 = vst [vmem:[#allocation9_spill] sm:$0xff] %v11813_v44 }
 0x4ca   : > { %4105 = vrot.lane.b32.xlu1 %v14830_v28, %s8561_s18  ;;  %4103 = vrot.lane.b32.xlu0 %v14831_v20, %s8561_s18 }
 0x4cb   : > { %4113 = vrot.lane.b32.xlu2 %v11246_v18, %s8561_s18  ;;  %v14834_v18 = vld [vmem:[#allocation43_spill] sm:$0xff] }
 0x4cc   : > { %v3934_v6 = vpop.permute.xlu1 %3933  ;;  %v3932_v22 = vpop.permute.xlu0 %3931 }
 0x4cd   : > { %4016 = vst.msk [vmem:[#allocation4 + $0x34] sm:$0xf] %vm640_vm9, %v3934_v6  ;;  %v3960_v3 = vpop.permute.xlu2 %3959 }
 0x4ce   : > { %4015 = vst.msk [vmem:[#allocation4 + $0x30] sm:$0xf] %vm640_vm9, %v3932_v22  ;;  %v11822_v22 = vld [vmem:[#allocation2 + $0xc8] sm:$0x1] }
 0x4cf   : > { %4029 = vst.msk [vmem:[#allocation4 + $0x68] sm:$0xf] %vm640_vm9, %v3960_v3  ;;  %v4052_v3 = vor.u32 %v4051_v2, %v4047_v35 }
 0x4d1   : > { %v4053_v20 = vrot.slane %v4052_v3, 4 }
 0x4d2   : > { %4111 = vrot.lane.b32.xlu1 %v14833_v50, %s8561_s18  ;;  %4109 = vrot.lane.b32.xlu0 %v14834_v18, %s8561_s18  ;;  %v4055_v50 = vshll.u32 %v11822_v22, 16  ;;  %v14835_v18 = vld [vmem:[#allocation56_spill] sm:$0xff] }
 0x4d3   : > { %4119 = vrot.lane.b32.xlu2 %v11813_v44, %s8561_s18  ;;  %v14836_v44 = vld [vmem:[#allocation54_spill] sm:$0xff] }
 0x4d4   : > { %v3940_v10 = vpop.permute.xlu1 %3939  ;;  %v3938_v6 = vpop.permute.xlu0 %3937  ;;  %v4057_v28 = vrot.slane %v4055_v50, 5  ;;  %v14839_v50 = vld [vmem:[#allocation63_spill] sm:$0xff] }
 0x4d5   : > { %4019 = vst.msk [vmem:[#allocation4 + $0x40] sm:$0xf] %vm640_vm9, %v3940_v10  ;;  %v3966_v38 = vpop.permute.xlu2 %3965 }
 0x4d6   : > { %4018 = vst.msk [vmem:[#allocation4 + $0x3c] sm:$0xf] %vm640_vm9, %v3938_v6  ;;  %v11838_v2 = vsel %vm8677_vm5, %v4053_v20, %v4057_v28  ;;  %v14840_v28 = vld [vmem:[#allocation39_spill] sm:$0xff]  ;;  %v14841_v20 = vld [vmem:[#allocation57_spill] sm:$0xff] }
 0x4d7   : > { %4032 = vst.msk [vmem:[#allocation4 + $0x74] sm:$0xf] %vm640_vm9, %v3966_v38  ;;  %v14838_v38 = vld [vmem:[#allocation59_spill] sm:$0xff] }
 0x4da   : > { %4117 = vrot.lane.b32.xlu1 %v14835_v18, %s8561_s18  ;;  %4115 = vrot.lane.b32.xlu0 %v14836_v44, %s8561_s18 }
 0x4db   : > { %4197 = vrot.lane.b32.xlu2 %v14837_v15, %s8562_s19 }
 0x4dc   : > { %v3946_v10 = vpop.permute.xlu1 %3945  ;;  %v3944_v6 = vpop.permute.xlu0 %3943 }
 0x4dd   : > { %4022 = vst.msk [vmem:[#allocation4 + $0x4c] sm:$0xf] %vm640_vm9, %v3946_v10  ;;  %v4060_v35 = vpop.permute.xlu2 %4059 }
 0x4de   : > { %4021 = vst.msk [vmem:[#allocation4 + $0x48] sm:$0xf] %vm640_vm9, %v3944_v6  ;;  %v14842_v6 = vld [vmem:[#allocation20_spill] sm:$0xff] }
 0x4df   : > { %4155 = vst.msk [vmem:[#allocation4] sm:$0xf] %vm687_vm10, %v4060_v35 }
 0x4e2   : > { %4195 = vrot.lane.b32.xlu1 %v14838_v38, %s8562_s19  ;;  %4121 = vrot.lane.b32.xlu0 %v11838_v2, %s8561_s18 }
 0x4e3   : > { %4203 = vrot.lane.b32.xlu2 %v14839_v50, %s8562_s19  ;;  %v14845_v50 = vld [vmem:[#allocation8_spill] sm:$0xff] }
 0x4e4   : > { %v3952_v3 = vpop.permute.xlu1 %3951  ;;  %v3950_v15 = vpop.permute.xlu0 %3949 }
 0x4e5   : > { %4025 = vst.msk [vmem:[#allocation4 + $0x58] sm:$0xf] %vm640_vm9, %v3952_v3  ;;  %v4066_v10 = vpop.permute.xlu2 %4065 }
 0x4e6   : > { %4024 = vst.msk [vmem:[#allocation4 + $0x54] sm:$0xf] %vm640_vm9, %v3950_v15  ;;  %v14843_v15 = vld [vmem:[#allocation23_spill] sm:$0xff] }
 0x4e7   : > { %4158 = vst.msk [vmem:[#allocation4 + $0xc] sm:$0xf] %vm687_vm10, %v4066_v10  ;;  %v14844_v10 = vld [vmem:[#allocation60_spill] sm:$0xff] }
 0x4ea   : > { %4201 = vrot.lane.b32.xlu1 %v14840_v28, %s8562_s19  ;;  %4199 = vrot.lane.b32.xlu0 %v14841_v20, %s8562_s19 }
 0x4eb   : > { %4209 = vrot.lane.b32.xlu2 %v14842_v6, %s8562_s19 }
 0x4ec   : > { %v3958_v35 = vpop.permute.xlu1 %3957  ;;  %v3956_v38 = vpop.permute.xlu0 %3955 }
 0x4ed   : > { %4028 = vst.msk [vmem:[#allocation4 + $0x64] sm:$0xf] %vm640_vm9, %v3958_v35  ;;  %v4072_v3 = vpop.permute.xlu2 %4071 }
 0x4ee   : > { %4027 = vst.msk [vmem:[#allocation4 + $0x60] sm:$0xf] %vm640_vm9, %v3956_v38  ;;  %v14846_v38 = vld [vmem:[#allocation48_spill] sm:$0xff] }
 0x4ef   : > { %4161 = vst.msk [vmem:[#allocation4 + $0x18] sm:$0xf] %vm687_vm10, %v4072_v3  ;;  %v14847_v3 = vld [vmem:[#allocation64_spill] sm:$0xff] }
 0x4f2   : > { %4207 = vrot.lane.b32.xlu1 %v14843_v15, %s8562_s19  ;;  %4205 = vrot.lane.b32.xlu0 %v14844_v10, %s8562_s19 }
 0x4f3   : > { %4215 = vrot.lane.b32.xlu2 %v14845_v50, %s8562_s19 }
 0x4f4   : > { %v3964_v20 = vpop.permute.xlu1 %3963  ;;  %v3962_v6 = vpop.permute.xlu0 %3961 }
 0x4f5   : > { %4031 = vst.msk [vmem:[#allocation4 + $0x70] sm:$0xf] %vm640_vm9, %v3964_v20  ;;  %v4078_v35 = vpop.permute.xlu2 %4077 }
 0x4f6   : > { %4030 = vst.msk [vmem:[#allocation4 + $0x6c] sm:$0xf] %vm640_vm9, %v3962_v6  ;;  %v14848_v6 = vld [vmem:[#allocation11_spill] sm:$0xff] }
 0x4f7   : > { %4164 = vst.msk [vmem:[#allocation4 + $0x24] sm:$0xf] %vm687_vm10, %v4078_v35 }
 0x4fa   : > { %4213 = vrot.lane.b32.xlu1 %v14846_v38, %s8562_s19  ;;  %4211 = vrot.lane.b32.xlu0 %v14847_v3, %s8562_s19 }
 0x4fb   : > { %4221 = vrot.lane.b32.xlu2 %v11453_v42, %s8562_s19 }
 0x4fc   : > { %v3970_v10 = vpop.permute.xlu1 %3969  ;;  %v3968_v50 = vpop.permute.xlu0 %3967 }
 0x4fd   : > { %4034 = vst.msk [vmem:[#allocation4 + $0x7c] sm:$0xf] %vm640_vm9, %v3970_v10  ;;  %v4084_v20 = vpop.permute.xlu2 %4083 }
 0x4fe   : > { %4033 = vst.msk [vmem:[#allocation4 + $0x78] sm:$0xf] %vm640_vm9, %v3968_v50  ;;  %v14849_v50 = vld [vmem:[#allocation21_spill] sm:$0xff]  ;;  %vm5319_vm9 = vcmask 57344  }
 0x4ff   : > { %4167 = vst.msk [vmem:[#allocation4 + $0x30] sm:$0xf] %vm687_vm10, %v4084_v20  ;;  %v14850_v20 = vld [vmem:[#allocation65_spill] sm:$0xff] }
 0x502   : > { %4219 = vrot.lane.b32.xlu1 %v11459_v21, %s8562_s19  ;;  %4217 = vrot.lane.b32.xlu0 %v14848_v6, %s8562_s19  ;;  %v14851_v6 = vld [vmem:[#allocation29_spill] sm:$0xff] }
 0x503   : > { %4227 = vrot.lane.b32.xlu2 %v11480_v19, %s8562_s19 }
 0x504   : > { %v4064_v35 = vpop.permute.xlu1 %4063  ;;  %v4062_v42 = vpop.permute.xlu0 %4061 }
 0x505   : > { %4157 = vst.msk [vmem:[#allocation4 + $0x8] sm:$0xf] %vm687_vm10, %v4064_v35  ;;  %v4090_v10 = vpop.permute.xlu2 %4089 }
 0x506   : > { %4156 = vst.msk [vmem:[#allocation4 + $0x4] sm:$0xf] %vm687_vm10, %v4062_v42  ;;  %v14852_v42 = vld [vmem:[#allocation69_spill] sm:$0xff] }
 0x507   : > { %4170 = vst.msk [vmem:[#allocation4 + $0x3c] sm:$0xf] %vm687_vm10, %v4090_v10  ;;  %v14853_v10 = vld [vmem:[#allocation67_spill] sm:$0xff] }
 0x50a   : > { %4225 = vrot.lane.b32.xlu1 %v14849_v50, %s8562_s19  ;;  %4223 = vrot.lane.b32.xlu0 %v14850_v20, %s8562_s19 }
 0x50b   : > { %4233 = vrot.lane.b32.xlu2 %v14851_v6, %s8562_s19 }
 0x50c   : > { %v4070_v21 = vpop.permute.xlu1 %4069  ;;  %v4068_v19 = vpop.permute.xlu0 %4067 }
 0x50d   : > { %4160 = vst.msk [vmem:[#allocation4 + $0x14] sm:$0xf] %vm687_vm10, %v4070_v21  ;;  %v4096_v35 = vpop.permute.xlu2 %4095 }
 0x50e   : > { %4159 = vst.msk [vmem:[#allocation4 + $0x10] sm:$0xf] %vm687_vm10, %v4068_v19  ;;  %v14854_v19 = vld [vmem:[#allocation68_spill] sm:$0xff] }
 0x50f   : > { %4173 = vst.msk [vmem:[#allocation4 + $0x48] sm:$0xf] %vm687_vm10, %v4096_v35 }
 0x512   : > { %4231 = vrot.lane.b32.xlu1 %v14852_v42, %s8562_s19  ;;  %4229 = vrot.lane.b32.xlu0 %v14853_v10, %s8562_s19 }
 0x513   : > { %4239 = vrot.lane.b32.xlu2 %v11536_v17, %s8562_s19 }
 0x514   : > { %v4076_v20 = vpop.permute.xlu1 %4075  ;;  %v4074_v6 = vpop.permute.xlu0 %4073 }
 0x515   : > { %4163 = vst.msk [vmem:[#allocation4 + $0x20] sm:$0xf] %vm687_vm10, %v4076_v20  ;;  %v4102_v21 = vpop.permute.xlu2 %4101 }
 0x516   : > { %4162 = vst.msk [vmem:[#allocation4 + $0x1c] sm:$0xf] %vm687_vm10, %v4074_v6  ;;  %v4190_v6 = vrot.slane %v11717_v4, 5 }
 0x517   : > { %4176 = vst.msk [vmem:[#allocation4 + $0x54] sm:$0xf] %vm687_vm10, %v4102_v21  ;;  %v14855_v21 = vld [vmem:[#allocation70_spill] sm:$0xff] }
 0x51a   : > { %4237 = vrot.lane.b32.xlu1 %v11547_v46, %s8562_s19  ;;  %4235 = vrot.lane.b32.xlu0 %v14854_v19, %s8562_s19  ;;  %v4192_v19 = vrot.slane %v4190_v6, 4 }
 0x51b   : > { %4245 = vrot.lane.b32.xlu2 %v11561_v51, %s8562_s19 }
 0x51c   : > { %v4082_v35 = vpop.permute.xlu1 %4081  ;;  %v4080_v17 = vpop.permute.xlu0 %4079 }
 0x51d   : > { %4166 = vst.msk [vmem:[#allocation4 + $0x2c] sm:$0xf] %vm687_vm10, %v4082_v35  ;;  %v4108_v20 = vpop.permute.xlu2 %4107 }
 0x51e   : > { %4165 = vst.msk [vmem:[#allocation4 + $0x28] sm:$0xf] %vm687_vm10, %v4080_v17  ;;  %v4193_v17 = vrot.slane %v11822_v22, 5 }
 0x51f   : > { %4179 = vst.msk [vmem:[#allocation4 + $0x60] sm:$0xf] %vm687_vm10, %v4108_v20 }
 0x522   : > { %4243 = vrot.lane.b32.xlu1 %v11565_v41, %s8562_s19  ;;  %4241 = vrot.lane.b32.xlu0 %v14855_v21, %s8562_s19  ;;  %v11925_v41 = vsel %vm8637_vm2, %v4192_v19, %v4193_v17 }
 0x523   : > { %4251 = vrot.lane.b32.xlu2 %v11587_v11, %s8562_s19  ;;  %v14856_v11 = vld [vmem:[#allocation28_spill] sm:$0xff] }
 0x524   : > { %v4088_v51 = vpop.permute.xlu1 %4087  ;;  %v4086_v35 = vpop.permute.xlu0 %4085 }
 0x525   : > { %4169 = vst.msk [vmem:[#allocation4 + $0x38] sm:$0xf] %vm687_vm10, %v4088_v51  ;;  %v4114_v20 = vpop.permute.xlu2 %4113  ;;  %v8144_v51 = vrot.slane %v11719_v23, 9 }
 0x526   : > { %4168 = vst.msk [vmem:[#allocation4 + $0x34] sm:$0xf] %vm687_vm10, %v4086_v35 }
 0x527   : > { %4182 = vst.msk [vmem:[#allocation4 + $0x6c] sm:$0xf] %vm687_vm10, %v4114_v20  ;;  %v11939_v19 = vsel %vm8637_vm2, %v8144_v51, %v4190_v6 }
 0x52a   : > { %4249 = vrot.lane.b32.xlu1 %v11591_v56, %s8562_s19  ;;  %4247 = vrot.lane.b32.xlu0 %v14856_v11, %s8562_s19 }
 0x52b   : > { %4257 = vrot.lane.b32.xlu2 %v11925_v41, %s8562_s19 }
 0x52c   : > { %v4094_v22 = vpop.permute.xlu1 %4093  ;;  %v4092_v35 = vpop.permute.xlu0 %4091 }
 0x52d   : > { %4172 = vst.msk [vmem:[#allocation4 + $0x44] sm:$0xf] %vm687_vm10, %v4094_v22  ;;  %v4120_v20 = vpop.permute.xlu2 %4119 }
 0x52e   : > { %4171 = vst.msk [vmem:[#allocation4 + $0x40] sm:$0xf] %vm687_vm10, %v4092_v35 }
 0x52f   : > { %4185 = vst.msk [vmem:[#allocation4 + $0x78] sm:$0xf] %vm687_vm10, %v4120_v20  ;;  %v1111_v20 = vld [vmem:[#allocation2 + $0xd0] sm:$0xc] }
 0x532   : > { %4255 = vrot.lane.b32.xlu1 %v11939_v19, %s8562_s19  ;;  %4253 = vrot.lane.b32.xlu0 %v11569_v40, %s8562_s19 }
 0x533   : > { %4329 = vrot.lane.b32.xlu2 %v10714_v53, %s8563_s20 }
 0x534   : > { %v4100_v17 = vpop.permute.xlu1 %4099  ;;  %v4098_v22 = vpop.permute.xlu0 %4097 }
 0x535   : > { %4175 = vst.msk [vmem:[#allocation4 + $0x50] sm:$0xf] %vm687_vm10, %v4100_v17  ;;  %v4198_v35 = vpop.permute.xlu2 %4197  ;;  %v1112_v17 = vsel %vm9913_vm14, 0, %v1111_v20  ;;  %v14864_v20 = vld [vmem:[#allocation37_spill] sm:$0xff]  ;;  %vm14899_vm14 = vmmov %vm14797_vm3 }
 0x536   : > { %4174 = vst.msk [vmem:[#allocation4 + $0x4c] sm:$0xf] %vm687_vm10, %v4098_v22 }
 0x537   : > { %4292 = vst.msk [vmem:[#allocation4 + $0x4] sm:$0xf] %vm725_vm11, %v4198_v35 }
 0x538   : > { %1113 = vst [vmem:[#allocation2 + $0xd0] sm:$0xc] %v1112_v17  ;;  %v14865_v17 = vld [vmem:[#allocation6_spill] sm:$0xff] }
 0x53a   : > { %4327 = vrot.lane.b32.xlu1 %v10728_v62, %s8563_s20  ;;  %4325 = vrot.lane.b32.xlu0 %v10751_v13, %s8563_s20 }
 0x53b   : > { %4335 = vrot.lane.b32.xlu2 %v10773_v9, %s8563_s20 }
 0x53c   : > { %v4106_v6 = vpop.permute.xlu1 %4105  ;;  %v4104_v53 = vpop.permute.xlu0 %4103 }
 0x53d   : > { %4178 = vst.msk [vmem:[#allocation4 + $0x5c] sm:$0xf] %vm687_vm10, %v4106_v6  ;;  %v4204_v51 = vpop.permute.xlu2 %4203 }
 0x53e   : > { %4177 = vst.msk [vmem:[#allocation4 + $0x58] sm:$0xf] %vm687_vm10, %v4104_v53 }
 0x53f   : > { %4295 = vst.msk [vmem:[#allocation4 + $0x10] sm:$0xf] %vm725_vm11, %v4204_v51 }
 0x542   : > { %4333 = vrot.lane.b32.xlu1 %v14737_v26, %s8563_s20  ;;  %4331 = vrot.lane.b32.xlu0 %v10730_v5, %s8563_s20 }
 0x543   : > { %4341 = vrot.lane.b32.xlu2 %v10756_v54, %s8563_s20 }
 0x544   : > { %v4112_v62 = vpop.permute.xlu1 %4111  ;;  %v4110_v13 = vpop.permute.xlu0 %4109 }
 0x545   : > { %4181 = vst.msk [vmem:[#allocation4 + $0x68] sm:$0xf] %vm687_vm10, %v4112_v62  ;;  %v4210_v9 = vpop.permute.xlu2 %4209  ;;  %v14858_v62 = vld [vmem:[#allocation50_spill] sm:$0xff] }
 0x546   : > { %4180 = vst.msk [vmem:[#allocation4 + $0x64] sm:$0xf] %vm687_vm10, %v4110_v13 }
 0x547   : > { %4298 = vst.msk [vmem:[#allocation4 + $0x1c] sm:$0xf] %vm725_vm11, %v4210_v9 }
 0x54a   : > { %4339 = vrot.lane.b32.xlu1 %v14732_v7, %s8563_s20  ;;  %4337 = vrot.lane.b32.xlu0 %v10737_v49, %s8563_s20 }
 0x54b   : > { %4347 = vrot.lane.b32.xlu2 %v10828_v33, %s8563_s20 }
 0x54c   : > { %v4118_v5 = vpop.permute.xlu1 %4117  ;;  %v4116_v54 = vpop.permute.xlu0 %4115 }
 0x54d   : > { %4184 = vst.msk [vmem:[#allocation4 + $0x74] sm:$0xf] %vm687_vm10, %v4118_v5  ;;  %v4216_v26 = vpop.permute.xlu2 %4215 }
 0x54e   : > { %4183 = vst.msk [vmem:[#allocation4 + $0x70] sm:$0xf] %vm687_vm10, %v4116_v54  ;;  %v14861_v54 = vld [vmem:[#allocation18_spill] sm:$0xff] }
 0x54f   : > { %4301 = vst.msk [vmem:[#allocation4 + $0x28] sm:$0xf] %vm725_vm11, %v4216_v26 }
 0x552   : > { %4345 = vrot.lane.b32.xlu1 %v10848_v30, %s8563_s20  ;;  %4343 = vrot.lane.b32.xlu0 %v10801_v63, %s8563_s20 }
 0x553   : > { %4353 = vrot.lane.b32.xlu2 %v10887_v24, %s8563_s20 }
 0x554   : > { %v4196_v49 = vpop.permute.xlu1 %4195  ;;  %v4122_v33 = vpop.permute.xlu0 %4121 }
 0x555   : > { %4291 = vst.msk [vmem:[#allocation4] sm:$0xf] %vm725_vm11, %v4196_v49  ;;  %v4222_v7 = vpop.permute.xlu2 %4221 }
 0x556   : > { %4186 = vst.msk [vmem:[#allocation4 + $0x7c] sm:$0xf] %vm687_vm10, %v4122_v33  ;;  %v14862_v33 = vld [vmem:[#allocation15_spill] sm:$0xff]  ;;  %vm5326_vm10 = vsmask.f32 256 }
 0x557   : > { %4304 = vst.msk [vmem:[#allocation4 + $0x34] sm:$0xf] %vm725_vm11, %v4222_v7  ;;  %v14863_v7 = vld [vmem:[#allocation25_spill] sm:$0xff] }
 0x55a   : > { %4351 = vrot.lane.b32.xlu1 %v10853_v36, %s8563_s20  ;;  %4349 = vrot.lane.b32.xlu0 %v10850_v59, %s8563_s20 }
 0x55b   : > { %4359 = vrot.lane.b32.xlu2 %v10920_v12, %s8563_s20 }
 0x55c   : > { %v4202_v63 = vpop.permute.xlu1 %4201  ;;  %v4200_v30 = vpop.permute.xlu0 %4199 }
 0x55d   : > { %4294 = vst.msk [vmem:[#allocation4 + $0xc] sm:$0xf] %vm725_vm11, %v4202_v63  ;;  %v4228_v24 = vpop.permute.xlu2 %4227 }
 0x55e   : > { %4293 = vst.msk [vmem:[#allocation4 + $0x8] sm:$0xf] %vm725_vm11, %v4200_v30 }
 0x55f   : > { %4307 = vst.msk [vmem:[#allocation4 + $0x40] sm:$0xf] %vm725_vm11, %v4228_v24 }
 0x562   : > { %4357 = vrot.lane.b32.xlu1 %v10960_v43, %s8563_s20  ;;  %4355 = vrot.lane.b32.xlu0 %v10926_v58, %s8563_s20  ;;  %v1037_v58 = vld [vmem:[#allocation2 + $0xcc] sm:$0x7] }
 0x563   : > { %4365 = vrot.lane.b32.xlu2 %v14736_v34, %s8563_s20  ;;  %v1038_v43 = vsel %vm9906_vm0, 0, %v1037_v58  ;;  %vm14901_vm0 = vmmov %vm14797_vm3 }
 0x564   : > { %v4208_v59 = vpop.permute.xlu1 %4207  ;;  %v4206_v36 = vpop.permute.xlu0 %4205  ;;  %1039 = vst [vmem:[#allocation2 + $0xcc] sm:$0x7] %v1038_v43  ;;  %vm14904_vm1 = vmmov %vm14901_vm0 }
 0x565   : > { %4297 = vst.msk [vmem:[#allocation4 + $0x18] sm:$0xf] %vm725_vm11, %v4208_v59  ;;  %v4234_v12 = vpop.permute.xlu2 %4233  ;;  %vm14908_vm6 = vmmov %vm14901_vm0 }
 0x566   : > { %4296 = vst.msk [vmem:[#allocation4 + $0x14] sm:$0xf] %vm725_vm11, %v4206_v36  ;;  %vm14909_vm4 = vmmov %vm14901_vm0 }
 0x567   : > { %4310 = vst.msk [vmem:[#allocation4 + $0x4c] sm:$0xf] %vm725_vm11, %v4234_v12  ;;  %vm14910_vm7 = vmmov %vm14901_vm0 }
 0x56a   : > { %4363 = vrot.lane.b32.xlu1 %v10976_v32, %s8563_s20  ;;  %4361 = vrot.lane.b32.xlu0 %v10969_v16, %s8563_s20 }
 0x56b   : > { %4371 = vrot.lane.b32.xlu2 %v11111_v27, %s8563_s20  ;;  %v12046_v35 = vld [vmem:[#allocation2 + $0xcc] sm:$0xf] }
 0x56c   : > { %v4214_v34 = vpop.permute.xlu1 %4213  ;;  %v4212_v1 = vpop.permute.xlu0 %4211  ;;  %v4454_v26 = vshrl.u32 %v12046_v35, 16  ;;  %v4457_v49 = vshll.u32 %v12046_v35, 16 }
 0x56d   : > { %4300 = vst.msk [vmem:[#allocation4 + $0x24] sm:$0xf] %vm725_vm11, %v4214_v34  ;;  %v4240_v22 = vpop.permute.xlu2 %4239  ;;  %v14866_v34 = vld [vmem:[#allocation46_spill] sm:$0xff] }
 0x56e   : > { %4299 = vst.msk [vmem:[#allocation4 + $0x20] sm:$0xf] %vm725_vm11, %v4212_v1  ;;  %v4456_v36 = vrot.slane %v4454_v26, 4  ;;  %v4459_v12 = vrot.slane %v4457_v49, 5  ;;  %v14876_v49 = vld [vmem:[#allocation9_spill] sm:$0xff] }
 0x56f   : > { %4313 = vst.msk [vmem:[#allocation4 + $0x58] sm:$0xf] %vm725_vm11, %v4240_v22 }
 0x570   : > { %v4460_v58 = vor.u32 %v4459_v12, %v4456_v36 }
 0x572   : > { %4369 = vrot.lane.b32.xlu1 %v11118_v25, %s8563_s20  ;;  %4367 = vrot.lane.b32.xlu0 %v11038_v61, %s8563_s20 }
 0x573   : > { %4377 = vrot.lane.b32.xlu2 %v11162_v31, %s8563_s20 }
 0x574   : > { %v4220_v16 = vpop.permute.xlu1 %4219  ;;  %v4218_v32 = vpop.permute.xlu0 %4217 }
 0x575   : > { %4303 = vst.msk [vmem:[#allocation4 + $0x30] sm:$0xf] %vm725_vm11, %v4220_v16  ;;  %v4246_v27 = vpop.permute.xlu2 %4245  ;;  %v4461_v16 = vrot.slane %v4460_v58, 4 }
 0x576   : > { %4302 = vst.msk [vmem:[#allocation4 + $0x2c] sm:$0xf] %vm725_vm11, %v4218_v32 }
 0x577   : > { %4316 = vst.msk [vmem:[#allocation4 + $0x64] sm:$0xf] %vm725_vm11, %v4246_v27 }
 0x57a   : > { %4375 = vrot.lane.b32.xlu1 %v11206_v45, %s8563_s20  ;;  %4373 = vrot.lane.b32.xlu0 %v11218_v47, %s8563_s20 }
 0x57b   : > { %4383 = vrot.lane.b32.xlu2 %v11717_v4, %s8563_s20  ;;  %v12044_v4 = vld [vmem:[#allocation2 + $0xd0] sm:$0xf] }
 0x57c   : > { %v4226_v61 = vpop.permute.xlu1 %4225  ;;  %v4224_v25 = vpop.permute.xlu0 %4223  ;;  %v4463_v59 = vshll.u32 %v12044_v4, 16 }
 0x57d   : > { %4306 = vst.msk [vmem:[#allocation4 + $0x3c] sm:$0xf] %vm725_vm11, %v4226_v61  ;;  %v4252_v31 = vpop.permute.xlu2 %4251  ;;  %v14867_v61 = vld [vmem:[#allocation27_spill] sm:$0xff] }
 0x57e   : > { %4305 = vst.msk [vmem:[#allocation4 + $0x38] sm:$0xf] %vm725_vm11, %v4224_v25  ;;  %v4465_v43 = vrot.slane %v4463_v59, 5  ;;  %v14868_v25 = vld [vmem:[#allocation22_spill] sm:$0xff]  ;;  %v14877_v59 = vld [vmem:[#allocation57_spill] sm:$0xff] }
 0x57f   : > { %4319 = vst.msk [vmem:[#allocation4 + $0x70] sm:$0xf] %vm725_vm11, %v4252_v31  ;;  %v14869_v31 = vld [vmem:[#allocation53_spill] sm:$0xff] }
 0x580   : > { %v4466_v27 = vsel %vm8677_vm5, %v4461_v16, %v4465_v43 }
 0x582   : > { %4381 = vrot.lane.b32.xlu1 %v11719_v23, %s8563_s20  ;;  %4379 = vrot.lane.b32.xlu0 %v11170_v57, %s8563_s20 }
 0x583   : > { %4477 = vrot.lane.b32.xlu2 %v14809_v48, %s8564_s25 }
 0x584   : > { %v4232_v45 = vpop.permute.xlu1 %4231  ;;  %v4230_v47 = vpop.permute.xlu0 %4229 }
 0x585   : > { %4309 = vst.msk [vmem:[#allocation4 + $0x48] sm:$0xf] %vm725_vm11, %v4232_v45  ;;  %v4258_v39 = vpop.permute.xlu2 %4257 }
 0x586   : > { %4308 = vst.msk [vmem:[#allocation4 + $0x44] sm:$0xf] %vm725_vm11, %v4230_v47 }
 0x587   : > { %4322 = vst.msk [vmem:[#allocation4 + $0x7c] sm:$0xf] %vm725_vm11, %v4258_v39 }
 0x58a   : > { %4387 = vrot.lane.b32.xlu1 %v12044_v4, %s8563_s20  ;;  %4385 = vrot.lane.b32.xlu0 %v12046_v35, %s8563_s20 }
 0x58b   : > { %4483 = vrot.lane.b32.xlu2 %v14812_v37, %s8564_s25 }
 0x58c   : > { %v4238_v57 = vpop.permute.xlu1 %4237  ;;  %v4236_v23 = vpop.permute.xlu0 %4235 }
 0x58d   : > { %4312 = vst.msk [vmem:[#allocation4 + $0x54] sm:$0xf] %vm725_vm11, %v4238_v57  ;;  %v4330_v48 = vpop.permute.xlu2 %4329  ;;  %v14870_v57 = vld [vmem:[#allocation32_spill] sm:$0xff] }
 0x58e   : > { %4311 = vst.msk [vmem:[#allocation4 + $0x50] sm:$0xf] %vm725_vm11, %v4236_v23  ;;  %v14871_v23 = vld [vmem:[#allocation41_spill] sm:$0xff] }
 0x58f   : > { %4423 = vst.msk [vmem:[#allocation4 + $0x8] sm:$0xf] %vm759_vm12, %v4330_v48  ;;  %v14872_v48 = vld [vmem:[#allocation13_spill] sm:$0xff] }
 0x592   : > { %4481 = vrot.lane.b32.xlu1 %v14813_v55, %s8564_s25  ;;  %4479 = vrot.lane.b32.xlu0 %v14806_v52, %s8564_s25  ;;  %v14857_v52 = vld [vmem:[#allocation26_spill] sm:$0xff] }
 0x593   : > { %4489 = vrot.lane.b32.xlu2 %v14815_v60, %s8564_s25 }
 0x594   : > { %v4244_v6 = vpop.permute.xlu1 %4243  ;;  %v4242_v37 = vpop.permute.xlu0 %4241 }
 0x595   : > { %4315 = vst.msk [vmem:[#allocation4 + $0x60] sm:$0xf] %vm725_vm11, %v4244_v6  ;;  %v4336_v53 = vpop.permute.xlu2 %4335 }
 0x596   : > { %4314 = vst.msk [vmem:[#allocation4 + $0x5c] sm:$0xf] %vm725_vm11, %v4242_v37 }
 0x597   : > { %4426 = vst.msk [vmem:[#allocation4 + $0x14] sm:$0xf] %vm759_vm12, %v4336_v53 }
 0x59a   : > { %4487 = vrot.lane.b32.xlu1 %v14816_v8, %s8564_s25  ;;  %4485 = vrot.lane.b32.xlu0 %v14811_v14, %s8564_s25  ;;  %v14859_v8 = vld [vmem:[#allocation36_spill] sm:$0xff] }
 0x59b   : > { %4495 = vrot.lane.b32.xlu2 %v14857_v52, %s8564_s25  ;;  %v14860_v14 = vld [vmem:[#allocation12_spill] sm:$0xff]  ;;  %v14873_v52 = vld [vmem:[#allocation43_spill] sm:$0xff] }
 0x59c   : > { %v4250_v55 = vpop.permute.xlu1 %4249  ;;  %v4248_v60 = vpop.permute.xlu0 %4247 }
 0x59d   : > { %4318 = vst.msk [vmem:[#allocation4 + $0x6c] sm:$0xf] %vm725_vm11, %v4250_v55  ;;  %v4342_v51 = vpop.permute.xlu2 %4341  ;;  %v14874_v55 = vld [vmem:[#allocation45_spill] sm:$0xff] }
 0x59e   : > { %4317 = vst.msk [vmem:[#allocation4 + $0x68] sm:$0xf] %vm725_vm11, %v4248_v60 }
 0x59f   : > { %4429 = vst.msk [vmem:[#allocation4 + $0x20] sm:$0xf] %vm759_vm12, %v4342_v51 }
 0x5a2   : > { %4493 = vrot.lane.b32.xlu1 %v14858_v62, %s8564_s25  ;;  %4491 = vrot.lane.b32.xlu0 %v14859_v8, %s8564_s25  ;;  %v4467_v8 = vshrl.u32 %v12044_v4, 16 }
 0x5a3   : > { %4501 = vrot.lane.b32.xlu2 %v14860_v14, %s8564_s25  ;;  %v14875_v14 = vld [vmem:[#allocation24_spill] sm:$0xff] }
 0x5a4   : > { %v4256_v13 = vpop.permute.xlu1 %4255  ;;  %v4254_v9 = vpop.permute.xlu0 %4253 }
 0x5a5   : > { %4321 = vst.msk [vmem:[#allocation4 + $0x78] sm:$0xf] %vm725_vm11, %v4256_v13  ;;  %v4348_v5 = vpop.permute.xlu2 %4347  ;;  %v4469_v13 = vrot.slane %v4467_v8, 4 }
 0x5a6   : > { %4320 = vst.msk [vmem:[#allocation4 + $0x74] sm:$0xf] %vm725_vm11, %v4254_v9  ;;  %vm12259_vm11 = vmand %vm5319_vm9, %vm5326_vm10 }
 0x5a7   : > { %4432 = vst.msk [vmem:[#allocation4 + $0x2c] sm:$0xf] %vm759_vm12, %v4348_v5  ;;  %v12141_v5 = vld [vmem:[#allocation2 + $0xd4] sm:$0x1]  ;;  %v4470_v26 = vor.u32 %v4469_v13, %v4465_v43 }
 0x5aa   : > { %4499 = vrot.lane.b32.xlu1 %v14861_v54, %s8564_s25  ;;  %4497 = vrot.lane.b32.xlu0 %v14862_v33, %s8564_s25 }
 0x5ab   : > { %4507 = vrot.lane.b32.xlu2 %v14863_v7, %s8564_s25  ;;  %v4471_v7 = vrot.slane %v4470_v26, 4 }
 0x5ac   : > { %v4328_v63 = vpop.permute.xlu1 %4327  ;;  %v4326_v30 = vpop.permute.xlu0 %4325 }
 0x5ad   : > { %4422 = vst.msk [vmem:[#allocation4 + $0x4] sm:$0xf] %vm759_vm12, %v4328_v63  ;;  %v4354_v24 = vpop.permute.xlu2 %4353 }
 0x5ae   : > { %4421 = vst.msk [vmem:[#allocation4] sm:$0xf] %vm759_vm12, %v4326_v30 }
 0x5af   : > { %4435 = vst.msk [vmem:[#allocation4 + $0x38] sm:$0xf] %vm759_vm12, %v4354_v24 }
 0x5b2   : > { %4505 = vrot.lane.b32.xlu1 %v14864_v20, %s8564_s25  ;;  %4503 = vrot.lane.b32.xlu0 %v14865_v17, %s8564_s25  ;;  %v14878_v20 = vld [vmem:[#allocation60_spill] sm:$0xff]  ;;  %v14879_v17 = vld [vmem:[#allocation63_spill] sm:$0xff] }
 0x5b3   : > { %4513 = vrot.lane.b32.xlu2 %v14866_v34, %s8564_s25  ;;  %v14880_v34 = vld [vmem:[#allocation20_spill] sm:$0xff] }
 0x5b4   : > { %v4334_v1 = vpop.permute.xlu1 %4333  ;;  %v4332_v22 = vpop.permute.xlu0 %4331 }
 0x5b5   : > { %4425 = vst.msk [vmem:[#allocation4 + $0x10] sm:$0xf] %vm759_vm12, %v4334_v1  ;;  %v4360_v32 = vpop.permute.xlu2 %4359  ;;  %v14881_v1 = vld [vmem:[#allocation66_spill] sm:$0xff] }
 0x5b6   : > { %4424 = vst.msk [vmem:[#allocation4 + $0xc] sm:$0xf] %vm759_vm12, %v4332_v22 }
 0x5b7   : > { %4438 = vst.msk [vmem:[#allocation4 + $0x44] sm:$0xf] %vm759_vm12, %v4360_v32  ;;  %v14882_v32 = vld [vmem:[#allocation11_spill] sm:$0xff] }
 0x5ba   : > { %4511 = vrot.lane.b32.xlu1 %v14867_v61, %s8564_s25  ;;  %4509 = vrot.lane.b32.xlu0 %v14868_v25, %s8564_s25 }
 0x5bb   : > { %4519 = vrot.lane.b32.xlu2 %v14869_v31, %s8564_s25  ;;  %v14884_v31 = vld [vmem:[#allocation65_spill] sm:$0xff] }
 0x5bc   : > { %v4340_v45 = vpop.permute.xlu1 %4339  ;;  %v4338_v47 = vpop.permute.xlu0 %4337 }
 0x5bd   : > { %4428 = vst.msk [vmem:[#allocation4 + $0x1c] sm:$0xf] %vm759_vm12, %v4340_v45  ;;  %v4366_v39 = vpop.permute.xlu2 %4365  ;;  %v14885_v45 = vld [vmem:[#allocation16_spill] sm:$0xff] }
 0x5be   : > { %4427 = vst.msk [vmem:[#allocation4 + $0x18] sm:$0xf] %vm759_vm12, %v4338_v47 }
 0x5bf   : > { %4441 = vst.msk [vmem:[#allocation4 + $0x50] sm:$0xf] %vm759_vm12, %v4366_v39 }
 0x5c2   : > { %4517 = vrot.lane.b32.xlu1 %v14870_v57, %s8564_s25  ;;  %4515 = vrot.lane.b32.xlu0 %v14871_v23, %s8564_s25  ;;  %v14886_v57 = vld [vmem:[#allocation14_spill] sm:$0xff] }
 0x5c3   : > { %4525 = vrot.lane.b32.xlu2 %v14872_v48, %s8564_s25 }
 0x5c4   : > { %v4346_v6 = vpop.permute.xlu1 %4345  ;;  %v4344_v37 = vpop.permute.xlu0 %4343 }
 0x5c5   : > { %4431 = vst.msk [vmem:[#allocation4 + $0x28] sm:$0xf] %vm759_vm12, %v4346_v6  ;;  %v4372_v53 = vpop.permute.xlu2 %4371  ;;  %v14887_v6 = vld [vmem:[#allocation68_spill] sm:$0xff] }
 0x5c6   : > { %4430 = vst.msk [vmem:[#allocation4 + $0x24] sm:$0xf] %vm759_vm12, %v4344_v37 }
 0x5c7   : > { %4444 = vst.msk [vmem:[#allocation4 + $0x5c] sm:$0xf] %vm759_vm12, %v4372_v53  ;;  %v14889_v53 = vld [vmem:[#allocation71_spill] sm:$0xff] }
 0x5ca   : > { %4523 = vrot.lane.b32.xlu1 %v14873_v52, %s8564_s25  ;;  %4521 = vrot.lane.b32.xlu0 %v14874_v55, %s8564_s25  ;;  %v14890_v55 = vmov 0  }
 0x5cb   : > { %4531 = vrot.lane.b32.xlu2 %v14835_v18, %s8564_s25  ;;  %5318 = vst.msk [vmem:[#allocation3 + $0x4] sm:$0xf] %vm5316_vm8, %v14890_v55 }
 0x5cc   : > { %v4352_v60 = vpop.permute.xlu1 %4351  ;;  %v4350_v51 = vpop.permute.xlu0 %4349  ;;  %5317 = vst.msk [vmem:[#allocation3] sm:$0xf] %vm5316_vm8, %v14890_v55 }
 0x5cd   : > { %4434 = vst.msk [vmem:[#allocation4 + $0x34] sm:$0xf] %vm759_vm12, %v4352_v60  ;;  %v4378_v62 = vpop.permute.xlu2 %4377  ;;  %v14891_v60 = vld [vmem:[#allocation34_spill] sm:$0xff] }
 0x5ce   : > { %4433 = vst.msk [vmem:[#allocation4 + $0x30] sm:$0xf] %vm759_vm12, %v4350_v51 }
 0x5cf   : > { %4447 = vst.msk [vmem:[#allocation4 + $0x68] sm:$0xf] %vm759_vm12, %v4378_v62 }
 0x5d0   : > { %5322 = vst.msk [vmem:[#allocation3 + $0xcc] sm:$0xf] %vm5316_vm8, %v14890_v55 }
 0x5d1   : > { %5323 = vst.msk [vmem:[#allocation3 + $0xd0] sm:$0xf] %vm5316_vm8, %v14890_v55 }
 0x5d2   : > { %4529 = vrot.lane.b32.xlu1 %v14836_v44, %s8564_s25  ;;  %4527 = vrot.lane.b32.xlu0 %v14875_v14, %s8564_s25  ;;  %v4473_v44 = vshll.u32 %v12141_v5, 16  ;;  %5320 = vst.msk [vmem:[#allocation3 + $0x8] sm:$0x1] %vm5319_vm9, %v14890_v55 }
 0x5d3   : > { %4537 = vrot.lane.b32.xlu2 %v4466_v27, %s8564_s25  ;;  %5324 = vst.msk [vmem:[#allocation3 + $0xd4] sm:$0x1] %vm5319_vm9, %v14890_v55 }
 0x5d4   : > { %v4358_v18 = vpop.permute.xlu1 %4357  ;;  %v4356_v9 = vpop.permute.xlu0 %4355  ;;  %v4475_v63 = vrot.slane %v4473_v44, 5  ;;  %v14894_v44 = vmov 0 }
 0x5d5   : > { %4437 = vst.msk [vmem:[#allocation4 + $0x40] sm:$0xf] %vm759_vm12, %v4358_v18  ;;  %v4384_v54 = vpop.permute.xlu2 %4383  ;;  %v14895_v44 = vsel %vm12259_vm11, 4294967295, %v14894_v44 }
 0x5d6   : > { %4436 = vst.msk [vmem:[#allocation4 + $0x3c] sm:$0xf] %vm759_vm12, %v4356_v9 }
 0x5d7   : > { %4450 = vst.msk [vmem:[#allocation4 + $0x74] sm:$0xf] %vm759_vm12, %v4384_v54  ;;  %v4777_v54 = vld [vmem:[%s14163_s5 + $0x10] sm:$0x3] }
 0x5d8   : > { %v4867_v26 = vunpack.c.l.b16 %v4777_v54  ;;  %14896 = vst [vmem:[#allocation30_spill] sm:$0xff] %v14895_v44  ;;  %v8145_v54 = vrot.slane %v12046_v35, 9 }
 0x5da   : > { %4535 = vrot.lane.b32.xlu1 %v11838_v2, %s8564_s25  ;;  %4533 = vrot.lane.b32.xlu0 %v14876_v49, %s8564_s25  ;;  %v4476_v2 = vsel %vm8677_vm5, %v4471_v7, %v4475_v63  ;;  %v4870_v49 = vpack.c.b16 %v4867_v26, %v4867_v26 }
 0x5db   : > { %4615 = vrot.lane.b32.xlu2 %v14840_v28, %s8565_s26 }
 0x5dc   : > { %v4364_v33 = vpop.permute.xlu1 %4363  ;;  %v4362_v30 = vpop.permute.xlu0 %4361 }
 0x5dd   : > { %4440 = vst.msk [vmem:[#allocation4 + $0x4c] sm:$0xf] %vm759_vm12, %v4364_v33  ;;  %v4478_v24 = vpop.permute.xlu2 %4477 }
 0x5de   : > { %4439 = vst.msk [vmem:[#allocation4 + $0x48] sm:$0xf] %vm759_vm12, %v4362_v30 }
 0x5df   : > { %4573 = vst.msk [vmem:[#allocation4] sm:$0xf] %vm806_vm13, %v4478_v24 }
 0x5e2   : > { %4613 = vrot.lane.b32.xlu1 %v14877_v59, %s8565_s26  ;;  %4539 = vrot.lane.b32.xlu0 %v4476_v2, %s8564_s25 }
 0x5e3   : > { %4621 = vrot.lane.b32.xlu2 %v14843_v15, %s8565_s26 }
 0x5e4   : > { %v4370_v28 = vpop.permute.xlu1 %4369  ;;  %v4368_v36 = vpop.permute.xlu0 %4367 }
 0x5e5   : > { %4443 = vst.msk [vmem:[#allocation4 + $0x58] sm:$0xf] %vm759_vm12, %v4370_v28  ;;  %v4484_v12 = vpop.permute.xlu2 %4483  ;;  %v12277_v28 = vld [vmem:[#allocation3 + $0x4] sm:$0xf] }
 0x5e6   : > { %4442 = vst.msk [vmem:[#allocation4 + $0x54] sm:$0xf] %vm759_vm12, %v4368_v36 }
 0x5e7   : > { %4576 = vst.msk [vmem:[#allocation4 + $0xc] sm:$0xf] %vm806_vm13, %v4484_v12 }
 0x5ea   : > { %4619 = vrot.lane.b32.xlu1 %v14878_v20, %s8565_s26  ;;  %4617 = vrot.lane.b32.xlu0 %v14879_v17, %s8565_s26  ;;  %v8479_v20 = vld [vmem:[%s14163_s5] sm:$0xff] }
 0x5eb   : > { %4627 = vrot.lane.b32.xlu2 %v14846_v38, %s8565_s26 }
 0x5ec   : > { %v4376_v58 = vpop.permute.xlu1 %4375  ;;  %v4374_v15 = vpop.permute.xlu0 %4373 }
 0x5ed   : > { %4446 = vst.msk [vmem:[#allocation4 + $0x64] sm:$0xf] %vm759_vm12, %v4376_v58  ;;  %v4490_v43 = vpop.permute.xlu2 %4489  ;;  %v14898_v58 = vld [vmem:[#allocation47_spill] sm:$0xff] }
 0x5ee   : > { %4445 = vst.msk [vmem:[#allocation4 + $0x60] sm:$0xf] %vm759_vm12, %v4374_v15 }
 0x5ef   : > { %4579 = vst.msk [vmem:[#allocation4 + $0x18] sm:$0xf] %vm806_vm13, %v4490_v43 }
 0x5f2   : > { %4625 = vrot.lane.b32.xlu1 %v14847_v3, %s8565_s26  ;;  %4623 = vrot.lane.b32.xlu0 %v14880_v34, %s8565_s26  ;;  %v14883_v3 = vld [vmem:[#allocation8_spill] sm:$0xff] }
 0x5f3   : > { %4633 = vrot.lane.b32.xlu2 %v14881_v1, %s8565_s26  ;;  %v8538_v34 = vld [vmem:[%s14162_s4 + $0x8] sm:$0xff] }
 0x5f4   : > { %v4382_v22 = vpop.permute.xlu1 %4381  ;;  %v4380_v38 = vpop.permute.xlu0 %4379 }
 0x5f5   : > { %4449 = vst.msk [vmem:[#allocation4 + $0x70] sm:$0xf] %vm759_vm12, %v4382_v22  ;;  %v4496_v16 = vpop.permute.xlu2 %4495  ;;  %v8539_v22 = vld [vmem:[%s14162_s4] sm:$0xff] }
 0x5f6   : > { %4448 = vst.msk [vmem:[#allocation4 + $0x6c] sm:$0xf] %vm759_vm12, %v4380_v38 }
 0x5f7   : > { %4582 = vst.msk [vmem:[#allocation4 + $0x24] sm:$0xf] %vm806_vm13, %v4496_v16 }
 0x5fa   : > { %4631 = vrot.lane.b32.xlu1 %v14882_v32, %s8565_s26  ;;  %4629 = vrot.lane.b32.xlu0 %v14883_v3, %s8565_s26 }
 0x5fb   : > { %4639 = vrot.lane.b32.xlu2 %v14849_v50, %s8565_s26 }
 0x5fc   : > { %v4388_v27 = vpop.permute.xlu1 %4387  ;;  %v4386_v61 = vpop.permute.xlu0 %4385 }
 0x5fd   : > { %4452 = vst.msk [vmem:[#allocation4 + $0x7c] sm:$0xf] %vm759_vm12, %v4388_v27  ;;  %v4502_v25 = vpop.permute.xlu2 %4501 }
 0x5fe   : > { %4451 = vst.msk [vmem:[#allocation4 + $0x78] sm:$0xf] %vm759_vm12, %v4386_v61  ;;  %vm14897_vm12 = vcmask 1041408  }
 0x5ff   : > { %4585 = vst.msk [vmem:[#allocation4 + $0x30] sm:$0xf] %vm806_vm13, %v4502_v25  ;;  %v4922_v63 = vsel %vm14897_vm12, %v4870_v49, 0  ;;  %vm14911_vm12 = vmmov %vm14901_vm0 }
 0x600   : > { %4929 = vmatpush.bf16.msrb.mxu0 %v4922_v63  ;;  %8501 = vmatpush.bf16.msra.mxu1 %v4922_v63 }
 0x602   : > { %4637 = vrot.lane.b32.xlu1 %v14884_v31, %s8565_s26  ;;  %4635 = vrot.lane.b32.xlu0 %v14885_v45, %s8565_s26 }
 0x603   : > { %4645 = vrot.lane.b32.xlu2 %v14852_v42, %s8565_s26 }
 0x604   : > { %v4482_v47 = vpop.permute.xlu1 %4481  ;;  %v4480_v50 = vpop.permute.xlu0 %4479 }
 0x605   : > { %4575 = vst.msk [vmem:[#allocation4 + $0x8] sm:$0xf] %vm806_vm13, %v4482_v47  ;;  %v4508_v39 = vpop.permute.xlu2 %4507 }
 0x606   : > { %4574 = vst.msk [vmem:[#allocation4 + $0x4] sm:$0xf] %vm806_vm13, %v4480_v50 }
 0x607   : > { %4588 = vst.msk [vmem:[#allocation4 + $0x3c] sm:$0xf] %vm806_vm13, %v4508_v39 }
 0x60a   : > { %4643 = vrot.lane.b32.xlu1 %v14853_v10, %s8565_s26  ;;  %4641 = vrot.lane.b32.xlu0 %v14886_v57, %s8565_s26  ;;  %v14888_v10 = vld [vmem:[#allocation29_spill] sm:$0xff] }
 0x60b   : > { %4651 = vrot.lane.b32.xlu2 %v11547_v46, %s8565_s26 }
 0x60c   : > { %v4488_v23 = vpop.permute.xlu1 %4487  ;;  %v4486_v42 = vpop.permute.xlu0 %4485 }
 0x60d   : > { %4578 = vst.msk [vmem:[#allocation4 + $0x14] sm:$0xf] %vm806_vm13, %v4488_v23  ;;  %v4514_v48 = vpop.permute.xlu2 %4513 }
 0x60e   : > { %4577 = vst.msk [vmem:[#allocation4 + $0x10] sm:$0xf] %vm806_vm13, %v4486_v42 }
 0x60f   : > { %4591 = vst.msk [vmem:[#allocation4 + $0x48] sm:$0xf] %vm806_vm13, %v4514_v48 }
 0x612   : > { %4649 = vrot.lane.b32.xlu1 %v14887_v6, %s8565_s26  ;;  %4647 = vrot.lane.b32.xlu0 %v14888_v10, %s8565_s26 }
 0x613   : > { %4657 = vrot.lane.b32.xlu2 %v14889_v53, %s8565_s26 }
 0x614   : > { %v4494_v37 = vpop.permute.xlu1 %4493  ;;  %v4492_v46 = vpop.permute.xlu0 %4491 }
 0x615   : > { %4581 = vst.msk [vmem:[#allocation4 + $0x20] sm:$0xf] %vm806_vm13, %v4494_v37  ;;  %v4520_v52 = vpop.permute.xlu2 %4519 }
 0x616   : > { %4580 = vst.msk [vmem:[#allocation4 + $0x1c] sm:$0xf] %vm806_vm13, %v4492_v46 }
 0x617   : > { %4594 = vst.msk [vmem:[#allocation4 + $0x54] sm:$0xf] %vm806_vm13, %v4520_v52 }
 0x61a   : > { %4655 = vrot.lane.b32.xlu1 %v14855_v21, %s8565_s26  ;;  %4653 = vrot.lane.b32.xlu0 %v14891_v60, %s8565_s26  ;;  %v14892_v21 = vld [vmem:[#allocation19_spill] sm:$0xff]  ;;  %v14902_v60 = vld [vmem:[#allocation33_spill] sm:$0xff] }
 0x61b   : > { %4663 = vrot.lane.b32.xlu2 %v11591_v56, %s8565_s26 }
 0x61c   : > { %v4500_v51 = vpop.permute.xlu1 %4499  ;;  %v4498_v62 = vpop.permute.xlu0 %4497 }
 0x61d   : > { %4584 = vst.msk [vmem:[#allocation4 + $0x2c] sm:$0xf] %vm806_vm13, %v4500_v51  ;;  %v4526_v8 = vpop.permute.xlu2 %4525  ;;  %v14903_v51 = vld [vmem:[#allocation31_spill] sm:$0xff] }
 0x61e   : > { %4583 = vst.msk [vmem:[#allocation4 + $0x28] sm:$0xf] %vm806_vm13, %v4498_v62  ;;  %v8237_v62 = vor.u32 %v14903_v51, %v14902_v60 }
 0x61f   : > { %4597 = vst.msk [vmem:[#allocation4 + $0x60] sm:$0xf] %vm806_vm13, %v4526_v8 }
 0x622   : > { %4661 = vrot.lane.b32.xlu1 %v14856_v11, %s8565_s26  ;;  %4659 = vrot.lane.b32.xlu0 %v14892_v21, %s8565_s26  ;;  %v14893_v11 = vld [vmem:[#allocation44_spill] sm:$0xff] }
 0x623   : > { %4669 = vrot.lane.b32.xlu2 %v11939_v19, %s8565_s26 }
 0x624   : > { %v4506_v14 = vpop.permute.xlu1 %4505  ;;  %v4504_v56 = vpop.permute.xlu0 %4503 }
 0x625   : > { %4587 = vst.msk [vmem:[#allocation4 + $0x38] sm:$0xf] %vm806_vm13, %v4506_v14  ;;  %v4532_v13 = vpop.permute.xlu2 %4531 }
 0x626   : > { %4586 = vst.msk [vmem:[#allocation4 + $0x34] sm:$0xf] %vm806_vm13, %v4504_v56 }
 0x627   : > { %4600 = vst.msk [vmem:[#allocation4 + $0x6c] sm:$0xf] %vm806_vm13, %v4532_v13 }
 0x62a   : > { %4667 = vrot.lane.b32.xlu1 %v11569_v40, %s8565_s26  ;;  %4665 = vrot.lane.b32.xlu0 %v14893_v11, %s8565_s26  ;;  %v5328_v40 = vld [vmem:[#allocation3] sm:$0x1] }
 0x62b   : > { %v5329_v33 = vsel %vm12259_vm11, 0, %v5328_v40  ;;  %v14906_v11 = vld [vmem:[#allocation42_spill] sm:$0xff] }
 0x62c   : > { %v4512_v18 = vpop.permute.xlu1 %4511  ;;  %v4510_v9 = vpop.permute.xlu0 %4509  ;;  %5330 = vst [vmem:[#allocation3] sm:$0x1] %v5329_v33 }
 0x62d   : > { %4590 = vst.msk [vmem:[#allocation4 + $0x44] sm:$0xf] %vm806_vm13, %v4512_v18  ;;  %v4538_v19 = vpop.permute.xlu2 %4537  ;;  %v14907_v18 = vld [vmem:[#allocation17_spill] sm:$0xff] }
 0x62e   : > { %4589 = vst.msk [vmem:[#allocation4 + $0x40] sm:$0xf] %vm806_vm13, %v4510_v9  ;;  %v8241_v9 = vor.u32 %v14907_v18, %v14906_v11 }
 0x62f   : > { %4603 = vst.msk [vmem:[#allocation4 + $0x78] sm:$0xf] %vm806_vm13, %v4538_v19  ;;  %v4608_v19 = vrot.slane %v12044_v4, 5 }
 0x631   : > { %v4609_v40 = vsel %vm8637_vm2, %v8145_v54, %v4608_v19  ;;  %v4610_v33 = vrot.slane %v4608_v19, 4 }
 0x632   : > { %4671 = vrot.lane.b32.xlu0 %v11925_v41, %s8565_s26  ;;  %v8480_v41 = vld [vmem:[%s14163_s5 + $0x8] sm:$0xff]  ;;  %4673 = vrot.lane.b32.xlu1 %v4609_v40, %s8565_s26  ;;  %v5334_v40 = vld [vmem:[#allocation3 + $0x18] sm:$0x1] }
 0x633   : > { %4930 = vmatpush.bf16.msrb.mxu0 %v8480_v41  ;;  %8502 = vmatpush.bf16.msra.mxu1 %v8480_v41  ;;  %v12302_v61 = vld [vmem:[#allocation3] sm:$0xf]  ;;  %v5393_v41 = vld [vmem:[#allocation3 + $0x2c] sm:$0x1] }
 0x634   : > { %v4518_v7 = vpop.permute.xlu1 %4517  ;;  %v4516_v30 = vpop.permute.xlu0 %4515 }
 0x635   : > { %4593 = vst.msk [vmem:[#allocation4 + $0x50] sm:$0xf] %vm806_vm13, %v4518_v7  ;;  %v4616_v24 = vpop.permute.xlu2 %4615  ;;  %v4611_v7 = vrot.slane %v12141_v5, 5  ;;  %v14914_v5 = vmov 0 }
 0x636   : > { %4592 = vst.msk [vmem:[#allocation4 + $0x4c] sm:$0xf] %vm806_vm13, %v4516_v30  ;;  %v5337_v30 = vld [vmem:[#allocation3 + $0x24] sm:$0x1] }
 0x637   : > { %4710 = vst.msk [vmem:[#allocation4 + $0x4] sm:$0xf] %vm844_vm15, %v4616_v24  ;;  %4931 = vmatpush.bf16.msrb.mxu0 %v8479_v20  ;;  %8503 = vmatpush.bf16.msra.mxu1 %v8479_v20  ;;  %v4612_v63 = vsel %vm8637_vm2, %v4610_v33, %v4611_v7  ;;  %v5338_v24 = vsel %vm12259_vm11, 0, %v5337_v30  ;;  %v14922_v33 = vld [vmem:[#allocation62_spill] sm:$0xff]  ;;  %v5335_v30 = vsel %vm12259_vm11, 0, %v5334_v40 }
 0x638   : > { %4675 = vrot.lane.b32.xlu2 %v4612_v63, %s8565_s26  ;;  %5339 = vst [vmem:[#allocation3 + $0x24] sm:$0x1] %v5338_v24 }
 0x639   : > { %5336 = vst [vmem:[#allocation3 + $0x18] sm:$0x1] %v5335_v30  ;;  %v5997_v30 = vshll.u32 %v12302_v61, 16 }
 0x63b   : > { %5164 = vmatpush.bf16.msra.mxu0 %v14898_v58 }
 0x63c   : > { %v4524_v2 = vpop.permute.xlu1 %4523  ;;  %v4522_v59 = vpop.permute.xlu0 %4521 }
 0x63d   : > { %4596 = vst.msk [vmem:[#allocation4 + $0x5c] sm:$0xf] %vm806_vm13, %v4524_v2  ;;  %v4622_v12 = vpop.permute.xlu2 %4621 }
 0x63e   : > { %v8463_v36 = vld [vmem:[#allocation4] sm:$0xf0]  ;;  %4595 = vst.msk [vmem:[#allocation4 + $0x58] sm:$0xf] %vm806_vm13, %v4522_v59 }
 0x63f   : > { %5962 = vst.msk [vmem:[#allocation4 + $0x4] sm:$0xf] %vm5316_vm8, %v12277_v28  ;;  %5165 = vmatpush.bf16.msra.mxu0 %v8538_v34 }
 0x640   : > { %4713 = vst.msk [vmem:[#allocation4 + $0x10] sm:$0xf] %vm844_vm15, %v4622_v12 }
 0x643   : > { %5166 = vmatpush.bf16.msra.mxu0 %v8539_v22 }
 0x644   : > { %v4530_v17 = vpop.permute.xlu1 %4529  ;;  %v4528_v15 = vpop.permute.xlu0 %4527 }
 0x645   : > { %4599 = vst.msk [vmem:[#allocation4 + $0x68] sm:$0xf] %vm806_vm13, %v4530_v17  ;;  %v4628_v43 = vpop.permute.xlu2 %4627 }
 0x646   : > { %4598 = vst.msk [vmem:[#allocation4 + $0x64] sm:$0xf] %vm806_vm13, %v4528_v15  ;;  %v5340_v15 = vld [vmem:[#allocation3 + $0x30] sm:$0x1] }
 0x647   : > { %4716 = vst.msk [vmem:[#allocation4 + $0x1c] sm:$0xf] %vm844_vm15, %v4628_v43  ;;  %v5341_v43 = vsel %vm12259_vm11, 0, %v5340_v15 }
 0x648   : > { %5342 = vst [vmem:[#allocation3 + $0x30] sm:$0x1] %v5341_v43 }
 0x64c   : > { %v4536_v1 = vpop.permute.xlu1 %4535  ;;  %v4534_v38 = vpop.permute.xlu0 %4533 }
 0x64d   : > { %4602 = vst.msk [vmem:[#allocation4 + $0x74] sm:$0xf] %vm806_vm13, %v4536_v1  ;;  %v4634_v16 = vpop.permute.xlu2 %4633  ;;  %v12372_v1 = vld [vmem:[%s14164_s6] ss:$0 sm:$0xff] }
 0x64e   : > { %4601 = vst.msk [vmem:[#allocation4 + $0x70] sm:$0xf] %vm806_vm13, %v4534_v38 }
 0x64f   : > { %4719 = vst.msk [vmem:[#allocation4 + $0x28] sm:$0xf] %vm844_vm15, %v4634_v16  ;;  %v5331_v16 = vld [vmem:[#allocation3 + $0xc] sm:$0x1] }
 0x654   : > { %v4614_v32 = vpop.permute.xlu1 %4613  ;;  %v4540_v3 = vpop.permute.xlu0 %4539 }
 0x655   : > { %4709 = vst.msk [vmem:[#allocation4] sm:$0xf] %vm844_vm15, %v4614_v32  ;;  %v4640_v27 = vpop.permute.xlu2 %4639  ;;  %v14917_v32 = vld [vmem:[#allocation40_spill] sm:$0xff] }
 0x656   : > { %4604 = vst.msk [vmem:[#allocation4 + $0x7c] sm:$0xf] %vm806_vm13, %v4540_v3  ;;  %vm14900_vm13 = vmmov %vm14797_vm3 }
 0x657   : > { %4722 = vst.msk [vmem:[#allocation4 + $0x34] sm:$0xf] %vm844_vm15, %v4640_v27  ;;  %vm14905_vm3 = vmmov %vm14901_vm0 }
 0x65c   : > { %v8148_v25 = vld [vmem:[#allocation4] sm:$0xf]  ;;  %v4620_v31 = vpop.permute.xlu1 %4619  ;;  %v4618_v45 = vpop.permute.xlu0 %4617 }
 0x65d   : > { %5961 = vst.msk [vmem:[#allocation4] sm:$0xf] %vm5316_vm8, %v12302_v61  ;;  %v8149_v47 = vor.u32 %v8463_v36, %v8148_v25  ;;  %v4646_v50 = vpop.permute.xlu2 %4645  ;;  %v12356_v36 = vpop.f32.mrf.mxu2  ;;  %v5332_v25 = vsel %vm12259_vm11, 0, %v5331_v16 }
 0x65e   : > { %4712 = vst.msk [vmem:[#allocation4 + $0xc] sm:$0xf] %vm844_vm15, %v4620_v31 }
 0x65f   : > { %4711 = vst.msk [vmem:[#allocation4 + $0x8] sm:$0xf] %vm844_vm15, %v4618_v45  ;;  %8218 = vmatmul.msk.bf16.vlgmr.msrb.gmra.mxu0 %vm14899_vm14, %v8149_v47  ;;  %vm14912_vm14 = vmmov %vm14901_vm0  ;;  %v5396_v47 = vld [vmem:[#allocation3 + $0x38] sm:$0x1] }
 0x660   : > { %4725 = vst.msk [vmem:[#allocation4 + $0x40] sm:$0xf] %vm844_vm15, %v4646_v50 }
 0x661   : > { %5333 = vst [vmem:[#allocation3 + $0xc] sm:$0x1] %v5332_v25 }
 0x664   : > { %v4626_v39 = vpop.permute.xlu1 %4625  ;;  %v4624_v57 = vpop.permute.xlu0 %4623 }
 0x665   : > { %4715 = vst.msk [vmem:[#allocation4 + $0x18] sm:$0xf] %vm844_vm15, %v4626_v39  ;;  %v4652_v23 = vpop.permute.xlu2 %4651  ;;  %v12367_v34 = vpop.f32.mrf.mxu2 }
 0x666   : > { %4714 = vst.msk [vmem:[#allocation4 + $0x14] sm:$0xf] %vm844_vm15, %v4624_v57  ;;  %v8464_v6 = vld [vmem:[#allocation4 + $0x8] sm:$0xff] }
 0x667   : > { %4728 = vst.msk [vmem:[#allocation4 + $0x4c] sm:$0xf] %vm844_vm15, %v4652_v23 }
 0x66c   : > { %v4632_v42 = vpop.permute.xlu1 %4631  ;;  %v4630_v48 = vpop.permute.xlu0 %4629  ;;  %v8466_v55 = vld [vmem:[#allocation4 + $0x18] sm:$0xff] }
 0x66d   : > { %4718 = vst.msk [vmem:[#allocation4 + $0x24] sm:$0xf] %vm844_vm15, %v4632_v42  ;;  %v8465_v10 = vld [vmem:[#allocation4 + $0x10] sm:$0xff]  ;;  %v4658_v59 = vpop.permute.xlu2 %4657  ;;  %v12385_v57 = vpop.f32.mrf.mxu2 }
 0x66e   : > { %4717 = vst.msk [vmem:[#allocation4 + $0x20] sm:$0xf] %vm844_vm15, %v4630_v48  ;;  %8220 = vmatmul.msk.bf16.vlgmr.msra.gmra.mxu1 %vm14901_vm0, %v8465_v10 }
 0x66f   : > { %8219 = vmatmul.msk.bf16.gmra.mxu0 %vm14900_vm13, %v8464_v6  ;;  %vm14913_vm13 = vmmov %vm14901_vm0  ;;  %vm5382_vm0 = vsmask.f32 7938  ;;  %4731 = vst.msk [vmem:[#allocation4 + $0x58] sm:$0xf] %vm844_vm15, %v4658_v59 }
 0x674   : > { %v4638_v37 = vpop.permute.xlu1 %4637  ;;  %v4636_v53 = vpop.permute.xlu0 %4635 }
 0x675   : > { %4721 = vst.msk [vmem:[#allocation4 + $0x30] sm:$0xf] %vm844_vm15, %v4638_v37  ;;  %v8467_v13 = vld [vmem:[#allocation4 + $0x20] sm:$0xff]  ;;  %v4664_v31 = vpop.permute.xlu2 %4663  ;;  %v14919_v37 = vld [vmem:[#allocation10_spill] sm:$0xff]  ;;  %v12401_v11 = vpop.f32.mrf.mxu2 }
 0x676   : > { %4720 = vst.msk [vmem:[#allocation4 + $0x2c] sm:$0xf] %vm844_vm15, %v4636_v53 }
 0x677   : > { %4734 = vst.msk [vmem:[#allocation4 + $0x64] sm:$0xf] %vm844_vm15, %v4664_v31 }
 0x67c   : > { %v4644_v46 = vpop.permute.xlu1 %4643  ;;  %v4642_v52 = vpop.permute.xlu0 %4641  ;;  %v8469_v49 = vld [vmem:[#allocation4 + $0x30] sm:$0xff] }
 0x67d   : > { %4724 = vst.msk [vmem:[#allocation4 + $0x3c] sm:$0xf] %vm844_vm15, %v4644_v46  ;;  %v8468_v26 = vld [vmem:[#allocation4 + $0x28] sm:$0xff]  ;;  %v5387_v46 = vld [vmem:[#allocation3 + $0x14] sm:$0x1] }
 0x67e   : > { %4723 = vst.msk [vmem:[#allocation4 + $0x38] sm:$0xf] %vm844_vm15, %v4642_v52  ;;  %8221 = vmatmul.msk.bf16.gmra.mxu1 %vm14904_vm1, %v8466_v55  ;;  %vm12350_vm1 = vmand %vm5319_vm9, %vm5382_vm0 }
 0x67f   : > { %8306 = vmatmul.msk.bf16.vlgmr.msra.gmra.mxu0 %vm14905_vm3, %v8237_v62  ;;  %v14915_v5 = vsel %vm12350_vm1, 4294967295, %v14914_v5  ;;  %v5394_v20 = vsel %vm12350_vm1, 0, %v5393_v41  ;;  %v5397_v50 = vsel %vm12350_vm1, 0, %v5396_v47  ;;  %vm14918_vm9 = vmmov %vm14905_vm3  ;;  %v5388_v51 = vsel %vm12350_vm1, 0, %v5387_v46 }
 0x680   : > { %14916 = vst [vmem:[#allocation35_spill] sm:$0xff] %v14915_v5 }
 0x681   : > { %5395 = vst [vmem:[#allocation3 + $0x2c] sm:$0x1] %v5394_v20 }
 0x682   : > { %5398 = vst [vmem:[#allocation3 + $0x38] sm:$0x1] %v5397_v50  ;;  %v12426_v50 = vpop.f32.mrf.mxu2 }
 0x683   : > { %5389 = vst [vmem:[#allocation3 + $0x14] sm:$0x1] %v5388_v51 }
 0x684   : > { %v4650_v8 = vpop.permute.xlu1 %4649  ;;  %v4648_v21 = vpop.permute.xlu0 %4647 }
 0x685   : > { %4727 = vst.msk [vmem:[#allocation4 + $0x48] sm:$0xf] %vm844_vm15, %v4650_v8  ;;  %v8470_v4 = vld [vmem:[#allocation4 + $0x38] sm:$0xff]  ;;  %v5809_v8 = vld [vmem:[#allocation3 + $0x24] sm:$0xf] }
 0x686   : > { %4726 = vst.msk [vmem:[#allocation4 + $0x44] sm:$0xf] %vm844_vm15, %v4648_v21  ;;  %v5343_v21 = vld [vmem:[#allocation3 + $0x3c] sm:$0x1] }
 0x688   : > { %v5813_v15 = vld [vmem:[#allocation3 + $0x2c] sm:$0x1] }
 0x68c   : > { %v4656_v14 = vpop.permute.xlu1 %4655  ;;  %v4654_v56 = vpop.permute.xlu0 %4653  ;;  %v8472_v12 = vld [vmem:[#allocation4 + $0x48] sm:$0xff] }
 0x68d   : > { %4730 = vst.msk [vmem:[#allocation4 + $0x54] sm:$0xf] %vm844_vm15, %v4656_v14  ;;  %v8471_v35 = vld [vmem:[#allocation4 + $0x40] sm:$0xff] }
 0x68e   : > { %4729 = vst.msk [vmem:[#allocation4 + $0x50] sm:$0xf] %vm844_vm15, %v4654_v56  ;;  %8222 = vmatmul.msk.bf16.gmra.mxu1 %vm14908_vm6, %v8467_v13  ;;  %vm12395_vm6 = vmand %vm5316_vm8, %vm5382_vm0  ;;  %v5344_v13 = vsel %vm12259_vm11, 0, %v5343_v21  ;;  %vm6473_vm0 = vcmask 126016  }
 0x68f   : > { %8307 = vmatmul.msk.bf16.gmra.mxu0 %vm14909_vm4, %v8241_v9  ;;  %5345 = vst [vmem:[#allocation3 + $0x3c] sm:$0x1] %v5344_v13  ;;  %vm5470_vm4 = vsmask.f32 4368  ;;  %v5346_v13 = vld [vmem:[#allocation3 + $0x48] sm:$0x1] }
 0x694   : > { %v4660_v58 = vpop.permute.xlu0 %4659  ;;  %v4662_v45 = vpop.permute.xlu1 %4661 }
 0x695   : > { %4732 = vst.msk [vmem:[#allocation4 + $0x5c] sm:$0xf] %vm844_vm15, %v4660_v58  ;;  %v8473_v27 = vld [vmem:[#allocation4 + $0x50] sm:$0xff] }
 0x696   : > { %4733 = vst.msk [vmem:[#allocation4 + $0x60] sm:$0xf] %vm844_vm15, %v4662_v45 }
 0x69c   : > { %v8474_v19 = vld [vmem:[#allocation4 + $0x58] sm:$0xff] }
 0x69e   : > { %8223 = vmatmul.msk.bf16.gmra.mxu1 %vm14910_vm7, %v8468_v26  ;;  %vm14923_vm7 = vmmov %vm14905_vm3 }
 0x6ae   : > { %8224 = vmatmul.msk.bf16.gmra.mxu1 %vm14911_vm12, %v8469_v49  ;;  %vm12417_vm12 = vmor %vm5326_vm10, %vm5470_vm4  ;;  %vm7838_vm4 = vcmask 1043456  }
 0x6af   : > { %vm14927_vm10 = vmmov %vm14905_vm3 }
 0x6be   : > { %8225 = vmatmul.msk.bf16.gmra.mxu1 %vm14912_vm14, %v8470_v4  ;;  %v4668_v4 = vpop.permute.xlu1 %4667  ;;  %vm14930_vm14 = vmmov %vm14905_vm3 }
 0x6bf   : > { %4736 = vst.msk [vmem:[#allocation4 + $0x6c] sm:$0xf] %vm844_vm15, %v4668_v4 }
 0x6ce   : > { %8226 = vmatmul.msk.bf16.gmra.mxu1 %vm14913_vm13, %v8471_v35  ;;  %v5399_v35 = vld [vmem:[#allocation3 + $0x44] sm:$0x1]  ;;  %vm14944_vm13 = vmmov %vm14905_vm3 }
 0x6cf   : > { %v5400_v24 = vsel %vm12350_vm1, 0, %v5399_v35  ;;  %v5994_v35 = vshrl.u32 %v12302_v61, 16 }
 0x6d0   : > { %5401 = vst [vmem:[#allocation3 + $0x44] sm:$0x1] %v5400_v24  ;;  %v5402_v24 = vld [vmem:[#allocation3 + $0x50] sm:$0x1] }
 0x6dc   : > { %v12354_v2 = vpop.f32.mrf.mxu0 }
 0x6de   : > { %8227 = vmatmul.msk.bf16.gmra.mxu1 %vm14905_vm3, %v8472_v12 }
 0x6e4   : > { %v12362_v17 = vpop.f32.mrf.mxu0 }
 0x6eb   : > { %v4943_v38 = vpop.f32.mrf.mxu1 }
 0x6ec   : > { %v12374_v22 = vpop.f32.mrf.mxu0  ;;  %v5179_v3 = vadd.f32 %v14917_v32, %v4943_v38 }
 0x6ee   : > { %v5256_v39 = vadd.f32 %v12372_v1, %v5179_v3  ;;  %8228 = vmatmul.msk.bf16.gmra.mxu1 %vm14918_vm9, %v8473_v27  ;;  %vm7046_vm9 = vcmask 322816  }
 0x6f0   : > { %v5288_v23 = vmax.f32 %v5256_v39, 0.0 }
 0x6f2   : > { %v5442_v42 = vpack.c.bf16 %v5288_v23, %v5288_v23 }
 0x6f3   : > { %v4945_v6 = vpop.f32.mrf.mxu1 }
 0x6f4   : > { %v12387_v48 = vpop.f32.mrf.mxu0  ;;  %v5507_v10 = vshrl.u32 %v5442_v42, 16  ;;  %v5181_v53 = vadd.f32 %v14919_v37, %v4945_v6  ;;  %v5510_v55 = vshll.u32 %v5442_v42, 16  ;;  %v14926_v6 = vld [vmem:[#allocation61_spill] sm:$0xff] }
 0x6f6   : > { %v5509_v52 = vrot.slane %v5507_v10, 7  ;;  %v5257_v60 = vadd.f32 %v12372_v1, %v5181_v53  ;;  %v5390_v53 = vld [vmem:[#allocation3 + $0x20] sm:$0x1] }
 0x6f7   : > { %v5391_v51 = vsel %vm12350_vm1, 0, %v5390_v53 }
 0x6f8   : > { %v5512_v14 = vor.u32 %v5510_v55, %v5509_v52  ;;  %v5289_v56 = vmax.f32 %v5257_v60, 0.0  ;;  %5392 = vst [vmem:[#allocation3 + $0x20] sm:$0x1] %v5391_v51 }
 0x6fa   : > { %v5810_v18 = vsel %vm12395_vm6, %v5512_v14, %v5809_v8  ;;  %v5443_v9 = vpack.c.bf16 %v5289_v56, %v5289_v56  ;;  %v5795_v8 = vld [vmem:[#allocation3 + $0xc] sm:$0xf]  ;;  %v4666_v56 = vpop.permute.xlu0 %4665 }
 0x6fb   : > { %5811 = vst [vmem:[#allocation3 + $0x24] sm:$0xf] %v5810_v18  ;;  %v4948_v54 = vpop.f32.mrf.mxu1 }
 0x6fc   : > { %v5168_v26 = vpop.f32.mrf.mxu0  ;;  %v5515_v49 = vshrl.u32 %v5443_v9, 16  ;;  %v5184_v7 = vadd.f32 %v14922_v33, %v4948_v54  ;;  %v5518_v41 = vshll.u32 %v5443_v9, 16  ;;  %4735 = vst.msk [vmem:[#allocation4 + $0x68] sm:$0xf] %vm844_vm15, %v4666_v56  ;;  %v5347_v54 = vsel %vm12259_vm11, 0, %v5346_v13 }
 0x6fd   : > { %v5169_v63 = vadd.f32 %v5168_v26, %v12354_v2  ;;  %v5513_v2 = vrot.slane %v5509_v52, 4  ;;  %v5816_v52 = vld [vmem:[#allocation3 + $0x30] sm:$0xf]  ;;  %5348 = vst [vmem:[#allocation3 + $0x48] sm:$0x1] %v5347_v54 }
 0x6fe   : > { %v5517_v59 = vrot.slane %v5515_v49, 7  ;;  %v5258_v12 = vadd.f32 %v12372_v1, %v5184_v7  ;;  %8229 = vmatmul.msk.bf16.gmra.mxu1 %vm14923_vm7, %v8474_v19  ;;  %v8475_v49 = vld [vmem:[#allocation4 + $0x60] sm:$0xff]  ;;  %vm7314_vm7 = vcmask 454016  }
 0x6ff   : > { %v5252_v20 = vadd.f32 %v12372_v1, %v5169_v63 }
 0x700   : > { %v5520_v43 = vor.u32 %v5518_v41, %v5517_v59  ;;  %v5522_v38 = vrot.slane %v5517_v59, 4  ;;  %v5290_v16 = vmax.f32 %v5258_v12, 0.0  ;;  %v6003_v12 = vshll.u32 %v12277_v28, 16 }
 0x701   : > { %v5284_v32 = vmax.f32 %v5252_v20, 0.0  ;;  %v4670_v20 = vpop.permute.xlu2 %4669 }
 0x702   : > { %v5521_v3 = vsel %vm12417_vm12, %v5513_v2, %v5520_v43  ;;  %v5814_v27 = vsel %vm12259_vm11, %v5522_v38, %v5813_v15  ;;  %v5444_v25 = vpack.c.bf16 %v5290_v16, %v5290_v16  ;;  %v5403_v2 = vsel %vm12350_vm1, 0, %v5402_v24  ;;  %4737 = vst.msk [vmem:[#allocation4 + $0x70] sm:$0xf] %vm844_vm15, %v4670_v20  ;;  %v5384_v20 = vld [vmem:[#allocation3 + $0x8] sm:$0x1] }
 0x703   : > { %v5438_v31 = vpack.c.bf16 %v5284_v32, %v5284_v32  ;;  %5812 = vst.msk [vmem:[#allocation3 + $0x28] sm:$0xf] %vm5316_vm8, %v5521_v3  ;;  %v4950_v45 = vpop.f32.mrf.mxu1  ;;  %v12457_v32 = vpop.f32.mrf.mxu2  ;;  %v5820_v3 = vld [vmem:[#allocation3 + $0x38] sm:$0x1]  ;;  %v12462_v53 = vrot.slane %v6003_v12, 5 }
 0x704   : > { %v5170_v47 = vpop.f32.mrf.mxu0  ;;  %5815 = vst [vmem:[#allocation3 + $0x2c] sm:$0x1] %v5814_v27  ;;  %v5524_v39 = vshrl.u32 %v5444_v25, 16  ;;  %v5527_v42 = vshll.u32 %v5444_v25, 16  ;;  %v5186_v10 = vadd.f32 %v14926_v6, %v4950_v45  ;;  %v5996_v27 = vrot.slane %v5994_v35, 4 }
 0x705   : > { %v5473_v23 = vshrl.u32 %v5438_v31, 16  ;;  %v5171_v37 = vadd.f32 %v5170_v47, %v12362_v17  ;;  %v5476_v60 = vshll.u32 %v5438_v31, 16  ;;  %v5999_v25 = vrot.slane %v5997_v30, 5  ;;  %5404 = vst [vmem:[#allocation3 + $0x50] sm:$0x1] %v5403_v2 }
 0x706   : > { %v12430_v46 = vrot.slane %v5524_v39, 7  ;;  %v5259_v21 = vadd.f32 %v12372_v1, %v5186_v10 }
 0x707   : > { %v12432_v55 = vrot.slane %v5473_v23, 7  ;;  %v5253_v14 = vadd.f32 %v12372_v1, %v5171_v37  ;;  %v5799_v23 = vld [vmem:[#allocation3 + $0x14] sm:$0x1]  ;;  %v6000_v37 = vor.u32 %v5999_v25, %v5996_v27  ;;  %v5385_v27 = vsel %vm12350_vm1, 0, %v5384_v20 }
 0x708   : > { %v5529_v17 = vor.u32 %v5527_v42, %v12430_v46  ;;  %v5291_v9 = vmax.f32 %v5259_v21, 0.0  ;;  %v5530_v15 = vrot.slane %v12430_v46, 4  ;;  %v4672_v42 = vpop.permute.xlu0 %4671  ;;  %5386 = vst [vmem:[#allocation3 + $0x8] sm:$0x1] %v5385_v27 }
 0x709   : > { %v5478_v18 = vor.u32 %v5476_v60, %v12432_v55  ;;  %v5285_v19 = vmax.f32 %v5253_v14, 0.0  ;;  %v5479_v43 = vrot.slane %v12432_v55, 4  ;;  %4738 = vst.msk [vmem:[#allocation4 + $0x74] sm:$0xf] %vm844_vm15, %v4672_v42  ;;  %v6001_v21 = vrot.slane %v6000_v37, 4 }
 0x70a   : > { %v5817_v26 = vsel %vm12395_vm6, %v5529_v17, %v5816_v52  ;;  %v5445_v33 = vpack.c.bf16 %v5291_v9, %v5291_v9 }
 0x70b   : > { %v5796_v40 = vsel %vm12395_vm6, %v5478_v18, %v5795_v8  ;;  %5818 = vst [vmem:[#allocation3 + $0x30] sm:$0xf] %v5817_v26  ;;  %v5439_v7 = vpack.c.bf16 %v5285_v19, %v5285_v19  ;;  %v4953_v63 = vpop.f32.mrf.mxu1  ;;  %v12492_v2 = vpop.f32.mrf.mxu2 }
 0x70c   : > { %v5173_v4 = vpop.f32.mrf.mxu0  ;;  %5797 = vst [vmem:[#allocation3 + $0xc] sm:$0xf] %v5796_v40  ;;  %v5189_v59 = vadd.f32 %v12356_v36, %v4953_v63  ;;  %v5532_v38 = vshrl.u32 %v5445_v33, 16  ;;  %v5535_v45 = vshll.u32 %v5445_v33, 16  ;;  %v5823_v33 = vld [vmem:[#allocation3 + $0x3c] sm:$0xf] }
 0x70d   : > { %v5174_v41 = vadd.f32 %v5173_v4, %v12374_v22  ;;  %v5481_v16 = vshrl.u32 %v5439_v7, 16  ;;  %v5484_v39 = vshll.u32 %v5439_v7, 16  ;;  %v6006_v4 = vsel %vm8677_vm5, %v6001_v21, %v12462_v53 }
 0x70e   : > { %v5260_v36 = vadd.f32 %v12372_v1, %v5189_v59  ;;  %8230 = vmatmul.msk.bf16.gmra.mxu1 %vm14927_vm10, %v8475_v49  ;;  %v5534_v31 = vrot.slane %v5532_v38, 7  ;;  %6377 = vrot.lane.b32.xlu0 %v6006_v4, %s8558_s15  ;;  %vm7604_vm10 = vcmask 585216  }
 0x70f   : > { %v5254_v22 = vadd.f32 %v12372_v1, %v5174_v41  ;;  %v5483_v47 = vrot.slane %v5481_v16, 7  ;;  %v5349_v16 = vld [vmem:[#allocation3 + $0x54] sm:$0x1] }
 0x710   : > { %v5292_v6 = vmax.f32 %v5260_v36, 0.0  ;;  %v5537_v46 = vor.u32 %v5535_v45, %v5534_v31  ;;  %v5539_v52 = vrot.slane %v5534_v31, 4  ;;  %v5350_v37 = vsel %vm12259_vm11, 0, %v5349_v16 }
 0x711   : > { %v5286_v10 = vmax.f32 %v5254_v22, 0.0  ;;  %v5486_v55 = vor.u32 %v5484_v39, %v5483_v47  ;;  %v5488_v60 = vrot.slane %v5483_v47, 4  ;;  %v8476_v47 = vld [vmem:[#allocation4 + $0x68] sm:$0xff]  ;;  %5351 = vst [vmem:[#allocation3 + $0x54] sm:$0x1] %v5350_v37 }
 0x712   : > { %v5446_v51 = vpack.c.bf16 %v5292_v6, %v5292_v6  ;;  %v5538_v14 = vsel %vm12417_vm12, %v5530_v15, %v5537_v46  ;;  %v5821_v56 = vsel %vm12259_vm11, %v5539_v52, %v5820_v3  ;;  %v12508_v46 = vld [vmem:[#allocation3 + $0x24] sm:$0xf] }
 0x713   : > { %v5440_v8 = vpack.c.bf16 %v5286_v10, %v5286_v10  ;;  %v5487_v13 = vsel %vm12417_vm12, %v5479_v43, %v5486_v55  ;;  %v5800_v17 = vsel %vm12259_vm11, %v5488_v60, %v5799_v23  ;;  %v4955_v18 = vpop.f32.mrf.mxu1  ;;  %v12473_v19 = vld [vmem:[#allocation3 + $0xc] sm:$0xf]  ;;  %5819 = vst.msk [vmem:[#allocation3 + $0x34] sm:$0xf] %vm5316_vm8, %v5538_v14 }
 0x714   : > { %v5175_v9 = vpop.f32.mrf.mxu0  ;;  %v5541_v54 = vshrl.u32 %v5446_v51, 16  ;;  %v5544_v26 = vshll.u32 %v5446_v51, 16  ;;  %5822 = vst [vmem:[#allocation3 + $0x38] sm:$0x1] %v5821_v56  ;;  %v5191_v7 = vadd.f32 %v12367_v34, %v4955_v18  ;;  %v6018_v35 = vshrl.u32 %v12473_v19, 16 }
 0x715   : > { %v5490_v40 = vshrl.u32 %v5440_v8, 16  ;;  %v5493_v49 = vshll.u32 %v5440_v8, 16  ;;  %v5176_v63 = vadd.f32 %v5175_v9, %v12387_v48  ;;  %5798 = vst.msk [vmem:[#allocation3 + $0x10] sm:$0xf] %vm5316_vm8, %v5487_v13  ;;  %v6021_v59 = vshll.u32 %v12473_v19, 16 }
 0x716   : > { %v12483_v30 = vrot.slane %v5541_v54, 7  ;;  %v6007_v34 = vshrl.u32 %v12277_v28, 16  ;;  %5801 = vst [vmem:[#allocation3 + $0x14] sm:$0x1] %v5800_v17  ;;  %v5802_v48 = vld [vmem:[#allocation3 + $0x18] sm:$0xf]  ;;  %v5261_v41 = vadd.f32 %v12372_v1, %v5191_v7  ;;  %v4676_v7 = vpop.permute.xlu2 %4675 }
 0x717   : > { %v12485_v24 = vrot.slane %v5490_v40, 7  ;;  %v5255_v12 = vadd.f32 %v12372_v1, %v5176_v63  ;;  %v6020_v38 = vrot.slane %v6018_v35, 4  ;;  %5963 = vst.msk [vmem:[#allocation4 + $0x8] sm:$0xf] %vm5316_vm8, %v12473_v19  ;;  %v6023_v22 = vrot.slane %v6021_v59, 5 }
 0x718   : > { %v5546_v15 = vor.u32 %v5544_v26, %v12483_v30  ;;  %v5293_v3 = vmax.f32 %v5261_v41, 0.0  ;;  %v5547_v25 = vrot.slane %v12483_v30, 4  ;;  %v6009_v39 = vrot.slane %v6007_v34, 4  ;;  %14928 = vst [vmem:[#allocation7_spill] sm:$0xff] %v12508_v46  ;;  %v12512_v51 = vld [vmem:[#allocation3 + $0x28] sm:$0xf] }
 0x719   : > { %v5495_v43 = vor.u32 %v5493_v49, %v12485_v24  ;;  %v5287_v36 = vmax.f32 %v5255_v12, 0.0  ;;  %v5496_v23 = vrot.slane %v12485_v24, 4  ;;  %v6024_v55 = vor.u32 %v6023_v22, %v6020_v38  ;;  %14929 = vst [vmem:[#allocation51_spill] sm:$0xff] %v12512_v51  ;;  %v5827_v18 = vld [vmem:[#allocation3 + $0x44] sm:$0x1]  ;;  %v12528_v12 = vpop.f32.mrf.mxu2 }
 0x71a   : > { %v5824_v31 = vsel %vm12395_vm6, %v5546_v15, %v5823_v33  ;;  %v5447_v42 = vpack.c.bf16 %v5293_v3, %v5293_v3  ;;  %v6010_v60 = vor.u32 %v6009_v39, %v12462_v53  ;;  %v6066_v8 = vshrl.u32 %v12508_v46, 16  ;;  %5967 = vst.msk [vmem:[#allocation4 + $0x18] sm:$0xf] %vm5316_vm8, %v12508_v46  ;;  %v5806_v41 = vld [vmem:[#allocation3 + $0x20] sm:$0x1] }
 0x71b   : > { %v5803_v45 = vsel %vm12395_vm6, %v5495_v43, %v5802_v48  ;;  %5825 = vst [vmem:[#allocation3 + $0x3c] sm:$0xf] %v5824_v31  ;;  %v5441_v6 = vpack.c.bf16 %v5287_v36, %v5287_v36  ;;  %v4958_v10 = vpop.f32.mrf.mxu1  ;;  %v6069_v17 = vshll.u32 %v12508_v46, 16  ;;  %v6025_v4 = vrot.slane %v6024_v55, 4  ;;  %v5909_v38 = vld [vmem:[#allocation3 + $0x8] sm:$0x1] }
 0x71c   : > { %5804 = vst [vmem:[#allocation3 + $0x18] sm:$0xf] %v5803_v45  ;;  %v5194_v52 = vadd.f32 %v12385_v57, %v4958_v10  ;;  %v5549_v21 = vshrl.u32 %v5447_v42, 16  ;;  %v5552_v14 = vshll.u32 %v5447_v42, 16  ;;  %v12515_v13 = vld [vmem:[#allocation3 + $0x10] sm:$0xf] }
 0x71d   : > { %v5498_v56 = vshrl.u32 %v5441_v6, 16  ;;  %v5501_v9 = vshll.u32 %v5441_v6, 16  ;;  %v6027_v57 = vshll.u32 %v12515_v13, 16  ;;  %5964 = vst.msk [vmem:[#allocation4 + $0xc] sm:$0xf] %vm5316_vm8, %v12515_v13  ;;  %v6031_v49 = vshrl.u32 %v12515_v13, 16 }
 0x71e   : > { %v5262_v54 = vadd.f32 %v12372_v1, %v5194_v52  ;;  %8231 = vmatmul.msk.bf16.gmra.mxu1 %vm14930_vm14, %v8476_v47  ;;  %v5912_v53 = vld [vmem:[#allocation3 + $0x14] sm:$0x1]  ;;  %v5551_v26 = vrot.slane %v5549_v21, 7  ;;  %v6011_v30 = vrot.slane %v6010_v60, 4  ;;  %5968 = vst.msk [vmem:[#allocation4 + $0x1c] sm:$0xf] %vm5316_vm8, %v12512_v51 }
 0x71f   : > { %v5500_v40 = vrot.slane %v5498_v56, 7  ;;  %v6037_v33 = vshll.u32 %v5912_v53, 16  ;;  %v6029_v35 = vrot.slane %v6027_v57, 5  ;;  %v6033_v43 = vrot.slane %v6031_v49, 4  ;;  %4740 = vst.msk [vmem:[#allocation4 + $0x7c] sm:$0xf] %vm844_vm15, %v4676_v7  ;;  %v4674_v56 = vpop.permute.xlu1 %4673 }
 0x720   : > { %v5294_v63 = vmax.f32 %v5262_v54, 0.0  ;;  %v5554_v24 = vor.u32 %v5552_v14, %v5551_v26  ;;  %v5556_v59 = vrot.slane %v5551_v26, 4  ;;  %v6068_v16 = vrot.slane %v6066_v8, 4  ;;  %v5405_v6 = vld [vmem:[#allocation3 + $0x5c] sm:$0x1] }
 0x721   : > { %v5503_v34 = vor.u32 %v5501_v9, %v5500_v40  ;;  %v5505_v48 = vrot.slane %v5500_v40, 4  ;;  %v12532_v15 = vsel %vm8677_vm5, %v6025_v4, %v6029_v35  ;;  %v6039_v31 = vrot.slane %v6037_v33, 5  ;;  %v5830_v10 = vld [vmem:[#allocation3 + $0x48] sm:$0xf]  ;;  %v12557_v54 = vld [vmem:[#allocation3 + $0x34] sm:$0xf] }
 0x722   : > { %v5448_v20 = vpack.c.bf16 %v5294_v63, %v5294_v63  ;;  %14931 = vst [vmem:[#allocation52_spill] sm:$0xff] %v12532_v15  ;;  %v5555_v3 = vsel %vm12417_vm12, %v5547_v25, %v5554_v24  ;;  %v5828_v36 = vsel %vm12259_vm11, %v5556_v59, %v5827_v18  ;;  %6381 = vrot.lane.b32.xlu2 %v12532_v15, %s8558_s15  ;;  %v6071_v37 = vrot.slane %v6069_v17, 5  ;;  %v5921_v40 = vld [vmem:[#allocation3 + $0x38] sm:$0x1]  ;;  %v8477_v24 = vld [vmem:[#allocation4 + $0x70] sm:$0xff] }
 0x723   : > { %v5504_v22 = vsel %vm12417_vm12, %v5496_v23, %v5503_v34  ;;  %v4960_v27 = vpop.f32.mrf.mxu1  ;;  %v12543_v45 = vld [vmem:[#allocation3 + $0x18] sm:$0xf]  ;;  %5826 = vst.msk [vmem:[#allocation3 + $0x40] sm:$0xf] %vm5316_vm8, %v5555_v3  ;;  %v5807_v47 = vsel %vm12259_vm11, %v5505_v48, %v5806_v41  ;;  %v6034_v42 = vor.u32 %v6033_v43, %v6029_v35  ;;  %v6013_v23 = vshll.u32 %v5909_v38, 16  ;;  %v12581_v38 = vpop.f32.mrf.mxu2 }
 0x724   : > { %14932 = vst [vmem:[#allocation38_spill] sm:$0xff] %v12543_v45  ;;  %v5558_v39 = vshrl.u32 %v5448_v20, 16  ;;  %v5196_v25 = vadd.f32 %v12401_v11, %v4960_v27  ;;  %v6075_v52 = vshll.u32 %v12512_v51, 16  ;;  %v6042_v55 = vshrl.u32 %v12543_v45, 16  ;;  %v5834_v27 = vld [vmem:[#allocation3 + $0x50] sm:$0x1] }
 0x725   : > { %5829 = vst [vmem:[#allocation3 + $0x44] sm:$0x1] %v5828_v36  ;;  %v5561_v8 = vshll.u32 %v5448_v20, 16  ;;  %v6035_v14 = vrot.slane %v6034_v42, 4  ;;  %v6015_v11 = vrot.slane %v6013_v23, 5  ;;  %v6072_v18 = vor.u32 %v6071_v37, %v6068_v16 }
 0x726   : > { %5805 = vst.msk [vmem:[#allocation3 + $0x1c] sm:$0xf] %vm5316_vm8, %v5504_v22  ;;  %v12552_v60 = vrot.slane %v5558_v39, 7  ;;  %v5263_v21 = vadd.f32 %v12372_v1, %v5196_v25  ;;  %v12555_v9 = vrot.slane %v6075_v52, 5  ;;  %v6044_v26 = vrot.slane %v6042_v55, 4 }
 0x727   : > { %5808 = vst [vmem:[#allocation3 + $0x20] sm:$0x1] %v5807_v47  ;;  %v12562_v53 = vsel %vm8677_vm5, %v6035_v14, %v6039_v31  ;;  %v6016_v33 = vsel %vm8677_vm5, %v6011_v30, %v6015_v11  ;;  %v6045_v7 = vshll.u32 %v12543_v45, 16  ;;  %v5406_v63 = vsel %vm12350_vm1, 0, %v5405_v6 }
 0x728   : > { %14933 = vst [vmem:[#allocation55_spill] sm:$0xff] %v12557_v54  ;;  %v5563_v17 = vor.u32 %v5561_v8, %v12552_v60  ;;  %v5295_v57 = vmax.f32 %v5263_v21, 0.0  ;;  %v5564_v49 = vrot.slane %v12552_v60, 4  ;;  %6383 = vrot.lane.b32.xlu0 %v12562_v53, %s8558_s15  ;;  %6379 = vrot.lane.b32.xlu1 %v6016_v33, %s8558_s15  ;;  %v6099_v59 = vshll.u32 %v12557_v54, 16  ;;  %v5918_v21 = vld [vmem:[#allocation3 + $0x2c] sm:$0x1] }
 0x729   : > { %14934 = vst [vmem:[#allocation49_spill] sm:$0xff] %v12562_v53  ;;  %v6103_v34 = vshrl.u32 %v12557_v54, 16  ;;  %v6073_v48 = vrot.slane %v6072_v18, 4  ;;  %v6047_v41 = vrot.slane %v6045_v7, 5  ;;  %v6109_v20 = vshll.u32 %v5921_v40, 16 }
 0x72a   : > { %5965 = vst.msk [vmem:[#allocation4 + $0x10] sm:$0xf] %vm5316_vm8, %v12543_v45  ;;  %v5831_v4 = vsel %vm12395_vm6, %v5563_v17, %v5830_v10  ;;  %v5449_v35 = vpack.c.bf16 %v5295_v57, %v5295_v57  ;;  %v6079_v43 = vshrl.u32 %v12512_v51, 16  ;;  %v12584_v22 = vrot.slane %v6099_v59, 5  ;;  %v12604_v17 = vld [vmem:[#allocation3 + $0x30] sm:$0xf] }
 0x72b   : > { %4739 = vst.msk [vmem:[#allocation4 + $0x78] sm:$0xf] %vm844_vm15, %v4674_v56  ;;  %v4963_v30 = vpop.f32.mrf.mxu1  ;;  %v6048_v47 = vor.u32 %v6047_v41, %v6044_v26  ;;  %v6105_v39 = vrot.slane %v6103_v34, 4  ;;  %v12590_v25 = vrot.slane %v6109_v20, 5  ;;  %vm14937_vm15 = vmmov %vm14905_vm3  ;;  %v5352_v7 = vld [vmem:[#allocation3 + $0x60] sm:$0x1] }
 0x72c   : > { %5407 = vst [vmem:[#allocation3 + $0x5c] sm:$0x1] %v5406_v63  ;;  %v5566_v16 = vshrl.u32 %v5449_v35, 16  ;;  %v5569_v3 = vshll.u32 %v5449_v35, 16  ;;  %v5199_v36 = vadd.f32 %v12426_v50, %v4963_v30  ;;  %v6081_v42 = vrot.slane %v6079_v43, 4 }
 0x72d   : > { %5832 = vst [vmem:[#allocation3 + $0x48] sm:$0xf] %v5831_v4  ;;  %v12588_v31 = vld [vmem:[#allocation3 + $0x1c] sm:$0xf]  ;;  %v12596_v50 = vsel %vm8677_vm5, %v6073_v48, %v12555_v9  ;;  %v6049_v52 = vrot.slane %v6048_v47, 4  ;;  %v6106_v8 = vor.u32 %v6105_v39, %v12584_v22  ;;  %v6085_v30 = vshll.u32 %v5918_v21, 16 }
 0x72e   : > { %5970 = vst.msk [vmem:[#allocation4 + $0x24] sm:$0xf] %vm5316_vm8, %v12557_v54  ;;  %v5568_v6 = vrot.slane %v5566_v16, 7  ;;  %v5264_v10 = vadd.f32 %v12372_v1, %v5199_v36  ;;  %8232 = vmatmul.msk.bf16.gmra.mxu1 %vm14937_vm15, %v8477_v24  ;;  %v6051_v23 = vshll.u32 %v12588_v31, 16  ;;  %v5915_v37 = vld [vmem:[#allocation3 + $0x20] sm:$0x1]  ;;  %v6082_v33 = vor.u32 %v6081_v42, %v12555_v9  ;;  %v12633_v42 = vpop.f32.mrf.mxu2 }
 0x72f   : > { %14935 = vst [vmem:[#allocation56_spill] sm:$0xff] %v12588_v31  ;;  %v6055_v55 = vshrl.u32 %v12588_v31, 16  ;;  %v6061_v60 = vshll.u32 %v5915_v37, 16  ;;  %v6107_v40 = vrot.slane %v6106_v8, 4  ;;  %v12619_v59 = vld [vmem:[#allocation3 + $0x3c] sm:$0xf] }
 0x730   : > { %14936 = vst [vmem:[#allocation54_spill] sm:$0xff] %v12596_v50  ;;  %v5571_v14 = vor.u32 %v5569_v3, %v5568_v6  ;;  %v5573_v56 = vrot.slane %v5568_v6, 4  ;;  %v5296_v11 = vmax.f32 %v5264_v10, 0.0  ;;  %v6053_v18 = vrot.slane %v6051_v23, 5  ;;  %6389 = vrot.lane.b32.xlu0 %v12596_v50, %s8558_s15  ;;  %v12624_v48 = vld [vmem:[#allocation3 + $0x40] sm:$0xf] }
 0x731   : > { %5966 = vst.msk [vmem:[#allocation4 + $0x14] sm:$0xf] %vm5316_vm8, %v12588_v31  ;;  %v6057_v57 = vrot.slane %v6055_v55, 4  ;;  %v6063_v26 = vrot.slane %v6061_v60, 5  ;;  %v6083_v34 = vrot.slane %v6082_v33, 4  ;;  %v5353_v43 = vsel %vm12259_vm11, 0, %v5352_v7 }
 0x732   : > { %14938 = vst [vmem:[#allocation58_spill] sm:$0xff] %v12604_v17  ;;  %v5572_v63 = vsel %vm12417_vm12, %v5564_v49, %v5571_v14  ;;  %v5835_v4 = vsel %vm12259_vm11, %v5573_v56, %v5834_v27  ;;  %v5450_v35 = vpack.c.bf16 %v5296_v11, %v5296_v11  ;;  %v12615_v24 = vsel %vm8677_vm5, %v6049_v52, %v6053_v18  ;;  %v5837_v36 = vld [vmem:[#allocation3 + $0x54] sm:$0xf]  ;;  %v5408_v11 = vld [vmem:[#allocation3 + $0x68] sm:$0x1] }
 0x733   : > { %14939 = vst [vmem:[#allocation59_spill] sm:$0xff] %v12615_v24  ;;  %6385 = vrot.lane.b32.xlu1 %v12615_v24, %s8558_s15  ;;  %v4965_v9 = vpop.f32.mrf.mxu1  ;;  %v6058_v49 = vor.u32 %v6057_v57, %v6053_v18  ;;  %v6090_v47 = vshrl.u32 %v12604_v17, 16  ;;  %v6093_v39 = vshll.u32 %v12604_v17, 16  ;;  %v6117_v23 = vshll.u32 %v12619_v59, 16 }
 0x734   : > { %5969 = vst.msk [vmem:[#allocation4 + $0x20] sm:$0xf] %vm5316_vm8, %v12604_v17  ;;  %v5575_v41 = vshrl.u32 %v5450_v35, 16  ;;  %v5201_v20 = vadd.f32 %v12457_v32, %v4965_v9  ;;  %v12629_v16 = vld [vmem:[#allocation3 + $0x48] sm:$0xf]  ;;  %v5578_v3 = vshll.u32 %v5450_v35, 16  ;;  %v12654_v14 = vsel %vm8677_vm5, %v6107_v40, %v12590_v25 }
 0x735   : > { %5833 = vst.msk [vmem:[#allocation3 + $0x4c] sm:$0xf] %vm5316_vm8, %v5572_v63  ;;  %v6059_v27 = vrot.slane %v6058_v49, 4  ;;  %v6114_v32 = vshrl.u32 %v12619_v59, 16  ;;  %v6087_v52 = vrot.slane %v6085_v30, 5  ;;  %v6092_v55 = vrot.slane %v6090_v47, 4 }
 0x736   : > { %5836 = vst [vmem:[#allocation3 + $0x50] sm:$0x1] %v5835_v4  ;;  %v12635_v6 = vrot.slane %v5575_v41, 7  ;;  %v5265_v10 = vadd.f32 %v12372_v1, %v5201_v20  ;;  %v6095_v60 = vrot.slane %v6093_v39, 5  ;;  %v6119_v57 = vrot.slane %v6117_v23, 5  ;;  %v8478_v40 = vld [vmem:[#allocation4 + $0x78] sm:$0xff] }
 0x737   : > { %5354 = vst [vmem:[#allocation3 + $0x60] sm:$0x1] %v5353_v43  ;;  %v12644_v37 = vsel %vm8677_vm5, %v6059_v27, %v6063_v26  ;;  %v6116_v56 = vrot.slane %v6114_v32, 4  ;;  %v6123_v26 = vshll.u32 %v12624_v48, 16  ;;  %v6138_v33 = vshrl.u32 %v12629_v16, 16 }
 0x738   : > { %5971 = vst.msk [vmem:[#allocation4 + $0x28] sm:$0xf] %vm5316_vm8, %v12619_v59  ;;  %v5580_v8 = vor.u32 %v5578_v3, %v12635_v6  ;;  %v5297_v21 = vmax.f32 %v5265_v10, 0.0  ;;  %6387 = vrot.lane.b32.xlu2 %v12644_v37, %s8558_s15  ;;  %6395 = vrot.lane.b32.xlu0 %v12654_v14, %s8558_s15  ;;  %v6096_v18 = vor.u32 %v6095_v60, %v6092_v55  ;;  %v6141_v35 = vshll.u32 %v12629_v16, 16  ;;  %v5841_v55 = vld [vmem:[#allocation3 + $0x5c] sm:$0x1] }
 0x739   : > { %14940 = vst [vmem:[#allocation39_spill] sm:$0xff] %v12644_v37  ;;  %v12666_v25 = vsel %vm8677_vm5, %v6083_v34, %v6087_v52  ;;  %v5581_v9 = vrot.slane %v12635_v6, 4  ;;  %v6120_v30 = vor.u32 %v6119_v57, %v6116_v56  ;;  %v6140_v41 = vrot.slane %v6138_v33, 4  ;;  %v5924_v52 = vld [vmem:[#allocation3 + $0x44] sm:$0x1] }
 0x73a   : > { %5972 = vst.msk [vmem:[#allocation4 + $0x2c] sm:$0xf] %vm5316_vm8, %v12624_v48  ;;  %v5838_v7 = vsel %vm12395_vm6, %v5580_v8, %v5837_v36  ;;  %v5451_v63 = vpack.c.bf16 %v5297_v21, %v5297_v21  ;;  %v5409_v20 = vsel %vm12350_vm1, 0, %v5408_v11  ;;  %v6097_v3 = vrot.slane %v6096_v18, 4  ;;  %v12689_v11 = vpop.f32.mrf.mxu2  ;;  %v5355_v33 = vld [vmem:[#allocation3 + $0x6c] sm:$0x1] }
 0x73b   : > { %14941 = vst [vmem:[#allocation23_spill] sm:$0xff] %v12654_v14  ;;  %6391 = vrot.lane.b32.xlu1 %v12666_v25, %s8558_s15  ;;  %v4968_v49 = vpop.f32.mrf.mxu1  ;;  %v6143_v36 = vrot.slane %v6141_v35, 5  ;;  %v6125_v47 = vrot.slane %v6123_v26, 5  ;;  %v6127_v6 = vshrl.u32 %v12624_v48, 16  ;;  %v6121_v60 = vrot.slane %v6120_v30, 4 }
 0x73c   : > { %5973 = vst.msk [vmem:[#allocation4 + $0x30] sm:$0xf] %vm5316_vm8, %v12629_v16  ;;  %v12668_v4 = vld [vmem:[#allocation3 + $0x4c] sm:$0xf]  ;;  %v5583_v43 = vshrl.u32 %v5451_v63, 16  ;;  %v5204_v34 = vadd.f32 %v12492_v2, %v4968_v49  ;;  %v5586_v27 = vshll.u32 %v5451_v63, 16  ;;  %v12685_v23 = vsel %vm8677_vm5, %v6097_v3, %v12584_v22 }
 0x73d   : > { %14942 = vst [vmem:[#allocation48_spill] sm:$0xff] %v12666_v25  ;;  %v6147_v39 = vshll.u32 %v12668_v4, 16  ;;  %v6144_v2 = vor.u32 %v6143_v36, %v6140_v41  ;;  %v6129_v21 = vrot.slane %v6127_v6, 4  ;;  %v6151_v56 = vshrl.u32 %v12668_v4, 16  ;;  %v5927_v35 = vld [vmem:[#allocation3 + $0x50] sm:$0x1] }
 0x73e   : > { %5839 = vst [vmem:[#allocation3 + $0x54] sm:$0xf] %v5838_v7  ;;  %v5585_v10 = vrot.slane %v5583_v43, 7  ;;  %v5266_v32 = vadd.f32 %v12372_v1, %v5204_v34  ;;  %8233 = vmatmul.msk.bf16.gmra.mxu1 %vm14944_vm13, %v8478_v40  ;;  %v12695_v7 = vsel %vm8677_vm5, %v6121_v60, %v6125_v47  ;;  %v6133_v40 = vshll.u32 %v5924_v52, 16  ;;  %v5844_v52 = vld [vmem:[#allocation3 + $0x60] sm:$0xf] }
 0x73f   : > { %5974 = vst.msk [vmem:[#allocation4 + $0x34] sm:$0xf] %vm5316_vm8, %v12668_v4  ;;  %v6149_v8 = vrot.slane %v6147_v39, 5  ;;  %v6145_v22 = vrot.slane %v6144_v2, 4  ;;  %v6130_v63 = vor.u32 %v6129_v21, %v6125_v47  ;;  %v6153_v49 = vrot.slane %v6151_v56, 4 }
 0x740   : > { %14943 = vst [vmem:[#allocation64_spill] sm:$0xff] %v12685_v23  ;;  %v5588_v18 = vor.u32 %v5586_v27, %v5585_v10  ;;  %v5590_v57 = vrot.slane %v5585_v10, 4  ;;  %v5298_v26 = vmax.f32 %v5266_v32, 0.0  ;;  %6393 = vrot.lane.b32.xlu2 %v12685_v23, %s8558_s15  ;;  %v5356_v27 = vsel %vm12259_vm11, 0, %v5355_v33  ;;  %v5411_v47 = vld [vmem:[#allocation3 + $0x74] sm:$0x1] }
 0x741   : > { %5410 = vst [vmem:[#allocation3 + $0x68] sm:$0x1] %v5409_v20  ;;  %v12703_v43 = vsel %vm8677_vm5, %v6145_v22, %v6149_v8  ;;  %v6154_v36 = vor.u32 %v6153_v49, %v6149_v8  ;;  %v6157_v10 = vshll.u32 %v5927_v35, 16  ;;  %v5358_v22 = vld [vmem:[#allocation3 + $0x78] sm:$0x1]  ;;  %vm6893_vm3 = vcmask 257216  }
 0x742   : > { %14945 = vst [vmem:[#allocation21_spill] sm:$0xff] %v12695_v7  ;;  %v5589_v30 = vsel %vm12417_vm12, %v5581_v9, %v5588_v18  ;;  %v5842_v41 = vsel %vm12259_vm11, %v5590_v57, %v5841_v55  ;;  %v5452_v20 = vpack.c.bf16 %v5298_v26, %v5298_v26  ;;  %6401 = vrot.lane.b32.xlu0 %v12703_v43, %s8558_s15  ;;  %v6131_v9 = vrot.slane %v6130_v63, 4 }
 0x743   : > { %14946 = vst [vmem:[#allocation69_spill] sm:$0xff] %v12703_v43  ;;  %6397 = vrot.lane.b32.xlu1 %v12695_v7, %s8558_s15  ;;  %v4970_v3 = vpop.f32.mrf.mxu1  ;;  %v6135_v55 = vrot.slane %v6133_v40, 5  ;;  %v6155_v60 = vrot.slane %v6154_v36, 4  ;;  %v6159_v40 = vrot.slane %v6157_v10, 5  ;;  %v5359_v35 = vsel %vm12259_vm11, 0, %v5358_v22 }
 0x744   : > { %5840 = vst.msk [vmem:[#allocation3 + $0x58] sm:$0xf] %vm5316_vm8, %v5589_v30  ;;  %v5592_v39 = vshrl.u32 %v5452_v20, 16  ;;  %v5206_v6 = vadd.f32 %v12528_v12, %v4970_v3  ;;  %v5595_v2 = vshll.u32 %v5452_v20, 16  ;;  %v5412_v12 = vsel %vm12350_vm1, 0, %v5411_v47  ;;  %v12730_v30 = vpop.f32.mrf.mxu2 }
 0x745   : > { %v12705_v34 = vld [vmem:[#allocation3 + $0x54] sm:$0xf]  ;;  %5843 = vst [vmem:[#allocation3 + $0x5c] sm:$0x1] %v5842_v41  ;;  %v12724_v57 = vsel %vm8677_vm5, %v6131_v9, %v6135_v55  ;;  %v12736_v3 = vsel %vm8677_vm5, %v6155_v60, %v6159_v40  ;;  %vm7789_vm14 = vcmask 588800  }
 0x746   : > { %v6162_v32 = vshrl.u32 %v12705_v34, 16  ;;  %5357 = vst [vmem:[#allocation3 + $0x6c] sm:$0x1] %v5356_v27  ;;  %v6165_v21 = vshll.u32 %v12705_v34, 16  ;;  %v5594_v56 = vrot.slane %v5592_v39, 7  ;;  %v5267_v8 = vadd.f32 %v12372_v1, %v5206_v6 }
 0x747   : > { %5975 = vst.msk [vmem:[#allocation4 + $0x38] sm:$0xf] %vm5316_vm8, %v12705_v34 }
 0x748   : > { %v6164_v18 = vrot.slane %v6162_v32, 4  ;;  %14947 = vst [vmem:[#allocation67_spill] sm:$0xff] %v12724_v57  ;;  %v6167_v26 = vrot.slane %v6165_v21, 5  ;;  %v5597_v33 = vor.u32 %v5595_v2, %v5594_v56  ;;  %v5299_v63 = vmax.f32 %v5267_v8, 0.0  ;;  %6399 = vrot.lane.b32.xlu2 %v12724_v57, %s8558_s15 }
 0x749   : > { %5413 = vst [vmem:[#allocation3 + $0x74] sm:$0x1] %v5412_v12  ;;  %v5598_v22 = vrot.slane %v5594_v56, 4 }
 0x74a   : > { %v6168_v49 = vor.u32 %v6167_v26, %v6164_v18  ;;  %5360 = vst [vmem:[#allocation3 + $0x78] sm:$0x1] %v5359_v35  ;;  %v5845_v41 = vsel %vm12395_vm6, %v5597_v33, %v5844_v52  ;;  %v5453_v20 = vpack.c.bf16 %v5299_v63, %v5299_v63  ;;  %v5414_v52 = vld [vmem:[#allocation3 + $0x80] sm:$0x1]  ;;  %v5848_v18 = vld [vmem:[#allocation3 + $0x68] sm:$0x1] }
 0x74b   : > { %14948 = vst [vmem:[#allocation70_spill] sm:$0xff] %v12736_v3  ;;  %v12738_v9 = vld [vmem:[#allocation3 + $0x58] sm:$0xf]  ;;  %6403 = vrot.lane.b32.xlu1 %v12736_v3, %s8558_s15  ;;  %v4973_v36 = vpop.f32.mrf.mxu1  ;;  %v5415_v8 = vsel %vm12350_vm1, 0, %v5414_v52 }
 0x74c   : > { %5846 = vst [vmem:[#allocation3 + $0x60] sm:$0xf] %v5845_v41  ;;  %v6171_v27 = vshll.u32 %v12738_v9, 16  ;;  %v5600_v47 = vshrl.u32 %v5453_v20, 16  ;;  %v5209_v39 = vadd.f32 %v12581_v38, %v4973_v36  ;;  %v5930_v6 = vld [vmem:[#allocation3 + $0x5c] sm:$0x1] }
 0x74d   : > { %5976 = vst.msk [vmem:[#allocation4 + $0x3c] sm:$0xf] %vm5316_vm8, %v12738_v9  ;;  %v6169_v10 = vrot.slane %v6168_v49, 4  ;;  %v6175_v2 = vshrl.u32 %v12738_v9, 16  ;;  %v5603_v60 = vshll.u32 %v5453_v20, 16  ;;  %v6181_v26 = vshll.u32 %v5930_v6, 16  ;;  %v12765_v6 = vpop.f32.mrf.mxu2 }
 0x74e   : > { %v6173_v32 = vrot.slane %v6171_v27, 5  ;;  %v5602_v55 = vrot.slane %v5600_v47, 7  ;;  %v5268_v21 = vadd.f32 %v12372_v1, %v5209_v39  ;;  %5416 = vst [vmem:[#allocation3 + $0x80] sm:$0x1] %v5415_v8 }
 0x74f   : > { %v6177_v12 = vrot.slane %v6175_v2, 4  ;;  %v6183_v27 = vrot.slane %v6181_v26, 5  ;;  %v5361_v2 = vld [vmem:[#allocation3 + $0x84] sm:$0x1]  ;;  %v5851_v26 = vld [vmem:[#allocation3 + $0x6c] sm:$0xf] }
 0x750   : > { %v12752_v38 = vsel %vm8677_vm5, %v6169_v10, %v6173_v32  ;;  %v5605_v33 = vor.u32 %v5603_v60, %v5602_v55  ;;  %v5607_v63 = vrot.slane %v5602_v55, 4  ;;  %v5300_v40 = vmax.f32 %v5268_v21, 0.0 }
 0x751   : > { %14949 = vst [vmem:[#allocation28_spill] sm:$0xff] %v12752_v38  ;;  %6405 = vrot.lane.b32.xlu2 %v12752_v38, %s8558_s15  ;;  %v6178_v35 = vor.u32 %v6177_v12, %v6173_v32  ;;  %v5362_v21 = vsel %vm12259_vm11, 0, %v5361_v2  ;;  %v12779_v12 = vld [vmem:[%s14164_s6] ss:$0 sm:$0xff] }
 0x752   : > { %v5606_v1 = vsel %vm12417_vm12, %v5598_v22, %v5605_v33  ;;  %v5849_v49 = vsel %vm12259_vm11, %v5607_v63, %v5848_v18  ;;  %v5454_v41 = vpack.c.bf16 %v5300_v40, %v5300_v40  ;;  %5363 = vst [vmem:[#allocation3 + $0x84] sm:$0x1] %v5362_v21 }
 0x753   : > { %v12760_v20 = vld [vmem:[#allocation3 + $0x60] sm:$0xf]  ;;  %5847 = vst.msk [vmem:[#allocation3 + $0x64] sm:$0xf] %vm5316_vm8, %v5606_v1  ;;  %v4975_v36 = vpop.f32.mrf.mxu1  ;;  %v6179_v56 = vrot.slane %v6178_v35, 4 }
 0x754   : > { %v6186_v47 = vshrl.u32 %v12760_v20, 16  ;;  %v6189_v39 = vshll.u32 %v12760_v20, 16  ;;  %5850 = vst [vmem:[#allocation3 + $0x68] sm:$0x1] %v5849_v49  ;;  %v5609_v10 = vshrl.u32 %v5454_v41, 16  ;;  %v5211_v32 = vadd.f32 %v12633_v42, %v4975_v36 }
 0x755   : > { %v12770_v52 = vsel %vm8677_vm5, %v6179_v56, %v6183_v27  ;;  %5977 = vst.msk [vmem:[#allocation4 + $0x40] sm:$0xf] %vm5316_vm8, %v12760_v20  ;;  %v5612_v18 = vshll.u32 %v5454_v41, 16 }
 0x756   : > { %14950 = vst [vmem:[#allocation26_spill] sm:$0xff] %v12770_v52  ;;  %v6188_v55 = vrot.slane %v6186_v47, 4  ;;  %v6191_v60 = vrot.slane %v6189_v39, 5  ;;  %v5611_v8 = vrot.slane %v5609_v10, 7  ;;  %v5269_v42 = vadd.f32 %v12779_v12, %v5211_v32  ;;  %6407 = vrot.lane.b32.xlu0 %v12770_v52, %s8558_s15 }
 0x758   : > { %v5614_v22 = vor.u32 %v5612_v18, %v5611_v8  ;;  %v5301_v33 = vmax.f32 %v5269_v42, 0.0  ;;  %v6192_v63 = vor.u32 %v6191_v60, %v6188_v55  ;;  %v5417_v55 = vld [vmem:[#allocation3 + $0x8c] sm:$0x1]  ;;  %v12793_v60 = vpop.f32.mrf.mxu2 }
 0x75a   : > { %v5852_v40 = vsel %vm12395_vm6, %v5614_v22, %v5851_v26  ;;  %v5455_v35 = vpack.c.bf16 %v5301_v33, %v5301_v33  ;;  %v12786_v1 = vld [vmem:[#allocation3 + $0x64] sm:$0xf]  ;;  %v6193_v39 = vrot.slane %v6192_v63, 4  ;;  %v5418_v26 = vsel %vm12350_vm1, 0, %v5417_v55  ;;  %v5855_v22 = vld [vmem:[#allocation3 + $0x74] sm:$0x1] }
 0x75b   : > { %5853 = vst [vmem:[#allocation3 + $0x6c] sm:$0xf] %v5852_v40  ;;  %v4978_v49 = vpop.f32.mrf.mxu1  ;;  %v6195_v41 = vshll.u32 %v12786_v1, 16  ;;  %v5933_v36 = vld [vmem:[#allocation3 + $0x68] sm:$0x1]  ;;  %v6199_v56 = vshrl.u32 %v12786_v1, 16 }
 0x75c   : > { %v5617_v27 = vshrl.u32 %v5455_v35, 16  ;;  %v5214_v47 = vadd.f32 %v12689_v11, %v4978_v49  ;;  %5978 = vst.msk [vmem:[#allocation4 + $0x44] sm:$0xf] %vm5316_vm8, %v12786_v1  ;;  %v6205_v2 = vshll.u32 %v5933_v36, 16  ;;  %v5620_v18 = vshll.u32 %v5455_v35, 16 }
 0x75d   : > { %v6197_v10 = vrot.slane %v6195_v41, 5  ;;  %v6201_v32 = vrot.slane %v6199_v56, 4  ;;  %5419 = vst [vmem:[#allocation3 + $0x8c] sm:$0x1] %v5418_v26  ;;  %v5615_v63 = vrot.slane %v5611_v8, 4 }
 0x75e   : > { %v5619_v21 = vrot.slane %v5617_v27, 7  ;;  %v5270_v42 = vadd.f32 %v12779_v12, %v5214_v47  ;;  %v6207_v36 = vrot.slane %v6205_v2, 5  ;;  %v5364_v26 = vld [vmem:[#allocation3 + $0x90] sm:$0x1] }
 0x75f   : > { %v12800_v11 = vsel %vm8677_vm5, %v6193_v39, %v6197_v10  ;;  %v6202_v33 = vor.u32 %v6201_v32, %v6197_v10 }
 0x760   : > { %14951 = vst [vmem:[#allocation50_spill] sm:$0xff] %v12800_v11  ;;  %v5622_v40 = vor.u32 %v5620_v18, %v5619_v21  ;;  %v5624_v49 = vrot.slane %v5619_v21, 4  ;;  %v5302_v41 = vmax.f32 %v5270_v42, 0.0  ;;  %6409 = vrot.lane.b32.xlu1 %v12800_v11, %s8558_s15 }
 0x761   : > { %v6203_v35 = vrot.slane %v6202_v33, 4 }
 0x762   : > { %v5623_v56 = vsel %vm12417_vm12, %v5615_v63, %v5622_v40  ;;  %v5856_v27 = vsel %vm12259_vm11, %v5624_v49, %v5855_v22  ;;  %v5456_v47 = vpack.c.bf16 %v5302_v41, %v5302_v41  ;;  %v12808_v39 = vld [vmem:[#allocation3 + $0x6c] sm:$0xf]  ;;  %v5365_v40 = vsel %vm12259_vm11, 0, %v5364_v26  ;;  %v5858_v49 = vld [vmem:[#allocation3 + $0x78] sm:$0xf]  ;;  %v12825_v41 = vpop.f32.mrf.mxu2 }
 0x763   : > { %5854 = vst.msk [vmem:[#allocation3 + $0x70] sm:$0xf] %vm5316_vm8, %v5623_v56  ;;  %v4980_v8 = vpop.f32.mrf.mxu1  ;;  %v12813_v10 = vsel %vm8677_vm5, %v6203_v35, %v6207_v36  ;;  %v6210_v32 = vshrl.u32 %v12808_v39, 16  ;;  %v6213_v2 = vshll.u32 %v12808_v39, 16 }
 0x764   : > { %14952 = vst [vmem:[#allocation36_spill] sm:$0xff] %v12813_v10  ;;  %v5626_v55 = vshrl.u32 %v5456_v47, 16  ;;  %v5216_v21 = vadd.f32 %v12730_v30, %v4980_v8  ;;  %6411 = vrot.lane.b32.xlu2 %v12813_v10, %s8558_s15  ;;  %v5629_v33 = vshll.u32 %v5456_v47, 16  ;;  %v5862_v10 = vld [vmem:[#allocation3 + $0x80] sm:$0x1] }
 0x765   : > { %5857 = vst [vmem:[#allocation3 + $0x74] sm:$0x1] %v5856_v27  ;;  %v6212_v18 = vrot.slane %v6210_v32, 4  ;;  %v6215_v42 = vrot.slane %v6213_v2, 5 }
 0x766   : > { %5979 = vst.msk [vmem:[#allocation4 + $0x48] sm:$0xf] %vm5316_vm8, %v12808_v39  ;;  %v5628_v22 = vrot.slane %v5626_v55, 7  ;;  %v5271_v63 = vadd.f32 %v12779_v12, %v5216_v21 }
 0x767   : > { %5366 = vst [vmem:[#allocation3 + $0x90] sm:$0x1] %v5365_v40  ;;  %v6216_v36 = vor.u32 %v6215_v42, %v6212_v18  ;;  %v5420_v40 = vld [vmem:[#allocation3 + $0x98] sm:$0x1] }
 0x768   : > { %v5631_v30 = vor.u32 %v5629_v33, %v5628_v22  ;;  %v5303_v35 = vmax.f32 %v5271_v63, 0.0 }
 0x769   : > { %v6217_v18 = vrot.slane %v6216_v36, 4  ;;  %v5632_v36 = vrot.slane %v5628_v22, 4 }
 0x76a   : > { %v5859_v56 = vsel %vm12395_vm6, %v5631_v30, %v5858_v49  ;;  %v5457_v27 = vpack.c.bf16 %v5303_v35, %v5303_v35  ;;  %v12829_v8 = vld [vmem:[#allocation3 + $0x70] sm:$0xf] }
 0x76b   : > { %5860 = vst [vmem:[#allocation3 + $0x78] sm:$0xf] %v5859_v56  ;;  %v4983_v47 = vpop.f32.mrf.mxu1  ;;  %v6219_v32 = vshll.u32 %v12829_v8, 16  ;;  %v6223_v55 = vshrl.u32 %v12829_v8, 16  ;;  %v5421_v56 = vsel %vm12350_vm1, 0, %v5420_v40 }
 0x76c   : > { %v12832_v2 = vld [vmem:[#allocation3 + $0x74] sm:$0x1]  ;;  %v5634_v21 = vshrl.u32 %v5457_v27, 16  ;;  %v5219_v26 = vadd.f32 %v12765_v6, %v4983_v47  ;;  %5980 = vst.msk [vmem:[#allocation4 + $0x4c] sm:$0xf] %vm5316_vm8, %v12829_v8  ;;  %v5637_v30 = vshll.u32 %v5457_v27, 16 }
 0x76d   : > { %v6221_v42 = vrot.slane %v6219_v32, 5  ;;  %v6225_v33 = vrot.slane %v6223_v55, 4  ;;  %v6229_v63 = vshll.u32 %v12832_v2, 16  ;;  %5422 = vst [vmem:[#allocation3 + $0x98] sm:$0x1] %v5421_v56 }
 0x76e   : > { %v5636_v49 = vrot.slane %v5634_v21, 7  ;;  %v5272_v35 = vadd.f32 %v12779_v12, %v5219_v26  ;;  %v12848_v26 = vpop.f32.mrf.mxu2 }
 0x76f   : > { %v12844_v6 = vsel %vm8677_vm5, %v6217_v18, %v6221_v42  ;;  %v6226_v47 = vor.u32 %v6225_v33, %v6221_v42  ;;  %v6231_v21 = vrot.slane %v6229_v63, 5 }
 0x770   : > { %14953 = vst [vmem:[#allocation12_spill] sm:$0xff] %v12844_v6  ;;  %v5639_v32 = vor.u32 %v5637_v30, %v5636_v49  ;;  %v5641_v55 = vrot.slane %v5636_v49, 4  ;;  %v5304_v52 = vmax.f32 %v5272_v35, 0.0  ;;  %6413 = vrot.lane.b32.xlu0 %v12844_v6, %s8558_s15 }
 0x771   : > { %v6227_v27 = vrot.slane %v6226_v47, 4 }
 0x772   : > { %v5640_v40 = vsel %vm12417_vm12, %v5632_v36, %v5639_v32  ;;  %v5863_v18 = vsel %vm12259_vm11, %v5641_v55, %v5862_v10  ;;  %v5458_v38 = vpack.c.bf16 %v5304_v52, %v5304_v52  ;;  %v12854_v42 = vld [vmem:[#allocation3 + $0x78] sm:$0xf]  ;;  %v5367_v52 = vld [vmem:[#allocation3 + $0x9c] sm:$0x1] }
 0x773   : > { %5861 = vst.msk [vmem:[#allocation3 + $0x7c] sm:$0xf] %vm5316_vm8, %v5640_v40  ;;  %v4985_v22 = vpop.f32.mrf.mxu1  ;;  %v12859_v33 = vsel %vm8677_vm5, %v6227_v27, %v6231_v21  ;;  %v6234_v63 = vshrl.u32 %v12854_v42, 16  ;;  %v6237_v49 = vshll.u32 %v12854_v42, 16  ;;  %v5368_v47 = vsel %vm12259_vm11, 0, %v5367_v52 }
 0x774   : > { %14954 = vst [vmem:[#allocation18_spill] sm:$0xff] %v12859_v33  ;;  %v5643_v30 = vshrl.u32 %v5458_v38, 16  ;;  %v5221_v35 = vadd.f32 %v12793_v60, %v4985_v22  ;;  %6415 = vrot.lane.b32.xlu1 %v12859_v33, %s8558_s15  ;;  %v5646_v32 = vshll.u32 %v5458_v38, 16  ;;  %v5865_v27 = vld [vmem:[#allocation3 + $0x84] sm:$0xf] }
 0x775   : > { %5864 = vst [vmem:[#allocation3 + $0x80] sm:$0x1] %v5863_v18  ;;  %v6236_v10 = vrot.slane %v6234_v63, 4  ;;  %v6239_v56 = vrot.slane %v6237_v49, 5 }
 0x776   : > { %5981 = vst.msk [vmem:[#allocation4 + $0x50] sm:$0xf] %vm5316_vm8, %v12854_v42  ;;  %v5645_v36 = vrot.slane %v5643_v30, 7  ;;  %v5273_v55 = vadd.f32 %v12779_v12, %v5221_v35  ;;  %v12879_v35 = vpop.f32.mrf.mxu2 }
 0x777   : > { %5369 = vst [vmem:[#allocation3 + $0x9c] sm:$0x1] %v5368_v47  ;;  %v6240_v40 = vor.u32 %v6239_v56, %v6236_v10 }
 0x778   : > { %v5648_v21 = vor.u32 %v5646_v32, %v5645_v36  ;;  %v5305_v60 = vmax.f32 %v5273_v55, 0.0 }
 0x779   : > { %v6241_v32 = vrot.slane %v6240_v40, 4 }
 0x77a   : > { %v5866_v18 = vsel %vm12395_vm6, %v5648_v21, %v5865_v27  ;;  %v5459_v22 = vpack.c.bf16 %v5305_v60, %v5305_v60  ;;  %v12873_v63 = vld [vmem:[#allocation3 + $0x7c] sm:$0xf]  ;;  %v5423_v60 = vld [vmem:[#allocation3 + $0xa4] sm:$0x1] }
 0x77b   : > { %5867 = vst [vmem:[#allocation3 + $0x84] sm:$0xf] %v5866_v18  ;;  %v4988_v49 = vpop.f32.mrf.mxu1  ;;  %v6243_v52 = vshll.u32 %v12873_v63, 16  ;;  %v6247_v38 = vshrl.u32 %v12873_v63, 16  ;;  %v5424_v11 = vsel %vm12350_vm1, 0, %v5423_v60  ;;  %v15002_v0 = vld [vmem:[#allocation18_spill] sm:$0xff] }
 0x77c   : > { %v12876_v30 = vld [vmem:[#allocation3 + $0x80] sm:$0x1]  ;;  %v5651_v47 = vshrl.u32 %v5459_v22, 16  ;;  %v5224_v10 = vadd.f32 %v12825_v41, %v4988_v49  ;;  %5982 = vst.msk [vmem:[#allocation4 + $0x54] sm:$0xf] %vm5316_vm8, %v12873_v63  ;;  %v6382_v56 = vpop.permute.xlu2 %6381  ;;  %v5654_v6 = vshll.u32 %v5459_v22, 16 }
 0x77d   : > { %v6245_v55 = vrot.slane %v6243_v52, 5  ;;  %v6249_v27 = vrot.slane %v6247_v38, 4  ;;  %v6253_v21 = vshll.u32 %v12876_v30, 16  ;;  %6476 = vst.msk [vmem:[#allocation4 + $0x8] sm:$0xf] %vm6473_vm0, %v6382_v56  ;;  %v5649_v52 = vrot.slane %v5645_v36, 4 }
 0x77e   : > { %v5653_v18 = vrot.slane %v5651_v47, 7  ;;  %v5274_v33 = vadd.f32 %v12779_v12, %v5224_v10  ;;  %v5869_v41 = vld [vmem:[#allocation3 + $0x8c] sm:$0x1]  ;;  %5425 = vst [vmem:[#allocation3 + $0xa4] sm:$0x1] %v5424_v11 }
 0x77f   : > { %v12891_v49 = vsel %vm8677_vm5, %v6241_v32, %v6245_v55  ;;  %v6250_v40 = vor.u32 %v6249_v27, %v6245_v55  ;;  %v6255_v47 = vrot.slane %v6253_v21, 5 }
 0x780   : > { %14955 = vst [vmem:[#allocation15_spill] sm:$0xff] %v12891_v49  ;;  %v5656_v38 = vor.u32 %v5654_v6, %v5653_v18  ;;  %v5658_v43 = vrot.slane %v5653_v18, 4  ;;  %v5306_v57 = vmax.f32 %v5274_v33, 0.0  ;;  %6417 = vrot.lane.b32.xlu2 %v12891_v49, %s8558_s15  ;;  %v5876_v49 = vld [vmem:[#allocation3 + $0x98] sm:$0x1] }
 0x781   : > { %v6251_v22 = vrot.slane %v6250_v40, 4 }
 0x782   : > { %v5657_v10 = vsel %vm12417_vm12, %v5649_v52, %v5656_v38  ;;  %v5870_v56 = vsel %vm12259_vm11, %v5658_v43, %v5869_v41  ;;  %v5460_v60 = vpack.c.bf16 %v5306_v57, %v5306_v57  ;;  %v12899_v32 = vld [vmem:[#allocation3 + $0x84] sm:$0xf]  ;;  %v5370_v43 = vld [vmem:[#allocation3 + $0xa8] sm:$0x1]  ;;  %v5230_v41 = vpop.f32.mrf.mxu2 }
 0x783   : > { %5868 = vst.msk [vmem:[#allocation3 + $0x88] sm:$0xf] %vm5316_vm8, %v5657_v10  ;;  %v4990_v11 = vpop.f32.mrf.mxu1  ;;  %v12904_v6 = vsel %vm8677_vm5, %v6251_v22, %v6255_v47  ;;  %v6258_v33 = vshrl.u32 %v12899_v32, 16  ;;  %v6261_v36 = vshll.u32 %v12899_v32, 16  ;;  %v5371_v18 = vsel %vm12259_vm11, 0, %v5370_v43  ;;  %v6378_v10 = vpop.permute.xlu0 %6377 }
 0x784   : > { %14956 = vst [vmem:[#allocation25_spill] sm:$0xff] %v12904_v6  ;;  %v5660_v55 = vshrl.u32 %v5460_v60, 16  ;;  %v5226_v27 = vadd.f32 %v12848_v26, %v4990_v11  ;;  %6419 = vrot.lane.b32.xlu0 %v12904_v6, %s8558_s15  ;;  %v5663_v52 = vshll.u32 %v5460_v60, 16  ;;  %v5872_v22 = vld [vmem:[#allocation3 + $0x90] sm:$0xf] }
 0x785   : > { %5871 = vst [vmem:[#allocation3 + $0x8c] sm:$0x1] %v5870_v56  ;;  %v6260_v57 = vrot.slane %v6258_v33, 4  ;;  %v6263_v21 = vrot.slane %v6261_v36, 5  ;;  %v5883_v50 = vld [vmem:[#allocation3 + $0xa4] sm:$0x1] }
 0x786   : > { %5983 = vst.msk [vmem:[#allocation4 + $0x58] sm:$0xf] %vm5316_vm8, %v12899_v32  ;;  %v5662_v40 = vrot.slane %v5660_v55, 7  ;;  %v5275_v38 = vadd.f32 %v12779_v12, %v5226_v27 }
 0x787   : > { %5372 = vst [vmem:[#allocation3 + $0xa8] sm:$0x1] %v5371_v18  ;;  %v6264_v56 = vor.u32 %v6263_v21, %v6260_v57 }
 0x788   : > { %v5665_v26 = vor.u32 %v5663_v52, %v5662_v40  ;;  %v5307_v47 = vmax.f32 %v5275_v38, 0.0  ;;  %6474 = vst.msk [vmem:[#allocation4] sm:$0xf] %vm6473_vm0, %v6378_v10 }
 0x789   : > { %v6265_v57 = vrot.slane %v6264_v56, 4 }
 0x78a   : > { %v5873_v11 = vsel %vm12395_vm6, %v5665_v26, %v5872_v22  ;;  %v5461_v33 = vpack.c.bf16 %v5307_v47, %v5307_v47  ;;  %v12919_v36 = vld [vmem:[#allocation3 + $0x88] sm:$0xf]  ;;  %v5426_v26 = vld [vmem:[#allocation3 + $0xb0] sm:$0x1]  ;;  %v5233_v56 = vpop.f32.mrf.mxu2 }
 0x78b   : > { %5874 = vst [vmem:[#allocation3 + $0x90] sm:$0xf] %v5873_v11  ;;  %v4993_v43 = vpop.f32.mrf.mxu1  ;;  %v6267_v60 = vshll.u32 %v12919_v36, 16  ;;  %v6271_v27 = vshrl.u32 %v12919_v36, 16  ;;  %v5427_v6 = vsel %vm12350_vm1, 0, %v5426_v26 }
 0x78c   : > { %v12922_v55 = vld [vmem:[#allocation3 + $0x8c] sm:$0x1]  ;;  %v5668_v18 = vshrl.u32 %v5461_v33, 16  ;;  %v5229_v52 = vadd.f32 %v12879_v35, %v4993_v43  ;;  %5984 = vst.msk [vmem:[#allocation4 + $0x5c] sm:$0xf] %vm5316_vm8, %v12919_v36  ;;  %v5671_v10 = vshll.u32 %v5461_v33, 16 }
 0x78d   : > { %v6269_v21 = vrot.slane %v6267_v60, 5  ;;  %v6273_v38 = vrot.slane %v6271_v27, 4  ;;  %v6277_v22 = vshll.u32 %v12922_v55, 16  ;;  %5428 = vst [vmem:[#allocation3 + $0xb0] sm:$0x1] %v5427_v6  ;;  %v5666_v60 = vrot.slane %v5662_v40, 4 }
 0x78e   : > { %v5670_v47 = vrot.slane %v5668_v18, 7  ;;  %v5276_v11 = vadd.f32 %v12779_v12, %v5229_v52 }
 0x78f   : > { %v12934_v35 = vsel %vm8677_vm5, %v6265_v57, %v6269_v21  ;;  %v6274_v43 = vor.u32 %v6273_v38, %v6269_v21  ;;  %v6279_v18 = vrot.slane %v6277_v22, 5 }
 0x790   : > { %14957 = vst [vmem:[#allocation37_spill] sm:$0xff] %v12934_v35  ;;  %v5673_v27 = vor.u32 %v5671_v10, %v5670_v47  ;;  %v5675_v3 = vrot.slane %v5670_v47, 4  ;;  %v5308_v14 = vmax.f32 %v5276_v11, 0.0  ;;  %6421 = vrot.lane.b32.xlu1 %v12934_v35, %s8558_s15 }
 0x791   : > { %v6275_v33 = vrot.slane %v6274_v43, 4 }
 0x792   : > { %v5674_v52 = vsel %vm12417_vm12, %v5666_v60, %v5673_v27  ;;  %v5877_v26 = vsel %vm12259_vm11, %v5675_v3, %v5876_v49  ;;  %v5462_v57 = vpack.c.bf16 %v5308_v14, %v5308_v14  ;;  %v6388_v23 = vpop.permute.xlu2 %6387  ;;  %v12942_v21 = vld [vmem:[#allocation3 + $0x90] sm:$0xf]  ;;  %v5373_v14 = vld [vmem:[#allocation3 + $0xb4] sm:$0x1] }
 0x793   : > { %5875 = vst.msk [vmem:[#allocation3 + $0x94] sm:$0xf] %vm5316_vm8, %v5674_v52  ;;  %v4995_v6 = vpop.f32.mrf.mxu1  ;;  %v12947_v40 = vsel %vm8677_vm5, %v6275_v33, %v6279_v18  ;;  %v6282_v38 = vshrl.u32 %v12942_v21, 16  ;;  %v6285_v22 = vshll.u32 %v12942_v21, 16  ;;  %v5374_v11 = vsel %vm12259_vm11, 0, %v5373_v14 }
 0x794   : > { %14958 = vst [vmem:[#allocation6_spill] sm:$0xff] %v12947_v40  ;;  %v5677_v47 = vshrl.u32 %v5462_v57, 16  ;;  %v5231_v10 = vadd.f32 %v5230_v41, %v4995_v6  ;;  %6423 = vrot.lane.b32.xlu2 %v12947_v40, %s8558_s15  ;;  %v5680_v60 = vshll.u32 %v5462_v57, 16  ;;  %v5879_v33 = vld [vmem:[#allocation3 + $0x9c] sm:$0xf] }
 0x795   : > { %5878 = vst [vmem:[#allocation3 + $0x98] sm:$0x1] %v5877_v26  ;;  %v6284_v3 = vrot.slane %v6282_v38, 4  ;;  %v6287_v49 = vrot.slane %v6285_v22, 5  ;;  %v5235_v26 = vpop.f32.mrf.mxu2 }
 0x796   : > { %6479 = vst.msk [vmem:[#allocation4 + $0x14] sm:$0xf] %vm6473_vm0, %v6388_v23  ;;  %v5679_v43 = vrot.slane %v5677_v47, 7  ;;  %v5277_v27 = vadd.f32 %v12779_v12, %v5231_v10 }
 0x797   : > { %5985 = vst.msk [vmem:[#allocation4 + $0x60] sm:$0xf] %vm5316_vm8, %v12942_v21  ;;  %v6288_v52 = vor.u32 %v6287_v49, %v6284_v3 }
 0x798   : > { %5375 = vst [vmem:[#allocation3 + $0xb4] sm:$0x1] %v5374_v11  ;;  %v5682_v41 = vor.u32 %v5680_v60, %v5679_v43  ;;  %v5309_v18 = vmax.f32 %v5277_v27, 0.0 }
 0x799   : > { %v6289_v27 = vrot.slane %v6288_v52, 4 }
 0x79a   : > { %v5880_v23 = vsel %vm12395_vm6, %v5682_v41, %v5879_v33  ;;  %v5463_v6 = vpack.c.bf16 %v5309_v18, %v5309_v18  ;;  %v6394_v38 = vpop.permute.xlu2 %6393  ;;  %v12961_v22 = vld [vmem:[#allocation3 + $0x94] sm:$0xf]  ;;  %v6384_v57 = vpop.permute.xlu0 %6383 }
 0x79b   : > { %5881 = vst [vmem:[#allocation3 + $0x9c] sm:$0xf] %v5880_v23  ;;  %v4998_v47 = vpop.f32.mrf.mxu1  ;;  %v6291_v10 = vshll.u32 %v12961_v22, 16  ;;  %v6295_v11 = vshrl.u32 %v12961_v22, 16  ;;  %v6380_v3 = vpop.permute.xlu1 %6379  ;;  %v5429_v23 = vld [vmem:[#allocation3 + $0xbc] sm:$0x1] }
 0x79c   : > { %v12964_v14 = vld [vmem:[#allocation3 + $0x98] sm:$0x1]  ;;  %v5685_v60 = vshrl.u32 %v5463_v6, 16  ;;  %6482 = vst.msk [vmem:[#allocation4 + $0x20] sm:$0xf] %vm6473_vm0, %v6394_v38  ;;  %v5234_v49 = vadd.f32 %v5233_v56, %v4998_v47  ;;  %v5688_v35 = vshll.u32 %v5463_v6, 16 }
 0x79d   : > { %v6301_v33 = vshll.u32 %v12964_v14, 16  ;;  %6477 = vst.msk [vmem:[#allocation4 + $0xc] sm:$0xf] %vm6473_vm0, %v6384_v57  ;;  %v6293_v41 = vrot.slane %v6291_v10, 5  ;;  %v6297_v18 = vrot.slane %v6295_v11, 4  ;;  %v5430_v52 = vsel %vm12350_vm1, 0, %v5429_v23 }
 0x79e   : > { %v5687_v40 = vrot.slane %v5685_v60, 7  ;;  %6475 = vst.msk [vmem:[#allocation4 + $0x4] sm:$0xf] %vm6473_vm0, %v6380_v3  ;;  %v5278_v7 = vadd.f32 %v12779_v12, %v5234_v49  ;;  %v5683_v57 = vrot.slane %v5679_v43, 4 }
 0x79f   : > { %v12974_v38 = vsel %vm8677_vm5, %v6289_v27, %v6293_v41  ;;  %5986 = vst.msk [vmem:[#allocation4 + $0x64] sm:$0xf] %vm5316_vm8, %v12961_v22  ;;  %v6298_v56 = vor.u32 %v6297_v18, %v6293_v41  ;;  %v6303_v60 = vrot.slane %v6301_v33, 5 }
 0x7a0   : > { %14959 = vst [vmem:[#allocation46_spill] sm:$0xff] %v12974_v38  ;;  %v5690_v47 = vor.u32 %v5688_v35, %v5687_v40  ;;  %v5692_v10 = vrot.slane %v5687_v40, 4  ;;  %v5310_v6 = vmax.f32 %v5278_v7, 0.0  ;;  %6425 = vrot.lane.b32.xlu0 %v12974_v38, %s8558_s15 }
 0x7a1   : > { %5431 = vst [vmem:[#allocation3 + $0xbc] sm:$0x1] %v5430_v52  ;;  %v6299_v11 = vrot.slane %v6298_v56, 4  ;;  %v5238_v52 = vpop.f32.mrf.mxu2 }
 0x7a2   : > { %v5691_v3 = vsel %vm12417_vm12, %v5683_v57, %v5690_v47  ;;  %v5884_v49 = vsel %vm12259_vm11, %v5692_v10, %v5883_v50  ;;  %v5464_v27 = vpack.c.bf16 %v5310_v6, %v5310_v6  ;;  %v6400_v41 = vpop.permute.xlu2 %6399  ;;  %v12986_v18 = vld [vmem:[#allocation3 + $0x9c] sm:$0xf]  ;;  %v6390_v35 = vpop.permute.xlu0 %6389  ;;  %v5376_v50 = vld [vmem:[#allocation3 + $0xc0] sm:$0x1] }
 0x7a3   : > { %14960 = vst [vmem:[#allocation27_spill] sm:$0xff] %v12986_v18  ;;  %v5000_v7 = vpop.f32.mrf.mxu1  ;;  %v12991_v40 = vsel %vm8677_vm5, %v6299_v11, %v6303_v60  ;;  %v6306_v43 = vshrl.u32 %v12986_v18, 16  ;;  %v6309_v33 = vshll.u32 %v12986_v18, 16 }
 0x7a4   : > { %5882 = vst.msk [vmem:[#allocation3 + $0xa0] sm:$0xf] %vm5316_vm8, %v5691_v3  ;;  %v5694_v23 = vshrl.u32 %v5464_v27, 16  ;;  %v5236_v56 = vadd.f32 %v5235_v26, %v5000_v7  ;;  %6427 = vrot.lane.b32.xlu1 %v12991_v40, %s8558_s15  ;;  %v5697_v11 = vshll.u32 %v5464_v27, 16  ;;  %v5377_v3 = vsel %vm12259_vm11, 0, %v5376_v50 }
 0x7a5   : > { %14961 = vst [vmem:[#allocation22_spill] sm:$0xff] %v12991_v40  ;;  %v6386_v57 = vpop.permute.xlu1 %6385  ;;  %v6308_v47 = vrot.slane %v6306_v43, 4  ;;  %v6311_v10 = vrot.slane %v6309_v33, 5  ;;  %v5886_v26 = vld [vmem:[#allocation3 + $0xa8] sm:$0xf] }
 0x7a6   : > { %5885 = vst [vmem:[#allocation3 + $0xa4] sm:$0x1] %v5884_v49  ;;  %v5696_v6 = vrot.slane %v5694_v23, 7  ;;  %v5279_v60 = vadd.f32 %v12779_v12, %v5236_v56 }
 0x7a7   : > { %6485 = vst.msk [vmem:[#allocation4 + $0x2c] sm:$0xf] %vm6473_vm0, %v6400_v41  ;;  %v6312_v38 = vor.u32 %v6311_v10, %v6308_v47 }
 0x7a8   : > { %6480 = vst.msk [vmem:[#allocation4 + $0x18] sm:$0xf] %vm6473_vm0, %v6390_v35  ;;  %v5699_v49 = vor.u32 %v5697_v11, %v5696_v6  ;;  %v5311_v7 = vmax.f32 %v5279_v60, 0.0 }
 0x7a9   : > { %6478 = vst.msk [vmem:[#allocation4 + $0x10] sm:$0xf] %vm6473_vm0, %v6386_v57  ;;  %v6313_v11 = vrot.slane %v6312_v38, 4 }
 0x7aa   : > { %5987 = vst.msk [vmem:[#allocation4 + $0x68] sm:$0xf] %vm5316_vm8, %v12986_v18  ;;  %v5887_v27 = vsel %vm12395_vm6, %v5699_v49, %v5886_v26  ;;  %v5465_v41 = vpack.c.bf16 %v5311_v7, %v5311_v7  ;;  %v6396_v33 = vpop.permute.xlu0 %6395  ;;  %v5432_v7 = vld [vmem:[#allocation3 + $0xc8] sm:$0x1] }
 0x7ab   : > { %5378 = vst [vmem:[#allocation3 + $0xc0] sm:$0x1] %v5377_v3  ;;  %v6406_v35 = vpop.permute.xlu2 %6405  ;;  %v13007_v43 = vld [vmem:[#allocation3 + $0xa0] sm:$0xf]  ;;  %v5003_v23 = vpop.f32.mrf.mxu1  ;;  %v5433_v25 = vsel %vm12350_vm1, 0, %v5432_v7 }
 0x7ac   : > { %14962 = vst [vmem:[#allocation53_spill] sm:$0xff] %v13007_v43  ;;  %v6315_v56 = vshll.u32 %v13007_v43, 16  ;;  %v6319_v57 = vshrl.u32 %v13007_v43, 16  ;;  %v5702_v47 = vshrl.u32 %v5465_v41, 16  ;;  %v5239_v10 = vadd.f32 %v5238_v52, %v5003_v23  ;;  %v5890_v52 = vld [vmem:[#allocation3 + $0xb0] sm:$0x1] }
 0x7ad   : > { %5888 = vst [vmem:[#allocation3 + $0xa8] sm:$0xf] %v5887_v27  ;;  %v13010_v50 = vld [vmem:[#allocation3 + $0xa4] sm:$0x1]  ;;  %v6392_v3 = vpop.permute.xlu1 %6391  ;;  %v5705_v40 = vshll.u32 %v5465_v41, 16  ;;  %v5700_v23 = vrot.slane %v5696_v6, 4 }
 0x7ae   : > { %6483 = vst.msk [vmem:[#allocation4 + $0x24] sm:$0xf] %vm6473_vm0, %v6396_v33  ;;  %v6325_v60 = vshll.u32 %v13010_v50, 16  ;;  %v6317_v26 = vrot.slane %v6315_v56, 5  ;;  %v6321_v49 = vrot.slane %v6319_v57, 4  ;;  %v5704_v27 = vrot.slane %v5702_v47, 7  ;;  %v5240_v33 = vpop.f32.mrf.mxu2 }
 0x7af   : > { %6488 = vst.msk [vmem:[#allocation4 + $0x38] sm:$0xf] %vm6473_vm0, %v6406_v35  ;;  %v5280_v37 = vadd.f32 %v12779_v12, %v5239_v10 }
 0x7b0   : > { %6481 = vst.msk [vmem:[#allocation4 + $0x1c] sm:$0xf] %vm6473_vm0, %v6392_v3  ;;  %v13022_v38 = vsel %vm8677_vm5, %v6313_v11, %v6317_v26  ;;  %v6322_v35 = vor.u32 %v6321_v49, %v6317_v26  ;;  %v5707_v56 = vor.u32 %v5705_v40, %v5704_v27  ;;  %v5709_v41 = vrot.slane %v5704_v27, 4 }
 0x7b1   : > { %14963 = vst [vmem:[#allocation32_spill] sm:$0xff] %v13022_v38  ;;  %v5312_v57 = vmax.f32 %v5280_v37, 0.0  ;;  %6429 = vrot.lane.b32.xlu2 %v13022_v38, %s8558_s15  ;;  %v6327_v10 = vrot.slane %v6325_v60, 5  ;;  %v5897_v38 = vld [vmem:[#allocation3 + $0xbc] sm:$0x1] }
 0x7b2   : > { %5988 = vst.msk [vmem:[#allocation4 + $0x6c] sm:$0xf] %vm5316_vm8, %v13007_v43  ;;  %v6323_v47 = vrot.slane %v6322_v35, 4  ;;  %v5708_v3 = vsel %vm12417_vm12, %v5700_v23, %v5707_v56  ;;  %v5891_v11 = vsel %vm12259_vm11, %v5709_v41, %v5890_v52 }
 0x7b3   : > { %5434 = vst [vmem:[#allocation3 + $0xc8] sm:$0x1] %v5433_v25  ;;  %v5466_v7 = vpack.c.bf16 %v5312_v57, %v5312_v57  ;;  %v5005_v40 = vpop.f32.mrf.mxu1  ;;  %v5893_v57 = vld [vmem:[#allocation3 + $0xb4] sm:$0xf] }
 0x7b4   : > { %v13032_v5 = vld [vmem:[#allocation3 + $0xa8] sm:$0xf]  ;;  %5889 = vst.msk [vmem:[#allocation3 + $0xac] sm:$0xf] %vm5316_vm8, %v5708_v3  ;;  %v13037_v37 = vsel %vm8677_vm5, %v6323_v47, %v6327_v10  ;;  %v5241_v26 = vadd.f32 %v5240_v33, %v5005_v40  ;;  %v6402_v27 = vpop.permute.xlu0 %6401 }
 0x7b5   : > { %14964 = vst [vmem:[#allocation41_spill] sm:$0xff] %v13032_v5  ;;  %v6330_v25 = vshrl.u32 %v13032_v5, 16  ;;  %v6333_v6 = vshll.u32 %v13032_v5, 16  ;;  %v5711_v60 = vshrl.u32 %v5466_v7, 16  ;;  %6431 = vrot.lane.b32.xlu0 %v13037_v37, %s8558_s15  ;;  %v6398_v49 = vpop.permute.xlu1 %6397  ;;  %v5714_v56 = vshll.u32 %v5466_v7, 16 }
 0x7b6   : > { %14965 = vst [vmem:[#allocation13_spill] sm:$0xff] %v13037_v37  ;;  %v5281_v41 = vadd.f32 %v12779_v12, %v5241_v26  ;;  %v5243_v10 = vpop.f32.mrf.mxu2 }
 0x7b7   : > { %5892 = vst [vmem:[#allocation3 + $0xb0] sm:$0x1] %v5891_v11  ;;  %v6332_v52 = vrot.slane %v6330_v25, 4  ;;  %v6335_v35 = vrot.slane %v6333_v6, 5  ;;  %v5713_v23 = vrot.slane %v5711_v60, 7 }
 0x7b8   : > { %5989 = vst.msk [vmem:[#allocation4 + $0x70] sm:$0xf] %vm5316_vm8, %v13032_v5  ;;  %v5313_v47 = vmax.f32 %v5281_v41, 0.0 }
 0x7b9   : > { %6484 = vst.msk [vmem:[#allocation4 + $0x28] sm:$0xf] %vm6473_vm0, %v6398_v49  ;;  %v5716_v33 = vor.u32 %v5714_v56, %v5713_v23  ;;  %v6336_v3 = vor.u32 %v6335_v35, %v6332_v52 }
 0x7ba   : > { %6486 = vst.msk [vmem:[#allocation4 + $0x30] sm:$0xf] %vm6473_vm0, %v6402_v27  ;;  %v5467_v40 = vpack.c.bf16 %v5313_v47, %v5313_v47 }
 0x7bb   : > { %v5894_v11 = vsel %vm12395_vm6, %v5716_v33, %v5893_v57  ;;  %v13050_v25 = vld [vmem:[#allocation3 + $0xac] sm:$0xf]  ;;  %v5008_v6 = vpop.f32.mrf.mxu1  ;;  %v6337_v35 = vrot.slane %v6336_v3, 4  ;;  %v5717_v3 = vrot.slane %v5713_v23, 4 }
 0x7bc   : > { %14966 = vst [vmem:[#allocation43_spill] sm:$0xff] %v13050_v25  ;;  %v6339_v7 = vshll.u32 %v13050_v25, 16  ;;  %v6343_v26 = vshrl.u32 %v13050_v25, 16  ;;  %v5719_v49 = vshrl.u32 %v5467_v40, 16  ;;  %v5244_v27 = vadd.f32 %v5243_v10, %v5008_v6 }
 0x7bd   : > { %5895 = vst [vmem:[#allocation3 + $0xb4] sm:$0xf] %v5894_v11  ;;  %v6404_v52 = vpop.permute.xlu1 %6403  ;;  %v5722_v47 = vshll.u32 %v5467_v40, 16 }
 0x7be   : > { %v13053_v60 = vld [vmem:[#allocation3 + $0xb0] sm:$0x1]  ;;  %5990 = vst.msk [vmem:[#allocation4 + $0x74] sm:$0xf] %vm5316_vm8, %v13050_v25  ;;  %v6341_v56 = vrot.slane %v6339_v7, 5  ;;  %v6345_v41 = vrot.slane %v6343_v26, 4  ;;  %v5282_v11 = vadd.f32 %v12779_v12, %v5244_v27  ;;  %v6412_v37 = vpop.permute.xlu2 %6411 }
 0x7bf   : > { %v6349_v57 = vshll.u32 %v13053_v60, 16  ;;  %v5721_v33 = vrot.slane %v5719_v49, 7  ;;  %6487 = vst.msk [vmem:[#allocation4 + $0x34] sm:$0xf] %vm6473_vm0, %v6404_v52 }
 0x7c0   : > { %6491 = vst.msk [vmem:[#allocation4 + $0x44] sm:$0xf] %vm6473_vm0, %v6412_v37  ;;  %v13064_v10 = vsel %vm8677_vm5, %v6337_v35, %v6341_v56  ;;  %v6346_v6 = vor.u32 %v6345_v41, %v6341_v56  ;;  %v5314_v53 = vmax.f32 %v5282_v11, 0.0  ;;  %v5245_v35 = vpop.f32.mrf.mxu2 }
 0x7c1   : > { %14967 = vst [vmem:[#allocation45_spill] sm:$0xff] %v13064_v10  ;;  %v5724_v7 = vor.u32 %v5722_v47, %v5721_v33  ;;  %v5726_v26 = vrot.slane %v5721_v33, 4  ;;  %6433 = vrot.lane.b32.xlu1 %v13064_v10, %s8558_s15  ;;  %v6351_v49 = vrot.slane %v6349_v57, 5 }
 0x7c2   : > { %v6347_v40 = vrot.slane %v6346_v6, 4  ;;  %v5468_v52 = vpack.c.bf16 %v5314_v53, %v5314_v53  ;;  %v8322_v53 = vrot.slane %v12302_v61, 9 }
 0x7c3   : > { %v5725_v27 = vsel %vm12417_vm12, %v5717_v3, %v5724_v7  ;;  %v5898_v37 = vsel %vm12259_vm11, %v5726_v26, %v5897_v38  ;;  %v5010_v23 = vpop.f32.mrf.mxu1  ;;  %v6556_v38 = vrot.slane %v12277_v28, 5 }
 0x7c4   : > { %v13072_v15 = vld [vmem:[#allocation3 + $0xb4] sm:$0xf]  ;;  %5896 = vst.msk [vmem:[#allocation3 + $0xb8] sm:$0xf] %vm5316_vm8, %v5725_v27  ;;  %v13077_v56 = vsel %vm8677_vm5, %v6347_v40, %v6351_v49  ;;  %v5728_v33 = vshrl.u32 %v5468_v52, 16  ;;  %v5246_v47 = vadd.f32 %v5245_v35, %v5010_v23  ;;  %v5731_v7 = vshll.u32 %v5468_v52, 16 }
 0x7c5   : > { %14968 = vst [vmem:[#allocation24_spill] sm:$0xff] %v13072_v15  ;;  %v6354_v41 = vshrl.u32 %v13072_v15, 16  ;;  %v6357_v57 = vshll.u32 %v13072_v15, 16  ;;  %6435 = vrot.lane.b32.xlu2 %v13077_v56, %s8558_s15  ;;  %v5900_v40 = vld [vmem:[#allocation3 + $0xc0] sm:$0xf]  ;;  %v6557_v61 = vsel %vm8637_vm2, %v8322_v53, %v6556_v38  ;;  %v6563_v52 = vrot.slane %v12515_v13, 5 }
 0x7c6   : > { %14969 = vst [vmem:[#allocation9_spill] sm:$0xff] %v13077_v56  ;;  %v5730_v3 = vrot.slane %v5728_v33, 7  ;;  %v5283_v26 = vadd.f32 %v12779_v12, %v5246_v47  ;;  %v6558_v24 = vrot.slane %v6556_v38, 4  ;;  %v8325_v38 = vrot.slane %v12508_v46, 9 }
 0x7c7   : > { %5899 = vst [vmem:[#allocation3 + $0xbc] sm:$0x1] %v5898_v37  ;;  %v6356_v11 = vrot.slane %v6354_v41, 4  ;;  %v6359_v6 = vrot.slane %v6357_v57, 5 }
 0x7c8   : > { %5991 = vst.msk [vmem:[#allocation4 + $0x78] sm:$0xf] %vm5316_vm8, %v13072_v15  ;;  %v5733_v49 = vor.u32 %v5731_v7, %v5730_v3  ;;  %v5315_v27 = vmax.f32 %v5283_v26, 0.0  ;;  %v6408_v37 = vpop.permute.xlu0 %6407 }
 0x7c9   : > { %6489 = vst.msk [vmem:[#allocation4 + $0x3c] sm:$0xf] %vm6473_vm0, %v6408_v37  ;;  %v6360_v35 = vor.u32 %v6359_v6, %v6356_v11 }
 0x7ca   : > { %v5901_v28 = vsel %vm12395_vm6, %v5733_v49, %v5900_v40  ;;  %v5469_v23 = vpack.c.bf16 %v5315_v27, %v5315_v27  ;;  %v5904_v40 = vld [vmem:[#allocation3 + $0xc8] sm:$0x1]  ;;  %v6565_v27 = vrot.slane %v6563_v52, 4  ;;  %vm7183_vm6 = vcmask 388416  }
 0x7cb   : > { %v13093_v41 = vld [vmem:[#allocation3 + $0xb8] sm:$0xf]  ;;  %5902 = vst [vmem:[#allocation3 + $0xc0] sm:$0xf] %v5901_v28  ;;  %v6361_v62 = vrot.slane %v6360_v35, 4  ;;  %v5734_v28 = vrot.slane %v5730_v3, 4 }
 0x7cc   : > { %14970 = vst [vmem:[#allocation57_spill] sm:$0xff] %v13093_v41  ;;  %v6363_v12 = vshll.u32 %v13093_v41, 16  ;;  %v6367_v33 = vshrl.u32 %v13093_v41, 16  ;;  %v5736_v47 = vshrl.u32 %v5469_v23, 16  ;;  %v5739_v26 = vshll.u32 %v5469_v23, 16 }
 0x7cd   : > { %6666 = vrot.lane.b32.xlu2 %v6557_v61, %s8561_s18  ;;  %5992 = vst.msk [vmem:[#allocation4 + $0x7c] sm:$0xf] %vm5316_vm8, %v13093_v41  ;;  %v8541_v35 = vld [vmem:[#allocation3 + $0x14] sm:$0x1] }
 0x7ce   : > { %v13097_v57 = vld [vmem:[#allocation3 + $0xbc] sm:$0x1]  ;;  %v6365_v53 = vrot.slane %v6363_v12, 5  ;;  %v6369_v11 = vrot.slane %v6367_v33, 4  ;;  %v5738_v7 = vrot.slane %v5736_v47, 7  ;;  %v6566_v12 = vrot.slane %v8541_v35, 5 }
 0x7cf   : > { %14971 = vst [vmem:[#allocation60_spill] sm:$0xff] %v13097_v57  ;;  %v6373_v6 = vshll.u32 %v13097_v57, 16  ;;  %v8542_v47 = vld [vmem:[#allocation3 + $0x8] sm:$0x1]  ;;  %v8544_v35 = vld [vmem:[#allocation3 + $0x20] sm:$0x1] }
 0x7d0   : > { %v13106_v49 = vsel %vm8677_vm5, %v6361_v62, %v6365_v53  ;;  %v6370_v37 = vor.u32 %v6369_v11, %v6365_v53  ;;  %v5741_v56 = vor.u32 %v5739_v26, %v5738_v7  ;;  %v5743_v61 = vrot.slane %v5738_v7, 4 }
 0x7d1   : > { %6437 = vrot.lane.b32.xlu0 %v13106_v49, %s8558_s15  ;;  %v6375_v10 = vrot.slane %v6373_v6, 5  ;;  %v6559_v23 = vrot.slane %v8542_v47, 5  ;;  %v13117_v3 = vsel %vm8637_vm2, %v6565_v27, %v6566_v12  ;;  %v6584_v26 = vrot.slane %v12557_v54, 5 }
 0x7d2   : > { %v6371_v33 = vrot.slane %v6370_v37, 4  ;;  %v5742_v57 = vsel %vm12417_vm12, %v5734_v28, %v5741_v56  ;;  %v5905_v62 = vsel %vm12259_vm11, %v5743_v61, %v5904_v40  ;;  %v6410_v53 = vpop.permute.xlu1 %6409  ;;  %14972 = vst [vmem:[#allocation63_spill] sm:$0xff] %v13117_v3  ;;  %v6577_v56 = vrot.slane %v12512_v51, 5 }
 0x7d3   : > { %5903 = vst.msk [vmem:[#allocation3 + $0xc4] sm:$0xf] %vm5316_vm8, %v5742_v57  ;;  %v6560_v58 = vsel %vm8637_vm2, %v6558_v24, %v6559_v23  ;;  %v6570_v24 = vrot.slane %v12588_v31, 5  ;;  %v8324_v40 = vrot.slane %v12543_v45, 9  ;;  %v6586_v37 = vrot.slane %v6584_v26, 4 }
 0x7d4   : > { %v13121_v11 = vsel %vm8677_vm5, %v6371_v33, %v6375_v10  ;;  %5906 = vst [vmem:[#allocation3 + $0xc8] sm:$0x1] %v5905_v62  ;;  %v8323_v10 = vrot.slane %v12473_v19, 9  ;;  %v13137_v6 = vsel %vm8637_vm2, %v8325_v38, %v6577_v56  ;;  %v6573_v12 = vrot.slane %v8544_v35, 5 }
 0x7d5   : > { %6672 = vrot.lane.b32.xlu2 %v13117_v3, %s8561_s18  ;;  %6439 = vrot.lane.b32.xlu1 %v13121_v11, %s8558_s15  ;;  %6490 = vst.msk [vmem:[#allocation4 + $0x40] sm:$0xf] %vm6473_vm0, %v6410_v53  ;;  %v13152_v27 = vsel %vm8637_vm2, %v8324_v40, %v6570_v24  ;;  %v6572_v28 = vrot.slane %v6570_v24, 4  ;;  %v6579_v62 = vrot.slane %v6577_v56, 4  ;;  %v8545_v53 = vld [vmem:[#allocation3 + $0x2c] sm:$0x1] }
 0x7d6   : > { %14973 = vst [vmem:[#allocation20_spill] sm:$0xff] %v13137_v6  ;;  %v13141_v7 = vsel %vm8637_vm2, %v8323_v10, %v6563_v52  ;;  %v8543_v52 = vld [vmem:[#allocation3 + $0x38] sm:$0x1]  ;;  %v8328_v56 = vrot.slane %v12629_v16, 9  ;;  %v8326_v24 = vrot.slane %v12604_v17, 9  ;;  %vm6762_vm8 = vcmask 191616  }
 0x7d7   : > { %14974 = vst [vmem:[#allocation66_spill] sm:$0xff] %v13141_v7  ;;  %v6587_v61 = vrot.slane %v8543_v52, 5  ;;  %v13163_v23 = vsel %vm8637_vm2, %v6572_v28, %v6573_v12  ;;  %v6591_v28 = vrot.slane %v12624_v48, 5  ;;  %v6605_v52 = vrot.slane %v12738_v9, 5  ;;  %s8567_s15 = smov 40  }
 0x7d8   : > { %14975 = vst [vmem:[#allocation11_spill] sm:$0xff] %v13152_v27  ;;  %vm7467_vm12 = vcmask 519616  }
 0x7d9   : > { %6668 = vrot.lane.b32.xlu0 %v6560_v58, %s8561_s18  ;;  %v13159_v47 = vsel %vm8637_vm2, %v6586_v37, %v6587_v61  ;;  %14976 = vst [vmem:[#allocation8_spill] sm:$0xff] %v13163_v23  ;;  %v6580_v58 = vrot.slane %v8545_v53, 5  ;;  %v13185_v37 = vsel %vm8637_vm2, %v8326_v24, %v6584_v26  ;;  %v8327_v61 = vrot.slane %v12619_v59, 9 }
 0x7da   : > { %v6418_v57 = vpop.permute.xlu2 %6417  ;;  %v6607_v26 = vrot.slane %v6605_v52, 4 }
 0x7db   : > { %6494 = vst.msk [vmem:[#allocation4 + $0x50] sm:$0xf] %vm6473_vm0, %v6418_v57  ;;  %v13172_v10 = vsel %vm8637_vm2, %v6579_v62, %v6580_v58  ;;  %v6598_v57 = vrot.slane %v12668_v4, 5  ;;  %v13197_v12 = vsel %vm8637_vm2, %v8327_v61, %v6591_v28  ;;  %v8546_v62 = vld [vmem:[#allocation3 + $0x5c] sm:$0x1] }
 0x7dc   : > { %14977 = vst [vmem:[#allocation65_spill] sm:$0xff] %v13172_v10  ;;  %v6608_v53 = vrot.slane %v8546_v62, 5  ;;  %v8547_v58 = vld [vmem:[#allocation3 + $0x44] sm:$0x1] }
 0x7dd   : > { %6678 = vrot.lane.b32.xlu2 %v13137_v6, %s8561_s18  ;;  %6670 = vrot.lane.b32.xlu1 %v13141_v7, %s8561_s18  ;;  %v13181_v40 = vsel %vm8637_vm2, %v8328_v56, %v6598_v57 }
 0x7de   : > { %v13203_v56 = vsel %vm8637_vm2, %v6607_v26, %v6608_v53  ;;  %v6619_v53 = vrot.slane %v12829_v8, 5 }
 0x7e1   : > { %6674 = vrot.lane.b32.xlu0 %v13152_v27, %s8561_s18  ;;  %v6621_v27 = vrot.slane %v6619_v53, 4 }
 0x7e2   : > { %v6414_v33 = vpop.permute.xlu0 %6413 }
 0x7e3   : > { %6492 = vst.msk [vmem:[#allocation4 + $0x48] sm:$0xf] %vm6473_vm0, %v6414_v33  ;;  %v6593_v33 = vrot.slane %v6591_v28, 4  ;;  %v8548_v28 = vld [vmem:[#allocation3 + $0x50] sm:$0x1] }
 0x7e4   : > { %v6601_v61 = vrot.slane %v8548_v28, 5  ;;  %v6626_v28 = vrot.slane %v12873_v63, 5 }
 0x7e5   : > { %6684 = vrot.lane.b32.xlu2 %v13159_v47, %s8561_s18  ;;  %6676 = vrot.lane.b32.xlu1 %v13163_v23, %s8561_s18 }
 0x7e6   : > { %v6416_v38 = vpop.permute.xlu1 %6415 }
 0x7e7   : > { %6493 = vst.msk [vmem:[#allocation4 + $0x4c] sm:$0xf] %vm6473_vm0, %v6416_v38  ;;  %v6594_v38 = vrot.slane %v8547_v58, 5 }
 0x7e9   : > { %6680 = vrot.lane.b32.xlu0 %v13172_v10, %s8561_s18  ;;  %v13207_v24 = vsel %vm8637_vm2, %v6593_v33, %v6594_v38  ;;  %v8329_v33 = vrot.slane %v12705_v34, 9 }
 0x7eb   : > { %v13229_v38 = vsel %vm8637_vm2, %v8329_v33, %v6605_v52  ;;  %v6629_v52 = vrot.slane %v12876_v30, 5  ;;  %v8549_v33 = vld [vmem:[#allocation3 + $0x68] sm:$0x1]  ;;  %v6622_v30 = vrot.slane %v12832_v2, 5 }
 0x7ec   : > { %v6615_v6 = vrot.slane %v8549_v33, 5  ;;  %v8333_v33 = vrot.slane %v12899_v32, 9 }
 0x7ed   : > { %6690 = vrot.lane.b32.xlu2 %v13181_v40, %s8561_s18  ;;  %6682 = vrot.lane.b32.xlu1 %v13185_v37, %s8561_s18 }
 0x7ee   : > { %v6424_v35 = vpop.permute.xlu2 %6423 }
 0x7ef   : > { %6497 = vst.msk [vmem:[#allocation4 + $0x5c] sm:$0xf] %vm6473_vm0, %v6424_v35  ;;  %v6600_v35 = vrot.slane %v6598_v57, 4  ;;  %v8331_v57 = vrot.slane %v12808_v39, 9 }
 0x7f1   : > { %6686 = vrot.lane.b32.xlu0 %v13197_v12, %s8561_s18  ;;  %v13216_v26 = vsel %vm8637_vm2, %v6600_v35, %v6601_v61  ;;  %v13225_v58 = vsel %vm8637_vm2, %v8331_v57, %v6619_v53  ;;  %v6612_v35 = vrot.slane %v12786_v1, 5  ;;  %v8330_v61 = vrot.slane %v12760_v20, 9 }
 0x7f2   : > { %v6628_v57 = vrot.slane %v6626_v28, 4 }
 0x7f3   : > { %v6614_v10 = vrot.slane %v6612_v35, 4 }
 0x7f4   : > { %v13248_v23 = vsel %vm8637_vm2, %v6628_v57, %v6629_v52  ;;  %v6647_v52 = vrot.slane %v13007_v43, 5 }
 0x7f5   : > { %6696 = vrot.lane.b32.xlu2 %v13203_v56, %s8561_s18  ;;  %6688 = vrot.lane.b32.xlu1 %v13207_v24, %s8561_s18 }
 0x7f6   : > { %v6420_v62 = vpop.permute.xlu0 %6419 }
 0x7f7   : > { %6495 = vst.msk [vmem:[#allocation4 + $0x54] sm:$0xf] %vm6473_vm0, %v6420_v62  ;;  %v13240_v62 = vsel %vm8637_vm2, %v8330_v61, %v6612_v35  ;;  %v13252_v61 = vsel %vm8637_vm2, %v6614_v10, %v6615_v6  ;;  %v6640_v35 = vrot.slane %v12961_v22, 5  ;;  %v8334_v6 = vrot.slane %v12942_v21, 9 }
 0x7f8   : > { %v8332_v10 = vrot.slane %v12854_v42, 9 }
 0x7f9   : > { %6692 = vrot.lane.b32.xlu0 %v13216_v26, %s8561_s18  ;;  %v13271_v57 = vsel %vm8637_vm2, %v8334_v6, %v6640_v35  ;;  %v6649_v6 = vrot.slane %v6647_v52, 4 }
 0x7fa   : > { %14978 = vst [vmem:[#allocation16_spill] sm:$0xff] %v13271_v57  ;;  %v13275_v2 = vsel %vm8637_vm2, %v8332_v10, %v6626_v28  ;;  %v6650_v28 = vrot.slane %v13010_v50, 5  ;;  %v6636_v10 = vrot.slane %v12922_v55, 5  ;;  %v6643_v55 = vrot.slane %v12964_v14, 5 }
 0x7fc   : > { %v13295_v7 = vsel %vm8637_vm2, %v6649_v6, %v6650_v28  ;;  %v8335_v6 = vrot.slane %v12986_v18, 9  ;;  %v8336_v28 = vrot.slane %v13032_v5, 9 }
 0x7fd   : > { %6702 = vrot.lane.b32.xlu2 %v13225_v58, %s8561_s18  ;;  %6694 = vrot.lane.b32.xlu1 %v13229_v38, %s8561_s18  ;;  %14979 = vst [vmem:[#allocation14_spill] sm:$0xff] %v13295_v7 }
 0x7fe   : > { %v13322_v14 = vsel %vm8637_vm2, %v8335_v6, %v6647_v52  ;;  %v6657_v52 = vrot.slane %v13053_v60, 5 }
 0x7ff   : > { %14981 = vst [vmem:[#allocation29_spill] sm:$0xff] %v13322_v14 }
 0x801   : > { %6698 = vrot.lane.b32.xlu0 %v13240_v62, %s8561_s18 }
 0x802   : > { %v6422_v44 = vpop.permute.xlu1 %6421 }
 0x803   : > { %6496 = vst.msk [vmem:[#allocation4 + $0x58] sm:$0xf] %vm6473_vm0, %v6422_v44  ;;  %v13261_v44 = vsel %vm8637_vm2, %v6621_v27, %v6622_v30  ;;  %v6633_v27 = vrot.slane %v12919_v36, 5 }
 0x805   : > { %6708 = vrot.lane.b32.xlu2 %v13248_v23, %s8561_s18  ;;  %6700 = vrot.lane.b32.xlu1 %v13252_v61, %s8561_s18  ;;  %v13286_v30 = vsel %vm8637_vm2, %v8333_v33, %v6633_v27 }
 0x809   : > { %6704 = vrot.lane.b32.xlu0 %v13261_v44, %s8561_s18 }
 0x80b   : > { %v6430_v53 = vpop.permute.xlu2 %6429 }
 0x80c   : > { %6500 = vst.msk [vmem:[#allocation4 + $0x68] sm:$0xf] %vm6473_vm0, %v6430_v53  ;;  %v6635_v53 = vrot.slane %v6633_v27, 4  ;;  %v6661_v27 = vrot.slane %v13093_v41, 5 }
 0x80d   : > { %6714 = vrot.lane.b32.xlu2 %v13271_v57, %s8561_s18  ;;  %6706 = vrot.lane.b32.xlu1 %v13275_v2, %s8561_s18  ;;  %v6642_v57 = vrot.slane %v6640_v35, 4  ;;  %v8337_v35 = vrot.slane %v13072_v15, 9 }
 0x80e   : > { %v13299_v33 = vsel %vm8637_vm2, %v6635_v53, %v6636_v10  ;;  %v6663_v6 = vrot.slane %v6661_v27, 4 }
 0x80f   : > { %v13318_v53 = vsel %vm8637_vm2, %v8337_v35, %v6661_v27 }
 0x810   : > { %14980 = vst [vmem:[#allocation68_spill] sm:$0xff] %v13318_v53 }
 0x811   : > { %6710 = vrot.lane.b32.xlu0 %v13286_v30, %s8561_s18 }
 0x812   : > { %v6426_v3 = vpop.permute.xlu0 %6425 }
 0x813   : > { %6498 = vst.msk [vmem:[#allocation4 + $0x60] sm:$0xf] %vm6473_vm0, %v6426_v3  ;;  %v13309_v3 = vsel %vm8637_vm2, %v6642_v57, %v6643_v55  ;;  %v6654_v57 = vrot.slane %v13050_v25, 5 }
 0x815   : > { %6720 = vrot.lane.b32.xlu2 %v13295_v7, %s8561_s18  ;;  %6712 = vrot.lane.b32.xlu1 %v13299_v33, %s8561_s18  ;;  %v13333_v55 = vsel %vm8637_vm2, %v8336_v28, %v6654_v57 }
 0x816   : > { %v6428_v50 = vpop.permute.xlu1 %6427  ;;  %14982 = vst [vmem:[#allocation71_spill] sm:$0xff] %v13333_v55 }
 0x817   : > { %6499 = vst.msk [vmem:[#allocation4 + $0x64] sm:$0xf] %vm6473_vm0, %v6428_v50  ;;  %v6656_v50 = vrot.slane %v6654_v57, 4 }
 0x819   : > { %6716 = vrot.lane.b32.xlu0 %v13309_v3, %s8561_s18  ;;  %v13340_v35 = vsel %vm8637_vm2, %v6656_v50, %v6657_v52 }
 0x81a   : > { %14983 = vst [vmem:[#allocation34_spill] sm:$0xff] %v13340_v35 }
 0x81d   : > { %6726 = vrot.lane.b32.xlu2 %v13318_v53, %s8561_s18  ;;  %6718 = vrot.lane.b32.xlu1 %v13322_v14, %s8561_s18  ;;  %v15013_v14 = vld [vmem:[#allocation13_spill] sm:$0xff] }
 0x81f   : > { %v6436_v10 = vpop.permute.xlu2 %6435 }
 0x820   : > { %6503 = vst.msk [vmem:[#allocation4 + $0x74] sm:$0xf] %vm6473_vm0, %v6436_v10  ;;  %v14984_v10 = vld [vmem:[#allocation60_spill] sm:$0xff] }
 0x821   : > { %6722 = vrot.lane.b32.xlu0 %v13333_v55, %s8561_s18  ;;  %v6664_v28 = vrot.slane %v14984_v10, 5 }
 0x823   : > { %v13350_v60 = vsel %vm8637_vm2, %v6663_v6, %v6664_v28 }
 0x824   : > { %14985 = vst [vmem:[#allocation19_spill] sm:$0xff] %v13350_v60 }
 0x825   : > { %6799 = vrot.lane.b32.xlu2 %v12515_v13, %s8563_s20  ;;  %6724 = vrot.lane.b32.xlu1 %v13340_v35, %s8561_s18  ;;  %v15011_v35 = vld [vmem:[#allocation45_spill] sm:$0xff] }
 0x827   : > { %v6432_v53 = vpop.permute.xlu0 %6431  ;;  %v6667_v57 = vpop.permute.xlu2 %6666 }
 0x828   : > { %6501 = vst.msk [vmem:[#allocation4 + $0x6c] sm:$0xf] %vm6473_vm0, %v6432_v53 }
 0x829   : > { %6763 = vst.msk [vmem:[#allocation4] sm:$0xf] %vm6762_vm8, %v6667_v57  ;;  %6728 = vrot.lane.b32.xlu0 %v13350_v60, %s8561_s18  ;;  %s8568_s18 = smov 56  }
 0x82d   : > { %6805 = vrot.lane.b32.xlu2 %v12508_v46, %s8563_s20  ;;  %6797 = vrot.lane.b32.xlu1 %v12473_v19, %s8563_s20 }
 0x82f   : > { %v6673_v13 = vpop.permute.xlu2 %6672 }
 0x830   : > { %6766 = vst.msk [vmem:[#allocation4 + $0xc] sm:$0xf] %vm6762_vm8, %v6673_v13 }
 0x831   : > { %6801 = vrot.lane.b32.xlu0 %v12543_v45, %s8563_s20  ;;  %v15005_v45 = vld [vmem:[#allocation37_spill] sm:$0xff] }
 0x833   : > { %v6434_v27 = vpop.permute.xlu1 %6433 }
 0x834   : > { %6502 = vst.msk [vmem:[#allocation4 + $0x70] sm:$0xf] %vm6473_vm0, %v6434_v27 }
 0x835   : > { %6811 = vrot.lane.b32.xlu2 %v12557_v54, %s8563_s20  ;;  %6803 = vrot.lane.b32.xlu1 %v12588_v31, %s8563_s20 }
 0x837   : > { %v6679_v53 = vpop.permute.xlu2 %6678 }
 0x838   : > { %6769 = vst.msk [vmem:[#allocation4 + $0x18] sm:$0xf] %vm6762_vm8, %v6679_v53 }
 0x839   : > { %6807 = vrot.lane.b32.xlu0 %v12512_v51, %s8563_s20 }
 0x83d   : > { %6817 = vrot.lane.b32.xlu2 %v12629_v16, %s8563_s20  ;;  %6809 = vrot.lane.b32.xlu1 %v12604_v17, %s8563_s20 }
 0x83f   : > { %v6685_v19 = vpop.permute.xlu2 %6684 }
 0x840   : > { %6772 = vst.msk [vmem:[#allocation4 + $0x24] sm:$0xf] %vm6762_vm8, %v6685_v19 }
 0x841   : > { %6813 = vrot.lane.b32.xlu0 %v12619_v59, %s8563_s20 }
 0x843   : > { %v6438_v50 = vpop.permute.xlu0 %6437 }
 0x844   : > { %6504 = vst.msk [vmem:[#allocation4 + $0x78] sm:$0xf] %vm6473_vm0, %v6438_v50 }
 0x845   : > { %6823 = vrot.lane.b32.xlu2 %v12738_v9, %s8563_s20  ;;  %6815 = vrot.lane.b32.xlu1 %v12624_v48, %s8563_s20 }
 0x847   : > { %v6691_v52 = vpop.permute.xlu2 %6690  ;;  %v6440_v6 = vpop.permute.xlu1 %6439 }
 0x848   : > { %6775 = vst.msk [vmem:[#allocation4 + $0x30] sm:$0xf] %vm6762_vm8, %v6691_v52 }
 0x849   : > { %6505 = vst.msk [vmem:[#allocation4 + $0x7c] sm:$0xf] %vm6473_vm0, %v6440_v6  ;;  %6819 = vrot.lane.b32.xlu0 %v12668_v4, %s8563_s20 }
 0x84b   : > { %v6669_v10 = vpop.permute.xlu0 %6668 }
 0x84c   : > { %6764 = vst.msk [vmem:[#allocation4 + $0x4] sm:$0xf] %vm6762_vm8, %v6669_v10 }
 0x84d   : > { %6829 = vrot.lane.b32.xlu2 %v12808_v39, %s8563_s20  ;;  %6821 = vrot.lane.b32.xlu1 %v12705_v34, %s8563_s20 }
 0x84f   : > { %v6697_v28 = vpop.permute.xlu2 %6696  ;;  %v6671_v57 = vpop.permute.xlu1 %6670 }
 0x850   : > { %6778 = vst.msk [vmem:[#allocation4 + $0x3c] sm:$0xf] %vm6762_vm8, %v6697_v28 }
 0x851   : > { %6765 = vst.msk [vmem:[#allocation4 + $0x8] sm:$0xf] %vm6762_vm8, %v6671_v57  ;;  %6825 = vrot.lane.b32.xlu0 %v12760_v20, %s8563_s20 }
 0x853   : > { %v6675_v13 = vpop.permute.xlu0 %6674 }
 0x854   : > { %6767 = vst.msk [vmem:[#allocation4 + $0x10] sm:$0xf] %vm6762_vm8, %v6675_v13 }
 0x855   : > { %6835 = vrot.lane.b32.xlu2 %v12873_v63, %s8563_s20  ;;  %6827 = vrot.lane.b32.xlu1 %v12786_v1, %s8563_s20 }
 0x857   : > { %v6703_v27 = vpop.permute.xlu2 %6702  ;;  %v6677_v53 = vpop.permute.xlu1 %6676 }
 0x858   : > { %6781 = vst.msk [vmem:[#allocation4 + $0x48] sm:$0xf] %vm6762_vm8, %v6703_v27 }
 0x859   : > { %6768 = vst.msk [vmem:[#allocation4 + $0x14] sm:$0xf] %vm6762_vm8, %v6677_v53  ;;  %6831 = vrot.lane.b32.xlu0 %v12829_v8, %s8563_s20 }
 0x85b   : > { %v6681_v19 = vpop.permute.xlu0 %6680 }
 0x85c   : > { %6770 = vst.msk [vmem:[#allocation4 + $0x1c] sm:$0xf] %vm6762_vm8, %v6681_v19  ;;  %v13432_v19 = vld [vmem:[#allocation3 + $0xc4] sm:$0xf] }
 0x85d   : > { %6841 = vrot.lane.b32.xlu2 %v12942_v21, %s8563_s20  ;;  %6833 = vrot.lane.b32.xlu1 %v12854_v42, %s8563_s20 }
 0x85f   : > { %v6709_v50 = vpop.permute.xlu2 %6708  ;;  %v6683_v52 = vpop.permute.xlu1 %6682 }
 0x860   : > { %6784 = vst.msk [vmem:[#allocation4 + $0x54] sm:$0xf] %vm6762_vm8, %v6709_v50 }
 0x861   : > { %6771 = vst.msk [vmem:[#allocation4 + $0x20] sm:$0xf] %vm6762_vm8, %v6683_v52  ;;  %6837 = vrot.lane.b32.xlu0 %v12899_v32, %s8563_s20 }
 0x863   : > { %v6687_v6 = vpop.permute.xlu0 %6686 }
 0x864   : > { %6773 = vst.msk [vmem:[#allocation4 + $0x28] sm:$0xf] %vm6762_vm8, %v6687_v6 }
 0x865   : > { %6847 = vrot.lane.b32.xlu2 %v13007_v43, %s8563_s20  ;;  %6839 = vrot.lane.b32.xlu1 %v12919_v36, %s8563_s20 }
 0x867   : > { %v6715_v10 = vpop.permute.xlu2 %6714  ;;  %v6689_v28 = vpop.permute.xlu1 %6688 }
 0x868   : > { %6787 = vst.msk [vmem:[#allocation4 + $0x60] sm:$0xf] %vm6762_vm8, %v6715_v10  ;;  %v13443_v10 = vld [vmem:[#allocation3 + $0xc0] sm:$0xf] }
 0x869   : > { %6774 = vst.msk [vmem:[#allocation4 + $0x2c] sm:$0xf] %vm6762_vm8, %v6689_v28  ;;  %6843 = vrot.lane.b32.xlu0 %v12961_v22, %s8563_s20  ;;  %v14987_v28 = vld [vmem:[#allocation59_spill] sm:$0xff]  ;;  %v6930_v7 = vshll.u32 %v13443_v10, 16 }
 0x86a   : > { %14986 = vst [vmem:[#allocation44_spill] sm:$0xff] %v13443_v10 }
 0x86b   : > { %v6693_v57 = vpop.permute.xlu0 %6692 }
 0x86c   : > { %6776 = vst.msk [vmem:[#allocation4 + $0x34] sm:$0xf] %vm6762_vm8, %v6693_v57 }
 0x86d   : > { %6853 = vrot.lane.b32.xlu2 %v13072_v15, %s8563_s20  ;;  %6845 = vrot.lane.b32.xlu1 %v12986_v18, %s8563_s20 }
 0x86f   : > { %v6721_v13 = vpop.permute.xlu2 %6720  ;;  %v6695_v27 = vpop.permute.xlu1 %6694 }
 0x870   : > { %6790 = vst.msk [vmem:[#allocation4 + $0x6c] sm:$0xf] %vm6762_vm8, %v6721_v13 }
 0x871   : > { %6777 = vst.msk [vmem:[#allocation4 + $0x38] sm:$0xf] %vm6762_vm8, %v6695_v27  ;;  %6849 = vrot.lane.b32.xlu0 %v13032_v5, %s8563_s20  ;;  %v14988_v27 = vld [vmem:[#allocation52_spill] sm:$0xff] }
 0x873   : > { %v6699_v53 = vpop.permute.xlu0 %6698 }
 0x874   : > { %6779 = vst.msk [vmem:[#allocation4 + $0x40] sm:$0xf] %vm6762_vm8, %v6699_v53 }
 0x875   : > { %6851 = vrot.lane.b32.xlu1 %v13050_v25, %s8563_s20  ;;  %6859 = vrot.lane.b32.xlu2 %v13432_v19, %s8563_s20 }
 0x877   : > { %v6727_v50 = vpop.permute.xlu2 %6726  ;;  %v6701_v52 = vpop.permute.xlu1 %6700 }
 0x878   : > { %6793 = vst.msk [vmem:[#allocation4 + $0x78] sm:$0xf] %vm6762_vm8, %v6727_v50  ;;  %v14989_v50 = vld [vmem:[#allocation49_spill] sm:$0xff] }
 0x879   : > { %6780 = vst.msk [vmem:[#allocation4 + $0x44] sm:$0xf] %vm6762_vm8, %v6701_v52  ;;  %6855 = vrot.lane.b32.xlu0 %v13093_v41, %s8563_s20  ;;  %v14990_v52 = vld [vmem:[#allocation48_spill] sm:$0xff]  ;;  %v15008_v41 = vld [vmem:[#allocation22_spill] sm:$0xff] }
 0x87b   : > { %v6705_v6 = vpop.permute.xlu0 %6704 }
 0x87c   : > { %6782 = vst.msk [vmem:[#allocation4 + $0x4c] sm:$0xf] %vm6762_vm8, %v6705_v6 }
 0x87d   : > { %6857 = vrot.lane.b32.xlu1 %v13443_v10, %s8563_s20  ;;  %6954 = vrot.lane.b32.xlu2 %v14987_v28, %s8565_s26  ;;  %s8569_s20 = smov 48  }
 0x87f   : > { %v6800_v57 = vpop.permute.xlu2 %6799  ;;  %v6707_v13 = vpop.permute.xlu1 %6706 }
 0x880   : > { %6895 = vst.msk [vmem:[#allocation4 + $0x4] sm:$0xf] %vm6893_vm3, %v6800_v57  ;;  %v14991_v57 = vld [vmem:[#allocation39_spill] sm:$0xff] }
 0x881   : > { %6783 = vst.msk [vmem:[#allocation4 + $0x50] sm:$0xf] %vm6762_vm8, %v6707_v13  ;;  %6950 = vrot.lane.b32.xlu0 %v14988_v27, %s8565_s26  ;;  %v14992_v27 = vld [vmem:[#allocation54_spill] sm:$0xff] }
 0x883   : > { %v6711_v53 = vpop.permute.xlu0 %6710 }
 0x884   : > { %6785 = vst.msk [vmem:[#allocation4 + $0x58] sm:$0xf] %vm6762_vm8, %v6711_v53  ;;  %v14993_v53 = vld [vmem:[#allocation21_spill] sm:$0xff] }
 0x885   : > { %6952 = vrot.lane.b32.xlu1 %v14989_v50, %s8565_s26  ;;  %6960 = vrot.lane.b32.xlu2 %v14990_v52, %s8565_s26 }
 0x887   : > { %v6806_v6 = vpop.permute.xlu2 %6805  ;;  %v6713_v17 = vpop.permute.xlu1 %6712 }
 0x888   : > { %6898 = vst.msk [vmem:[#allocation4 + $0x10] sm:$0xf] %vm6893_vm3, %v6806_v6 }
 0x889   : > { %6786 = vst.msk [vmem:[#allocation4 + $0x5c] sm:$0xf] %vm6762_vm8, %v6713_v17  ;;  %6956 = vrot.lane.b32.xlu0 %v14991_v57, %s8565_s26  ;;  %v14994_v17 = vld [vmem:[#allocation64_spill] sm:$0xff] }
 0x88b   : > { %v6717_v13 = vpop.permute.xlu0 %6716 }
 0x88c   : > { %6788 = vst.msk [vmem:[#allocation4 + $0x64] sm:$0xf] %vm6762_vm8, %v6717_v13  ;;  %v14995_v13 = vld [vmem:[#allocation23_spill] sm:$0xff] }
 0x88d   : > { %6958 = vrot.lane.b32.xlu1 %v14992_v27, %s8565_s26  ;;  %6966 = vrot.lane.b32.xlu2 %v14993_v53, %s8565_s26  ;;  %v14996_v27 = vld [vmem:[#allocation70_spill] sm:$0xff] }
 0x88f   : > { %v6812_v50 = vpop.permute.xlu2 %6811  ;;  %v6719_v54 = vpop.permute.xlu1 %6718 }
 0x890   : > { %6901 = vst.msk [vmem:[#allocation4 + $0x1c] sm:$0xf] %vm6893_vm3, %v6812_v50 }
 0x891   : > { %6789 = vst.msk [vmem:[#allocation4 + $0x68] sm:$0xf] %vm6762_vm8, %v6719_v54  ;;  %6962 = vrot.lane.b32.xlu0 %v14994_v17, %s8565_s26  ;;  %v14997_v54 = vld [vmem:[#allocation67_spill] sm:$0xff] }
 0x893   : > { %v6723_v6 = vpop.permute.xlu0 %6722 }
 0x894   : > { %6791 = vst.msk [vmem:[#allocation4 + $0x70] sm:$0xf] %vm6762_vm8, %v6723_v6  ;;  %v14998_v6 = vld [vmem:[#allocation69_spill] sm:$0xff] }
 0x895   : > { %6964 = vrot.lane.b32.xlu1 %v14995_v13, %s8565_s26  ;;  %6972 = vrot.lane.b32.xlu2 %v14996_v27, %s8565_s26  ;;  %v14999_v13 = vld [vmem:[#allocation50_spill] sm:$0xff] }
 0x897   : > { %v6818_v51 = vpop.permute.xlu2 %6817  ;;  %v6725_v52 = vpop.permute.xlu1 %6724 }
 0x898   : > { %6904 = vst.msk [vmem:[#allocation4 + $0x28] sm:$0xf] %vm6893_vm3, %v6818_v51  ;;  %v15000_v51 = vld [vmem:[#allocation28_spill] sm:$0xff] }
 0x899   : > { %6792 = vst.msk [vmem:[#allocation4 + $0x74] sm:$0xf] %vm6762_vm8, %v6725_v52  ;;  %6968 = vrot.lane.b32.xlu0 %v14997_v54, %s8565_s26 }
 0x89b   : > { %v6729_v50 = vpop.permute.xlu0 %6728 }
 0x89c   : > { %6794 = vst.msk [vmem:[#allocation4 + $0x7c] sm:$0xf] %vm6762_vm8, %v6729_v50  ;;  %v15001_v50 = vld [vmem:[#allocation26_spill] sm:$0xff] }
 0x89d   : > { %6970 = vrot.lane.b32.xlu1 %v14998_v6, %s8565_s26  ;;  %6978 = vrot.lane.b32.xlu2 %v14999_v13, %s8565_s26 }
 0x89f   : > { %v6824_v17 = vpop.permute.xlu2 %6823  ;;  %v6798_v46 = vpop.permute.xlu1 %6797 }
 0x8a0   : > { %6907 = vst.msk [vmem:[#allocation4 + $0x34] sm:$0xf] %vm6893_vm3, %v6824_v17 }
 0x8a1   : > { %6894 = vst.msk [vmem:[#allocation4] sm:$0xf] %vm6893_vm3, %v6798_v46  ;;  %6974 = vrot.lane.b32.xlu0 %v15000_v51, %s8565_s26  ;;  %v15003_v46 = vld [vmem:[#allocation36_spill] sm:$0xff] }
 0x8a3   : > { %v6802_v52 = vpop.permute.xlu0 %6801 }
 0x8a4   : > { %6896 = vst.msk [vmem:[#allocation4 + $0x8] sm:$0xf] %vm6893_vm3, %v6802_v52  ;;  %v15004_v52 = vld [vmem:[#allocation12_spill] sm:$0xff] }
 0x8a5   : > { %6976 = vrot.lane.b32.xlu1 %v15001_v50, %s8565_s26  ;;  %6984 = vrot.lane.b32.xlu2 %v15002_v0, %s8565_s26 }
 0x8a7   : > { %v6830_v57 = vpop.permute.xlu2 %6829  ;;  %v6804_v28 = vpop.permute.xlu1 %6803 }
 0x8a8   : > { %6910 = vst.msk [vmem:[#allocation4 + $0x40] sm:$0xf] %vm6893_vm3, %v6830_v57 }
 0x8a9   : > { %6897 = vst.msk [vmem:[#allocation4 + $0xc] sm:$0xf] %vm6893_vm3, %v6804_v28  ;;  %6980 = vrot.lane.b32.xlu0 %v15003_v46, %s8565_s26  ;;  %v15006_v28 = vld [vmem:[#allocation15_spill] sm:$0xff] }
 0x8ab   : > { %v6808_v17 = vpop.permute.xlu0 %6807 }
 0x8ac   : > { %6899 = vst.msk [vmem:[#allocation4 + $0x14] sm:$0xf] %vm6893_vm3, %v6808_v17  ;;  %v15007_v17 = vld [vmem:[#allocation25_spill] sm:$0xff] }
 0x8ad   : > { %6982 = vrot.lane.b32.xlu1 %v15004_v52, %s8565_s26  ;;  %6990 = vrot.lane.b32.xlu2 %v15005_v45, %s8565_s26 }
 0x8af   : > { %v6836_v31 = vpop.permute.xlu2 %6835  ;;  %v6810_v60 = vpop.permute.xlu1 %6809 }
 0x8b0   : > { %6913 = vst.msk [vmem:[#allocation4 + $0x4c] sm:$0xf] %vm6893_vm3, %v6836_v31  ;;  %v15009_v31 = vld [vmem:[#allocation6_spill] sm:$0xff] }
 0x8b1   : > { %6900 = vst.msk [vmem:[#allocation4 + $0x18] sm:$0xf] %vm6893_vm3, %v6810_v60  ;;  %6986 = vrot.lane.b32.xlu0 %v15006_v28, %s8565_s26 }
 0x8b3   : > { %v6814_v57 = vpop.permute.xlu0 %6813 }
 0x8b4   : > { %6902 = vst.msk [vmem:[#allocation4 + $0x20] sm:$0xf] %vm6893_vm3, %v6814_v57  ;;  %v15010_v57 = vld [vmem:[#allocation46_spill] sm:$0xff] }
 0x8b5   : > { %6988 = vrot.lane.b32.xlu1 %v15007_v17, %s8565_s26  ;;  %6996 = vrot.lane.b32.xlu2 %v15008_v41, %s8565_s26 }
 0x8b7   : > { %v6842_v15 = vpop.permute.xlu2 %6841  ;;  %v6816_v55 = vpop.permute.xlu1 %6815 }
 0x8b8   : > { %6916 = vst.msk [vmem:[#allocation4 + $0x58] sm:$0xf] %vm6893_vm3, %v6842_v15  ;;  %v15012_v15 = vld [vmem:[#allocation32_spill] sm:$0xff] }
 0x8b9   : > { %6903 = vst.msk [vmem:[#allocation4 + $0x24] sm:$0xf] %vm6893_vm3, %v6816_v55  ;;  %6992 = vrot.lane.b32.xlu0 %v15009_v31, %s8565_s26  ;;  %v6927_v55 = vshrl.u32 %v13443_v10, 16  ;;  %v15014_v10 = vld [vmem:[#allocation9_spill] sm:$0xff] }
 0x8bb   : > { %v6820_v60 = vpop.permute.xlu0 %6819 }
 0x8bc   : > { %6905 = vst.msk [vmem:[#allocation4 + $0x2c] sm:$0xf] %vm6893_vm3, %v6820_v60 }
 0x8bd   : > { %6994 = vrot.lane.b32.xlu1 %v15010_v57, %s8565_s26  ;;  %7002 = vrot.lane.b32.xlu2 %v15011_v35, %s8565_s26  ;;  %v6929_v35 = vrot.slane %v6927_v55, 4 }
 0x8bf   : > { %v6848_v25 = vpop.permute.xlu2 %6847  ;;  %v6822_v5 = vpop.permute.xlu1 %6821 }
 0x8c0   : > { %6919 = vst.msk [vmem:[#allocation4 + $0x64] sm:$0xf] %vm6893_vm3, %v6848_v25  ;;  %v6932_v25 = vrot.slane %v6930_v7, 5 }
 0x8c1   : > { %6906 = vst.msk [vmem:[#allocation4 + $0x30] sm:$0xf] %vm6893_vm3, %v6822_v5  ;;  %6998 = vrot.lane.b32.xlu0 %v15012_v15, %s8565_s26  ;;  %v6936_v15 = vshll.u32 %v13432_v19, 16 }
 0x8c3   : > { %v6826_v60 = vpop.permute.xlu0 %6825 }
 0x8c4   : > { %6908 = vst.msk [vmem:[#allocation4 + $0x38] sm:$0xf] %vm6893_vm3, %v6826_v60  ;;  %v6933_v60 = vor.u32 %v6932_v25, %v6929_v35 }
 0x8c5   : > { %7000 = vrot.lane.b32.xlu1 %v15013_v14, %s8565_s26  ;;  %7008 = vrot.lane.b32.xlu2 %v13121_v11, %s8565_s26  ;;  %v13538_v14 = vrot.slane %v6936_v15, 5 }
 0x8c7   : > { %v6854_v18 = vpop.permute.xlu2 %6853  ;;  %v6828_v5 = vpop.permute.xlu1 %6827 }
 0x8c8   : > { %6922 = vst.msk [vmem:[#allocation4 + $0x70] sm:$0xf] %vm6893_vm3, %v6854_v18  ;;  %v6934_v18 = vrot.slane %v6933_v60, 4 }
 0x8c9   : > { %6909 = vst.msk [vmem:[#allocation4 + $0x3c] sm:$0xf] %vm6893_vm3, %v6828_v5  ;;  %7004 = vrot.lane.b32.xlu0 %v15014_v10, %s8565_s26 }
 0x8ca   : > { %v13548_v35 = vsel %vm8677_vm5, %v6934_v18, %v13538_v14 }
 0x8cb   : > { %v6832_v43 = vpop.permute.xlu0 %6831 }
 0x8cc   : > { %6911 = vst.msk [vmem:[#allocation4 + $0x44] sm:$0xf] %vm6893_vm3, %v6832_v43 }
 0x8cd   : > { %7006 = vrot.lane.b32.xlu1 %v13106_v49, %s8565_s26  ;;  %7101 = vrot.lane.b32.xlu2 %v13159_v47, %s8567_s15 }
 0x8cf   : > { %v6834_v7 = vpop.permute.xlu1 %6833  ;;  %v6860_v55 = vpop.permute.xlu2 %6859 }
 0x8d0   : > { %6912 = vst.msk [vmem:[#allocation4 + $0x48] sm:$0xf] %vm6893_vm3, %v6834_v7 }
 0x8d1   : > { %6925 = vst.msk [vmem:[#allocation4 + $0x7c] sm:$0xf] %vm6893_vm3, %v6860_v55  ;;  %7010 = vrot.lane.b32.xlu0 %v13548_v35, %s8565_s26 }
 0x8d3   : > { %v6838_v43 = vpop.permute.xlu0 %6837 }
 0x8d4   : > { %6914 = vst.msk [vmem:[#allocation4 + $0x50] sm:$0xf] %vm6893_vm3, %v6838_v43 }
 0x8d5   : > { %7099 = vrot.lane.b32.xlu1 %v13185_v37, %s8567_s15  ;;  %7383 = vrot.lane.b32.xlu2 %v14993_v53, %s8568_s18 }
 0x8d7   : > { %v6840_v15 = vpop.permute.xlu1 %6839  ;;  %v6955_v25 = vpop.permute.xlu2 %6954 }
 0x8d8   : > { %6915 = vst.msk [vmem:[#allocation4 + $0x54] sm:$0xf] %vm6893_vm3, %v6840_v15 }
 0x8d9   : > { %7049 = vst.msk [vmem:[#allocation4 + $0x8] sm:$0xf] %vm7046_vm9, %v6955_v25  ;;  %7230 = vrot.lane.b32.xlu0 %v12619_v59, %s8569_s20 }
 0x8db   : > { %v6844_v5 = vpop.permute.xlu0 %6843 }
 0x8dc   : > { %6917 = vst.msk [vmem:[#allocation4 + $0x5c] sm:$0xf] %vm6893_vm3, %v6844_v5 }
 0x8dd   : > { %7232 = vrot.lane.b32.xlu1 %v12624_v48, %s8569_s20  ;;  %7522 = vrot.lane.b32.xlu2 %v13207_v24, %s8570_s29 }
 0x8df   : > { %v6846_v53 = vpop.permute.xlu1 %6845  ;;  %v6961_v60 = vpop.permute.xlu2 %6960 }
 0x8e0   : > { %6918 = vst.msk [vmem:[#allocation4 + $0x60] sm:$0xf] %vm6893_vm3, %v6846_v53 }
 0x8e1   : > { %7052 = vst.msk [vmem:[#allocation4 + $0x14] sm:$0xf] %vm7046_vm9, %v6961_v60  ;;  %7385 = vrot.lane.b32.xlu0 %v14997_v54, %s8568_s18 }
 0x8e3   : > { %v6850_v59 = vpop.permute.xlu0 %6849 }
 0x8e4   : > { %6920 = vst.msk [vmem:[#allocation4 + $0x68] sm:$0xf] %vm6893_vm3, %v6850_v59 }
 0x8e5   : > { %7520 = vrot.lane.b32.xlu1 %v13197_v12, %s8570_s29  ;;  %7234 = vrot.lane.b32.xlu2 %v12629_v16, %s8569_s20 }
 0x8e7   : > { %v6852_v48 = vpop.permute.xlu1 %6851  ;;  %v6967_v18 = vpop.permute.xlu2 %6966 }
 0x8e8   : > { %6921 = vst.msk [vmem:[#allocation4 + $0x6c] sm:$0xf] %vm6893_vm3, %v6852_v48 }
 0x8e9   : > { %7055 = vst.msk [vmem:[#allocation4 + $0x20] sm:$0xf] %vm7046_vm9, %v6967_v18  ;;  %7103 = vrot.lane.b32.xlu0 %v13197_v12, %s8567_s15 }
 0x8eb   : > { %v6856_v7 = vpop.permute.xlu0 %6855 }
 0x8ec   : > { %6923 = vst.msk [vmem:[#allocation4 + $0x74] sm:$0xf] %vm6893_vm3, %v6856_v7 }
 0x8ed   : > { %7105 = vrot.lane.b32.xlu1 %v13207_v24, %s8567_s15  ;;  %7389 = vrot.lane.b32.xlu2 %v14996_v27, %s8568_s18 }
 0x8ef   : > { %v6858_v54 = vpop.permute.xlu1 %6857  ;;  %v6973_v16 = vpop.permute.xlu2 %6972 }
 0x8f0   : > { %6924 = vst.msk [vmem:[#allocation4 + $0x78] sm:$0xf] %vm6893_vm3, %v6858_v54 }
 0x8f1   : > { %7058 = vst.msk [vmem:[#allocation4 + $0x2c] sm:$0xf] %vm7046_vm9, %v6973_v16  ;;  %7236 = vrot.lane.b32.xlu0 %v12668_v4, %s8569_s20 }
 0x8f3   : > { %v6951_v55 = vpop.permute.xlu0 %6950 }
 0x8f4   : > { %7047 = vst.msk [vmem:[#allocation4] sm:$0xf] %vm7046_vm9, %v6951_v55 }
 0x8f5   : > { %7387 = vrot.lane.b32.xlu1 %v14998_v6, %s8568_s18  ;;  %7107 = vrot.lane.b32.xlu2 %v13181_v40, %s8567_s15 }
 0x8f7   : > { %v6953_v12 = vpop.permute.xlu1 %6952  ;;  %v6979_v24 = vpop.permute.xlu2 %6978 }
 0x8f8   : > { %7048 = vst.msk [vmem:[#allocation4 + $0x4] sm:$0xf] %vm7046_vm9, %v6953_v12 }
 0x8f9   : > { %7061 = vst.msk [vmem:[#allocation4 + $0x38] sm:$0xf] %vm7046_vm9, %v6979_v24  ;;  %7524 = vrot.lane.b32.xlu0 %v13181_v40, %s8570_s29 }
 0x8fb   : > { %v6957_v27 = vpop.permute.xlu0 %6956 }
 0x8fc   : > { %7050 = vst.msk [vmem:[#allocation4 + $0xc] sm:$0xf] %vm7046_vm9, %v6957_v27 }
 0x8fd   : > { %7526 = vrot.lane.b32.xlu1 %v13216_v26, %s8570_s29  ;;  %7240 = vrot.lane.b32.xlu2 %v12738_v9, %s8569_s20 }
 0x8ff   : > { %v6959_v4 = vpop.permute.xlu1 %6958  ;;  %v6985_v6 = vpop.permute.xlu2 %6984 }
 0x900   : > { %7051 = vst.msk [vmem:[#allocation4 + $0x10] sm:$0xf] %vm7046_vm9, %v6959_v4 }
 0x901   : > { %7064 = vst.msk [vmem:[#allocation4 + $0x44] sm:$0xf] %vm7046_vm9, %v6985_v6  ;;  %7109 = vrot.lane.b32.xlu0 %v13216_v26, %s8567_s15 }
 0x903   : > { %v6963_v43 = vpop.permute.xlu0 %6962 }
 0x904   : > { %7053 = vst.msk [vmem:[#allocation4 + $0x18] sm:$0xf] %vm7046_vm9, %v6963_v43 }
 0x905   : > { %7238 = vrot.lane.b32.xlu1 %v12705_v34, %s8569_s20  ;;  %7528 = vrot.lane.b32.xlu2 %v13229_v38, %s8570_s29 }
 0x907   : > { %v6965_v40 = vpop.permute.xlu1 %6964  ;;  %v6991_v9 = vpop.permute.xlu2 %6990 }
 0x908   : > { %7054 = vst.msk [vmem:[#allocation4 + $0x1c] sm:$0xf] %vm7046_vm9, %v6965_v40 }
 0x909   : > { %7067 = vst.msk [vmem:[#allocation4 + $0x50] sm:$0xf] %vm7046_vm9, %v6991_v9  ;;  %7391 = vrot.lane.b32.xlu0 %v15000_v51, %s8568_s18 }
 0x90b   : > { %v6969_v15 = vpop.permute.xlu0 %6968 }
 0x90c   : > { %7056 = vst.msk [vmem:[#allocation4 + $0x24] sm:$0xf] %vm7046_vm9, %v6969_v15 }
 0x90d   : > { %7393 = vrot.lane.b32.xlu1 %v15001_v50, %s8568_s18  ;;  %7113 = vrot.lane.b32.xlu2 %v13203_v56, %s8567_s15 }
 0x90f   : > { %v6971_v34 = vpop.permute.xlu1 %6970  ;;  %v6997_v26 = vpop.permute.xlu2 %6996 }
 0x910   : > { %7057 = vst.msk [vmem:[#allocation4 + $0x28] sm:$0xf] %vm7046_vm9, %v6971_v34 }
 0x911   : > { %7070 = vst.msk [vmem:[#allocation4 + $0x5c] sm:$0xf] %vm7046_vm9, %v6997_v26  ;;  %7530 = vrot.lane.b32.xlu0 %v13203_v56, %s8570_s29 }
 0x913   : > { %v6975_v25 = vpop.permute.xlu0 %6974 }
 0x914   : > { %7059 = vst.msk [vmem:[#allocation4 + $0x30] sm:$0xf] %vm7046_vm9, %v6975_v25 }
 0x915   : > { %7111 = vrot.lane.b32.xlu1 %v13229_v38, %s8567_s15  ;;  %7395 = vrot.lane.b32.xlu2 %v14999_v13, %s8568_s18 }
 0x917   : > { %v6977_v51 = vpop.permute.xlu1 %6976  ;;  %v7003_v50 = vpop.permute.xlu2 %7002 }
 0x918   : > { %7060 = vst.msk [vmem:[#allocation4 + $0x34] sm:$0xf] %vm7046_vm9, %v6977_v51  ;;  %v15017_v51 = vld [vmem:[#allocation27_spill] sm:$0xff] }
 0x919   : > { %7073 = vst.msk [vmem:[#allocation4 + $0x68] sm:$0xf] %vm7046_vm9, %v7003_v50  ;;  %7242 = vrot.lane.b32.xlu0 %v12760_v20, %s8569_s20  ;;  %v15018_v50 = vld [vmem:[#allocation29_spill] sm:$0xff] }
 0x91b   : > { %v6981_v5 = vpop.permute.xlu0 %6980 }
 0x91c   : > { %7062 = vst.msk [vmem:[#allocation4 + $0x3c] sm:$0xf] %vm7046_vm9, %v6981_v5 }
 0x91d   : > { %7244 = vrot.lane.b32.xlu1 %v12786_v1, %s8569_s20  ;;  %7534 = vrot.lane.b32.xlu2 %v13252_v61, %s8570_s29 }
 0x91f   : > { %v6983_v56 = vpop.permute.xlu1 %6982  ;;  %v7009_v38 = vpop.permute.xlu2 %7008 }
 0x920   : > { %7063 = vst.msk [vmem:[#allocation4 + $0x40] sm:$0xf] %vm7046_vm9, %v6983_v56 }
 0x921   : > { %7076 = vst.msk [vmem:[#allocation4 + $0x74] sm:$0xf] %vm7046_vm9, %v7009_v38  ;;  %7397 = vrot.lane.b32.xlu0 %v15003_v46, %s8568_s18  ;;  %v15019_v38 = vld [vmem:[#allocation32_spill] sm:$0xff] }
 0x923   : > { %v6987_v13 = vpop.permute.xlu0 %6986 }
 0x924   : > { %7065 = vst.msk [vmem:[#allocation4 + $0x48] sm:$0xf] %vm7046_vm9, %v6987_v13 }
 0x925   : > { %7532 = vrot.lane.b32.xlu1 %v13240_v62, %s8570_s29  ;;  %7246 = vrot.lane.b32.xlu2 %v12808_v39, %s8569_s20  ;;  %v7677_v39 = vld [vmem:[%s14165_s7 + $0x20] sm:$0xf] }
 0x926   : > { %v7779_v53 = vunpack.c.l.b16 %v7677_v39 }
 0x927   : > { %v6989_v20 = vpop.permute.xlu1 %6988  ;;  %v7102_v1 = vpop.permute.xlu2 %7101 }
 0x928   : > { %7066 = vst.msk [vmem:[#allocation4 + $0x4c] sm:$0xf] %vm7046_vm9, %v6989_v20 }
 0x929   : > { %7191 = vst.msk [vmem:[#allocation4 + $0x1c] sm:$0xf] %vm7183_vm6, %v7102_v1  ;;  %7115 = vrot.lane.b32.xlu0 %v13240_v62, %s8567_s15  ;;  %v7784_v62 = vpack.c.b16 %v7779_v53, %v7779_v53  ;;  %v15021_v1 = vld [vmem:[#allocation14_spill] sm:$0xff] }
 0x92b   : > { %v6993_v46 = vpop.permute.xlu0 %6992  ;;  %v7840_v48 = vsel %vm7838_vm4, %v7784_v62, 0 }
 0x92c   : > { %7068 = vst.msk [vmem:[#allocation4 + $0x54] sm:$0xf] %vm7046_vm9, %v6993_v46  ;;  %8507 = vmatpush.bf16.msra.mxu3 %v7840_v48  ;;  %7845 = vmatpush.bf16.msrb.mxu0 %v7840_v48  ;;  %v15023_v48 = vld [vmem:[#allocation41_spill] sm:$0xff] }
 0x92d   : > { %7117 = vrot.lane.b32.xlu1 %v13252_v61, %s8567_s15  ;;  %7401 = vrot.lane.b32.xlu2 %v15002_v0, %s8568_s18  ;;  %v8500_v0 = vld [vmem:[%s14165_s7 + $0x18] sm:$0xff] }
 0x92f   : > { %v6995_v60 = vpop.permute.xlu1 %6994  ;;  %v7384_v59 = vpop.permute.xlu2 %7383 }
 0x930   : > { %7069 = vst.msk [vmem:[#allocation4 + $0x58] sm:$0xf] %vm7046_vm9, %v6995_v60  ;;  %8508 = vmatpush.bf16.msra.mxu3 %v8500_v0  ;;  %7846 = vmatpush.bf16.msrb.mxu0 %v8500_v0  ;;  %v15022_v60 = vld [vmem:[#allocation45_spill] sm:$0xff]  ;;  %v15024_v0 = vld [vmem:[#allocation43_spill] sm:$0xff] }
 0x931   : > { %7248 = vrot.lane.b32.xlu0 %v12829_v8, %s8569_s20  ;;  %v8499_v8 = vld [vmem:[%s14165_s7 + $0x10] sm:$0xff] }
 0x933   : > { %v6999_v18 = vpop.permute.xlu0 %6998 }
 0x934   : > { %7071 = vst.msk [vmem:[#allocation4 + $0x60] sm:$0xf] %vm7046_vm9, %v6999_v18  ;;  %8509 = vmatpush.bf16.msra.mxu3 %v8499_v8  ;;  %7847 = vmatpush.bf16.msrb.mxu0 %v8499_v8 }
 0x935   : > { %7399 = vrot.lane.b32.xlu1 %v15004_v52, %s8568_s18  ;;  %7119 = vrot.lane.b32.xlu2 %v13225_v58, %s8567_s15  ;;  %v8498_v52 = vld [vmem:[%s14165_s7 + $0x8] sm:$0xff] }
 0x937   : > { %v7001_v61 = vpop.permute.xlu1 %7000  ;;  %v7523_v7 = vpop.permute.xlu2 %7522 }
 0x938   : > { %7072 = vst.msk [vmem:[#allocation4 + $0x64] sm:$0xf] %vm7046_vm9, %v7001_v61  ;;  %8510 = vmatpush.bf16.msra.mxu3 %v8498_v52  ;;  %7848 = vmatpush.bf16.msrb.mxu0 %v8498_v52  ;;  %v15025_v61 = vld [vmem:[#allocation34_spill] sm:$0xff] }
 0x939   : > { %7536 = vrot.lane.b32.xlu0 %v13225_v58, %s8570_s29  ;;  %v8497_v58 = vld [vmem:[%s14165_s7] sm:$0xff] }
 0x93b   : > { %v7005_v54 = vpop.permute.xlu0 %7004 }
 0x93c   : > { %7074 = vst.msk [vmem:[#allocation4 + $0x6c] sm:$0xf] %vm7046_vm9, %v7005_v54  ;;  %8511 = vmatpush.bf16.msra.mxu3 %v8497_v58  ;;  %7849 = vmatpush.bf16.msrb.mxu0 %v8497_v58 }
 0x93d   : > { %7538 = vrot.lane.b32.xlu1 %v13261_v44, %s8570_s29  ;;  %7252 = vrot.lane.b32.xlu2 %v12873_v63, %s8569_s20 }
 0x93f   : > { %v7007_v16 = vpop.permute.xlu1 %7006  ;;  %v7235_v55 = vpop.permute.xlu2 %7234 }
 0x940   : > { %7075 = vst.msk [vmem:[#allocation4 + $0x70] sm:$0xf] %vm7046_vm9, %v7007_v16  ;;  %v15026_v16 = vld [vmem:[#allocation71_spill] sm:$0xff] }
 0x941   : > { %7121 = vrot.lane.b32.xlu0 %v13261_v44, %s8567_s15 }
 0x943   : > { %v7011_v12 = vpop.permute.xlu0 %7010 }
 0x944   : > { %7077 = vst.msk [vmem:[#allocation4 + $0x78] sm:$0xf] %vm7046_vm9, %v7011_v12 }
 0x945   : > { %7250 = vrot.lane.b32.xlu1 %v12854_v42, %s8569_s20  ;;  %7540 = vrot.lane.b32.xlu2 %v13275_v2, %s8570_s29 }
 0x947   : > { %v7100_v63 = vpop.permute.xlu1 %7099  ;;  %v7390_v24 = vpop.permute.xlu2 %7389 }
 0x948   : > { %7190 = vst.msk [vmem:[#allocation4 + $0x18] sm:$0xf] %vm7183_vm6, %v7100_v63 }
 0x949   : > { %7403 = vrot.lane.b32.xlu0 %v15006_v28, %s8568_s18 }
 0x94b   : > { %v7231_v44 = vpop.permute.xlu0 %7230 }
 0x94c   : > { %7321 = vst.msk [vmem:[#allocation4 + $0x18] sm:$0xf] %vm7314_vm7, %v7231_v44  ;;  %v15028_v44 = vld [vmem:[#allocation57_spill] sm:$0xff] }
 0x94d   : > { %7405 = vrot.lane.b32.xlu1 %v15007_v17, %s8568_s18  ;;  %7125 = vrot.lane.b32.xlu2 %v13248_v23, %s8567_s15  ;;  %7474 = vst.msk [vmem:[#allocation4 + $0x18] sm:$0xf] %vm7467_vm12, %v7384_v59 }
 0x94f   : > { %v7233_v42 = vpop.permute.xlu1 %7232  ;;  %v7108_v27 = vpop.permute.xlu2 %7107 }
 0x950   : > { %7322 = vst.msk [vmem:[#allocation4 + $0x1c] sm:$0xf] %vm7314_vm7, %v7233_v42 }
 0x951   : > { %7194 = vst.msk [vmem:[#allocation4 + $0x28] sm:$0xf] %vm7183_vm6, %v7108_v27  ;;  %7542 = vrot.lane.b32.xlu0 %v13248_v23, %s8570_s29  ;;  %v15029_v27 = vld [vmem:[#allocation66_spill] sm:$0xff] }
 0x953   : > { %v7386_v28 = vpop.permute.xlu0 %7385 }
 0x954   : > { %7475 = vst.msk [vmem:[#allocation4 + $0x1c] sm:$0xf] %vm7467_vm12, %v7386_v28 }
 0x955   : > { %7612 = vst.msk [vmem:[#allocation4 + $0x1c] sm:$0xf] %vm7604_vm10, %v7523_v7  ;;  %7123 = vrot.lane.b32.xlu1 %v13275_v2, %s8567_s15  ;;  %7407 = vrot.lane.b32.xlu2 %v15005_v45, %s8568_s18 }
 0x957   : > { %v7521_v17 = vpop.permute.xlu1 %7520  ;;  %v7241_v4 = vpop.permute.xlu2 %7240 }
 0x958   : > { %7611 = vst.msk [vmem:[#allocation4 + $0x18] sm:$0xf] %vm7604_vm10, %v7521_v17 }
 0x959   : > { %7254 = vrot.lane.b32.xlu0 %v12899_v32, %s8569_s20 }
 0x95b   : > { %v7104_v23 = vpop.permute.xlu0 %7103 }
 0x95c   : > { %7192 = vst.msk [vmem:[#allocation4 + $0x20] sm:$0xf] %vm7183_vm6, %v7104_v23 }
 0x95d   : > { %7323 = vst.msk [vmem:[#allocation4 + $0x20] sm:$0xf] %vm7314_vm7, %v7235_v55  ;;  %7256 = vrot.lane.b32.xlu1 %v12919_v36, %s8569_s20  ;;  %7546 = vrot.lane.b32.xlu2 %v13299_v33, %s8570_s29  ;;  %v15027_v55 = vld [vmem:[#allocation24_spill] sm:$0xff] }
 0x95f   : > { %v7106_v45 = vpop.permute.xlu1 %7105  ;;  %v7529_v2 = vpop.permute.xlu2 %7528  ;;  %v8484_v6 = vld [vmem:[#allocation4 + $0x18] sm:$0xff] }
 0x960   : > { %7193 = vst.msk [vmem:[#allocation4 + $0x24] sm:$0xf] %vm7183_vm6, %v7106_v45  ;;  %8423 = vmatmul.msk.bf16.vlgmr.msra.gmra.mxu3 %vm7789_vm14, %v8484_v6  ;;  %v15032_v45 = vld [vmem:[#allocation56_spill] sm:$0xff] }
 0x961   : > { %7409 = vrot.lane.b32.xlu0 %v15009_v31, %s8568_s18 }
 0x963   : > { %v7237_v32 = vpop.permute.xlu0 %7236 }
 0x964   : > { %7324 = vst.msk [vmem:[#allocation4 + $0x24] sm:$0xf] %vm7314_vm7, %v7237_v32  ;;  %v15033_v32 = vld [vmem:[#allocation63_spill] sm:$0xff] }
 0x965   : > { %7477 = vst.msk [vmem:[#allocation4 + $0x24] sm:$0xf] %vm7467_vm12, %v7390_v24  ;;  %7544 = vrot.lane.b32.xlu1 %v13286_v30, %s8570_s29  ;;  %7258 = vrot.lane.b32.xlu2 %v12942_v21, %s8569_s20 }
 0x967   : > { %v7388_v36 = vpop.permute.xlu1 %7387  ;;  %v7114_v43 = vpop.permute.xlu2 %7113 }
 0x968   : > { %7476 = vst.msk [vmem:[#allocation4 + $0x20] sm:$0xf] %vm7467_vm12, %v7388_v36 }
 0x969   : > { %7197 = vst.msk [vmem:[#allocation4 + $0x34] sm:$0xf] %vm7183_vm6, %v7114_v43  ;;  %7127 = vrot.lane.b32.xlu0 %v13286_v30, %s8567_s15  ;;  %v15015_v30 = vld [vmem:[#allocation16_spill] sm:$0xff]  ;;  %v15034_v43 = vld [vmem:[#allocation38_spill] sm:$0xff] }
 0x96b   : > { %v7525_v31 = vpop.permute.xlu0 %7524 }
 0x96c   : > { %7613 = vst.msk [vmem:[#allocation4 + $0x20] sm:$0xf] %vm7604_vm10, %v7525_v31  ;;  %v15035_v31 = vld [vmem:[#allocation11_spill] sm:$0xff] }
 0x96d   : > { %7129 = vrot.lane.b32.xlu1 %v13299_v33, %s8567_s15  ;;  %7413 = vrot.lane.b32.xlu2 %v15008_v41, %s8568_s18 }
 0x96f   : > { %v7527_v40 = vpop.permute.xlu1 %7526  ;;  %v7396_v21 = vpop.permute.xlu2 %7395 }
 0x970   : > { %7614 = vst.msk [vmem:[#allocation4 + $0x24] sm:$0xf] %vm7604_vm10, %v7527_v40 }
 0x971   : > { %7260 = vrot.lane.b32.xlu0 %v12961_v22, %s8569_s20 }
 0x973   : > { %v7110_v9 = vpop.permute.xlu0 %7109 }
 0x974   : > { %7195 = vst.msk [vmem:[#allocation4 + $0x2c] sm:$0xf] %vm7183_vm6, %v7110_v9  ;;  %v15036_v9 = vld [vmem:[#allocation59_spill] sm:$0xff] }
 0x975   : > { %7326 = vst.msk [vmem:[#allocation4 + $0x2c] sm:$0xf] %vm7314_vm7, %v7241_v4  ;;  %7411 = vrot.lane.b32.xlu1 %v15010_v57, %s8568_s18  ;;  %7131 = vrot.lane.b32.xlu2 %v15015_v30, %s8567_s15  ;;  %v15016_v57 = vld [vmem:[#allocation53_spill] sm:$0xff]  ;;  %v15030_v4 = vld [vmem:[#allocation68_spill] sm:$0xff] }
 0x977   : > { %v7239_v33 = vpop.permute.xlu1 %7238  ;;  %v7535_v41 = vpop.permute.xlu2 %7534  ;;  %v8485_v15 = vld [vmem:[#allocation4 + $0x20] sm:$0xff] }
 0x978   : > { %7325 = vst.msk [vmem:[#allocation4 + $0x28] sm:$0xf] %vm7314_vm7, %v7239_v33  ;;  %8424 = vmatmul.msk.bf16.gmra.mxu3 %vm7789_vm14, %v8485_v15 }
 0x979   : > { %7548 = vrot.lane.b32.xlu0 %v15015_v30, %s8570_s29 }
 0x97b   : > { %v7392_v22 = vpop.permute.xlu0 %7391 }
 0x97c   : > { %7478 = vst.msk [vmem:[#allocation4 + $0x28] sm:$0xf] %vm7467_vm12, %v7392_v22 }
 0x97d   : > { %7615 = vst.msk [vmem:[#allocation4 + $0x28] sm:$0xf] %vm7604_vm10, %v7529_v2  ;;  %7550 = vrot.lane.b32.xlu1 %v13309_v3, %s8570_s29  ;;  %7264 = vrot.lane.b32.xlu2 %v15016_v57, %s8569_s20  ;;  %v6940_v57 = vshrl.u32 %v13432_v19, 16 }
 0x97f   : > { %v7394_v34 = vpop.permute.xlu1 %7393  ;;  %v7247_v26 = vpop.permute.xlu2 %7246 }
 0x980   : > { %7479 = vst.msk [vmem:[#allocation4 + $0x2c] sm:$0xf] %vm7467_vm12, %v7394_v34  ;;  %v15038_v34 = vld [vmem:[#allocation8_spill] sm:$0xff] }
 0x981   : > { %7133 = vrot.lane.b32.xlu0 %v13309_v3, %s8567_s15  ;;  %v15020_v3 = vld [vmem:[#allocation13_spill] sm:$0xff] }
 0x983   : > { %v7531_v25 = vpop.permute.xlu0 %7530 }
 0x984   : > { %7616 = vst.msk [vmem:[#allocation4 + $0x2c] sm:$0xf] %vm7604_vm10, %v7531_v25  ;;  %v7082_v25 = vrot.slane %v13432_v19, 5 }
 0x985   : > { %7262 = vrot.lane.b32.xlu1 %v15017_v51, %s8569_s20  ;;  %7552 = vrot.lane.b32.xlu2 %v15018_v50, %s8570_s29  ;;  %v6942_v51 = vrot.slane %v6940_v57, 4 }
 0x987   : > { %v7112_v5 = vpop.permute.xlu1 %7111  ;;  %v7402_v56 = vpop.permute.xlu2 %7401 }
 0x988   : > { %7196 = vst.msk [vmem:[#allocation4 + $0x30] sm:$0xf] %vm7183_vm6, %v7112_v5 }
 0x989   : > { %7415 = vrot.lane.b32.xlu0 %v15019_v38, %s8568_s18  ;;  %v7084_v38 = vrot.slane %v7082_v25, 4 }
 0x98b   : > { %v7243_v13 = vpop.permute.xlu0 %7242  ;;  %v8486_v20 = vld [vmem:[#allocation4 + $0x28] sm:$0xff] }
 0x98c   : > { %7327 = vst.msk [vmem:[#allocation4 + $0x30] sm:$0xf] %vm7314_vm7, %v7243_v13  ;;  %8425 = vmatmul.msk.bf16.gmra.mxu3 %vm7789_vm14, %v8486_v20  ;;  %v6943_v13 = vor.u32 %v6942_v51, %v13538_v14  ;;  %v15039_v20 = vld [vmem:[#allocation44_spill] sm:$0xff]  ;;  %v5379_v14 = vld [vmem:[#allocation3 + $0xcc] sm:$0x1]  ;;  %v15048_v51 = vld [vmem:[#allocation65_spill] sm:$0xff] }
 0x98d   : > { %7480 = vst.msk [vmem:[#allocation4 + $0x30] sm:$0xf] %vm7467_vm12, %v7396_v21  ;;  %7417 = vrot.lane.b32.xlu1 %v15020_v3, %s8568_s18  ;;  %7137 = vrot.lane.b32.xlu2 %v15021_v1, %s8567_s15 }
 0x98f   : > { %v7245_v46 = vpop.permute.xlu1 %7244  ;;  %v7120_v39 = vpop.permute.xlu2 %7119 }
 0x990   : > { %7328 = vst.msk [vmem:[#allocation4 + $0x34] sm:$0xf] %vm7314_vm7, %v7245_v46 }
 0x991   : > { %7200 = vst.msk [vmem:[#allocation4 + $0x40] sm:$0xf] %vm7183_vm6, %v7120_v39  ;;  %7554 = vrot.lane.b32.xlu0 %v15021_v1, %s8570_s29 }
 0x993   : > { %v7398_v53 = vpop.permute.xlu0 %7397 }
 0x994   : > { %7481 = vst.msk [vmem:[#allocation4 + $0x34] sm:$0xf] %vm7467_vm12, %v7398_v53  ;;  %v6944_v53 = vrot.slane %v6943_v13, 4 }
 0x995   : > { %7618 = vst.msk [vmem:[#allocation4 + $0x34] sm:$0xf] %vm7604_vm10, %v7535_v41  ;;  %7135 = vrot.lane.b32.xlu1 %v15018_v50, %s8567_s15  ;;  %7419 = vrot.lane.b32.xlu2 %v15022_v60, %s8568_s18  ;;  %v15037_v41 = vld [vmem:[#allocation39_spill] sm:$0xff] }
 0x997   : > { %v7533_v59 = vpop.permute.xlu1 %7532  ;;  %v7253_v62 = vpop.permute.xlu2 %7252 }
 0x998   : > { %7617 = vst.msk [vmem:[#allocation4 + $0x30] sm:$0xf] %vm7604_vm10, %v7533_v59 }
 0x999   : > { %7266 = vrot.lane.b32.xlu0 %v15023_v48, %s8569_s20 }
 0x99b   : > { %v7116_v18 = vpop.permute.xlu0 %7115 }
 0x99c   : > { %7198 = vst.msk [vmem:[#allocation4 + $0x38] sm:$0xf] %vm7183_vm6, %v7116_v18 }
 0x99d   : > { %7329 = vst.msk [vmem:[#allocation4 + $0x38] sm:$0xf] %vm7314_vm7, %v7247_v26  ;;  %7268 = vrot.lane.b32.xlu1 %v15024_v0, %s8569_s20  ;;  %7558 = vrot.lane.b32.xlu2 %v15025_v61, %s8570_s29 }
 0x99f   : > { %v7118_v7 = vpop.permute.xlu1 %7117  ;;  %v7541_v8 = vpop.permute.xlu2 %7540  ;;  %v8487_v54 = vld [vmem:[#allocation4 + $0x30] sm:$0xff] }
 0x9a0   : > { %7199 = vst.msk [vmem:[#allocation4 + $0x3c] sm:$0xf] %vm7183_vm6, %v7118_v7  ;;  %8426 = vmatmul.msk.bf16.gmra.mxu3 %vm7789_vm14, %v8487_v54  ;;  %v8338_v7 = vrot.slane %v15039_v20, 9 }
 0x9a1   : > { %7421 = vrot.lane.b32.xlu0 %v15014_v10, %s8568_s18 }
 0x9a2   : > { %v13902_v54 = vsel %vm8637_vm2, %v8338_v7, %v7082_v25 }
 0x9a3   : > { %v7249_v52 = vpop.permute.xlu0 %7248 }
 0x9a4   : > { %7330 = vst.msk [vmem:[#allocation4 + $0x3c] sm:$0xf] %vm7314_vm7, %v7249_v52 }
 0x9a5   : > { %7483 = vst.msk [vmem:[#allocation4 + $0x3c] sm:$0xf] %vm7467_vm12, %v7402_v56  ;;  %7556 = vrot.lane.b32.xlu1 %v15026_v16, %s8570_s29  ;;  %7270 = vrot.lane.b32.xlu2 %v15027_v55, %s8569_s20  ;;  %v5957_v56 = vld [vmem:[#allocation3 + $0xc8] sm:$0x1] }
 0x9a6   : > { %v7085_v3 = vrot.slane %v5957_v56, 5  ;;  %v6946_v1 = vshll.u32 %v5957_v56, 16 }
 0x9a7   : > { %v7400_v58 = vpop.permute.xlu1 %7399  ;;  %v7126_v12 = vpop.permute.xlu2 %7125 }
 0x9a8   : > { %7482 = vst.msk [vmem:[#allocation4 + $0x38] sm:$0xf] %vm7467_vm12, %v7400_v58  ;;  %v6948_v60 = vrot.slane %v6946_v1, 5  ;;  %v5435_v58 = vld [vmem:[#allocation3 + $0xd4] sm:$0x1] }
 0x9a9   : > { %7203 = vst.msk [vmem:[#allocation4 + $0x4c] sm:$0xf] %vm7183_vm6, %v7126_v12  ;;  %7139 = vrot.lane.b32.xlu0 %v15026_v16, %s8567_s15  ;;  %v15042_v16 = vld [vmem:[#allocation7_spill] sm:$0xff] }
 0x9ab   : > { %v7537_v10 = vpop.permute.xlu0 %7536 }
 0x9ac   : > { %7619 = vst.msk [vmem:[#allocation4 + $0x38] sm:$0xf] %vm7604_vm10, %v7537_v10  ;;  %v5436_v10 = vsel %vm12350_vm1, 0, %v5435_v58 }
 0x9ad   : > { %7141 = vrot.lane.b32.xlu1 %v15025_v61, %s8567_s15  ;;  %7425 = vrot.lane.b32.xlu2 %v13121_v11, %s8568_s18  ;;  %v6949_v61 = vsel %vm8677_vm5, %v6944_v53, %v6948_v60  ;;  %5437 = vst [vmem:[#allocation3 + $0xd4] sm:$0x1] %v5436_v10 }
 0x9af   : > { %v7539_v63 = vpop.permute.xlu1 %7538  ;;  %v7408_v24 = vpop.permute.xlu2 %7407 }
 0x9b0   : > { %7620 = vst.msk [vmem:[#allocation4 + $0x3c] sm:$0xf] %vm7604_vm10, %v7539_v63 }
 0x9b1   : > { %7272 = vrot.lane.b32.xlu0 %v15028_v44, %s8569_s20 }
 0x9b3   : > { %v7122_v42 = vpop.permute.xlu0 %7121 }
 0x9b4   : > { %7201 = vst.msk [vmem:[#allocation4 + $0x44] sm:$0xf] %vm7183_vm6, %v7122_v42 }
 0x9b5   : > { %7332 = vst.msk [vmem:[#allocation4 + $0x44] sm:$0xf] %vm7314_vm7, %v7253_v62  ;;  %7423 = vrot.lane.b32.xlu1 %v13106_v49, %s8568_s18  ;;  %7087 = vrot.lane.b32.xlu2 %v15029_v27, %s8567_s15  ;;  %v15031_v49 = vld [vmem:[#allocation19_spill] sm:$0xff]  ;;  %v5380_v62 = vsel %vm12259_vm11, 0, %v5379_v14  ;;  %vm7963_vm11 = vcmask 64512  }
 0x9b6   : > { %5381 = vst [vmem:[#allocation3 + $0xcc] sm:$0x1] %v5380_v62 }
 0x9b7   : > { %v7251_v28 = vpop.permute.xlu1 %7250  ;;  %v7547_v11 = vpop.permute.xlu2 %7546  ;;  %v8488_v17 = vld [vmem:[#allocation4 + $0x38] sm:$0xff] }
 0x9b8   : > { %7331 = vst.msk [vmem:[#allocation4 + $0x40] sm:$0xf] %vm7314_vm7, %v7251_v28  ;;  %8427 = vmatmul.msk.bf16.gmra.mxu3 %vm7789_vm14, %v8488_v17  ;;  %v15044_v28 = vld [vmem:[#allocation48_spill] sm:$0xff] }
 0x9b9   : > { %7560 = vrot.lane.b32.xlu0 %v15030_v4, %s8570_s29 }
 0x9bb   : > { %v7404_v23 = vpop.permute.xlu0 %7403 }
 0x9bc   : > { %7484 = vst.msk [vmem:[#allocation4 + $0x40] sm:$0xf] %vm7467_vm12, %v7404_v23 }
 0x9bd   : > { %7621 = vst.msk [vmem:[#allocation4 + $0x40] sm:$0xf] %vm7604_vm10, %v7541_v8  ;;  %7562 = vrot.lane.b32.xlu1 %v15031_v49, %s8570_s29  ;;  %7220 = vrot.lane.b32.xlu2 %v15032_v45, %s8569_s20  ;;  %v15045_v45 = vld [vmem:[#allocation51_spill] sm:$0xff] }
 0x9bf   : > { %v7406_v2 = vpop.permute.xlu1 %7405  ;;  %v7259_v6 = vpop.permute.xlu2 %7258 }
 0x9c0   : > { %7485 = vst.msk [vmem:[#allocation4 + $0x44] sm:$0xf] %vm7467_vm12, %v7406_v2 }
 0x9c1   : > { %7089 = vrot.lane.b32.xlu0 %v15033_v32, %s8567_s15 }
 0x9c3   : > { %v7543_v36 = vpop.permute.xlu0 %7542 }
 0x9c4   : > { %7622 = vst.msk [vmem:[#allocation4 + $0x44] sm:$0xf] %vm7604_vm10, %v7543_v36  ;;  %v15046_v36 = vld [vmem:[#allocation54_spill] sm:$0xff] }
 0x9c5   : > { %7218 = vrot.lane.b32.xlu1 %v15034_v43, %s8569_s20  ;;  %7508 = vrot.lane.b32.xlu2 %v15035_v31, %s8570_s29 }
 0x9c7   : > { %v7124_v40 = vpop.permute.xlu1 %7123  ;;  %v7414_v21 = vpop.permute.xlu2 %7413 }
 0x9c8   : > { %7202 = vst.msk [vmem:[#allocation4 + $0x48] sm:$0xf] %vm7183_vm6, %v7124_v40 }
 0x9c9   : > { %7371 = vrot.lane.b32.xlu0 %v15036_v9, %s8568_s18 }
 0x9cb   : > { %v7255_v30 = vpop.permute.xlu0 %7254  ;;  %v8489_v33 = vld [vmem:[#allocation4 + $0x40] sm:$0xff] }
 0x9cc   : > { %7333 = vst.msk [vmem:[#allocation4 + $0x48] sm:$0xf] %vm7314_vm7, %v7255_v30  ;;  %8428 = vmatmul.msk.bf16.gmra.mxu3 %vm7789_vm14, %v8489_v33  ;;  %v13948_v30 = vld [vmem:[#allocation3 + $0xd4] sm:$0x1] }
 0x9cd   : > { %7486 = vst.msk [vmem:[#allocation4 + $0x48] sm:$0xf] %vm7467_vm12, %v7408_v24  ;;  %7373 = vrot.lane.b32.xlu1 %v15037_v41, %s8568_s18  ;;  %7145 = vrot.lane.b32.xlu2 %v15031_v49, %s8567_s15  ;;  %v13931_v49 = vld [vmem:[#allocation3 + $0xd0] sm:$0xf]  ;;  %v5958_v41 = vld [vmem:[#allocation3 + $0xcc] sm:$0xf] }
 0x9ce   : > { %v7357_v2 = vshll.u32 %v13931_v49, 16  ;;  %v15047_v33 = vld [vmem:[#allocation20_spill] sm:$0xff] }
 0x9cf   : > { %v7257_v15 = vpop.permute.xlu1 %7256  ;;  %v7132_v22 = vpop.permute.xlu2 %7131 }
 0x9d0   : > { %7334 = vst.msk [vmem:[#allocation4 + $0x4c] sm:$0xf] %vm7314_vm7, %v7257_v15  ;;  %v7359_v43 = vrot.slane %v7357_v2, 5  ;;  %v7348_v15 = vshrl.u32 %v5958_v41, 16 }
 0x9d1   : > { %7206 = vst.msk [vmem:[#allocation4 + $0x58] sm:$0xf] %vm7183_vm6, %v7132_v22  ;;  %7510 = vrot.lane.b32.xlu0 %v15038_v34, %s8570_s29  ;;  %v7351_v22 = vshll.u32 %v5958_v41, 16 }
 0x9d3   : > { %v7410_v26 = vpop.permute.xlu0 %7409  ;;  %v7353_v56 = vrot.slane %v7351_v22, 5 }
 0x9d4   : > { %7487 = vst.msk [vmem:[#allocation4 + $0x4c] sm:$0xf] %vm7467_vm12, %v7410_v26 }
 0x9d5   : > { %7624 = vst.msk [vmem:[#allocation4 + $0x4c] sm:$0xf] %vm7604_vm10, %v7547_v11  ;;  %7143 = vrot.lane.b32.xlu1 %v15030_v4, %s8567_s15  ;;  %7427 = vrot.lane.b32.xlu2 %v13548_v35, %s8568_s18  ;;  %v13876_v35 = vsel %vm8637_vm2, %v7084_v38, %v7085_v3 }
 0x9d7   : > { %v7545_v50 = vpop.permute.xlu1 %7544  ;;  %v13867_v5 = vpop.permute.xlu2 %7264 }
 0x9d8   : > { %7623 = vst.msk [vmem:[#allocation4 + $0x48] sm:$0xf] %vm7604_vm10, %v7545_v50 }
 0x9d9   : > { %7274 = vrot.lane.b32.xlu0 %v15039_v20, %s8569_s20 }
 0x9db   : > { %v7128_v46 = vpop.permute.xlu0 %7127 }
 0x9dc   : > { %7204 = vst.msk [vmem:[#allocation4 + $0x50] sm:$0xf] %vm7183_vm6, %v7128_v46 }
 0x9dd   : > { %7335 = vst.msk [vmem:[#allocation4 + $0x50] sm:$0xf] %vm7314_vm7, %v7259_v6  ;;  %7276 = vrot.lane.b32.xlu1 %v13432_v19, %s8569_s20  ;;  %7566 = vrot.lane.b32.xlu2 %v13876_v35, %s8570_s29  ;;  %v13895_v19 = vld [vmem:[%s14166_s8] ss:$0 sm:$0xff]  ;;  %v7361_v6 = vshrl.u32 %v13931_v49, 16 }
 0x9df   : > { %v7130_v48 = vpop.permute.xlu1 %7129  ;;  %v13885_v18 = vpop.permute.xlu2 %7552  ;;  %v8490_v0 = vld [vmem:[#allocation4 + $0x48] sm:$0xff] }
 0x9e0   : > { %7205 = vst.msk [vmem:[#allocation4 + $0x54] sm:$0xf] %vm7183_vm6, %v7130_v48  ;;  %8429 = vmatmul.msk.bf16.gmra.mxu3 %vm7789_vm14, %v8490_v0 }
 0x9e1   : > { %7429 = vrot.lane.b32.xlu0 %v6949_v61, %s8568_s18 }
 0x9e3   : > { %v7261_v8 = vpop.permute.xlu0 %7260  ;;  %v7866_v52 = vpop.f32.mrf.mxu3 }
 0x9e4   : > { %7336 = vst.msk [vmem:[#allocation4 + $0x54] sm:$0xf] %vm7314_vm7, %v7261_v8  ;;  %v7867_v55 = vadd.f32 %v13895_v19, %v7866_v52 }
 0x9e5   : > { %7489 = vst.msk [vmem:[#allocation4 + $0x54] sm:$0xf] %vm7467_vm12, %v7414_v21  ;;  %7564 = vrot.lane.b32.xlu1 %v13902_v54, %s8570_s29  ;;  %7222 = vrot.lane.b32.xlu2 %v15042_v16, %s8569_s20  ;;  %v7506_v16 = vrot.slane %v13948_v30, 5 }
 0x9e6   : > { %v7937_v63 = vmax.f32 %v7867_v55, 0.0 }
 0x9e7   : > { %v7412_v24 = vpop.permute.xlu1 %7411  ;;  %v7138_v44 = vpop.permute.xlu2 %7137 }
 0x9e8   : > { %7488 = vst.msk [vmem:[#allocation4 + $0x50] sm:$0xf] %vm7467_vm12, %v7412_v24 }
 0x9e9   : > { %7970 = vst.msk [vmem:[%s13913_s16 + $0x30] sm:$0xff] %vm7963_vm11, %v7937_v63  ;;  %7091 = vrot.lane.b32.xlu0 %v15035_v31, %s8567_s15  ;;  %v7363_v31 = vrot.slane %v7361_v6, 4  ;;  %v15051_v6 = vld [vmem:[#allocation64_spill] sm:$0xff] }
 0x9ea   : > { %7209 = vst.msk [vmem:[#allocation4 + $0x64] sm:$0xf] %vm7183_vm6, %v7138_v44 }
 0x9eb   : > { %v7549_v42 = vpop.permute.xlu0 %7548  ;;  %v7868_v27 = vpop.f32.mrf.mxu3  ;;  %v7364_v57 = vor.u32 %v7363_v31, %v7359_v43 }
 0x9ec   : > { %7625 = vst.msk [vmem:[#allocation4 + $0x50] sm:$0xf] %vm7604_vm10, %v7549_v42  ;;  %v7869_v11 = vadd.f32 %v13895_v19, %v7868_v27  ;;  %v15049_v42 = vld [vmem:[#allocation55_spill] sm:$0xff] }
 0x9ed   : > { %7093 = vrot.lane.b32.xlu1 %v15038_v34, %s8567_s15  ;;  %7377 = vrot.lane.b32.xlu2 %v15044_v28, %s8568_s18  ;;  %v7367_v34 = vshll.u32 %v13948_v30, 16  ;;  %v7365_v38 = vrot.slane %v7364_v57, 4 }
 0x9ee   : > { %v7938_v17 = vmax.f32 %v7869_v11, 0.0 }
 0x9ef   : > { %v7551_v4 = vpop.permute.xlu1 %7550  ;;  %v13929_v23 = vpop.permute.xlu2 %7419  ;;  %v7369_v13 = vrot.slane %v7367_v34, 5 }
 0x9f0   : > { %7626 = vst.msk [vmem:[#allocation4 + $0x54] sm:$0xf] %vm7604_vm10, %v7551_v4 }
 0x9f1   : > { %7971 = vst.msk [vmem:[%s13913_s16 + $0x38] sm:$0xff] %vm7963_vm11, %v7938_v17  ;;  %7224 = vrot.lane.b32.xlu0 %v15045_v45, %s8569_s20  ;;  %v7370_v46 = vsel %vm8677_vm5, %v7365_v38, %v7369_v13 }
 0x9f3   : > { %v7134_v32 = vpop.permute.xlu0 %7133 }
 0x9f4   : > { %7207 = vst.msk [vmem:[#allocation4 + $0x5c] sm:$0xf] %vm7183_vm6, %v7134_v32 }
 0x9f5   : > { %7338 = vst.msk [vmem:[#allocation4 + $0x5c] sm:$0xf] %vm7314_vm7, %v13867_v5  ;;  %7375 = vrot.lane.b32.xlu1 %v15046_v36, %s8568_s18  ;;  %7012 = vrot.lane.b32.xlu2 %v6949_v61, %s8565_s26  ;;  %v7350_v5 = vrot.slane %v7348_v15, 4  ;;  %v8339_v61 = vrot.slane %v5958_v41, 9 }
 0x9f7   : > { %v7263_v40 = vpop.permute.xlu1 %7262  ;;  %v13946_v21 = vpop.permute.xlu2 %7558  ;;  %v8491_v9 = vld [vmem:[#allocation4 + $0x50] sm:$0xff]  ;;  %v7354_v53 = vor.u32 %v7353_v56, %v7350_v5 }
 0x9f8   : > { %7337 = vst.msk [vmem:[#allocation4 + $0x58] sm:$0xf] %vm7314_vm7, %v7263_v40  ;;  %8430 = vmatmul.msk.bf16.gmra.mxu3 %vm7789_vm14, %v8491_v9 }
 0x9f9   : > { %7512 = vrot.lane.b32.xlu0 %v15047_v33, %s8570_s29  ;;  %v7355_v62 = vrot.slane %v7354_v53, 4 }
 0x9fb   : > { %v7416_v26 = vpop.permute.xlu0 %7415  ;;  %v7871_v25 = vpop.f32.mrf.mxu3  ;;  %v7360_v7 = vsel %vm8677_vm5, %v7355_v62, %v7359_v43 }
 0x9fc   : > { %7490 = vst.msk [vmem:[#allocation4 + $0x58] sm:$0xf] %vm7467_vm12, %v7416_v26  ;;  %v7872_v50 = vadd.f32 %v13895_v19, %v7871_v25 }
 0x9fd   : > { %7627 = vst.msk [vmem:[#allocation4 + $0x58] sm:$0xf] %vm7604_vm10, %v13885_v18  ;;  %7514 = vrot.lane.b32.xlu1 %v15048_v51, %s8570_s29  ;;  %7278 = vrot.lane.b32.xlu2 %v5958_v41, %s8569_s20 }
 0x9fe   : > { %v7939_v20 = vmax.f32 %v7872_v50, 0.0 }
 0x9ff   : > { %v7418_v3 = vpop.permute.xlu1 %7417  ;;  %v7271_v1 = vpop.permute.xlu2 %7270 }
 0xa00   : > { %7491 = vst.msk [vmem:[#allocation4 + $0x5c] sm:$0xf] %vm7467_vm12, %v7418_v3 }
 0xa01   : > { %7972 = vst.msk [vmem:[%s13913_s16 + $0x40] sm:$0xff] %vm7963_vm11, %v7939_v20  ;;  %7147 = vrot.lane.b32.xlu0 %v13902_v54, %s8567_s15 }
 0xa03   : > { %v7555_v14 = vpop.permute.xlu0 %7554  ;;  %v7873_v60 = vpop.f32.mrf.mxu3 }
 0xa04   : > { %7628 = vst.msk [vmem:[#allocation4 + $0x5c] sm:$0xf] %vm7604_vm10, %v7555_v14  ;;  %v7874_v59 = vadd.f32 %v13895_v19, %v7873_v60 }
 0xa05   : > { %7149 = vrot.lane.b32.xlu1 %v13876_v35, %s8567_s15  ;;  %7433 = vrot.lane.b32.xlu2 %v7370_v46, %s8568_s18  ;;  %v7503_v35 = vrot.slane %v13931_v49, 5 }
 0xa06   : > { %v7940_v48 = vmax.f32 %v7874_v59, 0.0 }
 0xa07   : > { %v7136_v18 = vpop.permute.xlu1 %7135  ;;  %v7426_v0 = vpop.permute.xlu2 %7425  ;;  %v7504_v29 = vsel %vm8637_vm2, %v8339_v61, %v7503_v35  ;;  %v7505_v52 = vrot.slane %v7503_v35, 4 }
 0xa08   : > { %7208 = vst.msk [vmem:[#allocation4 + $0x60] sm:$0xf] %vm7183_vm6, %v7136_v18 }
 0xa09   : > { %7973 = vst.msk [vmem:[%s13913_s16 + $0x48] sm:$0xff] %vm7963_vm11, %v7940_v48  ;;  %7280 = vrot.lane.b32.xlu0 %v13931_v49, %s8569_s20  ;;  %v7507_v63 = vsel %vm8637_vm2, %v7505_v52, %v7506_v16 }
 0xa0b   : > { %v7267_v8 = vpop.permute.xlu0 %7266  ;;  %v8492_v54 = vld [vmem:[#allocation4 + $0x58] sm:$0xff] }
 0xa0c   : > { %7339 = vst.msk [vmem:[#allocation4 + $0x60] sm:$0xf] %vm7314_vm7, %v7267_v8  ;;  %8431 = vmatmul.msk.bf16.gmra.mxu3 %vm7789_vm14, %v8492_v54 }
 0xa0d   : > { %7492 = vst.msk [vmem:[#allocation4 + $0x60] sm:$0xf] %vm7467_vm12, %v13929_v23  ;;  %7431 = vrot.lane.b32.xlu1 %v7360_v7, %s8568_s18  ;;  %7095 = vrot.lane.b32.xlu2 %v15047_v33, %s8567_s15  ;;  %v15050_v23 = vld [vmem:[#allocation58_spill] sm:$0xff] }
 0xa0f   : > { %v7269_v55 = vpop.permute.xlu1 %7268  ;;  %v7088_v58 = vpop.permute.xlu2 %7087 }
 0xa10   : > { %7340 = vst.msk [vmem:[#allocation4 + $0x64] sm:$0xf] %vm7314_vm7, %v7269_v55  ;;  %v7876_v12 = vpop.f32.mrf.mxu3 }
 0xa11   : > { %7184 = vst.msk [vmem:[#allocation4] sm:$0xf] %vm7183_vm6, %v7088_v58  ;;  %7568 = vrot.lane.b32.xlu0 %v7504_v29, %s8570_s29  ;;  %v7877_v10 = vadd.f32 %v13895_v19, %v7876_v12 }
 0xa13   : > { %v7422_v24 = vpop.permute.xlu0 %7421  ;;  %v7941_v44 = vmax.f32 %v7877_v10, 0.0 }
 0xa14   : > { %7493 = vst.msk [vmem:[#allocation4 + $0x64] sm:$0xf] %vm7467_vm12, %v7422_v24 }
 0xa15   : > { %7630 = vst.msk [vmem:[#allocation4 + $0x64] sm:$0xf] %vm7604_vm10, %v13946_v21  ;;  %7570 = vrot.lane.b32.xlu1 %v7507_v63, %s8570_s29  ;;  %7228 = vrot.lane.b32.xlu2 %v15049_v42, %s8569_s20 }
 0xa16   : > { %7974 = vst.msk [vmem:[%s13913_s16 + $0x50] sm:$0xff] %vm7963_vm11, %v7941_v44 }
 0xa17   : > { %v7557_v27 = vpop.permute.xlu1 %7556  ;;  %v7221_v28 = vpop.permute.xlu2 %7220 }
 0xa18   : > { %7629 = vst.msk [vmem:[#allocation4 + $0x60] sm:$0xf] %vm7604_vm10, %v7557_v27  ;;  %v7878_v39 = vpop.f32.mrf.mxu3 }
 0xa19   : > { %7097 = vrot.lane.b32.xlu0 %v15048_v51, %s8567_s15  ;;  %v7879_v11 = vadd.f32 %v13895_v19, %v7878_v39 }
 0xa1b   : > { %v7140_v17 = vpop.permute.xlu0 %7139  ;;  %v7942_v4 = vmax.f32 %v7879_v11, 0.0 }
 0xa1c   : > { %7210 = vst.msk [vmem:[#allocation4 + $0x68] sm:$0xf] %vm7183_vm6, %v7140_v17 }
 0xa1d   : > { %7341 = vst.msk [vmem:[#allocation4 + $0x68] sm:$0xf] %vm7314_vm7, %v7271_v1  ;;  %7226 = vrot.lane.b32.xlu1 %v15050_v23, %s8569_s20  ;;  %7516 = vrot.lane.b32.xlu2 %v13185_v37, %s8570_s29  ;;  %v15052_v37 = vld [vmem:[#allocation23_spill] sm:$0xff] }
 0xa1e   : > { %7975 = vst.msk [vmem:[%s13913_s16 + $0x58] sm:$0xff] %vm7963_vm11, %v7942_v4 }
 0xa1f   : > { %v7142_v49 = vpop.permute.xlu1 %7141  ;;  %v7509_v45 = vpop.permute.xlu2 %7508  ;;  %v8493_v2 = vld [vmem:[#allocation4 + $0x60] sm:$0xff] }
 0xa20   : > { %7211 = vst.msk [vmem:[#allocation4 + $0x6c] sm:$0xf] %vm7183_vm6, %v7142_v49  ;;  %8432 = vmatmul.msk.bf16.gmra.mxu3 %vm7789_vm14, %v8493_v2 }
 0xa21   : > { %7379 = vrot.lane.b32.xlu0 %v15051_v6, %s8568_s18 }
 0xa23   : > { %v7273_v32 = vpop.permute.xlu0 %7272  ;;  %v7881_v36 = vpop.f32.mrf.mxu3 }
 0xa24   : > { %7342 = vst.msk [vmem:[#allocation4 + $0x6c] sm:$0xf] %vm7314_vm7, %v7273_v32  ;;  %v7882_v43 = vadd.f32 %v13895_v19, %v7881_v36 }
 0xa25   : > { %7495 = vst.msk [vmem:[#allocation4 + $0x6c] sm:$0xf] %vm7467_vm12, %v7426_v0  ;;  %7381 = vrot.lane.b32.xlu1 %v15052_v37, %s8568_s18 }
 0xa26   : > { %v7943_v31 = vmax.f32 %v7882_v43, 0.0 }
 0xa27   : > { %v7424_v40 = vpop.permute.xlu1 %7423  ;;  %v7146_v21 = vpop.permute.xlu2 %7145 }
 0xa28   : > { %7494 = vst.msk [vmem:[#allocation4 + $0x68] sm:$0xf] %vm7467_vm12, %v7424_v40 }
 0xa29   : > { %7976 = vst.msk [vmem:[%s13913_s16 + $0x60] sm:$0xff] %vm7963_vm11, %v7943_v31  ;;  %7518 = vrot.lane.b32.xlu0 %v13159_v47, %s8570_s29 }
 0xa2a   : > { %7213 = vst.msk [vmem:[#allocation4 + $0x74] sm:$0xf] %vm7183_vm6, %v7146_v21 }
 0xa2b   : > { %v7561_v9 = vpop.permute.xlu0 %7560  ;;  %v7883_v30 = vpop.f32.mrf.mxu3 }
 0xa2c   : > { %7631 = vst.msk [vmem:[#allocation4 + $0x68] sm:$0xf] %vm7604_vm10, %v7561_v9  ;;  %v7884_v33 = vadd.f32 %v13895_v19, %v7883_v30 }
 0xa2e   : > { %v7944_v41 = vmax.f32 %v7884_v33, 0.0 }
 0xa2f   : > { %v7563_v15 = vpop.permute.xlu1 %7562  ;;  %v7428_v22 = vpop.permute.xlu2 %7427 }
 0xa30   : > { %7632 = vst.msk [vmem:[#allocation4 + $0x6c] sm:$0xf] %vm7604_vm10, %v7563_v15 }
 0xa31   : > { %7977 = vst.msk [vmem:[%s13913_s16 + $0x68] sm:$0xff] %vm7963_vm11, %v7944_v41 }
 0xa33   : > { %v7090_v57 = vpop.permute.xlu0 %7089 }
 0xa34   : > { %7185 = vst.msk [vmem:[#allocation4 + $0x4] sm:$0xf] %vm7183_vm6, %v7090_v57 }
 0xa35   : > { %7316 = vst.msk [vmem:[#allocation4 + $0x4] sm:$0xf] %vm7314_vm7, %v7221_v28 }
 0xa37   : > { %v7219_v47 = vpop.permute.xlu1 %7218  ;;  %v7567_v34 = vpop.permute.xlu2 %7566  ;;  %v8494_v26 = vld [vmem:[#allocation4 + $0x68] sm:$0xff] }
 0xa38   : > { %7315 = vst.msk [vmem:[#allocation4] sm:$0xf] %vm7314_vm7, %v7219_v47  ;;  %8433 = vmatmul.msk.bf16.gmra.mxu3 %vm7789_vm14, %v8494_v26 }
 0xa3b   : > { %v7372_v25 = vpop.permute.xlu0 %7371  ;;  %v7886_v51 = vpop.f32.mrf.mxu3 }
 0xa3c   : > { %7468 = vst.msk [vmem:[#allocation4] sm:$0xf] %vm7467_vm12, %v7372_v25  ;;  %v7887_v50 = vadd.f32 %v13895_v19, %v7886_v51 }
 0xa3d   : > { %7605 = vst.msk [vmem:[#allocation4] sm:$0xf] %vm7604_vm10, %v7509_v45 }
 0xa3e   : > { %v7945_v5 = vmax.f32 %v7887_v50, 0.0 }
 0xa3f   : > { %v7374_v56 = vpop.permute.xlu1 %7373  ;;  %v7223_v38 = vpop.permute.xlu2 %7222 }
 0xa40   : > { %7469 = vst.msk [vmem:[#allocation4 + $0x4] sm:$0xf] %vm7467_vm12, %v7374_v56 }
 0xa41   : > { %7978 = vst.msk [vmem:[%s13913_s16 + $0x70] sm:$0xff] %vm7963_vm11, %v7945_v5 }
 0xa43   : > { %v7511_v13 = vpop.permute.xlu0 %7510  ;;  %v7888_v20 = vpop.f32.mrf.mxu3 }
 0xa44   : > { %7606 = vst.msk [vmem:[#allocation4 + $0x4] sm:$0xf] %vm7604_vm10, %v7511_v13  ;;  %v7889_v3 = vadd.f32 %v13895_v19, %v7888_v20 }
 0xa46   : > { %v7946_v1 = vmax.f32 %v7889_v3, 0.0 }
 0xa47   : > { %v7144_v46 = vpop.permute.xlu1 %7143  ;;  %v7378_v53 = vpop.permute.xlu2 %7377 }
 0xa48   : > { %7212 = vst.msk [vmem:[#allocation4 + $0x70] sm:$0xf] %vm7183_vm6, %v7144_v46 }
 0xa49   : > { %7979 = vst.msk [vmem:[%s13913_s16 + $0x78] sm:$0xff] %vm7963_vm11, %v7946_v1 }
 0xa4b   : > { %v7275_v14 = vpop.permute.xlu0 %7274  ;;  %v8481_v60 = vld [vmem:[#allocation4] sm:$0xff] }
 0xa4c   : > { %7343 = vst.msk [vmem:[#allocation4 + $0x70] sm:$0xf] %vm7314_vm7, %v7275_v14  ;;  %8420 = vmatmul.msk.bf16.vlgmr.msrb.gmra.mxu0 %vm7789_vm14, %v8481_v60 }
 0xa4d   : > { %7496 = vst.msk [vmem:[#allocation4 + $0x70] sm:$0xf] %vm7467_vm12, %v7428_v22 }
 0xa4f   : > { %v7277_v59 = vpop.permute.xlu1 %7276  ;;  %v7013_v62 = vpop.permute.xlu2 %7012 }
 0xa50   : > { %7344 = vst.msk [vmem:[#allocation4 + $0x74] sm:$0xf] %vm7314_vm7, %v7277_v59  ;;  %v7891_v48 = vpop.f32.mrf.mxu3 }
 0xa51   : > { %7078 = vst.msk [vmem:[#allocation4 + $0x7c] sm:$0xf] %vm7046_vm9, %v7013_v62  ;;  %v7892_v18 = vadd.f32 %v13895_v19, %v7891_v48 }
 0xa53   : > { %v7430_v0 = vpop.permute.xlu0 %7429  ;;  %v7947_v61 = vmax.f32 %v7892_v18, 0.0 }
 0xa54   : > { %7497 = vst.msk [vmem:[#allocation4 + $0x74] sm:$0xf] %vm7467_vm12, %v7430_v0 }
 0xa55   : > { %7634 = vst.msk [vmem:[#allocation4 + $0x74] sm:$0xf] %vm7604_vm10, %v7567_v34 }
 0xa56   : > { %7980 = vst.msk [vmem:[%s13913_s16 + $0x80] sm:$0xff] %vm7963_vm11, %v7947_v61 }
 0xa57   : > { %v7565_v7 = vpop.permute.xlu1 %7564  ;;  %v7279_v35 = vpop.permute.xlu2 %7278 }
 0xa58   : > { %7633 = vst.msk [vmem:[#allocation4 + $0x70] sm:$0xf] %vm7604_vm10, %v7565_v7  ;;  %v7893_v8 = vpop.f32.mrf.mxu3 }
 0xa59   : > { %v7894_v54 = vadd.f32 %v13895_v19, %v7893_v8 }
 0xa5b   : > { %v7092_v29 = vpop.permute.xlu0 %7091  ;;  %v7948_v52 = vmax.f32 %v7894_v54, 0.0 }
 0xa5c   : > { %7186 = vst.msk [vmem:[#allocation4 + $0x8] sm:$0xf] %vm7183_vm6, %v7092_v29 }
 0xa5d   : > { %7317 = vst.msk [vmem:[#allocation4 + $0x8] sm:$0xf] %vm7314_vm7, %v7223_v38 }
 0xa5e   : > { %7981 = vst.msk [vmem:[%s13913_s16 + $0x88] sm:$0xff] %vm7963_vm11, %v7948_v52 }
 0xa5f   : > { %v7094_v16 = vpop.permute.xlu1 %7093  ;;  %v7434_v55 = vpop.permute.xlu2 %7433  ;;  %v8495_v58 = vld [vmem:[#allocation4 + $0x70] sm:$0xff] }
 0xa60   : > { %7187 = vst.msk [vmem:[#allocation4 + $0xc] sm:$0xf] %vm7183_vm6, %v7094_v16  ;;  %8434 = vmatmul.msk.bf16.gmra.mxu3 %vm7789_vm14, %v8495_v58 }
 0xa63   : > { %v7225_v12 = vpop.permute.xlu0 %7224  ;;  %v7896_v10 = vpop.f32.mrf.mxu3 }
 0xa64   : > { %7318 = vst.msk [vmem:[#allocation4 + $0xc] sm:$0xf] %vm7314_vm7, %v7225_v12  ;;  %v7897_v63 = vadd.f32 %v13895_v19, %v7896_v10 }
 0xa65   : > { %7471 = vst.msk [vmem:[#allocation4 + $0xc] sm:$0xf] %vm7467_vm12, %v7378_v53 }
 0xa66   : > { %v7949_v24 = vmax.f32 %v7897_v63, 0.0 }
 0xa67   : > { %v7376_v44 = vpop.permute.xlu1 %7375  ;;  %v7096_v42 = vpop.permute.xlu2 %7095 }
 0xa68   : > { %7470 = vst.msk [vmem:[#allocation4 + $0x8] sm:$0xf] %vm7467_vm12, %v7376_v44 }
 0xa69   : > { %7982 = vst.msk [vmem:[%s13913_s16 + $0x90] sm:$0xff] %vm7963_vm11, %v7949_v24 }
 0xa6a   : > { %7188 = vst.msk [vmem:[#allocation4 + $0x10] sm:$0xf] %vm7183_vm6, %v7096_v42 }
 0xa6b   : > { %v7513_v27 = vpop.permute.xlu0 %7512  ;;  %v7898_v28 = vpop.f32.mrf.mxu3 }
 0xa6c   : > { %7607 = vst.msk [vmem:[#allocation4 + $0x8] sm:$0xf] %vm7604_vm10, %v7513_v27  ;;  %v7899_v39 = vadd.f32 %v13895_v19, %v7898_v28 }
 0xa6e   : > { %v7950_v11 = vmax.f32 %v7899_v39, 0.0 }
 0xa6f   : > { %v7515_v17 = vpop.permute.xlu1 %7514  ;;  %v7229_v9 = vpop.permute.xlu2 %7228 }
 0xa70   : > { %7608 = vst.msk [vmem:[#allocation4 + $0xc] sm:$0xf] %vm7604_vm10, %v7515_v17 }
 0xa71   : > { %7983 = vst.msk [vmem:[%s13913_s16 + $0x98] sm:$0xff] %vm7963_vm11, %v7950_v11 }
 0xa73   : > { %v7148_v4 = vpop.permute.xlu0 %7147 }
 0xa74   : > { %7214 = vst.msk [vmem:[#allocation4 + $0x78] sm:$0xf] %vm7183_vm6, %v7148_v4 }
 0xa75   : > { %7345 = vst.msk [vmem:[#allocation4 + $0x78] sm:$0xf] %vm7314_vm7, %v7279_v35 }
 0xa77   : > { %v7150_v23 = vpop.permute.xlu1 %7149  ;;  %v8482_v49 = vld [vmem:[#allocation4 + $0x8] sm:$0xff]  ;;  %v7517_v47 = vpop.permute.xlu2 %7516 }
 0xa78   : > { %7215 = vst.msk [vmem:[#allocation4 + $0x7c] sm:$0xf] %vm7183_vm6, %v7150_v23  ;;  %8421 = vmatmul.msk.bf16.gmra.mxu0 %vm7789_vm14, %v8482_v49 }
 0xa7b   : > { %v7281_v45 = vpop.permute.xlu0 %7280  ;;  %v7901_v2 = vpop.f32.mrf.mxu3 }
 0xa7c   : > { %7346 = vst.msk [vmem:[#allocation4 + $0x7c] sm:$0xf] %vm7314_vm7, %v7281_v45  ;;  %v7902_v6 = vadd.f32 %v13895_v19, %v7901_v2 }
 0xa7d   : > { %7499 = vst.msk [vmem:[#allocation4 + $0x7c] sm:$0xf] %vm7467_vm12, %v7434_v55 }
 0xa7e   : > { %v7951_v32 = vmax.f32 %v7902_v6, 0.0 }
 0xa7f   : > { %v7432_v36 = vpop.permute.xlu1 %7431 }
 0xa80   : > { %7498 = vst.msk [vmem:[#allocation4 + $0x78] sm:$0xf] %vm7467_vm12, %v7432_v36 }
 0xa81   : > { %7984 = vst.msk [vmem:[%s13913_s16 + $0xa0] sm:$0xff] %vm7963_vm11, %v7951_v32 }
 0xa83   : > { %v7569_v37 = vpop.permute.xlu0 %7568  ;;  %v7903_v43 = vpop.f32.mrf.mxu3 }
 0xa84   : > { %7635 = vst.msk [vmem:[#allocation4 + $0x78] sm:$0xf] %vm7604_vm10, %v7569_v37  ;;  %v7904_v31 = vadd.f32 %v13895_v19, %v7903_v43 }
 0xa86   : > { %v7952_v40 = vmax.f32 %v7904_v31, 0.0 }
 0xa87   : > { %v7571_v21 = vpop.permute.xlu1 %7570 }
 0xa88   : > { %7636 = vst.msk [vmem:[#allocation4 + $0x7c] sm:$0xf] %vm7604_vm10, %v7571_v21 }
 0xa89   : > { %7985 = vst.msk [vmem:[%s13913_s16 + $0xa8] sm:$0xff] %vm7963_vm11, %v7952_v40 }
 0xa8b   : > { %v7098_v30 = vpop.permute.xlu0 %7097 }
 0xa8c   : > { %7189 = vst.msk [vmem:[#allocation4 + $0x14] sm:$0xf] %vm7183_vm6, %v7098_v30 }
 0xa8d   : > { %7320 = vst.msk [vmem:[#allocation4 + $0x14] sm:$0xf] %vm7314_vm7, %v7229_v9 }
 0xa8f   : > { %v7227_v33 = vpop.permute.xlu1 %7226  ;;  %v8496_v41 = vld [vmem:[#allocation4 + $0x78] sm:$0xff]  ;;  %v7906_v15 = vpop.f32.mrf.mxu3 }
 0xa90   : > { %7319 = vst.msk [vmem:[#allocation4 + $0x10] sm:$0xf] %vm7314_vm7, %v7227_v33  ;;  %8435 = vmatmul.msk.bf16.gmra.mxu3 %vm7789_vm14, %v8496_v41  ;;  %v7907_v22 = vadd.f32 %v13895_v19, %v7906_v15 }
 0xa92   : > { %v7953_v34 = vmax.f32 %v7907_v22, 0.0 }
 0xa93   : > { %v7380_v57 = vpop.permute.xlu0 %7379 }
 0xa94   : > { %7472 = vst.msk [vmem:[#allocation4 + $0x10] sm:$0xf] %vm7467_vm12, %v7380_v57 }
 0xa95   : > { %7609 = vst.msk [vmem:[#allocation4 + $0x10] sm:$0xf] %vm7604_vm10, %v7517_v47 }
 0xa96   : > { %7986 = vst.msk [vmem:[%s13913_s16 + $0xb0] sm:$0xff] %vm7963_vm11, %v7953_v34 }
 0xa97   : > { %v7382_v26 = vpop.permute.xlu1 %7381  ;;  %v7908_v25 = vpop.f32.mrf.mxu3 }
 0xa98   : > { %7473 = vst.msk [vmem:[#allocation4 + $0x14] sm:$0xf] %vm7467_vm12, %v7382_v26  ;;  %v7909_v51 = vadd.f32 %v13895_v19, %v7908_v25 }
 0xa9a   : > { %v7954_v5 = vmax.f32 %v7909_v51, 0.0 }
 0xa9b   : > { %v7519_v50 = vpop.permute.xlu0 %7518 }
 0xa9c   : > { %7610 = vst.msk [vmem:[#allocation4 + $0x14] sm:$0xf] %vm7604_vm10, %v7519_v50 }
 0xa9d   : > { %7987 = vst.msk [vmem:[%s13913_s16 + $0xb8] sm:$0xff] %vm7963_vm11, %v7954_v5 }
 0xaa3   : > { %v8483_v56 = vld [vmem:[#allocation4 + $0x10] sm:$0xff]  ;;  %v7911_v38 = vpop.f32.mrf.mxu3 }
 0xaa4   : > { %v7912_v13 = vadd.f32 %v13895_v19, %v7911_v38  ;;  %8422 = vmatmul.msk.bf16.gmra.mxu0 %vm7789_vm14, %v8483_v56 }
 0xaa6   : > { %v7955_v20 = vmax.f32 %v7912_v13, 0.0 }
 0xaa8   : > { %7988 = vst.msk [vmem:[%s13913_s16 + $0xc0] sm:$0xff] %vm7963_vm11, %v7955_v20 }
 0xaab   : > { %v7913_v3 = vpop.f32.mrf.mxu3 }
 0xaac   : > { %v7914_v1 = vadd.f32 %v13895_v19, %v7913_v3 }
 0xaae   : > { %v7956_v46 = vmax.f32 %v7914_v1, 0.0 }
 0xab0   : > { %7989 = vst.msk [vmem:[%s13913_s16 + $0xc8] sm:$0xff] %vm7963_vm11, %v7956_v46 }
 0xabb   : > { %v7916_v53 = vpop.f32.mrf.mxu3 }
 0xabc   : > { %v7917_v14 = vadd.f32 %v13895_v19, %v7916_v53 }
 0xabe   : > { %v7957_v60 = vmax.f32 %v7917_v14, 0.0 }
 0xac0   : > { %7990 = vst.msk [vmem:[%s13913_s16 + $0xd0] sm:$0xff] %vm7963_vm11, %v7957_v60 }
 0xac3   : > { %v7918_v59 = vpop.f32.mrf.mxu3 }
 0xac4   : > { %v7919_v62 = vadd.f32 %v13895_v19, %v7918_v59 }
 0xac6   : > { %v7958_v48 = vmax.f32 %v7919_v62, 0.0 }
 0xac8   : > { %7991 = vst.msk [vmem:[%s13913_s16 + $0xd8] sm:$0xff] %vm7963_vm11, %v7958_v48 }
 0xac9   : > { %v7851_v18 = vpop.f32.mrf.mxu0 }
 0xaca   : > { %v7852_v0 = vadd.f32 %v13895_v19, %v7851_v18 }
 0xacc   : > { %v7931_v61 = vmax.f32 %v7852_v0, 0.0 }
 0xace   : > { %7964 = vst.msk [vmem:[%s13913_s16] sm:$0xff] %vm7963_vm11, %v7931_v61 }
 0xad1   : > { %v7853_v7 = vpop.f32.mrf.mxu0 }
 0xad2   : > { %v7854_v35 = vadd.f32 %v13895_v19, %v7853_v7 }
 0xad4   : > { %v7932_v8 = vmax.f32 %v7854_v35, 0.0 }
 0xad6   : > { %7965 = vst.msk [vmem:[%s13913_s16 + $0x8] sm:$0xff] %vm7963_vm11, %v7932_v8 }
 0xae3   : > { %v7921_v54 = vpop.f32.mrf.mxu3 }
 0xae4   : > { %v7922_v29 = vadd.f32 %v13895_v19, %v7921_v54 }
 0xae6   : > { %v7959_v52 = vmax.f32 %v7922_v29, 0.0 }
 0xae8   : > { %7992 = vst.msk [vmem:[%s13913_s16 + $0xe0] sm:$0xff] %vm7963_vm11, %v7959_v52 }
 0xaeb   : > { %v7923_v16 = vpop.f32.mrf.mxu3 }
 0xaec   : > { %v7924_v55 = vadd.f32 %v13895_v19, %v7923_v16 }
 0xaee   : > { %v7960_v58 = vmax.f32 %v7924_v55, 0.0 }
 0xaf0   : > { %7993 = vst.msk [vmem:[%s13913_s16 + $0xe8] sm:$0xff] %vm7963_vm11, %v7960_v58 }
 0xaf5   : > { %v7856_v12 = vpop.f32.mrf.mxu0 }
 0xaf6   : > { %v7857_v10 = vadd.f32 %v13895_v19, %v7856_v12 }
 0xaf8   : > { %v7933_v63 = vmax.f32 %v7857_v10, 0.0 }
 0xafa   : > { %7966 = vst.msk [vmem:[%s13913_s16 + $0x10] sm:$0xff] %vm7963_vm11, %v7933_v63 }
 0xafd   : > { %v7858_v24 = vpop.f32.mrf.mxu0 }
 0xafe   : > { %v7859_v44 = vadd.f32 %v13895_v19, %v7858_v24 }
 0xb00   : > { %v7934_v42 = vmax.f32 %v7859_v44, 0.0 }
 0xb02   : > { %7967 = vst.msk [vmem:[%s13913_s16 + $0x18] sm:$0xff] %vm7963_vm11, %v7934_v42 }
 0xb13   : > { %v7926_v27 = vpop.f32.mrf.mxu3 }
 0xb14   : > { %v7927_v28 = vadd.f32 %v13895_v19, %v7926_v27 }
 0xb16   : > { %v7961_v39 = vmax.f32 %v7927_v28, 0.0 }
 0xb18   : > { %7994 = vst.msk [vmem:[%s13913_s16 + $0xf0] sm:$0xff] %vm7963_vm11, %v7961_v39 }
 0xb1b   : > { %v7928_v11 = vpop.f32.mrf.mxu3 }
 0xb1c   : > { %v7929_v17 = vadd.f32 %v13895_v19, %v7928_v11 }
 0xb1e   : > { %v7962_v4 = vmax.f32 %v7929_v17, 0.0 }
 0xb20   : > { %7995 = vst.msk [vmem:[%s13913_s16 + $0xf8] sm:$0xff] %vm7963_vm11, %v7962_v4 }
 0xb21   : > { %v7861_v23 = vpop.f32.mrf.mxu0 }
 0xb22   : > { %v7862_v49 = vadd.f32 %v13895_v19, %v7861_v23 }
 0xb24   : > { %v7935_v45 = vmax.f32 %v7862_v49, 0.0 }
 0xb26   : > { %7968 = vst.msk [vmem:[%s13913_s16 + $0x20] sm:$0xff] %vm7963_vm11, %v7935_v45 }
 0xb29   : > { %v7863_v2 = vpop.f32.mrf.mxu0 }
 0xb2a   : > { %v7864_v6 = vadd.f32 %v13895_v19, %v7863_v2 }
 0xb2c   : > { %v7936_v32 = vmax.f32 %v7864_v6, 0.0 }
 0xb2e   : > { %7969 = vst.msk [vmem:[%s13913_s16 + $0x28] sm:$0xff] %vm7963_vm11, %v7936_v32 }
 0xb2f PF: > { %s19_s30 = sadd.s32 1, %s8556_s30  }
 0xb30   : > { %p16_p4 = scmp.ge.s32.totalorder %s19_s30, 4  }
 0xb32   :  { %18 = sbr.rel (!%p16_p4) target bundleno = 1 (0x1), region = 93 }

</bundles_post_ra>
